<compile_context>
chip_gen: v7x
topology: tpu7x:2x2x1
jax: 0.10.0
libtpu: 0.0.40
codegen_flags: <defaults>
</compile_context>

<pallas_src>
import functools
import math

import jax
import jax.numpy as jnp
from jax.experimental import pallas as pl
from jax.experimental.pallas import tpu as pltpu


# ---------------------------------------------------------------------------
# Fused Bottle2neck kernel (one grid step per batch element)
# ---------------------------------------------------------------------------

def _bottle2neck_kernel(x_ref, w1_ref, b1_ref, wim_ref, bc_ref, w3_ref, b3_ref,
                        o_ref, pad_ref, cat_ref, *, H, W, width, scale):
    """x_ref  : (1, H*W, Cin)        NHWC with flattened spatial dim
       w1_ref : (Cin, mid)           conv1 weights, BN1 scale folded in
       b1_ref : (1, mid)             BN1 bias
       wim_ref: (nums, 9*width, width) im2col 3x3 weights (BN scale folded),
                 row blocks ordered (dx=-1|0|+1) x (dy=-1,0,+1)
       bc_ref : (nums, 1, width)     BN bias per hierarchical branch
       w3_ref : (mid, Cout)          conv3 weights, BN3 scale folded in
       b3_ref : (1, Cout)            BN3 bias
       o_ref  : (1, H*W, Cout)
       pad_ref: VMEM (H*W + 2*W, width) halo row-buffer
       cat_ref: VMEM (H*W, mid)      implicit-concat scratch
    """
    HW = H * W
    nums = scale - 1
    cdt = pad_ref.dtype

    # Zero ONLY the halo rows (2*W rows, never written by any branch).
    zeros_halo = jnp.zeros((W, pad_ref.shape[-1]), cdt)
    pad_ref[pl.ds(0, W), :] = zeros_halo
    pad_ref[pl.ds(W + HW, W), :] = zeros_halo

    x = x_ref[0]                                   # (HW, Cin), compute dtype
    x_f32 = x.astype(jnp.float32)

    # conv1 (1x1) + folded BN1 + ReLU as ONE whole-mid matmul.
    out1 = jnp.maximum(
        jnp.dot(x, w1_ref[...], preferred_element_type=jnp.float32)
        + b1_ref[...], 0.0)                        # (HW, mid) f32

    # Last width-group passes through unchanged (stype='normal', scale != 1).
    cat_ref[:, nums * width:] = out1[:, nums * width:].astype(cdt)

    # Column-validity masks for the horizontal (dx = +-1) taps.
    col = jax.lax.broadcasted_iota(jnp.int32, (HW, 1), 0) % W
    not_left = col >= 1                            # valid when dx = -1
    not_right = col <= W - 2                       # valid when dx = +1

    sp = None
    for i in range(nums):
        sl = slice(i * width, (i + 1) * width)
        cur_f32 = out1[:, sl] if i == 0 else sp + out1[:, sl]
        cur = cur_f32.astype(cdt)

        # Vertical halo: write interior rows once, read the dy = -1 / +1
        # shifted windows at statically aligned offsets (0 and 2*W).
        pad_ref[pl.ds(W, HW), :] = cur
        up = pad_ref[pl.ds(0, HW), :]              # dy = -1
        dn = pad_ref[pl.ds(2 * W, HW), :]          # dy = +1

        # im2col slab (HW, 9*width): dx = +-1 via XLU sublane rolls + masks,
        # then a single dense MXU matmul per branch.
        b_mid = jnp.concatenate([up, cur, dn], axis=-1)               # dx =  0
        b_left = jnp.where(not_left,
                           pltpu.roll(b_mid, shift=1, axis=0), 0.0)   # dx = -1
        b_right = jnp.where(not_right,
                            pltpu.roll(b_mid, shift=HW - 1, axis=0),  # dx = +1
                            0.0)
        im2col = jnp.concatenate([b_left, b_mid, b_right], axis=-1)   # (HW,9w)

        sp = jnp.maximum(
            jnp.dot(im2col, wim_ref[i], preferred_element_type=jnp.float32)
            + bc_ref[i], 0.0)                      # ReLU(BN(conv3x3)), f32
        cat_ref[:, sl] = sp.astype(cdt)            # implicit concat

    # conv3 (1x1) as ONE whole-mid matmul + BN3 bias + residual + ReLU.
    acc3 = jnp.dot(cat_ref[...], w3_ref[...], preferred_element_type=jnp.float32)
    o_ref[0] = jnp.maximum(acc3 + b3_ref[...] + x_f32, 0.0).astype(o_ref.dtype)


# ---------------------------------------------------------------------------
# Wrapper
# ---------------------------------------------------------------------------

def fold_bn(gamma, beta, mean, var, eps=1e-5):
    scale = gamma / jnp.sqrt(var + eps)
    bias = beta - mean * scale
    return scale, bias


def bottle2neck_forward(x_nchw, P, width, scale_, compute_dtype=jnp.float32):
    """stype='normal', stride=1, downsample=None, scale > 1.
    compute_dtype=jnp.bfloat16 recommended on v6e/v7x production shapes."""
    assert scale_ > 1
    N, C, H, W = x_nchw.shape
    nums = scale_ - 1
    mid = width * scale_
    outC = C                       # residual add requires inC == planes*4
    HW = H * W
    # W multiple of 8 keeps the in-kernel halo reads/writes tile-aligned
    # (correctness does not depend on it).

    # NCHW -> (N, H*W, C).  Boundary layout conversion only.
    x_flat = jnp.transpose(x_nchw, (0, 2, 3, 1)).reshape(N, HW, C)
    x_flat = x_flat.astype(compute_dtype)

    # --- fold BN scales into weights (exact for inference-mode BN) ---------
    s1, b1 = fold_bn(*P["bn1"])
    w1 = (P["w1"] * s1[None, :]).astype(compute_dtype)            # (C, mid)
    b1r = b1.reshape(1, mid)

    wim_list, bc_list = [], []
    for i in range(nums):
        si, bi = fold_bn(*P["bns"][i])
        wk = P["convs"][i] * si[None, None, :]                    # (9, w, w)
        # Permute taps (ky,kx) -> (kx,ky) so weight row-blocks match the
        # kernel's im2col column order [dx=-1 | dx=0 | dx=+1] x [dy=-1,0,+1].
        wim_list.append(wk.reshape(3, 3, width, width)
                          .transpose(1, 0, 2, 3)
                          .reshape(9 * width, width))
        bc_list.append(bi.reshape(1, width))
    wim = jnp.stack(wim_list, axis=0).astype(compute_dtype)       # (nums,9w,w)
    bc = jnp.stack(bc_list, axis=0)                               # (nums,1,w)

    s3, b3 = fold_bn(*P["bn3"])
    w3 = (P["w3"] * s3[None, :]).astype(compute_dtype)            # (mid, outC)
    b3r = b3.reshape(1, outC)

    kernel = functools.partial(_bottle2neck_kernel, H=H, W=W,
                               width=width, scale=scale_)

    itemsize = jnp.dtype(compute_dtype).itemsize
    flops = 2 * N * HW * (C * mid + nums * 9 * width * width + mid * outC)
    bytes_accessed = (N * HW * C * itemsize                       # input
                      + N * HW * outC * x_nchw.dtype.itemsize     # output
                      + (w1.size + wim.size + w3.size) * itemsize
                      + (b1r.size + bc.size + b3r.size) * 4)
    cost = pl.CostEstimate(flops=flops, transcendentals=0,
                           bytes_accessed=int(bytes_accessed))

    out = pl.pallas_call(
        kernel,
        out_shape=jax.ShapeDtypeStruct((N, HW, outC), x_nchw.dtype),
        grid=(N,),
        in_specs=[
            pl.BlockSpec((1, HW, C), lambda n: (n, 0, 0)),
            pl.BlockSpec((C, mid), lambda n: (0, 0)),
            pl.BlockSpec((1, mid), lambda n: (0, 0)),
            pl.BlockSpec((nums, 9 * width, width), lambda n: (0, 0, 0)),
            pl.BlockSpec((nums, 1, width), lambda n: (0, 0, 0)),
            pl.BlockSpec((mid, outC), lambda n: (0, 0)),
            pl.BlockSpec((1, outC), lambda n: (0, 0)),
        ],
        out_specs=pl.BlockSpec((1, HW, outC), lambda n: (n, 0, 0)),
        scratch_shapes=[pltpu.VMEM((HW + 2 * W, width), compute_dtype),
                        pltpu.VMEM((HW, mid), compute_dtype)],
        compiler_params=pltpu.CompilerParams(
            dimension_semantics=("parallel",)),
        cost_estimate=cost,
    )(x_flat, w1, b1r, wim, bc, w3, b3r)

    return jnp.transpose(out.reshape(N, H, W, outC), (0, 3, 1, 2))  # -> NCHW


# ---------------------------------------------------------------------------
# Pure-JAX reference (for correctness check)
# ---------------------------------------------------------------------------

def reference_forward(x_nchw, P, width, scale_, eps=1e-5):
    hp = jax.lax.Precision.HIGHEST

    def bn(y, p):
        g, b, m, v = p
        return g * (y - m) / jnp.sqrt(v + eps) + b

    x = jnp.transpose(x_nchw, (0, 2, 3, 1))
    out = jnp.einsum("nhwc,cd->nhwd", x, P["w1"], precision=hp)
    out = jax.nn.relu(bn(out, P["bn1"]))
    nums = scale_ - 1
    spx = [out[..., i * width:(i + 1) * width] for i in range(scale_)]
    outs = []
    sp = None
    for i in range(nums):
        cur = spx[i] if i == 0 else sp + spx[i]
        w = P["convs"][i].reshape(3, 3, width, width)
        y = jax.lax.conv_general_dilated(
            cur, w, (1, 1), "SAME",
            dimension_numbers=("NHWC", "HWIO", "NHWC"), precision=hp)
        sp = jax.nn.relu(bn(y, P["bns"][i]))
        outs.append(sp)
    outs.append(spx[nums])
    cat = jnp.concatenate(outs, -1)
    y = jnp.einsum("nhwc,cd->nhwd", cat, P["w3"], precision=hp)
    y = jax.nn.relu(bn(y, P["bn3"]) + x)
    return jnp.transpose(y, (0, 3, 1, 2))


# ---------------------------------------------------------------------------
# Main
# ---------------------------------------------------------------------------

if __name__ == "__main__":
    # Module config: baseWidth=26, scale=4, stype='normal', stride=1,
    # downsample=None  ->  inplanes must equal planes * expansion.
    planes, baseWidth, scale_ = 16, 26, 4
    width = int(math.floor(planes * (baseWidth / 64.0)))    # 6
    mid = width * scale_                                     # 24
    outC = planes * 4                                        # 64
    inC = outC                                               # 64 (residual add)
    nums = scale_ - 1
    N, H, W = 2, 16, 16

    key = jax.random.PRNGKey(0)
    keys = iter(jax.random.split(key, 64))

    def bn_params(c):
        g = jax.random.uniform(next(keys), (c,), jnp.float32, 0.5, 1.5)
        b = 0.1 * jax.random.normal(next(keys), (c,), jnp.float32)
        m = 0.1 * jax.random.normal(next(keys), (c,), jnp.float32)
        v = jax.random.uniform(next(keys), (c,), jnp.float32, 0.5, 1.5)
        return (g, b, m, v)

    P = {
        "w1": jax.random.normal(next(keys), (inC, mid), jnp.float32) / math.sqrt(inC),
        "bn1": bn_params(mid),
        "convs": [jax.random.normal(next(keys), (9, width, width), jnp.float32)
                  / math.sqrt(9 * width) for _ in range(nums)],
        "bns": [bn_params(width) for _ in range(nums)],
        "w3": jax.random.normal(next(keys), (mid, outC), jnp.float32) / math.sqrt(mid),
        "bn3": bn_params(outC),
    }

    x = jax.random.normal(next(keys), (N, inC, H, W), jnp.float32)

    out = jax.block_until_ready(bottle2neck_forward(x, P, width, scale_))
    ref = jax.block_until_ready(reference_forward(x, P, width, scale_))

    assert out.shape == (N, outC, H, W), out.shape
    max_err = float(jnp.max(jnp.abs(out - ref)))
    assert jnp.allclose(out, ref, rtol=1e-4, atol=1e-4), max_err

    print("KERNEL_OK")
</pallas_src>

<mosaic_0001>
module attributes {stable_mosaic.version = 11 : i64} {
  func.func @_bottle2neck_kernel(%arg0: i32, %arg1: memref<1x256x64xf32, #tpu.memory_space<vmem>>, %arg2: memref<64x24xf32, #tpu.memory_space<vmem>>, %arg3: memref<1x24xf32, #tpu.memory_space<vmem>>, %arg4: memref<3x54x6xf32, #tpu.memory_space<vmem>>, %arg5: memref<3x1x6xf32, #tpu.memory_space<vmem>>, %arg6: memref<24x64xf32, #tpu.memory_space<vmem>>, %arg7: memref<1x64xf32, #tpu.memory_space<vmem>>, %arg8: memref<1x256x64xf32, #tpu.memory_space<vmem>>, %arg9: memref<288x6xf32, #tpu.memory_space<vmem>>, %arg10: memref<256x24xf32, #tpu.memory_space<vmem>>) attributes {dimension_semantics = [#tpu.dimension_semantics<parallel>], iteration_bounds = array<i64: 2>, scalar_prefetch = 0 : i64, scratch_operands = 2 : i64, tpu.core_type = #tpu.core_type<tc>, window_params = [{transform_indices = @transform_0, window_bounds = array<i64: 1, 256, 64>}, {pipeline_mode = #tpu.pipeline_mode<synchronous>, transform_indices = @transform_1, window_bounds = array<i64: 64, 24>}, {pipeline_mode = #tpu.pipeline_mode<synchronous>, transform_indices = @transform_2, window_bounds = array<i64: 1, 24>}, {pipeline_mode = #tpu.pipeline_mode<synchronous>, transform_indices = @transform_3, window_bounds = array<i64: 3, 54, 6>}, {pipeline_mode = #tpu.pipeline_mode<synchronous>, transform_indices = @transform_4, window_bounds = array<i64: 3, 1, 6>}, {pipeline_mode = #tpu.pipeline_mode<synchronous>, transform_indices = @transform_5, window_bounds = array<i64: 24, 64>}, {pipeline_mode = #tpu.pipeline_mode<synchronous>, transform_indices = @transform_6, window_bounds = array<i64: 1, 64>}, {transform_indices = @transform_7, window_bounds = array<i64: 1, 256, 64>}]} {
    %cst = arith.constant 0.000000e+00 : f32
    %0 = vector.broadcast %cst : f32 to vector<16x6xf32>
    %c0 = arith.constant 0 : index
    %c0_0 = arith.constant 0 : index
    %1 = vector.load %arg9[%c0, %c0_0] : memref<288x6xf32, #tpu.memory_space<vmem>>, vector<16x6xf32>
    tpu.vector_store %arg9[%c0, %c0_0], %0 {strides = array<i32>} : memref<288x6xf32, #tpu.memory_space<vmem>>, vector<16x6xf32>,
    %c272 = arith.constant 272 : index
    %c0_1 = arith.constant 0 : index
    %2 = vector.load %arg9[%c272, %c0_1] : memref<288x6xf32, #tpu.memory_space<vmem>>, vector<16x6xf32>
    tpu.vector_store %arg9[%c272, %c0_1], %0 {strides = array<i32>} : memref<288x6xf32, #tpu.memory_space<vmem>>, vector<16x6xf32>,
    %c0_2 = arith.constant 0 : index
    %c0_3 = arith.constant 0 : index
    %c0_4 = arith.constant 0 : index
    %3 = vector.load %arg1[%c0_2, %c0_3, %c0_4] : memref<1x256x64xf32, #tpu.memory_space<vmem>>, vector<1x256x64xf32>
    %4 = vector.shape_cast %3 : vector<1x256x64xf32> to vector<256x64xf32>
    %c0_5 = arith.constant 0 : index
    %c0_6 = arith.constant 0 : index
    %5 = vector.load %arg2[%c0_5, %c0_6] : memref<64x24xf32, #tpu.memory_space<vmem>>, vector<64x24xf32>
    %cst_7 = arith.constant dense<0.000000e+00> : vector<256x24xf32>
    %6 = tpu.matmul %4, %5, %cst_7 {dimension_numbers = #tpu.dot_dimension_numbers<[1], [0], [0], [1], [0, 0, 1, 1], [], []>} : vector<256x64xf32>, vector<64x24xf32>, vector<256x24xf32> -> vector<256x24xf32>
    %c0_8 = arith.constant 0 : index
    %c0_9 = arith.constant 0 : index
    %7 = vector.load %arg3[%c0_8, %c0_9] : memref<1x24xf32, #tpu.memory_space<vmem>>, vector<1x24xf32>
    %8 = vector.broadcast %7 : vector<1x24xf32> to vector<256x24xf32>
    %9 = arith.addf %6, %8 : vector<256x24xf32>
    %cst_10 = arith.constant 0.000000e+00 : f32
    %10 = vector.broadcast %cst_10 : f32 to vector<256x24xf32>
    %11 = arith.maximumf %9, %10 : vector<256x24xf32>
    %12 = vector.extract_strided_slice %11 {offsets = [0, 18], sizes = [256, 6], strides = [1, 1]} : vector<256x24xf32> to vector<256x6xf32>
    %c0_11 = arith.constant 0 : index
    %c18 = arith.constant 18 : index
    %13 = vector.load %arg10[%c0_11, %c18] : memref<256x24xf32, #tpu.memory_space<vmem>>, vector<256x6xf32>
    tpu.vector_store %arg10[%c0_11, %c18], %12 {strides = array<i32>} : memref<256x24xf32, #tpu.memory_space<vmem>>, vector<256x6xf32>,
    %14 = tpu.iota {dimensions = array<i32: 0>} : vector<256x1xi32>
    %c16_i32 = arith.constant 16 : i32
    %c0_i32 = arith.constant 0 : i32
    %15 = arith.cmpi eq, %c16_i32, %c0_i32 : i32
    %c1_i32 = arith.constant 1 : i32
    %16 = arith.select %15, %c1_i32, %c16_i32 : i32
    %17 = vector.broadcast %16 : i32 to vector<256x1xi32>
    %18 = arith.remsi %14, %17 : vector<256x1xi32>
    %c0_i32_12 = arith.constant 0 : i32
    %19 = vector.broadcast %c0_i32_12 : i32 to vector<256x1xi32>
    %20 = arith.cmpi ne, %18, %19 : vector<256x1xi32>
    %c0_i32_13 = arith.constant 0 : i32
    %21 = vector.broadcast %c0_i32_13 : i32 to vector<256x1xi32>
    %22 = arith.cmpi slt, %18, %21 : vector<256x1xi32>
    %c0_i32_14 = arith.constant 0 : i32
    %23 = arith.cmpi slt, %16, %c0_i32_14 : i32
    %24 = vector.broadcast %23 : i1 to vector<256x1xi1>
    %25 = vector.broadcast %24 : vector<256x1xi1> to vector<256x1xi1>
    %26 = arith.xori %22, %25 : vector<256x1xi1>
    %27 = arith.andi %26, %20 : vector<256x1xi1>
    %28 = vector.broadcast %16 : i32 to vector<256x1xi32>
    %29 = arith.addi %18, %28 : vector<256x1xi32>
    %30 = arith.select %27, %29, %18 : vector<256x1xi1>, vector<256x1xi32>
    %c1_i32_15 = arith.constant 1 : i32
    %31 = vector.broadcast %c1_i32_15 : i32 to vector<256x1xi32>
    %32 = arith.cmpi sge, %30, %31 : vector<256x1xi32>
    %c14_i32 = arith.constant 14 : i32
    %33 = vector.broadcast %c14_i32 : i32 to vector<256x1xi32>
    %34 = arith.cmpi sle, %30, %33 : vector<256x1xi32>
    %35 = vector.extract_strided_slice %11 {offsets = [0, 0], sizes = [256, 6], strides = [1, 1]} : vector<256x24xf32> to vector<256x6xf32>
    %c16 = arith.constant 16 : index
    %c0_16 = arith.constant 0 : index
    %36 = vector.load %arg9[%c16, %c0_16] : memref<288x6xf32, #tpu.memory_space<vmem>>, vector<256x6xf32>
    tpu.vector_store %arg9[%c16, %c0_16], %35 {strides = array<i32>} : memref<288x6xf32, #tpu.memory_space<vmem>>, vector<256x6xf32>,
    %c0_17 = arith.constant 0 : index
    %c0_18 = arith.constant 0 : index
    %37 = vector.load %arg9[%c0_17, %c0_18] : memref<288x6xf32, #tpu.memory_space<vmem>>, vector<256x6xf32>
    %c32 = arith.constant 32 : index
    %c0_19 = arith.constant 0 : index
    %38 = vector.load %arg9[%c32, %c0_19] : memref<288x6xf32, #tpu.memory_space<vmem>>, vector<256x6xf32>
    %39 = tpu.concatenate %37, %35, %38 in 1 : vector<256x6xf32>, vector<256x6xf32>, vector<256x6xf32> -> vector<256x18xf32>
    %c1_i32_20 = arith.constant 1 : i32
    %40 = tpu.dynamic_rotate %39 by %c1_i32_20 dim 0 : vector<256x18xf32>, i32 -> vector<256x18xf32>
    %cst_21 = arith.constant 0.000000e+00 : f32
    %41 = vector.shape_cast %32 : vector<256x1xi1> to vector<256x1xi1>
    %42 = vector.broadcast %41 : vector<256x1xi1> to vector<256x18xi1>
    %43 = vector.broadcast %cst_21 : f32 to vector<256x18xf32>
    %44 = arith.select %42, %40, %43 : vector<256x18xi1>, vector<256x18xf32>
    %c255_i32 = arith.constant 255 : i32
    %45 = tpu.dynamic_rotate %39 by %c255_i32 dim 0 : vector<256x18xf32>, i32 -> vector<256x18xf32>
    %cst_22 = arith.constant 0.000000e+00 : f32
    %46 = vector.shape_cast %34 : vector<256x1xi1> to vector<256x1xi1>
    %47 = vector.broadcast %46 : vector<256x1xi1> to vector<256x18xi1>
    %48 = vector.broadcast %cst_22 : f32 to vector<256x18xf32>
    %49 = arith.select %47, %45, %48 : vector<256x18xi1>, vector<256x18xf32>
    %50 = tpu.concatenate %44, %39, %49 in 1 : vector<256x18xf32>, vector<256x18xf32>, vector<256x18xf32> -> vector<256x54xf32>
    %c0_23 = arith.constant 0 : index
    %c0_24 = arith.constant 0 : index
    %c0_25 = arith.constant 0 : index
    %51 = vector.load %arg4[%c0_23, %c0_24, %c0_25] : memref<3x54x6xf32, #tpu.memory_space<vmem>>, vector<1x54x6xf32>
    %52 = vector.shape_cast %51 : vector<1x54x6xf32> to vector<54x6xf32>
    %cst_26 = arith.constant dense<0.000000e+00> : vector<256x6xf32>
    %53 = tpu.matmul %50, %52, %cst_26 {dimension_numbers = #tpu.dot_dimension_numbers<[1], [0], [0], [1], [0, 0, 1, 1], [], []>} : vector<256x54xf32>, vector<54x6xf32>, vector<256x6xf32> -> vector<256x6xf32>
    %c0_27 = arith.constant 0 : index
    %c0_28 = arith.constant 0 : index
    %c0_29 = arith.constant 0 : index
    %54 = vector.load %arg5[%c0_27, %c0_28, %c0_29] : memref<3x1x6xf32, #tpu.memory_space<vmem>>, vector<1x1x6xf32>
    %55 = vector.shape_cast %54 : vector<1x1x6xf32> to vector<1x6xf32>
    %56 = vector.broadcast %55 : vector<1x6xf32> to vector<256x6xf32>
    %57 = arith.addf %53, %56 : vector<256x6xf32>
    %cst_30 = arith.constant 0.000000e+00 : f32
    %58 = vector.broadcast %cst_30 : f32 to vector<256x6xf32>
    %59 = arith.maximumf %57, %58 : vector<256x6xf32>
    %c0_31 = arith.constant 0 : index
    %c0_32 = arith.constant 0 : index
    %60 = vector.load %arg10[%c0_31, %c0_32] : memref<256x24xf32, #tpu.memory_space<vmem>>, vector<256x6xf32>
    tpu.vector_store %arg10[%c0_31, %c0_32], %59 {strides = array<i32>} : memref<256x24xf32, #tpu.memory_space<vmem>>, vector<256x6xf32>,
    %61 = vector.extract_strided_slice %11 {offsets = [0, 6], sizes = [256, 6], strides = [1, 1]} : vector<256x24xf32> to vector<256x6xf32>
    %62 = arith.addf %59, %61 : vector<256x6xf32>
    %c16_33 = arith.constant 16 : index
    %c0_34 = arith.constant 0 : index
    %63 = vector.load %arg9[%c16_33, %c0_34] : memref<288x6xf32, #tpu.memory_space<vmem>>, vector<256x6xf32>
    tpu.vector_store %arg9[%c16_33, %c0_34], %62 {strides = array<i32>} : memref<288x6xf32, #tpu.memory_space<vmem>>, vector<256x6xf32>,
    %c0_35 = arith.constant 0 : index
    %c0_36 = arith.constant 0 : index
    %64 = vector.load %arg9[%c0_35, %c0_36] : memref<288x6xf32, #tpu.memory_space<vmem>>, vector<256x6xf32>
    %c32_37 = arith.constant 32 : index
    %c0_38 = arith.constant 0 : index
    %65 = vector.load %arg9[%c32_37, %c0_38] : memref<288x6xf32, #tpu.memory_space<vmem>>, vector<256x6xf32>
    %66 = tpu.concatenate %64, %62, %65 in 1 : vector<256x6xf32>, vector<256x6xf32>, vector<256x6xf32> -> vector<256x18xf32>
    %c1_i32_39 = arith.constant 1 : i32
    %67 = tpu.dynamic_rotate %66 by %c1_i32_39 dim 0 : vector<256x18xf32>, i32 -> vector<256x18xf32>
    %cst_40 = arith.constant 0.000000e+00 : f32
    %68 = vector.shape_cast %32 : vector<256x1xi1> to vector<256x1xi1>
    %69 = vector.broadcast %68 : vector<256x1xi1> to vector<256x18xi1>
    %70 = vector.broadcast %cst_40 : f32 to vector<256x18xf32>
    %71 = arith.select %69, %67, %70 : vector<256x18xi1>, vector<256x18xf32>
    %c255_i32_41 = arith.constant 255 : i32
    %72 = tpu.dynamic_rotate %66 by %c255_i32_41 dim 0 : vector<256x18xf32>, i32 -> vector<256x18xf32>
    %cst_42 = arith.constant 0.000000e+00 : f32
    %73 = vector.shape_cast %34 : vector<256x1xi1> to vector<256x1xi1>
    %74 = vector.broadcast %73 : vector<256x1xi1> to vector<256x18xi1>
    %75 = vector.broadcast %cst_42 : f32 to vector<256x18xf32>
    %76 = arith.select %74, %72, %75 : vector<256x18xi1>, vector<256x18xf32>
    %77 = tpu.concatenate %71, %66, %76 in 1 : vector<256x18xf32>, vector<256x18xf32>, vector<256x18xf32> -> vector<256x54xf32>
    %c1 = arith.constant 1 : index
    %c0_43 = arith.constant 0 : index
    %c0_44 = arith.constant 0 : index
    %78 = vector.load %arg4[%c1, %c0_43, %c0_44] : memref<3x54x6xf32, #tpu.memory_space<vmem>>, vector<1x54x6xf32>
    %79 = vector.shape_cast %78 : vector<1x54x6xf32> to vector<54x6xf32>
    %cst_45 = arith.constant dense<0.000000e+00> : vector<256x6xf32>
    %80 = tpu.matmul %77, %79, %cst_45 {dimension_numbers = #tpu.dot_dimension_numbers<[1], [0], [0], [1], [0, 0, 1, 1], [], []>} : vector<256x54xf32>, vector<54x6xf32>, vector<256x6xf32> -> vector<256x6xf32>
    %c1_46 = arith.constant 1 : index
    %c0_47 = arith.constant 0 : index
    %c0_48 = arith.constant 0 : index
    %81 = vector.load %arg5[%c1_46, %c0_47, %c0_48] : memref<3x1x6xf32, #tpu.memory_space<vmem>>, vector<1x1x6xf32>
    %82 = vector.shape_cast %81 : vector<1x1x6xf32> to vector<1x6xf32>
    %83 = vector.broadcast %82 : vector<1x6xf32> to vector<256x6xf32>
    %84 = arith.addf %80, %83 : vector<256x6xf32>
    %cst_49 = arith.constant 0.000000e+00 : f32
    %85 = vector.broadcast %cst_49 : f32 to vector<256x6xf32>
    %86 = arith.maximumf %84, %85 : vector<256x6xf32>
    %c0_50 = arith.constant 0 : index
    %c6 = arith.constant 6 : index
    %87 = vector.load %arg10[%c0_50, %c6] : memref<256x24xf32, #tpu.memory_space<vmem>>, vector<256x6xf32>
    tpu.vector_store %arg10[%c0_50, %c6], %86 {strides = array<i32>} : memref<256x24xf32, #tpu.memory_space<vmem>>, vector<256x6xf32>,
    %88 = vector.extract_strided_slice %11 {offsets = [0, 12], sizes = [256, 6], strides = [1, 1]} : vector<256x24xf32> to vector<256x6xf32>
    %89 = arith.addf %86, %88 : vector<256x6xf32>
    %c16_51 = arith.constant 16 : index
    %c0_52 = arith.constant 0 : index
    %90 = vector.load %arg9[%c16_51, %c0_52] : memref<288x6xf32, #tpu.memory_space<vmem>>, vector<256x6xf32>
    tpu.vector_store %arg9[%c16_51, %c0_52], %89 {strides = array<i32>} : memref<288x6xf32, #tpu.memory_space<vmem>>, vector<256x6xf32>,
    %c0_53 = arith.constant 0 : index
    %c0_54 = arith.constant 0 : index
    %91 = vector.load %arg9[%c0_53, %c0_54] : memref<288x6xf32, #tpu.memory_space<vmem>>, vector<256x6xf32>
    %c32_55 = arith.constant 32 : index
    %c0_56 = arith.constant 0 : index
    %92 = vector.load %arg9[%c32_55, %c0_56] : memref<288x6xf32, #tpu.memory_space<vmem>>, vector<256x6xf32>
    %93 = tpu.concatenate %91, %89, %92 in 1 : vector<256x6xf32>, vector<256x6xf32>, vector<256x6xf32> -> vector<256x18xf32>
    %c1_i32_57 = arith.constant 1 : i32
    %94 = tpu.dynamic_rotate %93 by %c1_i32_57 dim 0 : vector<256x18xf32>, i32 -> vector<256x18xf32>
    %cst_58 = arith.constant 0.000000e+00 : f32
    %95 = vector.shape_cast %32 : vector<256x1xi1> to vector<256x1xi1>
    %96 = vector.broadcast %95 : vector<256x1xi1> to vector<256x18xi1>
    %97 = vector.broadcast %cst_58 : f32 to vector<256x18xf32>
    %98 = arith.select %96, %94, %97 : vector<256x18xi1>, vector<256x18xf32>
    %c255_i32_59 = arith.constant 255 : i32
    %99 = tpu.dynamic_rotate %93 by %c255_i32_59 dim 0 : vector<256x18xf32>, i32 -> vector<256x18xf32>
    %cst_60 = arith.constant 0.000000e+00 : f32
    %100 = vector.shape_cast %34 : vector<256x1xi1> to vector<256x1xi1>
    %101 = vector.broadcast %100 : vector<256x1xi1> to vector<256x18xi1>
    %102 = vector.broadcast %cst_60 : f32 to vector<256x18xf32>
    %103 = arith.select %101, %99, %102 : vector<256x18xi1>, vector<256x18xf32>
    %104 = tpu.concatenate %98, %93, %103 in 1 : vector<256x18xf32>, vector<256x18xf32>, vector<256x18xf32> -> vector<256x54xf32>
    %c2 = arith.constant 2 : index
    %c0_61 = arith.constant 0 : index
    %c0_62 = arith.constant 0 : index
    %105 = vector.load %arg4[%c2, %c0_61, %c0_62] : memref<3x54x6xf32, #tpu.memory_space<vmem>>, vector<1x54x6xf32>
    %106 = vector.shape_cast %105 : vector<1x54x6xf32> to vector<54x6xf32>
    %cst_63 = arith.constant dense<0.000000e+00> : vector<256x6xf32>
    %107 = tpu.matmul %104, %106, %cst_63 {dimension_numbers = #tpu.dot_dimension_numbers<[1], [0], [0], [1], [0, 0, 1, 1], [], []>} : vector<256x54xf32>, vector<54x6xf32>, vector<256x6xf32> -> vector<256x6xf32>
    %c2_64 = arith.constant 2 : index
    %c0_65 = arith.constant 0 : index
    %c0_66 = arith.constant 0 : index
    %108 = vector.load %arg5[%c2_64, %c0_65, %c0_66] : memref<3x1x6xf32, #tpu.memory_space<vmem>>, vector<1x1x6xf32>
    %109 = vector.shape_cast %108 : vector<1x1x6xf32> to vector<1x6xf32>
    %110 = vector.broadcast %109 : vector<1x6xf32> to vector<256x6xf32>
    %111 = arith.addf %107, %110 : vector<256x6xf32>
    %cst_67 = arith.constant 0.000000e+00 : f32
    %112 = vector.broadcast %cst_67 : f32 to vector<256x6xf32>
    %113 = arith.maximumf %111, %112 : vector<256x6xf32>
    %c0_68 = arith.constant 0 : index
    %c12 = arith.constant 12 : index
    %114 = vector.load %arg10[%c0_68, %c12] : memref<256x24xf32, #tpu.memory_space<vmem>>, vector<256x6xf32>
    tpu.vector_store %arg10[%c0_68, %c12], %113 {strides = array<i32>} : memref<256x24xf32, #tpu.memory_space<vmem>>, vector<256x6xf32>,
    %c0_69 = arith.constant 0 : index
    %c0_70 = arith.constant 0 : index
    %115 = vector.load %arg10[%c0_69, %c0_70] : memref<256x24xf32, #tpu.memory_space<vmem>>, vector<256x24xf32>
    %c0_71 = arith.constant 0 : index
    %c0_72 = arith.constant 0 : index
    %116 = vector.load %arg6[%c0_71, %c0_72] : memref<24x64xf32, #tpu.memory_space<vmem>>, vector<24x64xf32>
    %cst_73 = arith.constant dense<0.000000e+00> : vector<256x64xf32>
    %117 = tpu.matmul %115, %116, %cst_73 {dimension_numbers = #tpu.dot_dimension_numbers<[1], [0], [0], [1], [0, 0, 1, 1], [], []>} : vector<256x24xf32>, vector<24x64xf32>, vector<256x64xf32> -> vector<256x64xf32>
    %c0_74 = arith.constant 0 : index
    %c0_75 = arith.constant 0 : index
    %118 = vector.load %arg7[%c0_74, %c0_75] : memref<1x64xf32, #tpu.memory_space<vmem>>, vector<1x64xf32>
    %119 = vector.broadcast %118 : vector<1x64xf32> to vector<256x64xf32>
    %120 = arith.addf %117, %119 : vector<256x64xf32>
    %121 = arith.addf %120, %4 : vector<256x64xf32>
    %cst_76 = arith.constant 0.000000e+00 : f32
    %122 = vector.broadcast %cst_76 : f32 to vector<256x64xf32>
    %123 = arith.maximumf %121, %122 : vector<256x64xf32>
    %c0_77 = arith.constant 0 : index
    %c0_78 = arith.constant 0 : index
    %c0_79 = arith.constant 0 : index
    %124 = vector.load %arg8[%c0_77, %c0_78, %c0_79] : memref<1x256x64xf32, #tpu.memory_space<vmem>>, vector<1x256x64xf32>
    %125 = vector.shape_cast %124 : vector<1x256x64xf32> to vector<256x64xf32>
    %126 = vector.shape_cast %123 : vector<256x64xf32> to vector<1x256x64xf32>
    tpu.vector_store %arg8[%c0_77, %c0_78, %c0_79], %126 {strides = array<i32>} : memref<1x256x64xf32, #tpu.memory_space<vmem>>, vector<1x256x64xf32>,
    return
  }
  func.func @transform_0(%arg0: i32) -> (i32, i32, i32) {
    %c0_i32 = arith.constant 0 : i32
    %c0_i32_0 = arith.constant 0 : i32
    %c0_i32_1 = arith.constant 0 : i32
    return %arg0, %c0_i32, %c0_i32_0 : i32, i32, i32
  }
  func.func @transform_1(%arg0: i32) -> (i32, i32) {
    %c0_i32 = arith.constant 0 : i32
    %c0_i32_0 = arith.constant 0 : i32
    %c0_i32_1 = arith.constant 0 : i32
    return %c0_i32, %c0_i32_0 : i32, i32
  }
  func.func @transform_2(%arg0: i32) -> (i32, i32) {
    %c0_i32 = arith.constant 0 : i32
    %c0_i32_0 = arith.constant 0 : i32
    %c0_i32_1 = arith.constant 0 : i32
    return %c0_i32, %c0_i32_0 : i32, i32
  }
  func.func @transform_3(%arg0: i32) -> (i32, i32, i32) {
    %c0_i32 = arith.constant 0 : i32
    %c0_i32_0 = arith.constant 0 : i32
    %c0_i32_1 = arith.constant 0 : i32
    %c0_i32_2 = arith.constant 0 : i32
    return %c0_i32, %c0_i32_0, %c0_i32_1 : i32, i32, i32
  }
  func.func @transform_4(%arg0: i32) -> (i32, i32, i32) {
    %c0_i32 = arith.constant 0 : i32
    %c0_i32_0 = arith.constant 0 : i32
    %c0_i32_1 = arith.constant 0 : i32
    %c0_i32_2 = arith.constant 0 : i32
    return %c0_i32, %c0_i32_0, %c0_i32_1 : i32, i32, i32
  }
  func.func @transform_5(%arg0: i32) -> (i32, i32) {
    %c0_i32 = arith.constant 0 : i32
    %c0_i32_0 = arith.constant 0 : i32
    %c0_i32_1 = arith.constant 0 : i32
    return %c0_i32, %c0_i32_0 : i32, i32
  }
  func.func @transform_6(%arg0: i32) -> (i32, i32) {
    %c0_i32 = arith.constant 0 : i32
    %c0_i32_0 = arith.constant 0 : i32
    %c0_i32_1 = arith.constant 0 : i32
    return %c0_i32, %c0_i32_0 : i32, i32
  }
  func.func @transform_7(%arg0: i32) -> (i32, i32, i32) {
    %c0_i32 = arith.constant 0 : i32
    %c0_i32_0 = arith.constant 0 : i32
    %c0_i32_1 = arith.constant 0 : i32
    return %arg0, %c0_i32, %c0_i32_0 : i32, i32, i32
  }
}

</mosaic_0001>

<bundles_post_ra>
// kernel: tpu_custom_call.1
= control target key start
LH: loop header
LB: loop body
LE: loop exit
PB: predicated region body
PF: predicated region fallthrough
CT: control target
= control target key end

     0   :  { %s7132_s24 = smov 0   ;;  %s10793_s0 = inlined_call_operand.vmem [shape: f32[2,256,64], index: 0, kind: input, shape index: {}]   ;;  %s10794_s1 = inlined_call_operand.vmem [shape: f32[64,24], index: 1, kind: input, shape index: {}]   ;;  %s10795_s2 = inlined_call_operand.vmem [shape: f32[1,24], index: 2, kind: input, shape index: {}]   ;;  %s10796_s3 = inlined_call_operand.vmem [shape: f32[3,54,6], index: 3, kind: input, shape index: {}]   ;;  %s10797_s4 = inlined_call_operand.vmem [shape: f32[3,1,6], index: 4, kind: input, shape index: {}]   ;;  %s10798_s5 = inlined_call_operand.vmem [shape: f32[24,64], index: 5, kind: input, shape index: {}]   ;;  %s10799_s6 = inlined_call_operand.vmem [shape: f32[1,64], index: 6, kind: input, shape index: {}]   ;;  %s10800_s7 = inlined_call_operand.vmem [shape: f32[2,256,64], index: 7, kind: output, shape index: {}]  }
   0x1 LB: > { %s6273_s25 = sadd.s32 4294967295, %s7083_s24   ;;  %p6277_p0 = scmp.ge.s32.totalorder %s7083_s24, 1  ;;  %s7083_s24 = sphi %s7132_s24, %s17_s24  }
   0x2   : > { %p237_p1 = scmp.lt.s32.totalorder %s7083_s24, 3 }
   0x4   : > { %p238_p2 = pnand %p6277_p0, %p237_p1 }
   0x6   : > { %241 = sbr.rel (%p238_p2) target bundleno = 2169 (0x879), region = 48 }
   0xd   : > { %v316_v0 = vld [vmem:[%s10794_s1] sm:$0xff]  ;;  %v317_v1 = vld [vmem:[%s10794_s1 + $0x8] sm:$0xff]  ;;  %v318_v2 = vld [vmem:[%s10794_s1 + $0x10] sm:$0xff]  ;;  %p269_p3 = scmp.lt.s32.totalorder %s6273_s25, 1  ;;  %vm10869_vm0 = vcmask 523264   ;;  %vm10872_vm1 = vcmask 48128  }
   0xe   : > { %v6966_v3 = vpack.c.bf16 %v317_v1, %v316_v0  ;;  %v319_v4 = vld [vmem:[%s10794_s1 + $0x18] sm:$0xff]  ;;  %v320_v6 = vld [vmem:[%s10794_s1 + $0x20] sm:$0xff]  ;;  %v321_v7 = vld [vmem:[%s10794_s1 + $0x28] sm:$0xff]  ;;  %v7085_v44 = vmov 0.0   ;;  %s7086_s23 = smov 12   ;;  %vm685_vm2 = vcmask 195728  }
   0xf   : > { %v6970_v5 = vpack.c.bf16 %v319_v4, %v318_v2  ;;  %s12000_s25 = smov (!%p269_p3, %s6273_s25), 1  ;;  %v6974_v8 = vpack.c.bf16 %v321_v7, %v320_v6  ;;  %v322_v9 = vld [vmem:[%s10794_s1 + $0x30] sm:$0xff]  ;;  %v323_v10 = vld [vmem:[%s10794_s1 + $0x38] sm:$0xff]  ;;  %282 = vst.msk [vmem:[#allocation2 + $0x110] sm:$0xff] %vm10872_vm1, %v7085_v44  ;;  %280 = vst.msk [vmem:[#allocation2] sm:$0xff] %vm10872_vm1, %v7085_v44  ;;  %s7087_s28 = smov 6  }
  0x10   : > { %6967 = vmatprep.subr.bf16.mxu0 %v6966_v3  ;;  %s6468_s15 = sshll.u32 %s12000_s25, 8  ;;  %v6978_v12 = vpack.c.bf16 %v323_v10, %v322_v9  ;;  %281 = vst.msk [vmem:[#allocation2 + $0x8] sm:$0xff] %vm10872_vm1, %v7085_v44  ;;  %283 = vst.msk [vmem:[#allocation2 + $0x118] sm:$0xff] %vm10872_vm1, %v7085_v44  ;;  %v7247_v47 = vld [vmem:[%s10795_s2] ss:$0 sm:$0xff]  ;;  %vm10871_vm3 = vcmask 97280  }
  0x11   : > { %6969 = vmatpush3.bf16.msra.mxu0 %v6966_v3  ;;  %s7166_s18 = scalar_lea.vmem %s10793_s0, %s6468_s15  ;;  %vm10870_vm4 = vcmask 1045504   ;;  %s7088_s22 = smov 18  }
  0x12   : > { %6971 = vmatprep.subr.bf16.mxu0 %v6970_v5  ;;  %v284_v11 = vld [vmem:[%s7166_s18] sm:$0xff]  ;;  %v285_v13 = vld [vmem:[%s7166_s18 + $0x8] sm:$0xff]  ;;  %v286_v14 = vld [vmem:[%s7166_s18 + $0x10] sm:$0xff]  ;;  %s7089_s26 = smov 36   ;;  %s7090_s27 = smov 122  }
  0x13   : > { %6678 = vmatprep.mubr.msk.f32.mxu0 %vm10869_vm0, %v284_v11  ;;  %v287_v15 = vld [vmem:[%s7166_s18 + $0x18] sm:$0xff]  ;;  %v288_v16 = vld [vmem:[%s7166_s18 + $0x20] sm:$0xff]  ;;  %v289_v17 = vld [vmem:[%s7166_s18 + $0x28] sm:$0xff]  ;;  %s7091_s30 = smov 116   ;;  %s10663_s19 = scalar_lea.vmem %s10800_s7, %s6468_s15 }
  0x14   : > { %v290_v18 = vld [vmem:[%s7166_s18 + $0x30] sm:$0xff]  ;;  %v291_v19 = vld [vmem:[%s7166_s18 + $0x38] sm:$0xff]  ;;  %v292_v20 = vld [vmem:[%s7166_s18 + $0x40] sm:$0xff] }
  0x15   : > { %6973 = vmatpush3.bf16.msra.mxu0 %v6970_v5  ;;  %v293_v21 = vld [vmem:[%s7166_s18 + $0x48] sm:$0xff]  ;;  %v294_v22 = vld [vmem:[%s7166_s18 + $0x50] sm:$0xff]  ;;  %v295_v23 = vld [vmem:[%s7166_s18 + $0x58] sm:$0xff] }
  0x16   : > { %6975 = vmatprep.subr.bf16.mxu0 %v6974_v8  ;;  %v296_v24 = vld [vmem:[%s7166_s18 + $0x60] sm:$0xff]  ;;  %v297_v25 = vld [vmem:[%s7166_s18 + $0x68] sm:$0xff]  ;;  %v298_v26 = vld [vmem:[%s7166_s18 + $0x70] sm:$0xff] }
  0x17   : > { %v299_v27 = vld [vmem:[%s7166_s18 + $0x78] sm:$0xff]  ;;  %v300_v28 = vld [vmem:[%s7166_s18 + $0x80] sm:$0xff]  ;;  %v301_v29 = vld [vmem:[%s7166_s18 + $0x88] sm:$0xff] }
  0x18   : > { %v302_v30 = vld [vmem:[%s7166_s18 + $0x90] sm:$0xff]  ;;  %v303_v31 = vld [vmem:[%s7166_s18 + $0x98] sm:$0xff]  ;;  %v304_v32 = vld [vmem:[%s7166_s18 + $0xa0] sm:$0xff] }
  0x19   : > { %6977 = vmatpush3.bf16.msra.mxu0 %v6974_v8  ;;  %v305_v33 = vld [vmem:[%s7166_s18 + $0xa8] sm:$0xff]  ;;  %v306_v34 = vld [vmem:[%s7166_s18 + $0xb0] sm:$0xff]  ;;  %v307_v35 = vld [vmem:[%s7166_s18 + $0xb8] sm:$0xff] }
  0x1a   : > { %6979 = vmatprep.subr.bf16.mxu0 %v6978_v12  ;;  %v308_v36 = vld [vmem:[%s7166_s18 + $0xc0] sm:$0xff]  ;;  %v309_v37 = vld [vmem:[%s7166_s18 + $0xc8] sm:$0xff]  ;;  %v310_v38 = vld [vmem:[%s7166_s18 + $0xd0] sm:$0xff] }
  0x1b   : > { %v311_v39 = vld [vmem:[%s7166_s18 + $0xd8] sm:$0xff]  ;;  %v312_v40 = vld [vmem:[%s7166_s18 + $0xe0] sm:$0xff]  ;;  %v313_v41 = vld [vmem:[%s7166_s18 + $0xe8] sm:$0xff] }
  0x1c   : > { %v314_v42 = vld [vmem:[%s7166_s18 + $0xf0] sm:$0xff]  ;;  %v315_v43 = vld [vmem:[%s7166_s18 + $0xf8] sm:$0xff] }
  0x1d   : > { %6981 = vmatpush3.bf16.msra.mxu0 %v6978_v12  ;;  %v1265_v45 = vld [vmem:[#allocation2 + $0x110] sm:$0xff]  ;;  %v1266_v46 = vld [vmem:[#allocation2 + $0x118] sm:$0xff] }
  0x1e   : > { %1487 = vrot.lane.b32.xlu0 %v1265_v45, %s7086_s23  ;;  %1489 = vrot.lane.b32.xlu1 %v1266_v46, %s7086_s23 }
  0x20   : > { %6679 = vmatmul.mubr.msk.f32.vlgmr.msra.gmra.mrb[0].mxu0 %vm10869_vm0, %v285_v13 }
  0x21   : > { %6681 = vmatprep.mubr.msk.f32.mxu0 %vm10869_vm0, %v286_v14 }
  0x24   : > { %6682 = vmatmul.mubr.msk.f32.gmra.mrb[2].mxu0 %vm10869_vm0, %v287_v15 }
  0x25   : > { %6684 = vmatprep.mubr.msk.f32.mxu0 %vm10869_vm0, %v288_v16 }
  0x28   : > { %6685 = vmatmul.mubr.msk.f32.gmra.mrb[4].mxu0 %vm10869_vm0, %v289_v17 }
  0x29   : > { %6687 = vmatprep.mubr.msk.f32.mxu0 %vm10869_vm0, %v290_v18 }
  0x2c   : > { %6688 = vmatmul.mubr.msk.f32.gmra.mrb[6].mxu0 %vm10869_vm0, %v291_v19 }
  0x2d   : > { %6690 = vmatprep.mubr.msk.f32.mxu0 %vm10869_vm0, %v292_v20 }
  0x30   : > { %6691 = vmatmul.mubr.msk.f32.gmra.mrb[8].mxu0 %vm10869_vm0, %v293_v21 }
  0x31   : > { %6693 = vmatprep.mubr.msk.f32.mxu0 %vm10869_vm0, %v294_v22 }
  0x34   : > { %6694 = vmatmul.mubr.msk.f32.gmra.mrb[10].mxu0 %vm10869_vm0, %v295_v23 }
  0x35   : > { %6696 = vmatprep.mubr.msk.f32.mxu0 %vm10869_vm0, %v296_v24 }
  0x38   : > { %6697 = vmatmul.mubr.msk.f32.gmra.mrb[12].mxu0 %vm10869_vm0, %v297_v25 }
  0x39   : > { %6699 = vmatprep.mubr.msk.f32.mxu0 %vm10869_vm0, %v298_v26 }
  0x3c   : > { %6700 = vmatmul.mubr.msk.f32.gmra.mrb[14].mxu0 %vm10869_vm0, %v299_v27 }
  0x3d   : > { %6702 = vmatprep.mubr.msk.f32.mxu0 %vm10869_vm0, %v300_v28 }
  0x40   : > { %6703 = vmatmul.mubr.msk.f32.gmra.mrb[16].mxu0 %vm10869_vm0, %v301_v29 }
  0x41   : > { %6705 = vmatprep.mubr.msk.f32.mxu0 %vm10869_vm0, %v302_v30 }
  0x44   : > { %6706 = vmatmul.mubr.msk.f32.gmra.mrb[18].mxu0 %vm10869_vm0, %v303_v31 }
  0x45   : > { %6708 = vmatprep.mubr.msk.f32.mxu0 %vm10869_vm0, %v304_v32 }
  0x48   : > { %6709 = vmatmul.mubr.msk.f32.gmra.mrb[20].mxu0 %vm10869_vm0, %v305_v33 }
  0x49   : > { %6711 = vmatprep.mubr.msk.f32.mxu0 %vm10869_vm0, %v306_v34 }
  0x4c   : > { %6712 = vmatmul.mubr.msk.f32.gmra.mrb[22].mxu0 %vm10869_vm0, %v307_v35 }
  0x4d   : > { %6714 = vmatprep.mubr.msk.f32.mxu0 %vm10869_vm0, %v308_v36 }
  0x50   : > { %6715 = vmatmul.mubr.msk.f32.gmra.mrb[24].mxu0 %vm10869_vm0, %v309_v37 }
  0x51   : > { %6717 = vmatprep.mubr.msk.f32.mxu0 %vm10869_vm0, %v310_v38 }
  0x54   : > { %6718 = vmatmul.mubr.msk.f32.gmra.mrb[26].mxu0 %vm10869_vm0, %v311_v39 }
  0x55   : > { %6720 = vmatprep.mubr.msk.f32.mxu0 %vm10869_vm0, %v312_v40 }
  0x58   : > { %6721 = vmatmul.mubr.msk.f32.gmra.mrb[28].mxu0 %vm10869_vm0, %v313_v41 }
  0x59   : > { %6723 = vmatprep.mubr.msk.f32.mxu0 %vm10869_vm0, %v314_v42 }
  0x5c   : > { %6724 = vmatmul.mubr.msk.f32.gmra.mrb[30].mxu0 %vm10869_vm0, %v315_v43 }
  0xf3   : > { %v6680_v48 = vpop.f32.mrb[0].mxu0 }
  0xf4   : > { %v500_v49 = vadd.f32 %v6680_v48, %v7247_v47  ;;  %v494_v50 = vpop.f32.mrb[1].mxu0 }
  0xf5   : > { %v495_v51 = vadd.f32 %v7247_v47, %v494_v50 }
  0xf6   : > { %v7251_v52 = vmax.f32 %v500_v49, 0.0 }
  0xf7   : > { %v7253_v53 = vmax.f32 %v495_v51, 0.0  ;;  %v6683_v54 = vpop.f32.mrb[2].mxu0 }
  0xf8   : > { %11033 = vst [vmem:[#allocation4_spill] sm:$0xff] %v7251_v52  ;;  %1200 = vst.msk [vmem:[#allocation2 + $0x18] sm:$0xff] %vm10872_vm1, %v7251_v52  ;;  %v510_v55 = vadd.f32 %v6683_v54, %v7247_v47  ;;  %1301 = vrot.lane.b32.xlu0 %v7251_v52, %s7087_s28  ;;  %v504_v56 = vpop.f32.mrb[3].mxu0 }
  0xf9   : > { %11034 = vst [vmem:[#allocation5_spill] sm:$0xff] %v7253_v53  ;;  %687 = vst.msk [vmem:[#allocation3 + $0x8] sm:$0xff] %vm685_vm2, %v7251_v52  ;;  %v505_v57 = vadd.f32 %v7247_v47, %v504_v56 }
  0xfa   : > { %1199 = vst.msk [vmem:[#allocation2 + $0x10] sm:$0xff] %vm10872_vm1, %v7253_v53  ;;  %v7267_v58 = vmax.f32 %v510_v55, 0.0 }
  0xfb   : > { %686 = vst.msk [vmem:[#allocation3] sm:$0xff] %vm685_vm2, %v7253_v53  ;;  %v7269_v59 = vmax.f32 %v505_v57, 0.0  ;;  %v6686_v60 = vpop.f32.mrb[4].mxu0 }
  0xfc   : > { %11035 = vst [vmem:[#allocation6_spill] sm:$0xff] %v7267_v58  ;;  %1202 = vst.msk [vmem:[#allocation2 + $0x28] sm:$0xff] %vm10872_vm1, %v7267_v58  ;;  %v520_v61 = vadd.f32 %v6686_v60, %v7247_v47  ;;  %v514_v62 = vpop.f32.mrb[5].mxu0  ;;  %1299 = vrot.lane.b32.xlu0 %v7253_v53, %s7087_s28  ;;  %v11064_v53 = vmov 0 }
  0xfd   : > { %689 = vst.msk [vmem:[#allocation3 + $0x18] sm:$0xff] %vm685_vm2, %v7267_v58  ;;  %v515_v63 = vadd.f32 %v7247_v47, %v514_v62  ;;  %1303 = vrot.lane.b32.xlu1 %v7269_v59, %s7087_s28  ;;  %688 = vst.msk [vmem:[#allocation3 + $0x10] sm:$0xff] %vm685_vm2, %v7269_v59 }
  0xfe   : > { %1201 = vst.msk [vmem:[#allocation2 + $0x20] sm:$0xff] %vm10872_vm1, %v7269_v59  ;;  %v7285_v0 = vmax.f32 %v520_v61, 0.0 }
  0xff   : > { %v7287_v1 = vmax.f32 %v515_v63, 0.0  ;;  %v6689_v2 = vpop.f32.mrb[6].mxu0 }
 0x100   : > { %11036 = vst [vmem:[#allocation7_spill] sm:$0xff] %v7285_v0  ;;  %1204 = vst.msk [vmem:[#allocation2 + $0x38] sm:$0xff] %vm10872_vm1, %v7285_v0  ;;  %1305 = vrot.lane.b32.xlu0 %v7267_v58, %s7087_s28  ;;  %v530_v3 = vadd.f32 %v6689_v2, %v7247_v47  ;;  %v524_v4 = vpop.f32.mrb[7].mxu0 }
 0x101   : > { %11037 = vst [vmem:[#allocation8_spill] sm:$0xff] %v7287_v1  ;;  %691 = vst.msk [vmem:[#allocation3 + $0x28] sm:$0xff] %vm685_vm2, %v7285_v0  ;;  %1307 = vrot.lane.b32.xlu1 %v7287_v1, %s7087_s28  ;;  %v525_v5 = vadd.f32 %v7247_v47, %v524_v4 }
 0x102   : > { %1203 = vst.msk [vmem:[#allocation2 + $0x30] sm:$0xff] %vm10872_vm1, %v7287_v1  ;;  %v7303_v6 = vmax.f32 %v530_v3, 0.0 }
 0x103   : > { %690 = vst.msk [vmem:[#allocation3 + $0x20] sm:$0xff] %vm685_vm2, %v7287_v1  ;;  %v7305_v7 = vmax.f32 %v525_v5, 0.0  ;;  %v6692_v8 = vpop.f32.mrb[8].mxu0  ;;  %v7320_v12 = vld [vmem:[#allocation2 + $0x28] sm:$0xff] }
 0x104   : > { %11038 = vst [vmem:[#allocation9_spill] sm:$0xff] %v7303_v6  ;;  %1206 = vst.msk [vmem:[#allocation2 + $0x48] sm:$0xff] %vm10872_vm1, %v7303_v6  ;;  %1309 = vrot.lane.b32.xlu0 %v7285_v0, %s7087_s28  ;;  %v540_v10 = vadd.f32 %v6692_v8, %v7247_v47  ;;  %v534_v11 = vpop.f32.mrb[9].mxu0 }
 0x105   : > { %11039 = vst [vmem:[#allocation10_spill] sm:$0xff] %v7305_v7  ;;  %v7311_v9 = vld [vmem:[#allocation2 + $0x20] sm:$0xff]  ;;  %693 = vst.msk [vmem:[#allocation3 + $0x38] sm:$0xff] %vm685_vm2, %v7303_v6  ;;  %v535_v13 = vadd.f32 %v7247_v47, %v534_v11 }
 0x106   : > { %1205 = vst.msk [vmem:[#allocation2 + $0x40] sm:$0xff] %vm10872_vm1, %v7305_v7  ;;  %1427 = vrot.lane.b32.xlu1 %v7311_v9, %s7086_s23  ;;  %v7325_v14 = vmax.f32 %v540_v10, 0.0 }
 0x107   : > { %692 = vst.msk [vmem:[#allocation3 + $0x30] sm:$0xff] %vm685_vm2, %v7305_v7  ;;  %v7327_v15 = vmax.f32 %v535_v13, 0.0  ;;  %v6695_v16 = vpop.f32.mrb[10].mxu0  ;;  %v7365_v28 = vld [vmem:[#allocation2 + $0x38] sm:$0xff] }
 0x108   : > { %11040 = vst [vmem:[#allocation11_spill] sm:$0xff] %v7325_v14  ;;  %1429 = vrot.lane.b32.xlu0 %v7320_v12, %s7086_s23  ;;  %1208 = vst.msk [vmem:[#allocation2 + $0x58] sm:$0xff] %vm10872_vm1, %v7325_v14  ;;  %v550_v17 = vadd.f32 %v6695_v16, %v7247_v47  ;;  %v544_v18 = vpop.f32.mrb[11].mxu0 }
 0x109   : > { %11041 = vst [vmem:[#allocation12_spill] sm:$0xff] %v7327_v15  ;;  %695 = vst.msk [vmem:[#allocation3 + $0x48] sm:$0xff] %vm685_vm2, %v7325_v14  ;;  %v545_v19 = vadd.f32 %v7247_v47, %v544_v18  ;;  %v7343_v20 = vld [vmem:[#allocation2 + $0x30] sm:$0xff] }
 0x10a   : > { %1311 = vrot.lane.b32.xlu1 %v7305_v7, %s7087_s28  ;;  %1207 = vst.msk [vmem:[#allocation2 + $0x50] sm:$0xff] %vm10872_vm1, %v7327_v15  ;;  %v7345_v21 = vmax.f32 %v550_v17, 0.0 }
 0x10b   : > { %694 = vst.msk [vmem:[#allocation3 + $0x40] sm:$0xff] %vm685_vm2, %v7327_v15  ;;  %v7347_v22 = vmax.f32 %v545_v19, 0.0  ;;  %v6698_v23 = vpop.f32.mrb[12].mxu0  ;;  %v7405_v42 = vld [vmem:[#allocation2 + $0x48] sm:$0xff] }
 0x10c   : > { %11042 = vst [vmem:[#allocation13_spill] sm:$0xff] %v7345_v21  ;;  %1313 = vrot.lane.b32.xlu0 %v7303_v6, %s7087_s28  ;;  %1210 = vst.msk [vmem:[#allocation2 + $0x68] sm:$0xff] %vm10872_vm1, %v7345_v21  ;;  %v560_v24 = vadd.f32 %v6698_v23, %v7247_v47  ;;  %v554_v25 = vpop.f32.mrb[13].mxu0 }
 0x10d   : > { %11043 = vst [vmem:[#allocation14_spill] sm:$0xff] %v7347_v22  ;;  %697 = vst.msk [vmem:[#allocation3 + $0x58] sm:$0xff] %vm685_vm2, %v7345_v21  ;;  %v555_v26 = vadd.f32 %v7247_v47, %v554_v25  ;;  %v7383_v34 = vld [vmem:[#allocation2 + $0x40] sm:$0xff] }
 0x10e   : > { %1431 = vrot.lane.b32.xlu1 %v7343_v20, %s7086_s23  ;;  %1209 = vst.msk [vmem:[#allocation2 + $0x60] sm:$0xff] %vm10872_vm1, %v7347_v22  ;;  %v7363_v27 = vmax.f32 %v560_v24, 0.0 }
 0x10f   : > { %696 = vst.msk [vmem:[#allocation3 + $0x50] sm:$0xff] %vm685_vm2, %v7347_v22  ;;  %v7367_v29 = vmax.f32 %v555_v26, 0.0  ;;  %v6701_v30 = vpop.f32.mrb[14].mxu0  ;;  %v7445_v61 = vld [vmem:[#allocation2 + $0x58] sm:$0xff] }
 0x110   : > { %11044 = vst [vmem:[#allocation15_spill] sm:$0xff] %v7363_v27  ;;  %1433 = vrot.lane.b32.xlu0 %v7365_v28, %s7086_s23  ;;  %1212 = vst.msk [vmem:[#allocation2 + $0x78] sm:$0xff] %vm10872_vm1, %v7363_v27  ;;  %v570_v31 = vadd.f32 %v6701_v30, %v7247_v47  ;;  %v564_v32 = vpop.f32.mrb[15].mxu0 }
 0x111   : > { %11045 = vst [vmem:[#allocation16_spill] sm:$0xff] %v7367_v29  ;;  %699 = vst.msk [vmem:[#allocation3 + $0x68] sm:$0xff] %vm685_vm2, %v7363_v27  ;;  %v565_v33 = vadd.f32 %v7247_v47, %v564_v32  ;;  %v7423_v49 = vld [vmem:[#allocation2 + $0x50] sm:$0xff] }
 0x112   : > { %1315 = vrot.lane.b32.xlu1 %v7327_v15, %s7087_s28  ;;  %1211 = vst.msk [vmem:[#allocation2 + $0x70] sm:$0xff] %vm10872_vm1, %v7367_v29  ;;  %v7385_v35 = vmax.f32 %v570_v31, 0.0 }
 0x113   : > { %698 = vst.msk [vmem:[#allocation3 + $0x60] sm:$0xff] %vm685_vm2, %v7367_v29  ;;  %v7387_v36 = vmax.f32 %v565_v33, 0.0  ;;  %v6704_v37 = vpop.f32.mrb[16].mxu0  ;;  %v7485_v19 = vld [vmem:[#allocation2 + $0x68] sm:$0xff] }
 0x114   : > { %11046 = vst [vmem:[#allocation17_spill] sm:$0xff] %v7385_v35  ;;  %1317 = vrot.lane.b32.xlu0 %v7325_v14, %s7087_s28  ;;  %1214 = vst.msk [vmem:[#allocation2 + $0x88] sm:$0xff] %vm10872_vm1, %v7385_v35  ;;  %v580_v38 = vadd.f32 %v6704_v37, %v7247_v47  ;;  %v574_v39 = vpop.f32.mrb[17].mxu0 }
 0x115   : > { %11047 = vst [vmem:[#allocation18_spill] sm:$0xff] %v7387_v36  ;;  %701 = vst.msk [vmem:[#allocation3 + $0x78] sm:$0xff] %vm685_vm2, %v7385_v35  ;;  %v575_v40 = vadd.f32 %v7247_v47, %v574_v39  ;;  %v7463_v5 = vld [vmem:[#allocation2 + $0x60] sm:$0xff] }
 0x116   : > { %1435 = vrot.lane.b32.xlu1 %v7383_v34, %s7086_s23  ;;  %1213 = vst.msk [vmem:[#allocation2 + $0x80] sm:$0xff] %vm10872_vm1, %v7387_v36  ;;  %v7403_v41 = vmax.f32 %v580_v38, 0.0 }
 0x117   : > { %700 = vst.msk [vmem:[#allocation3 + $0x70] sm:$0xff] %vm685_vm2, %v7387_v36  ;;  %v7407_v43 = vmax.f32 %v575_v40, 0.0  ;;  %v6707_v44 = vpop.f32.mrb[18].mxu0 }
 0x118   : > { %11048 = vst [vmem:[#allocation19_spill] sm:$0xff] %v7403_v41  ;;  %1437 = vrot.lane.b32.xlu0 %v7405_v42, %s7086_s23  ;;  %1216 = vst.msk [vmem:[#allocation2 + $0x98] sm:$0xff] %vm10872_vm1, %v7403_v41  ;;  %v590_v45 = vadd.f32 %v6707_v44, %v7247_v47  ;;  %v584_v46 = vpop.f32.mrb[19].mxu0 }
 0x119   : > { %11049 = vst [vmem:[#allocation20_spill] sm:$0xff] %v7407_v43  ;;  %703 = vst.msk [vmem:[#allocation3 + $0x88] sm:$0xff] %vm685_vm2, %v7403_v41  ;;  %v585_v48 = vadd.f32 %v7247_v47, %v584_v46  ;;  %v7503_v31 = vld [vmem:[#allocation2 + $0x70] sm:$0xff] }
 0x11a   : > { %1319 = vrot.lane.b32.xlu1 %v7347_v22, %s7087_s28  ;;  %1215 = vst.msk [vmem:[#allocation2 + $0x90] sm:$0xff] %vm10872_vm1, %v7407_v43  ;;  %v7425_v50 = vmax.f32 %v590_v45, 0.0  ;;  %v7525_v45 = vld [vmem:[#allocation2 + $0x78] sm:$0xff] }
 0x11b   : > { %702 = vst.msk [vmem:[#allocation3 + $0x80] sm:$0xff] %vm685_vm2, %v7407_v43  ;;  %v7427_v51 = vmax.f32 %v585_v48, 0.0  ;;  %v6710_v54 = vpop.f32.mrb[20].mxu0 }
 0x11c   : > { %11050 = vst [vmem:[#allocation21_spill] sm:$0xff] %v7425_v50  ;;  %1321 = vrot.lane.b32.xlu0 %v7345_v21, %s7087_s28  ;;  %1218 = vst.msk [vmem:[#allocation2 + $0xa8] sm:$0xff] %vm10872_vm1, %v7425_v50  ;;  %v600_v55 = vadd.f32 %v6710_v54, %v7247_v47  ;;  %v594_v56 = vpop.f32.mrb[21].mxu0 }
 0x11d   : > { %11051 = vst [vmem:[#allocation22_spill] sm:$0xff] %v7427_v51  ;;  %705 = vst.msk [vmem:[#allocation3 + $0x98] sm:$0xff] %vm685_vm2, %v7425_v50  ;;  %v595_v57 = vadd.f32 %v7247_v47, %v594_v56 }
 0x11e   : > { %1439 = vrot.lane.b32.xlu1 %v7423_v49, %s7086_s23  ;;  %1217 = vst.msk [vmem:[#allocation2 + $0xa0] sm:$0xff] %vm10872_vm1, %v7427_v51  ;;  %v7443_v60 = vmax.f32 %v600_v55, 0.0 }
 0x11f   : > { %704 = vst.msk [vmem:[#allocation3 + $0x90] sm:$0xff] %vm685_vm2, %v7427_v51  ;;  %v7447_v62 = vmax.f32 %v595_v57, 0.0  ;;  %v6713_v63 = vpop.f32.mrb[22].mxu0  ;;  %v7543_v57 = vld [vmem:[#allocation2 + $0x80] sm:$0xff] }
 0x120   : > { %11052 = vst [vmem:[#allocation23_spill] sm:$0xff] %v7443_v60  ;;  %1441 = vrot.lane.b32.xlu0 %v7445_v61, %s7086_s23  ;;  %1220 = vst.msk [vmem:[#allocation2 + $0xb8] sm:$0xff] %vm10872_vm1, %v7443_v60  ;;  %v610_v2 = vadd.f32 %v6713_v63, %v7247_v47  ;;  %v604_v3 = vpop.f32.mrb[23].mxu0 }
 0x121   : > { %11053 = vst [vmem:[#allocation24_spill] sm:$0xff] %v7447_v62  ;;  %707 = vst.msk [vmem:[#allocation3 + $0xa8] sm:$0xff] %vm685_vm2, %v7443_v60  ;;  %v605_v4 = vadd.f32 %v7247_v47, %v604_v3  ;;  %v7567_v3 = vld [vmem:[#allocation2 + $0x90] sm:$0xff] }
 0x122   : > { %1323 = vrot.lane.b32.xlu1 %v7367_v29, %s7087_s28  ;;  %1219 = vst.msk [vmem:[#allocation2 + $0xb0] sm:$0xff] %vm10872_vm1, %v7447_v62  ;;  %v7465_v8 = vmax.f32 %v610_v2, 0.0 }
 0x123   : > { %706 = vst.msk [vmem:[#allocation3 + $0xa0] sm:$0xff] %vm685_vm2, %v7447_v62  ;;  %v7467_v10 = vmax.f32 %v605_v4, 0.0  ;;  %v6716_v11 = vpop.f32.mrb[24].mxu0  ;;  %v7573_v4 = vld [vmem:[#allocation2 + $0x98] sm:$0xff] }
 0x124   : > { %11054 = vst [vmem:[#allocation25_spill] sm:$0xff] %v7465_v8  ;;  %1325 = vrot.lane.b32.xlu0 %v7363_v27, %s7087_s28  ;;  %1222 = vst.msk [vmem:[#allocation2 + $0xc8] sm:$0xff] %vm10872_vm1, %v7465_v8  ;;  %v620_v13 = vadd.f32 %v6716_v11, %v7247_v47  ;;  %v614_v16 = vpop.f32.mrb[25].mxu0  ;;  %v1234_v27 = vld [vmem:[#allocation2 + $0x18] sm:$0xff] }
 0x125   : > { %11055 = vst [vmem:[#allocation26_spill] sm:$0xff] %v7467_v10  ;;  %709 = vst.msk [vmem:[#allocation3 + $0xb8] sm:$0xff] %vm685_vm2, %v7465_v8  ;;  %v615_v17 = vadd.f32 %v7247_v47, %v614_v16  ;;  %v7579_v11 = vld [vmem:[#allocation2 + $0xa0] sm:$0xff]  ;;  %v2233_v16 = vld [vmem:[%s10796_s3 + $0x8] sm:$0xff] }
 0x126   : > { %1443 = vrot.lane.b32.xlu1 %v7463_v5, %s7086_s23  ;;  %1221 = vst.msk [vmem:[#allocation2 + $0xc0] sm:$0xff] %vm10872_vm1, %v7467_v10  ;;  %v7483_v18 = vmax.f32 %v620_v13, 0.0  ;;  %v2232_v13 = vld [vmem:[%s10796_s3] sm:$0xff] }
 0x127   : > { %708 = vst.msk [vmem:[#allocation3 + $0xb0] sm:$0xff] %vm685_vm2, %v7467_v10  ;;  %v7487_v23 = vmax.f32 %v615_v17, 0.0  ;;  %v6719_v24 = vpop.f32.mrb[26].mxu0  ;;  %v6982_v17 = vpack.c.bf16 %v2233_v16, %v2232_v13  ;;  %v2236_v13 = vld [vmem:[%s10796_s3 + $0x20] sm:$0xff]  ;;  %v2237_v16 = vld [vmem:[%s10796_s3 + $0x28] sm:$0xff] }
 0x128   : > { %11056 = vst [vmem:[#allocation27_spill] sm:$0xff] %v7483_v18  ;;  %1445 = vrot.lane.b32.xlu0 %v7485_v19, %s7086_s23  ;;  %1224 = vst.msk [vmem:[#allocation2 + $0xd8] sm:$0xff] %vm10872_vm1, %v7483_v18  ;;  %v630_v25 = vadd.f32 %v6719_v24, %v7247_v47  ;;  %v624_v26 = vpop.f32.mrb[27].mxu0  ;;  %v7591_v24 = vld [vmem:[#allocation2 + $0xa8] sm:$0xff] }
 0x129   : > { %11057 = vst [vmem:[#allocation28_spill] sm:$0xff] %v7487_v23  ;;  %711 = vst.msk [vmem:[#allocation3 + $0xc8] sm:$0xff] %vm685_vm2, %v7483_v18  ;;  %v625_v30 = vadd.f32 %v7247_v47, %v624_v26  ;;  %6983 = vmatprep.subr.bf16.mxu0 %v6982_v17  ;;  %7022 = vmatprep.subr.bf16.mxu1 %v6982_v17  ;;  %v7603_v26 = vld [vmem:[#allocation2 + $0xb8] sm:$0xff] }
 0x12a   : > { %1327 = vrot.lane.b32.xlu1 %v7387_v36, %s7087_s28  ;;  %1223 = vst.msk [vmem:[#allocation2 + $0xd0] sm:$0xff] %vm10872_vm1, %v7487_v23  ;;  %v7505_v32 = vmax.f32 %v630_v25, 0.0  ;;  %6985 = vmatpush3.bf16.msra.mxu0 %v6982_v17  ;;  %v7597_v25 = vld [vmem:[#allocation2 + $0xb0] sm:$0xff] }
 0x12b   : > { %710 = vst.msk [vmem:[#allocation3 + $0xc0] sm:$0xff] %vm685_vm2, %v7487_v23  ;;  %v7507_v33 = vmax.f32 %v625_v30, 0.0  ;;  %v6722_v37 = vpop.f32.mrb[28].mxu0  ;;  %7026 = vmatpush3.bf16.msra.mxu1 %v6982_v17  ;;  %v6990_v17 = vpack.c.bf16 %v2237_v16, %v2236_v13 }
 0x12c   : > { %11058 = vst [vmem:[#allocation29_spill] sm:$0xff] %v7505_v32  ;;  %1329 = vrot.lane.b32.xlu0 %v7385_v35, %s7087_s28  ;;  %1226 = vst.msk [vmem:[#allocation2 + $0xe8] sm:$0xff] %vm10872_vm1, %v7505_v32  ;;  %v640_v38 = vadd.f32 %v6722_v37, %v7247_v47  ;;  %v634_v39 = vpop.f32.mrb[29].mxu0  ;;  %v2234_v37 = vld [vmem:[%s10796_s3 + $0x10] sm:$0xff] }
 0x12d   : > { %11059 = vst [vmem:[#allocation30_spill] sm:$0xff] %v7507_v33  ;;  %713 = vst.msk [vmem:[#allocation3 + $0xd8] sm:$0xff] %vm685_vm2, %v7505_v32  ;;  %v635_v40 = vadd.f32 %v7247_v47, %v634_v39  ;;  %v7609_v30 = vld [vmem:[#allocation2 + $0xc0] sm:$0xff]  ;;  %v1233_v35 = vld [vmem:[#allocation2 + $0x10] sm:$0xff] }
 0x12e   : > { %1447 = vrot.lane.b32.xlu1 %v7503_v31, %s7086_s23  ;;  %1225 = vst.msk [vmem:[#allocation2 + $0xe0] sm:$0xff] %vm10872_vm1, %v7507_v33  ;;  %v7523_v44 = vmax.f32 %v640_v38, 0.0  ;;  %v2235_v38 = vld [vmem:[%s10796_s3 + $0x18] sm:$0xff] }
 0x12f   : > { %712 = vst.msk [vmem:[#allocation3 + $0xd0] sm:$0xff] %vm685_vm2, %v7507_v33  ;;  %v7527_v46 = vmax.f32 %v635_v40, 0.0  ;;  %v6725_v48 = vpop.f32.mrb[30].mxu0  ;;  %v6986_v39 = vpack.c.bf16 %v2235_v38, %v2234_v37  ;;  %v7621_v40 = vld [vmem:[#allocation2 + $0xc8] sm:$0xff]  ;;  %v7659_v38 = vpop.permute.xlu1 %1489 }
 0x130   : > { %11060 = vst [vmem:[#allocation31_spill] sm:$0xff] %v7523_v44  ;;  %1449 = vrot.lane.b32.xlu0 %v7525_v45, %s7086_s23  ;;  %1228 = vst.msk [vmem:[#allocation2 + $0xf8] sm:$0xff] %vm10872_vm1, %v7523_v44  ;;  %v650_v54 = vadd.f32 %v6725_v48, %v7247_v47  ;;  %v644_v55 = vpop.f32.mrb[31].mxu0 }
 0x131   : > { %11061 = vst [vmem:[#allocation32_spill] sm:$0xff] %v7527_v46  ;;  %715 = vst.msk [vmem:[#allocation3 + $0xe8] sm:$0xff] %vm685_vm2, %v7523_v44  ;;  %v645_v56 = vadd.f32 %v7247_v47, %v644_v55  ;;  %v7561_v47 = vld [vmem:[#allocation2 + $0x88] sm:$0xff]  ;;  %6987 = vmatprep.subr.bf16.mxu0 %v6986_v39  ;;  %7023 = vmatprep.subr.bf16.mxu1 %v6986_v39  ;;  %v7627_v48 = vld [vmem:[#allocation2 + $0xd0] sm:$0xff] }
 0x132   : > { %1331 = vrot.lane.b32.xlu1 %v7407_v43, %s7087_s28  ;;  %1227 = vst.msk [vmem:[#allocation2 + $0xf0] sm:$0xff] %vm10872_vm1, %v7527_v46  ;;  %v7545_v63 = vmax.f32 %v650_v54, 0.0  ;;  %6989 = vmatpush3.bf16.msra.mxu0 %v6986_v39  ;;  %v7633_v54 = vld [vmem:[#allocation2 + $0xd8] sm:$0xff] }
 0x133   : > { %714 = vst.msk [vmem:[#allocation3 + $0xe0] sm:$0xff] %vm685_vm2, %v7527_v46  ;;  %v7547_v2 = vmax.f32 %v645_v56, 0.0  ;;  %7027 = vmatpush3.bf16.msra.mxu1 %v6986_v39  ;;  %v7643_v56 = vpop.permute.xlu0 %1487  ;;  %v7653_v37 = vld [vmem:[#allocation2 + $0xe8] sm:$0xff]  ;;  %6991 = vmatprep.subr.bf16.mxu0 %v6990_v17 }
 0x134   : > { %11062 = vst [vmem:[#allocation33_spill] sm:$0xff] %v7545_v63  ;;  %1333 = vrot.lane.b32.xlu0 %v7403_v41, %s7087_s28  ;;  %1230 = vst.msk [vmem:[#allocation2 + $0x108] sm:$0xff] %vm10872_vm1, %v7545_v63  ;;  %7024 = vmatprep.subr.bf16.mxu1 %v6990_v17 }
 0x135   : > { %11063 = vst [vmem:[#allocation34_spill] sm:$0xff] %v7547_v2  ;;  %717 = vst.msk [vmem:[#allocation3 + $0xf8] sm:$0xff] %vm685_vm2, %v7545_v63  ;;  %v7639_v55 = vld [vmem:[#allocation2 + $0xe0] sm:$0xff] }
 0x136   : > { %1451 = vrot.lane.b32.xlu1 %v7543_v57, %s7086_s23  ;;  %1229 = vst.msk [vmem:[#allocation2 + $0x100] sm:$0xff] %vm10872_vm1, %v7547_v2  ;;  %6993 = vmatpush3.bf16.msra.mxu0 %v6990_v17 }
 0x137   : > { %716 = vst.msk [vmem:[#allocation3 + $0xf0] sm:$0xff] %vm685_vm2, %v7547_v2  ;;  %7028 = vmatpush3.bf16.msra.mxu1 %v6990_v17  ;;  %v718_v17 = vlaneseq }
 0x138   : > { %1453 = vrot.lane.b32.xlu0 %v7561_v47, %s7086_s23 }
 0x139   : > { %v7677_v41 = vshrl.u32 %v718_v17, 7 }
 0x13a   : > { %1335 = vrot.lane.b32.xlu1 %v7427_v51, %s7087_s28 }
 0x13b   : > { %v1264_v16 = vld [vmem:[#allocation2 + $0x108] sm:$0xff]  ;;  %vm10875_vm5 = vcmp.lt.s32.totalorder %v7677_v41, 7  ;;  %vm10878_vm6 = vcmp.lt.s32.totalorder %v7677_v41, 1 }
 0x13c   : > { %1337 = vrot.lane.b32.xlu0 %v7425_v50, %s7087_s28 }
 0x13e   : > { %1455 = vrot.lane.b32.xlu1 %v7567_v3, %s7086_s23 }
 0x140   : > { %1457 = vrot.lane.b32.xlu0 %v7573_v4, %s7086_s23 }
 0x142   : > { %1339 = vrot.lane.b32.xlu1 %v7447_v62, %s7087_s28 }
 0x144   : > { %1341 = vrot.lane.b32.xlu0 %v7443_v60, %s7087_s28  ;;  %v2238_v60 = vld [vmem:[%s10796_s3 + $0x30] sm:$0x3f] }
 0x145   : > { %6738 = vmatprep.subr.msk.mxu0 %vm10870_vm4, %v2238_v60  ;;  %7025 = vmatprep.subr.msk.mxu1 %vm10870_vm4, %v2238_v60 }
 0x146   : > { %1459 = vrot.lane.b32.xlu1 %v7579_v11, %s7086_s23  ;;  %6739 = vmatpush3.msk.msra.mxu0 %vm10870_vm4, %v2238_v60 }
 0x147   : > { %7029 = vmatpush3.msk.msra.mxu1 %vm10870_vm4, %v2238_v60 }
 0x148   : > { %1461 = vrot.lane.b32.xlu0 %v7591_v24, %s7086_s23 }
 0x14a   : > { %1343 = vrot.lane.b32.xlu1 %v7467_v10, %s7087_s28 }
 0x14c   : > { %1345 = vrot.lane.b32.xlu0 %v7465_v8, %s7087_s28 }
 0x14e   : > { %1463 = vrot.lane.b32.xlu1 %v7597_v25, %s7086_s23 }
 0x150   : > { %1465 = vrot.lane.b32.xlu0 %v7603_v26, %s7086_s23 }
 0x152   : > { %1347 = vrot.lane.b32.xlu1 %v7487_v23, %s7087_s28  ;;  %v1232_v23 = vld [vmem:[#allocation2 + $0x8] sm:$0xff] }
 0x154   : > { %1349 = vrot.lane.b32.xlu0 %v7483_v18, %s7087_s28  ;;  %v7667_v18 = vld [vmem:[#allocation2 + $0xf8] sm:$0xff] }
 0x156   : > { %1467 = vrot.lane.b32.xlu1 %v7609_v30, %s7086_s23 }
 0x158   : > { %1469 = vrot.lane.b32.xlu0 %v7621_v40, %s7086_s23 }
 0x15a   : > { %1351 = vrot.lane.b32.xlu1 %v7507_v33, %s7087_s28  ;;  %v1231_v33 = vld [vmem:[#allocation2] sm:$0xff] }
 0x15c   : > { %1353 = vrot.lane.b32.xlu0 %v7505_v32, %s7087_s28 }
 0x15e   : > { %1471 = vrot.lane.b32.xlu1 %v7627_v48, %s7086_s23 }
 0x160   : > { %1473 = vrot.lane.b32.xlu0 %v7633_v54, %s7086_s23 }
 0x162   : > { %1355 = vrot.lane.b32.xlu1 %v7527_v46, %s7087_s28  ;;  %v1263_v46 = vld [vmem:[#allocation2 + $0x100] sm:$0xff] }
 0x164   : > { %1357 = vrot.lane.b32.xlu0 %v7523_v44, %s7087_s28  ;;  %v7661_v44 = vld [vmem:[#allocation2 + $0xf0] sm:$0xff] }
 0x166   : > { %1475 = vrot.lane.b32.xlu1 %v7639_v55, %s7086_s23 }
 0x168   : > { %1477 = vrot.lane.b32.xlu0 %v7653_v37, %s7086_s23 }
 0x16a   : > { %1359 = vrot.lane.b32.xlu1 %v7547_v2, %s7087_s28  ;;  %v1302_v39 = vpop.permute.xlu0 %1301 }
 0x16c   : > { %1361 = vrot.lane.b32.xlu0 %v7545_v63, %s7087_s28 }
 0x16e   : > { %1479 = vrot.lane.b32.xlu1 %v7661_v44, %s7086_s23  ;;  %v1300_v13 = vpop.permute.xlu0 %1299 }
 0x16f   : > { %v1304_v32 = vpop.permute.xlu1 %1303  ;;  %v1523_v50 = vsel %vm10872_vm1, %v1231_v33, %v1300_v13  ;;  %v1524_v33 = vsel %vm10872_vm1, %v1232_v23, %v1302_v39 }
 0x170   : > { %1481 = vrot.lane.b32.xlu0 %v7667_v18, %s7086_s23 }
 0x172   : > { %1485 = vrot.lane.b32.xlu1 %v1264_v16, %s7086_s23  ;;  %v1306_v2 = vpop.permute.xlu0 %1305 }
 0x173   : > { %v1308_v8 = vpop.permute.xlu1 %1307  ;;  %v1526_v21 = vsel %vm10872_vm1, %v1234_v27, %v1306_v2 }
 0x176   : > { %1483 = vrot.lane.b32.xlu1 %v1263_v46, %s7086_s23  ;;  %v1310_v63 = vpop.permute.xlu0 %1309 }
 0x178   : > { %v1428_v10 = vpop.permute.xlu1 %1427 }
 0x179   : > { %v7682_v16 = vsel %vm10871_vm3, %v1523_v50, %v1428_v10 }
 0x17a   : > { %1942 = vrot.lane.b32.xlu0 %v7682_v16, %s7088_s22  ;;  %v1430_v46 = vpop.permute.xlu0 %1429  ;;  %v10844_v50 = vrot.slane %v7682_v16, 7  ;;  %v10841_v10 = vrot.slane %v7682_v16, 1 }
 0x17b   : > { %v1557_v17 = vsel %vm10871_vm3, %v1524_v33, %v1430_v46  ;;  %v1525_v33 = vsel %vm10872_vm1, %v1233_v35, %v1304_v32 }
 0x17c   : > { %v1312_v13 = vpop.permute.xlu1 %1311  ;;  %1944 = vrot.lane.b32.xlu1 %v1557_v17, %s7088_s22  ;;  %v1589_v60 = vrot.slane %v1557_v17, 7  ;;  %v1750_v62 = vrot.slane %v1557_v17, 1 }
 0x17e   : > { %v1314_v51 = vpop.permute.xlu0 %1313  ;;  %v1812_v23 = vsel %vm10875_vm5, %v10841_v10, %v1750_v62  ;;  %v7703_v39 = vsel %vm10878_vm6, %v10844_v50, %v1589_v60  ;;  %v720_v50 = vadd.s32 8, %v7677_v41 }
 0x17f   : > { %2070 = vrot.lane.b32.xlu0 %v1812_v23, %s7089_s26 }
 0x180   : > { %v1432_v46 = vpop.permute.xlu1 %1431 }
 0x181   : > { %v1558_v17 = vsel %vm10871_vm3, %v1525_v33, %v1432_v46 }
 0x182   : > { %v1590_v43 = vrot.slane %v1558_v17, 7  ;;  %v1434_v36 = vpop.permute.xlu0 %1433  ;;  %v1751_v32 = vrot.slane %v1558_v17, 1 }
 0x183   : > { %1946 = vrot.lane.b32.xlu0 %v1558_v17, %s7088_s22  ;;  %v1559_v14 = vsel %vm10871_vm3, %v1526_v21, %v1434_v36  ;;  %v1527_v21 = vsel %vm10872_vm1, %v7311_v9, %v1308_v8  ;;  %v722_v9 = vadd.s32 24, %v7677_v41 }
 0x184   : > { %v1316_v10 = vpop.permute.xlu1 %1315  ;;  %v7714_v35 = vsel %vm10878_vm6, %v1589_v60, %v1590_v43  ;;  %1948 = vrot.lane.b32.xlu1 %v1559_v14, %s7088_s22  ;;  %v1591_v23 = vrot.slane %v1559_v14, 7  ;;  %v1752_v33 = vrot.slane %v1559_v14, 1  ;;  %v762_v60 = vand.u32 15, %v720_v50 }
 0x185   : > { %v1528_v14 = vsel %vm10872_vm1, %v7320_v12, %v1310_v63 }
 0x186   : > { %v1318_v46 = vpop.permute.xlu0 %1317  ;;  %v1810_v27 = vsel %vm10875_vm5, %v1751_v32, %v1752_v33  ;;  %v7721_v2 = vsel %vm10878_vm6, %v1590_v43, %v1591_v23  ;;  %vm7733_vm7 = vcmp.le.s32.totalorder %v762_v60, 14 }
 0x187   : > { %2074 = vrot.lane.b32.xlu0 %v1810_v27, %s7089_s26  ;;  %v11065_v53 = vsel %vm7733_vm7, 4294967295, %v11064_v53  ;;  %v1811_v27 = vsel %vm10875_vm5, %v1750_v62, %v1751_v32 }
 0x188   : > { %v1436_v36 = vpop.permute.xlu1 %1435  ;;  %11066 = vst [vmem:[#allocation35_spill] sm:$0xff] %v11065_v53 }
 0x189   : > { %v1560_v17 = vsel %vm10871_vm3, %v1527_v21, %v1436_v36 }
 0x18a   : > { %v1592_v29 = vrot.slane %v1560_v17, 7  ;;  %v1438_v6 = vpop.permute.xlu0 %1437  ;;  %v1753_v50 = vrot.slane %v1560_v17, 1 }
 0x18b   : > { %1950 = vrot.lane.b32.xlu0 %v1560_v17, %s7088_s22  ;;  %v1561_v43 = vsel %vm10871_vm3, %v1528_v14, %v1438_v6  ;;  %v1879_v17 = vsel %vm7733_vm7, %v1811_v27, 0.0  ;;  %v776_v14 = vand.u32 15, %v722_v9  ;;  %v724_v9 = vadd.s32 40, %v7677_v41 }
 0x18c   : > { %v7729_v22 = vpop.permute.xlu1 %1319  ;;  %v7740_v8 = vsel %vm10878_vm6, %v1591_v23, %v1592_v29  ;;  %1952 = vrot.lane.b32.xlu1 %v1561_v43, %s7088_s22  ;;  %v1593_v12 = vrot.slane %v1561_v43, 7  ;;  %v1754_v63 = vrot.slane %v1561_v43, 1  ;;  %v1529_v23 = vsel %vm10872_vm1, %v7343_v20, %v1312_v13 }
 0x18d   : > { %v1530_v43 = vsel %vm10872_vm1, %v7365_v28, %v1314_v51  ;;  %vm7764_vm8 = vcmp.le.s32.totalorder %v776_v14, 14  ;;  %v11068_v13 = vmov 0  ;;  %v1809_v51 = vsel %vm10875_vm5, %v1752_v33, %v1753_v50 }
 0x18e   : > { %v1322_v21 = vpop.permute.xlu0 %1321  ;;  %v1808_v6 = vsel %vm10875_vm5, %v1753_v50, %v1754_v63  ;;  %v7749_v36 = vsel %vm10878_vm6, %v1592_v29, %v1593_v12  ;;  %v11069_v13 = vsel %vm7764_vm8, 4294967295, %v11068_v13 }
 0x18f   : > { %11067 = vst [vmem:[#allocation36_spill] sm:$0xff] %v7749_v36  ;;  %2078 = vrot.lane.b32.xlu0 %v1808_v6, %s7089_s26  ;;  %11070 = vst [vmem:[#allocation37_spill] sm:$0xff] %v11069_v13 }
 0x190   : > { %v1440_v60 = vpop.permute.xlu1 %1439  ;;  %2072 = vrot.lane.b32.xlu1 %v1879_v17, %s7089_s26 }
 0x191   : > { %v1562_v62 = vsel %vm10871_vm3, %v1529_v23, %v1440_v60 }
 0x192   : > { %v1594_v32 = vrot.slane %v1562_v62, 7  ;;  %v1442_v29 = vpop.permute.xlu0 %1441  ;;  %v1755_v6 = vrot.slane %v1562_v62, 1 }
 0x193   : > { %1954 = vrot.lane.b32.xlu0 %v1562_v62, %s7088_s22  ;;  %v1563_v20 = vsel %vm10871_vm3, %v1530_v43, %v1442_v29  ;;  %v1881_v62 = vsel %vm7764_vm8, %v1809_v51, 0.0  ;;  %v790_v29 = vand.u32 15, %v724_v9  ;;  %v726_v9 = vadd.s32 56, %v7677_v41 }
 0x194   : > { %v7760_v36 = vpop.permute.xlu1 %1323  ;;  %v7771_v27 = vsel %vm10878_vm6, %v1593_v12, %v1594_v32  ;;  %v1595_v23 = vrot.slane %v1563_v20, 7  ;;  %v1756_v28 = vrot.slane %v1563_v20, 1  ;;  %1956 = vrot.lane.b32.xlu1 %v1563_v20, %s7088_s22  ;;  %v1531_v12 = vsel %vm10872_vm1, %v7383_v34, %v1316_v10 }
 0x195   : > { %v1532_v20 = vsel %vm10872_vm1, %v7405_v42, %v1318_v46  ;;  %vm7795_vm9 = vcmp.le.s32.totalorder %v790_v29, 14  ;;  %v11071_v10 = vmov 0  ;;  %v1807_v46 = vsel %vm10875_vm5, %v1754_v63, %v1755_v6 }
 0x196   : > { %v1326_v60 = vpop.permute.xlu0 %1325  ;;  %v1806_v17 = vsel %vm10875_vm5, %v1755_v6, %v1756_v28  ;;  %v7780_v14 = vsel %vm10878_vm6, %v1594_v32, %v1595_v23  ;;  %v11072_v10 = vsel %vm7795_vm9, 4294967295, %v11071_v10 }
 0x197   : > { %2082 = vrot.lane.b32.xlu0 %v1806_v17, %s7089_s26  ;;  %11073 = vst [vmem:[#allocation38_spill] sm:$0xff] %v11072_v10 }
 0x198   : > { %v1444_v43 = vpop.permute.xlu1 %1443  ;;  %2076 = vrot.lane.b32.xlu1 %v1881_v62, %s7089_s26 }
 0x199   : > { %v1564_v33 = vsel %vm10871_vm3, %v1531_v12, %v1444_v43 }
 0x19a   : > { %v1596_v50 = vrot.slane %v1564_v33, 7  ;;  %v1446_v32 = vpop.permute.xlu0 %1445  ;;  %v1757_v17 = vrot.slane %v1564_v33, 1 }
 0x19b   : > { %1958 = vrot.lane.b32.xlu0 %v1564_v33, %s7088_s22  ;;  %v1565_v34 = vsel %vm10871_vm3, %v1532_v20, %v1446_v32  ;;  %v1883_v20 = vsel %vm7795_vm9, %v1807_v46, 0.0  ;;  %v804_v32 = vand.u32 15, %v726_v9  ;;  %v728_v9 = vadd.s32 72, %v7677_v41 }
 0x19c   : > { %v7791_v53 = vpop.permute.xlu1 %1327  ;;  %v7802_v51 = vsel %vm10878_vm6, %v1595_v23, %v1596_v50  ;;  %v1597_v12 = vrot.slane %v1565_v34, 7  ;;  %v1758_v42 = vrot.slane %v1565_v34, 1  ;;  %1960 = vrot.lane.b32.xlu1 %v1565_v34, %s7088_s22  ;;  %v1533_v23 = vsel %vm10872_vm1, %v7423_v49, %v7729_v22 }
 0x19d   : > { %vm7827_vm10 = vcmp.le.s32.totalorder %v804_v32, 14  ;;  %v11074_v49 = vmov 0 }
 0x19e   : > { %v1330_v43 = vpop.permute.xlu0 %1329  ;;  %v1804_v62 = vsel %vm10875_vm5, %v1757_v17, %v1758_v42  ;;  %v7811_v29 = vsel %vm10878_vm6, %v1596_v50, %v1597_v12  ;;  %v1534_v50 = vsel %vm10872_vm1, %v7445_v61, %v1322_v21  ;;  %v11075_v49 = vsel %vm7827_vm10, 4294967295, %v11074_v49 }
 0x19f   : > { %2086 = vrot.lane.b32.xlu0 %v1804_v62, %s7089_s26  ;;  %11076 = vst [vmem:[#allocation39_spill] sm:$0xff] %v11075_v49  ;;  %v1805_v21 = vsel %vm10875_vm5, %v1756_v28, %v1757_v17 }
 0x1a0   : > { %v1448_v33 = vpop.permute.xlu1 %1447  ;;  %2080 = vrot.lane.b32.xlu1 %v1883_v20, %s7089_s26 }
 0x1a1   : > { %v1566_v63 = vsel %vm10871_vm3, %v1533_v23, %v1448_v33 }
 0x1a2   : > { %v1598_v6 = vrot.slane %v1566_v63, 7  ;;  %v1450_v34 = vpop.permute.xlu0 %1449  ;;  %v1759_v62 = vrot.slane %v1566_v63, 1 }
 0x1a3   : > { %1962 = vrot.lane.b32.xlu0 %v1566_v63, %s7088_s22  ;;  %v1567_v22 = vsel %vm10871_vm3, %v1534_v50, %v1450_v34  ;;  %v1885_v50 = vsel %vm7827_vm10, %v1805_v21, 0.0  ;;  %v818_v34 = vand.u32 15, %v728_v9  ;;  %v730_v9 = vadd.s32 88, %v7677_v41 }
 0x1a4   : > { %v7823_v13 = vpop.permute.xlu1 %1331  ;;  %v7834_v46 = vsel %vm10878_vm6, %v1597_v12, %v1598_v6  ;;  %v1599_v23 = vrot.slane %v1567_v22, 7  ;;  %v1760_v61 = vrot.slane %v1567_v22, 1  ;;  %1964 = vrot.lane.b32.xlu1 %v1567_v22, %s7088_s22  ;;  %v1535_v12 = vsel %vm10872_vm1, %v7463_v5, %v7760_v36 }
 0x1a5   : > { %vm7859_vm11 = vcmp.le.s32.totalorder %v818_v34, 14  ;;  %v11077_v36 = vmov 0 }
 0x1a6   : > { %v1334_v33 = vpop.permute.xlu0 %1333  ;;  %v1802_v20 = vsel %vm10875_vm5, %v1759_v62, %v1760_v61  ;;  %v7843_v32 = vsel %vm10878_vm6, %v1598_v6, %v1599_v23  ;;  %v1536_v6 = vsel %vm10872_vm1, %v7485_v19, %v1326_v60  ;;  %v11078_v36 = vsel %vm7859_vm11, 4294967295, %v11077_v36 }
 0x1a7   : > { %2090 = vrot.lane.b32.xlu0 %v1802_v20, %s7089_s26  ;;  %11079 = vst [vmem:[#allocation40_spill] sm:$0xff] %v11078_v36  ;;  %v1803_v60 = vsel %vm10875_vm5, %v1758_v42, %v1759_v62 }
 0x1a8   : > { %v1452_v63 = vpop.permute.xlu1 %1451  ;;  %2084 = vrot.lane.b32.xlu1 %v1885_v50, %s7089_s26 }
 0x1a9   : > { %v1568_v28 = vsel %vm10871_vm3, %v1535_v12, %v1452_v63 }
 0x1aa   : > { %v1600_v17 = vrot.slane %v1568_v28, 7  ;;  %v1454_v22 = vpop.permute.xlu0 %1453  ;;  %v1761_v20 = vrot.slane %v1568_v28, 1 }
 0x1ab   : > { %1966 = vrot.lane.b32.xlu0 %v1568_v28, %s7088_s22  ;;  %v1569_v5 = vsel %vm10871_vm3, %v1536_v6, %v1454_v22  ;;  %v1887_v6 = vsel %vm7859_vm11, %v1803_v60, 0.0  ;;  %v832_v22 = vand.u32 15, %v730_v9  ;;  %v732_v9 = vadd.s32 104, %v7677_v41 }
 0x1ac   : > { %v7855_v10 = vpop.permute.xlu1 %1335  ;;  %v7866_v21 = vsel %vm10878_vm6, %v1599_v23, %v1600_v17  ;;  %v1601_v12 = vrot.slane %v1569_v5, 7  ;;  %v1762_v19 = vrot.slane %v1569_v5, 1  ;;  %1968 = vrot.lane.b32.xlu1 %v1569_v5, %s7088_s22  ;;  %v1537_v23 = vsel %vm10872_vm1, %v7503_v31, %v7791_v53 }
 0x1ad   : > { %vm7891_vm12 = vcmp.le.s32.totalorder %v832_v22, 14  ;;  %v11080_v31 = vmov 0 }
 0x1ae   : > { %v1338_v63 = vpop.permute.xlu0 %1337  ;;  %v1800_v50 = vsel %vm10875_vm5, %v1761_v20, %v1762_v19  ;;  %v7875_v34 = vsel %vm10878_vm6, %v1600_v17, %v1601_v12  ;;  %v1538_v17 = vsel %vm10872_vm1, %v7525_v45, %v1330_v43  ;;  %v11081_v31 = vsel %vm7891_vm12, 4294967295, %v11080_v31 }
 0x1af   : > { %2094 = vrot.lane.b32.xlu0 %v1800_v50, %s7089_s26  ;;  %11082 = vst [vmem:[#allocation41_spill] sm:$0xff] %v11081_v31  ;;  %v1801_v43 = vsel %vm10875_vm5, %v1760_v61, %v1761_v20 }
 0x1b0   : > { %v1456_v28 = vpop.permute.xlu1 %1455  ;;  %2088 = vrot.lane.b32.xlu1 %v1887_v6, %s7089_s26 }
 0x1b1   : > { %v1570_v42 = vsel %vm10871_vm3, %v1537_v23, %v1456_v28 }
 0x1b2   : > { %v1602_v62 = vrot.slane %v1570_v42, 7  ;;  %v1458_v5 = vpop.permute.xlu0 %1457  ;;  %v1763_v50 = vrot.slane %v1570_v42, 1 }
 0x1b3   : > { %1970 = vrot.lane.b32.xlu0 %v1570_v42, %s7088_s22  ;;  %v1571_v53 = vsel %vm10871_vm3, %v1538_v17, %v1458_v5  ;;  %v1889_v17 = vsel %vm7891_vm12, %v1801_v43, 0.0  ;;  %v846_v5 = vand.u32 15, %v732_v9  ;;  %v734_v9 = vadd.s32 120, %v7677_v41 }
 0x1b4   : > { %v7887_v49 = vpop.permute.xlu1 %1339  ;;  %v7898_v60 = vsel %vm10878_vm6, %v1601_v12, %v1602_v62  ;;  %v1603_v23 = vrot.slane %v1571_v53, 7  ;;  %v1764_v45 = vrot.slane %v1571_v53, 1  ;;  %1972 = vrot.lane.b32.xlu1 %v1571_v53, %s7088_s22  ;;  %v1539_v12 = vsel %vm10872_vm1, %v7543_v57, %v7823_v13 }
 0x1b5   : > { %vm7923_vm13 = vcmp.le.s32.totalorder %v846_v5, 14  ;;  %v11083_v13 = vmov 0 }
 0x1b6   : > { %v1342_v28 = vpop.permute.xlu0 %1341  ;;  %v1798_v6 = vsel %vm10875_vm5, %v1763_v50, %v1764_v45  ;;  %v7907_v22 = vsel %vm10878_vm6, %v1602_v62, %v1603_v23  ;;  %v1540_v62 = vsel %vm10872_vm1, %v7561_v47, %v1334_v33  ;;  %v11084_v13 = vsel %vm7923_vm13, 4294967295, %v11083_v13 }
 0x1b7   : > { %2098 = vrot.lane.b32.xlu0 %v1798_v6, %s7089_s26  ;;  %11085 = vst [vmem:[#allocation42_spill] sm:$0xff] %v11084_v13  ;;  %v1799_v33 = vsel %vm10875_vm5, %v1762_v19, %v1763_v50 }
 0x1b8   : > { %v1460_v42 = vpop.permute.xlu1 %1459  ;;  %2092 = vrot.lane.b32.xlu1 %v1889_v17, %s7089_s26 }
 0x1b9   : > { %v1572_v61 = vsel %vm10871_vm3, %v1539_v12, %v1460_v42 }
 0x1ba   : > { %v1604_v20 = vrot.slane %v1572_v61, 7  ;;  %v1462_v53 = vpop.permute.xlu0 %1461  ;;  %v1765_v6 = vrot.slane %v1572_v61, 1 }
 0x1bb   : > { %1974 = vrot.lane.b32.xlu0 %v1572_v61, %s7088_s22  ;;  %v1573_v57 = vsel %vm10871_vm3, %v1540_v62, %v1462_v53  ;;  %v1891_v62 = vsel %vm7923_vm13, %v1799_v33, 0.0  ;;  %v860_v53 = vand.u32 15, %v734_v9  ;;  %v736_v9 = vadd.s32 136, %v7677_v41 }
 0x1bc   : > { %v7919_v36 = vpop.permute.xlu1 %1343  ;;  %v7930_v43 = vsel %vm10878_vm6, %v1603_v23, %v1604_v20  ;;  %v1605_v12 = vrot.slane %v1573_v57, 7  ;;  %v1766_v47 = vrot.slane %v1573_v57, 1  ;;  %1976 = vrot.lane.b32.xlu1 %v1573_v57, %s7088_s22  ;;  %v1541_v23 = vsel %vm10872_vm1, %v7567_v3, %v7855_v10 }
 0x1bd   : > { %vm7955_vm14 = vcmp.le.s32.totalorder %v860_v53, 14  ;;  %v11086_v10 = vmov 0 }
 0x1be   : > { %v1346_v42 = vpop.permute.xlu0 %1345  ;;  %v1796_v17 = vsel %vm10875_vm5, %v1765_v6, %v1766_v47  ;;  %v7939_v5 = vsel %vm10878_vm6, %v1604_v20, %v1605_v12  ;;  %v1542_v20 = vsel %vm10872_vm1, %v7573_v4, %v1338_v63  ;;  %v11087_v10 = vsel %vm7955_vm14, 4294967295, %v11086_v10 }
 0x1bf   : > { %2102 = vrot.lane.b32.xlu0 %v1796_v17, %s7089_s26  ;;  %11088 = vst [vmem:[#allocation43_spill] sm:$0xff] %v11087_v10  ;;  %v1797_v63 = vsel %vm10875_vm5, %v1764_v45, %v1765_v6 }
 0x1c0   : > { %v1464_v61 = vpop.permute.xlu1 %1463  ;;  %2096 = vrot.lane.b32.xlu1 %v1891_v62, %s7089_s26 }
 0x1c1   : > { %v1574_v19 = vsel %vm10871_vm3, %v1541_v23, %v1464_v61 }
 0x1c2   : > { %v1606_v50 = vrot.slane %v1574_v19, 7  ;;  %v1466_v57 = vpop.permute.xlu0 %1465  ;;  %v1767_v17 = vrot.slane %v1574_v19, 1 }
 0x1c3   : > { %1978 = vrot.lane.b32.xlu0 %v1574_v19, %s7088_s22  ;;  %v1575_v3 = vsel %vm10871_vm3, %v1542_v20, %v1466_v57  ;;  %v1893_v20 = vsel %vm7955_vm14, %v1797_v63, 0.0  ;;  %v874_v57 = vand.u32 15, %v736_v9 }
 0x1c4   : > { %v7951_v31 = vpop.permute.xlu1 %1347  ;;  %v7962_v33 = vsel %vm10878_vm6, %v1605_v12, %v1606_v50  ;;  %v1607_v23 = vrot.slane %v1575_v3, 7  ;;  %v1768_v4 = vrot.slane %v1575_v3, 1  ;;  %1980 = vrot.lane.b32.xlu1 %v1575_v3, %s7088_s22  ;;  %v1543_v12 = vsel %vm10872_vm1, %v7579_v11, %v7887_v49 }
 0x1c5   : > { %vm7985_vm15 = vcmp.le.s32.totalorder %v874_v57, 14  ;;  %v11090_v11 = vmov 0  ;;  %v738_v49 = vadd.s32 152, %v7677_v41 }
 0x1c6   : > { %v1350_v61 = vpop.permute.xlu0 %1349  ;;  %v1794_v62 = vsel %vm10875_vm5, %v1767_v17, %v1768_v4  ;;  %v7971_v53 = vsel %vm10878_vm6, %v1606_v50, %v1607_v23  ;;  %v1544_v50 = vsel %vm10872_vm1, %v7591_v24, %v1342_v28  ;;  %v11091_v11 = vsel %vm7985_vm15, 4294967295, %v11090_v11 }
 0x1c7   : > { %11089 = vst [vmem:[#allocation44_spill] sm:$0xff] %v7971_v53  ;;  %2106 = vrot.lane.b32.xlu0 %v1794_v62, %s7089_s26  ;;  %11092 = vst [vmem:[#allocation45_spill] sm:$0xff] %v11091_v11  ;;  %v1795_v24 = vsel %vm10875_vm5, %v1766_v47, %v1767_v17 }
 0x1c8   : > { %v1468_v19 = vpop.permute.xlu1 %1467  ;;  %2100 = vrot.lane.b32.xlu1 %v1893_v20, %s7089_s26 }
 0x1c9   : > { %v1576_v45 = vsel %vm10871_vm3, %v1543_v12, %v1468_v19 }
 0x1ca   : > { %v1608_v6 = vrot.slane %v1576_v45, 7  ;;  %v1470_v3 = vpop.permute.xlu0 %1469  ;;  %v1769_v63 = vrot.slane %v1576_v45, 1 }
 0x1cb   : > { %v1577_v13 = vsel %vm10871_vm3, %v1544_v50, %v1470_v3  ;;  %1982 = vrot.lane.b32.xlu0 %v1576_v45, %s7088_s22  ;;  %v888_v45 = vand.u32 15, %v738_v49  ;;  %v740_v49 = vadd.s32 168, %v7677_v41 }
 0x1cc   : > { %v1352_v53 = vpop.permute.xlu1 %1351  ;;  %v7992_v9 = vsel %vm10878_vm6, %v1607_v23, %v1608_v6  ;;  %v1609_v62 = vrot.slane %v1577_v13, 7  ;;  %v1770_v12 = vrot.slane %v1577_v13, 1  ;;  %1984 = vrot.lane.b32.xlu1 %v1577_v13, %s7088_s22  ;;  %v1545_v23 = vsel %vm10872_vm1, %v7597_v25, %v7919_v36 }
 0x1cd   : > { %v1895_v13 = vsel %vm7985_vm15, %v1795_v24, 0.0  ;;  %vm8019_vm2 = vcmp.le.s32.totalorder %v888_v45, 14  ;;  %v11093_v36 = vmov 0 }
 0x1ce   : > { %v1354_v28 = vpop.permute.xlu0 %1353  ;;  %v1792_v19 = vsel %vm10875_vm5, %v1769_v63, %v1770_v12  ;;  %v8001_v20 = vsel %vm10878_vm6, %v1608_v6, %v1609_v62  ;;  %v1546_v6 = vsel %vm10872_vm1, %v7603_v26, %v1346_v42  ;;  %v11094_v36 = vsel %vm8019_vm2, 4294967295, %v11093_v36 }
 0x1cf   : > { %2110 = vrot.lane.b32.xlu0 %v1792_v19, %s7089_s26 }
 0x1d0   : > { %v1472_v57 = vpop.permute.xlu1 %1471  ;;  %2104 = vrot.lane.b32.xlu1 %v1895_v13, %s7089_s26 }
 0x1d1   : > { %v1578_v47 = vsel %vm10871_vm3, %v1545_v23, %v1472_v57  ;;  %v1793_v23 = vsel %vm10875_vm5, %v1768_v4, %v1769_v63  ;;  %v902_v63 = vand.u32 15, %v740_v49 }
 0x1d2   : > { %v1610_v17 = vrot.slane %v1578_v47, 7  ;;  %v1474_v50 = vpop.permute.xlu0 %1473  ;;  %v1771_v19 = vrot.slane %v1578_v47, 1 }
 0x1d3   : > { %v8014_v3 = vsel %vm10871_vm3, %v1546_v6, %v1474_v50  ;;  %1986 = vrot.lane.b32.xlu0 %v1578_v47, %s7088_s22  ;;  %v1897_v6 = vsel %vm8019_vm2, %v1793_v23, 0.0  ;;  %vm8064_vm0 = vcmp.le.s32.totalorder %v902_v63, 14  ;;  %vm11106_vm2 = vcmp.lt.s32.totalorder %v7677_v41, 7 }
 0x1d4   : > { %v8016_v25 = vpop.permute.xlu1 %1355  ;;  %v8026_v24 = vsel %vm10878_vm6, %v1609_v62, %v1610_v17  ;;  %v1611_v26 = vrot.slane %v8014_v3, 7  ;;  %v1772_v42 = vrot.slane %v8014_v3, 1  ;;  %1988 = vrot.lane.b32.xlu1 %v8014_v3, %s7088_s22  ;;  %v1547_v62 = vsel %vm10872_vm1, %v7609_v30, %v7951_v31 }
 0x1d5   : > { %v742_v31 = vadd.s32 184, %v7677_v41 }
 0x1d6   : > { %v1358_v57 = vpop.permute.xlu0 %1357  ;;  %v1790_v13 = vsel %vm10875_vm5, %v1771_v19, %v1772_v42  ;;  %v8038_v45 = vsel %vm10878_vm6, %v1610_v17, %v1611_v26  ;;  %v1548_v17 = vsel %vm10872_vm1, %v7621_v40, %v1350_v61  ;;  %v11095_v40 = vmov 0 }
 0x1d7   : > { %2114 = vrot.lane.b32.xlu0 %v1790_v13, %s7089_s26  ;;  %v11096_v40 = vsel %vm8064_vm0, 4294967295, %v11095_v40  ;;  %v1791_v61 = vsel %vm10875_vm5, %v1770_v12, %v1771_v19  ;;  %v916_v12 = vand.u32 15, %v742_v31 }
 0x1d8   : > { %v1476_v47 = vpop.permute.xlu1 %1475  ;;  %2108 = vrot.lane.b32.xlu1 %v1897_v6, %s7089_s26  ;;  %v1549_v6 = vsel %vm10872_vm1, %v7627_v48, %v1352_v53 }
 0x1d9   : > { %v1580_v4 = vsel %vm10871_vm3, %v1547_v62, %v1476_v47  ;;  %vm8104_vm4 = vcmp.le.s32.totalorder %v916_v12, 14 }
 0x1da   : > { %v1612_v50 = vrot.slane %v1580_v4, 7  ;;  %v1478_v3 = vpop.permute.xlu0 %1477 }
 0x1db   : > { %v8051_v11 = vsel %vm10871_vm3, %v1548_v17, %v1478_v3  ;;  %1990 = vrot.lane.b32.xlu0 %v1580_v4, %s7088_s22 }
 0x1dc   : > { %v1360_v30 = vpop.permute.xlu1 %1359  ;;  %v8057_v23 = vsel %vm10878_vm6, %v1611_v26, %v1612_v50  ;;  %v1613_v13 = vrot.slane %v8051_v11, 7  ;;  %1992 = vrot.lane.b32.xlu1 %v8051_v11, %s7088_s22  ;;  %v1774_v26 = vrot.slane %v8051_v11, 1  ;;  %v1773_v11 = vrot.slane %v1580_v4, 1 }
 0x1dd   : > { %v1553_v49 = vsel %vm10872_vm1, %v7661_v44, %v1360_v30  ;;  %v1552_v30 = vsel %vm10872_vm1, %v7653_v37, %v1358_v57  ;;  %v744_v57 = vadd.s32 200, %v7677_v41 }
 0x1de   : > { %v8072_v62 = vsel %vm10871_vm3, %v1553_v49, %v7643_v56  ;;  %v1362_v47 = vpop.permute.xlu0 %1361  ;;  %v8077_v44 = vsel %vm10878_vm6, %v1612_v50, %v1613_v13  ;;  %v1899_v56 = vsel %vm8064_vm0, %v1791_v61, 0.0  ;;  %v1788_v3 = vsel %vm10875_vm5, %v1773_v11, %v1774_v26 }
 0x1df   : > { %v1554_v63 = vsel %vm10872_vm1, %v7667_v18, %v1362_v47  ;;  %2002 = vrot.lane.b32.xlu0 %v8072_v62, %s7088_s22  ;;  %v1550_v18 = vsel %vm10872_vm1, %v7633_v54, %v1354_v28  ;;  %v11097_v49 = vmov 0  ;;  %v1789_v37 = vsel %vm10875_vm5, %v1772_v42, %v1773_v11 }
 0x1e0   : > { %v1480_v17 = vpop.permute.xlu1 %1479  ;;  %v8089_v19 = vsel %vm10871_vm3, %v1554_v63, %v7659_v38  ;;  %2112 = vrot.lane.b32.xlu1 %v1899_v56, %s7089_s26  ;;  %v11098_v49 = vsel %vm8104_vm4, 4294967295, %v11097_v49  ;;  %v1618_v61 = vrot.slane %v8072_v62, 7  ;;  %v748_v63 = vadd.s32 232, %v7677_v41 }
 0x1e1   : > { %v1582_v50 = vsel %vm10871_vm3, %v1549_v6, %v1480_v17  ;;  %v1619_v4 = vrot.slane %v8089_v19, 7  ;;  %v1551_v42 = vsel %vm10872_vm1, %v7639_v55, %v8016_v25  ;;  %v1901_v11 = vsel %vm8104_vm4, %v1789_v37, 0.0 }
 0x1e2   : > { %v1614_v48 = vrot.slane %v1582_v50, 7  ;;  %v1482_v53 = vpop.permute.xlu0 %1481  ;;  %v930_v55 = vand.u32 15, %v744_v57  ;;  %v11099_v57 = vmov 0  ;;  %vm10883_vm4 = vcmask 146432  }
 0x1e3   : > { %v8101_v38 = vsel %vm10871_vm3, %v1550_v18, %v1482_v53  ;;  %2118 = vrot.lane.b32.xlu0 %v1788_v3, %s7089_s26  ;;  %v8138_v53 = vsel %vm10878_vm6, %v1618_v61, %v1619_v4  ;;  %v755_v3 = vand.u32 15, %v7677_v41 }
 0x1e4   : > { %v1486_v31 = vpop.permute.xlu1 %1485  ;;  %v1615_v54 = vrot.slane %v8101_v38, 7  ;;  %1996 = vrot.lane.b32.xlu1 %v8101_v38, %s7088_s22  ;;  %v1776_v6 = vrot.slane %v8101_v38, 1  ;;  %v8124_v56 = vsel %vm10878_vm6, %v1613_v13, %v1614_v48  ;;  %v1775_v13 = vrot.slane %v1582_v50, 1 }
 0x1e5   : > { %v1585_v28 = vsel %vm10871_vm3, %v1552_v30, %v1486_v31  ;;  %v958_v38 = vand.u32 15, %v748_v63  ;;  %v746_v63 = vadd.s32 216, %v7677_v41  ;;  %vm8162_vm1 = vcmp.ge.s32.totalorder %v755_v3, 1 }
 0x1e6   : > { %v1617_v47 = vrot.slane %v1585_v28, 7  ;;  %v8120_v17 = vsel %vm10878_vm6, %v1614_v48, %v1615_v54  ;;  %v1786_v30 = vsel %vm10875_vm5, %v1775_v13, %v1776_v6  ;;  %v1778_v37 = vrot.slane %v1585_v28, 1 }
 0x1e7   : > { %1994 = vrot.lane.b32.xlu0 %v1582_v50, %s7088_s22  ;;  %vm8174_vm0 = vcmp.le.s32.totalorder %v958_v38, 14  ;;  %v1780_v3 = vrot.slane %v8089_v19, 1 }
 0x1e8   : > { %v1484_v12 = vpop.permute.xlu1 %1483  ;;  %v8134_v18 = vsel %vm10878_vm6, %v1617_v47, %v1618_v61  ;;  %2116 = vrot.lane.b32.xlu1 %v1901_v11, %s7089_s26  ;;  %v1787_v61 = vsel %vm10875_vm5, %v1774_v26, %v1775_v13  ;;  %vm10885_vm5 = vcmask 293888   ;;  %v11104_v13 = vmov 0 }
 0x1e9   : > { %v1584_v48 = vsel %vm10871_vm3, %v1551_v42, %v1484_v12  ;;  %vm8155_vm3 = vcmp.le.s32.totalorder %v930_v55, 14  ;;  %v11101_v42 = vmov 0  ;;  %v11105_v13 = vsel %vm8174_vm0, 4294967295, %v11104_v13 }
 0x1ea   : > { %v1616_v25 = vrot.slane %v1584_v48, 7  ;;  %v11100_v57 = vsel %vm8155_vm3, 4294967295, %v11099_v57  ;;  %v11102_v42 = vsel %vm8162_vm1, 4294967295, %v11101_v42  ;;  %v1777_v11 = vrot.slane %v1584_v48, 1 }
 0x1eb   : > { %2122 = vrot.lane.b32.xlu0 %v1786_v30, %s7089_s26  ;;  %v1903_v26 = vsel %vm8155_vm3, %v1787_v61, 0.0  ;;  %vm11107_vm3 = vmmov %vm11106_vm2 }
 0x1ec   : > { %v8148_v31 = vsel %vm10878_vm6, %v1616_v25, %v1617_v47  ;;  %v8152_v50 = vsel %vm10878_vm6, %v1615_v54, %v1616_v25  ;;  %2000 = vrot.lane.b32.xlu1 %v1585_v28, %s7088_s22  ;;  %v11103_v47 = vrot.slane %v7682_v16, 7  ;;  %v1943_v12 = vpop.permute.xlu0 %1942  ;;  %v1779_v28 = vrot.slane %v8072_v62, 1 }
 0x1ed   : > { %v1784_v38 = vsel %vm11107_vm3, %v1777_v11, %v1778_v37 }
 0x1ee   : > { %v1652_v54 = vsel %vm10878_vm6, %v1619_v4, %v11103_v47  ;;  %vm10884_vm6 = vcmask 441344   ;;  %v1783_v62 = vsel %vm11106_vm2, %v1778_v37, %v1779_v28  ;;  %v944_v4 = vand.u32 15, %v746_v63  ;;  %v1945_v37 = vpop.permute.xlu1 %1944 }
 0x1ef   : > { %1998 = vrot.lane.b32.xlu0 %v1584_v48, %s7088_s22  ;;  %v1717_v55 = vsel %vm8162_vm1, %v1652_v54, 0.0  ;;  %v1907_v61 = vsel %vm8174_vm0, %v1783_v62, 0.0  ;;  %v11108_v63 = vmov 0  ;;  %v750_v54 = vadd.s32 248, %v7677_v41 }
 0x1f0   : > { %2120 = vrot.lane.b32.xlu1 %v1903_v26, %s7089_s26  ;;  %v2167_v48 = vsel %vm10883_vm4, %v1717_v55, %v1943_v12  ;;  %vm8193_vm2 = vcmp.le.s32.totalorder %v944_v4, 14  ;;  %vm11110_vm4 = vmmov %vm11107_vm3  ;;  %v1782_v26 = vsel %vm11107_vm3, %v1779_v28, %v1780_v3  ;;  %v721_v55 = vadd.s32 16, %v7677_v41 }
 0x1f1   : > { %v2071_v25 = vpop.permute.xlu0 %2070  ;;  %v11109_v63 = vsel %vm8193_vm2, 4294967295, %v11108_v63  ;;  %v1785_v47 = vsel %vm11110_vm4, %v1776_v6, %v1777_v11  ;;  %v972_v4 = vand.u32 15, %v750_v54  ;;  %v11111_v28 = vmov 0 }
 0x1f2   : > { %v2200_v30 = vsel %vm10885_vm5, %v2167_v48, %v2071_v25  ;;  %v1905_v62 = vsel %vm8193_vm2, %v1785_v47, 0.0  ;;  %v769_v6 = vand.u32 15, %v721_v55  ;;  %v11114_v11 = vrot.slane %v7682_v16, 1 }
 0x1f3   : > { %6740 = vmatprep.mubr.msk.f32.mxu0 %vm10884_vm6, %v2200_v30  ;;  %2126 = vrot.lane.b32.xlu0 %v1784_v38, %s7089_s26  ;;  %vm8211_vm4 = vcmp.le.s32.totalorder %v972_v4, 14  ;;  %v11115_v47 = vmov 0  ;;  %v723_v54 = vadd.s32 32, %v7677_v41  ;;  %vm11118_vm5 = vcmask 146432  }
 0x1f4   : > { %2128 = vrot.lane.b32.xlu1 %v1907_v61, %s7089_s26  ;;  %v11112_v28 = vsel %vm8211_vm4, 4294967295, %v11111_v28  ;;  %v1813_v30 = vsel %vm11107_vm3, %v1780_v3, %v11114_v11  ;;  %vm8219_vm6 = vcmp.ge.s32.totalorder %v769_v6, 1  ;;  %v2168_v3 = vsel %vm11118_vm5, %v7703_v39, %v1945_v37  ;;  %vm11119_vm3 = vmmov %vm11118_vm5 }
 0x1f5   : > { %v1947_v12 = vpop.permute.xlu0 %1946  ;;  %11113 = vst [vmem:[#allocation46_spill] sm:$0xff] %v11112_v28  ;;  %v11116_v47 = vsel %vm8219_vm6, 4294967295, %v11115_v47  ;;  %v783_v4 = vand.u32 15, %v723_v54  ;;  %vm11120_vm2 = vcmask 293888   ;;  %vm11122_vm0 = vcmask 441344  }
 0x1f6   : > { %v1949_v25 = vpop.permute.xlu1 %1948  ;;  %11117 = vst [vmem:[#allocation47_spill] sm:$0xff] %v11116_v47  ;;  %vm11123_vm5 = vmmov %vm11122_vm0  ;;  %v11124_v37 = vmov 0 }
 0x1f7   : > { %2130 = vrot.lane.b32.xlu0 %v1782_v26, %s7089_s26  ;;  %v1719_v26 = vsel %vm8219_vm6, %v7714_v35, 0.0  ;;  %vm8243_vm6 = vcmp.ge.s32.totalorder %v783_v4, 1  ;;  %v11130_v4 = vld [vmem:[#allocation5_spill] sm:$0xff] }
 0x1f8   : > { %2124 = vrot.lane.b32.xlu1 %v1905_v62, %s7089_s26  ;;  %v2169_v62 = vsel %vm11119_vm3, %v1719_v26, %v1947_v12  ;;  %v11125_v37 = vsel %vm8243_vm6, 4294967295, %v11124_v37  ;;  %v725_v12 = vadd.s32 48, %v7677_v41  ;;  %v1721_v54 = vsel %vm8243_vm6, %v7740_v8, 0.0 }
 0x1f9   : > { %v2075_v48 = vpop.permute.xlu0 %2074  ;;  %11126 = vst [vmem:[#allocation48_spill] sm:$0xff] %v11125_v37 }
 0x1fa   : > { %v797_v26 = vand.u32 15, %v725_v12  ;;  %v11137_v12 = vld [vmem:[#allocation36_spill] sm:$0xff] }
 0x1fb   : > { %2640 = vrot.lane.b32.xlu0 %v7269_v59, %s7090_s27 }
 0x1fc   : > { %2004 = vrot.lane.b32.xlu1 %v8089_v19, %s7088_s22  ;;  %v1909_v19 = vsel %vm8211_vm4, %v1813_v30, 0.0  ;;  %vm11121_vm4 = vmmov %vm11120_vm2  ;;  %vm8266_vm6 = vcmp.ge.s32.totalorder %v797_v26, 1 }
 0x1fd   : > { %v1951_v38 = vpop.permute.xlu0 %1950  ;;  %v2202_v11 = vsel %vm11121_vm4, %v2169_v62, %v2075_v48 }
 0x1fe   : > { %v1953_v61 = vpop.permute.xlu1 %1952 }
 0x1ff   : > { %2644 = vrot.lane.b32.xlu0 %v7287_v1, %s7090_s27 }
 0x200   : > { %2132 = vrot.lane.b32.xlu1 %v1909_v19, %s7089_s26 }
 0x201   : > { %v2079_v16 = vpop.permute.xlu0 %2078 }
 0x202   : > { %v2073_v55 = vpop.permute.xlu1 %2072 }
 0x203   : > { %v2201_v6 = vsel %vm11120_vm2, %v2168_v3, %v2073_v55  ;;  %2648 = vrot.lane.b32.xlu0 %v7305_v7, %s7090_s27  ;;  %vm11127_vm2 = vmmov %vm11119_vm3 }
 0x204   : > { %2642 = vrot.lane.b32.xlu1 %v7267_v58, %s7090_s27  ;;  %6741 = vmatmul.mubr.msk.f32.vlgmr.msra.gmra.mrb[32].mxu0 %vm11122_vm0, %v2201_v6  ;;  %v2170_v30 = vsel %vm11127_vm2, %v7721_v2, %v1949_v25  ;;  %vm11128_vm0 = vmmov %vm11127_vm2  ;;  %v11132_v25 = vmov 0  ;;  %v11135_v6 = vld [vmem:[#allocation14_spill] sm:$0xff] }
 0x205   : > { %v1955_v39 = vpop.permute.xlu0 %1954  ;;  %6743 = vmatprep.mubr.msk.f32.mxu0 %vm11123_vm5, %v2202_v11  ;;  %v2171_v3 = vsel %vm11128_vm0, %v1721_v54, %v1951_v38  ;;  %vm11129_vm3 = vmmov %vm11121_vm4  ;;  %v11133_v25 = vsel %vm8266_vm6, 4294967295, %v11132_v25  ;;  %v727_v38 = vadd.s32 64, %v7677_v41  ;;  %v1723_v54 = vsel %vm8266_vm6, %v7771_v27, 0.0 }
 0x206   : > { %v1957_v35 = vpop.permute.xlu1 %1956  ;;  %v2204_v62 = vsel %vm11129_vm3, %v2171_v3, %v2079_v16  ;;  %vm11131_vm2 = vmmov %vm11123_vm5  ;;  %11134 = vst [vmem:[#allocation49_spill] sm:$0xff] %v11133_v25  ;;  %v11136_v16 = vld [vmem:[#allocation9_spill] sm:$0xff] }
 0x207   : > { %2638 = vrot.lane.b32.xlu0 %v7251_v52, %s7090_s27  ;;  %v811_v26 = vand.u32 15, %v727_v38  ;;  %v11146_v38 = vld [vmem:[#allocation18_spill] sm:$0xff] }
 0x208   : > { %2646 = vrot.lane.b32.xlu1 %v7285_v0, %s7090_s27 }
 0x209   : > { %v2083_v48 = vpop.permute.xlu0 %2082  ;;  %vm8289_vm6 = vcmp.ge.s32.totalorder %v811_v26, 1 }
 0x20a   : > { %v2077_v19 = vpop.permute.xlu1 %2076 }
 0x20b   : > { %v2203_v55 = vsel %vm11121_vm4, %v2170_v30, %v2077_v19  ;;  %2652 = vrot.lane.b32.xlu0 %v7327_v15, %s7090_s27  ;;  %v2172_v30 = vsel %vm11128_vm0, %v11137_v12, %v1953_v61  ;;  %vm11138_vm4 = vmmov %vm11128_vm0  ;;  %v11143_v12 = vmov 0 }
 0x20c   : > { %2636 = vrot.lane.b32.xlu1 %v11130_v4, %s7090_s27  ;;  %6744 = vmatmul.mubr.msk.f32.gmra.mrb[34].mxu0 %vm11123_vm5, %v2203_v55  ;;  %v2173_v3 = vsel %vm11138_vm4, %v1723_v54, %v1955_v39  ;;  %vm11140_vm5 = vmmov %vm11129_vm3  ;;  %v11144_v12 = vsel %vm8289_vm6, 4294967295, %v11143_v12  ;;  %v729_v39 = vadd.s32 80, %v7677_v41  ;;  %v2174_v54 = vsel %vm11138_vm4, %v7780_v14, %v1957_v35 }
 0x20d   : > { %v1959_v2 = vpop.permute.xlu0 %1958  ;;  %6746 = vmatprep.mubr.msk.f32.mxu0 %vm11131_vm2, %v2204_v62  ;;  %v11139_v62 = vld [vmem:[#allocation16_spill] sm:$0xff]  ;;  %vm11142_vm0 = vmmov %vm11131_vm2  ;;  %11145 = vst [vmem:[#allocation36_spill] sm:$0xff] %v11144_v12 }
 0x20e   : > { %v1961_v8 = vpop.permute.xlu1 %1960  ;;  %v825_v26 = vand.u32 15, %v729_v39  ;;  %v731_v39 = vadd.s32 96, %v7677_v41  ;;  %v2796_v12 = vld [vmem:[#allocation2] sm:$0xff] }
 0x20f   : > { %2656 = vrot.lane.b32.xlu0 %v11135_v6, %s7090_s27  ;;  %v2206_v6 = vsel %vm11140_vm5, %v2173_v3, %v2083_v48  ;;  %v11147_v48 = vld [vmem:[#allocation13_spill] sm:$0xff] }
 0x210   : > { %2650 = vrot.lane.b32.xlu1 %v11136_v16, %s7090_s27  ;;  %v11141_v16 = vld [vmem:[#allocation11_spill] sm:$0xff] }
 0x211   : > { %v2087_v11 = vpop.permute.xlu0 %2086 }
 0x212   : > { %v2081_v19 = vpop.permute.xlu1 %2080 }
 0x213   : > { %v2205_v55 = vsel %vm11129_vm3, %v2172_v30, %v2081_v19  ;;  %2660 = vrot.lane.b32.xlu0 %v11139_v62, %s7090_s27  ;;  %vm11148_vm3 = vmmov %vm11138_vm4  ;;  %v11149_v62 = vld [vmem:[#allocation20_spill] sm:$0xff] }
 0x214   : > { %2654 = vrot.lane.b32.xlu1 %v11141_v16, %s7090_s27  ;;  %6747 = vmatmul.mubr.msk.f32.gmra.mrb[36].mxu0 %vm11131_vm2, %v2205_v55  ;;  %vm11150_vm2 = vmmov %vm11140_vm5 }
 0x215   : > { %v1963_v61 = vpop.permute.xlu0 %1962  ;;  %6749 = vmatprep.mubr.msk.f32.mxu0 %vm11142_vm0, %v2206_v6  ;;  %v1725_v6 = vsel %vm8289_vm6, %v7802_v51, 0.0  ;;  %vm11152_vm4 = vmmov %vm11142_vm0  ;;  %v733_v51 = vadd.s32 112, %v7677_v41  ;;  %vm11164_vm6 = vcmask 441344  }
 0x216   : > { %v1965_v27 = vpop.permute.xlu1 %1964  ;;  %v2175_v3 = vsel %vm11148_vm3, %v1725_v6, %v1959_v2  ;;  %vm8313_vm3 = vcmp.ge.s32.totalorder %v825_v26, 1  ;;  %v11153_v2 = vmov 0 }
 0x217   : > { %2664 = vrot.lane.b32.xlu0 %v11146_v38, %s7090_s27  ;;  %v2208_v38 = vsel %vm11150_vm2, %v2175_v3, %v2087_v11  ;;  %v11154_v2 = vsel %vm8313_vm3, 4294967295, %v11153_v2  ;;  %v11157_v11 = vld [vmem:[#allocation17_spill] sm:$0xff]  ;;  %v1727_v3 = vsel %vm8313_vm3, %v7834_v46, 0.0  ;;  %vm11168_vm3 = vmmov %vm11164_vm6 }
 0x218   : > { %2658 = vrot.lane.b32.xlu1 %v11147_v48, %s7090_s27  ;;  %v11151_v48 = vld [vmem:[#allocation15_spill] sm:$0xff]  ;;  %11155 = vst [vmem:[#allocation50_spill] sm:$0xff] %v11154_v2 }
 0x219   : > { %v2091_v30 = vpop.permute.xlu0 %2090 }
 0x21a   : > { %v2085_v19 = vpop.permute.xlu1 %2084 }
 0x21b   : > { %v2207_v55 = vsel %vm11140_vm5, %v2174_v54, %v2085_v19  ;;  %2668 = vrot.lane.b32.xlu0 %v11149_v62, %s7090_s27  ;;  %v11156_v54 = vld [vmem:[#allocation22_spill] sm:$0xff]  ;;  %v853_v19 = vand.u32 15, %v733_v51  ;;  %vm11158_vm5 = vcmask 146432   ;;  %v839_v62 = vand.u32 15, %v731_v39  ;;  %v11163_v51 = vld [vmem:[#allocation19_spill] sm:$0xff] }
 0x21c   : > { %2662 = vrot.lane.b32.xlu1 %v11151_v48, %s7090_s27  ;;  %6750 = vmatmul.mubr.msk.f32.gmra.mrb[38].mxu0 %vm11142_vm0, %v2207_v55  ;;  %vm11159_vm2 = vmmov %vm11158_vm5  ;;  %vm11160_vm0 = vcmask 293888   ;;  %v11172_v39 = vld [vmem:[#allocation26_spill] sm:$0xff] }
 0x21d   : > { %v1967_v14 = vpop.permute.xlu0 %1966  ;;  %6752 = vmatprep.mubr.msk.f32.mxu0 %vm11152_vm4, %v2208_v38  ;;  %v2176_v38 = vsel %vm11158_vm5, %v7811_v29, %v1961_v8  ;;  %v2177_v55 = vsel %vm11159_vm2, %v1727_v3, %v1963_v61  ;;  %vm11162_vm4 = vmmov %vm11160_vm0  ;;  %vm8335_vm5 = vcmp.ge.s32.totalorder %v853_v19, 1  ;;  %v11165_v29 = vmov 0 }
 0x21e   : > { %v1969_v35 = vpop.permute.xlu1 %1968  ;;  %v11166_v29 = vsel %vm8335_vm5, 4294967295, %v11165_v29  ;;  %vm8340_vm2 = vcmp.ge.s32.totalorder %v839_v62, 1  ;;  %v11169_v61 = vmov 0  ;;  %vm11177_vm1 = vmmov %vm11160_vm0 }
 0x21f   : > { %2672 = vrot.lane.b32.xlu0 %v11156_v54, %s7090_s27  ;;  %v11161_v54 = vld [vmem:[#allocation24_spill] sm:$0xff]  ;;  %11167 = vst [vmem:[#allocation51_spill] sm:$0xff] %v11166_v29  ;;  %v11170_v61 = vsel %vm8340_vm2, 4294967295, %v11169_v61  ;;  %v1729_v62 = vsel %vm8340_vm2, %v7866_v21, 0.0 }
 0x220   : > { %2666 = vrot.lane.b32.xlu1 %v11157_v11, %s7090_s27  ;;  %v2210_v11 = vsel %vm11162_vm4, %v2177_v55, %v2091_v30  ;;  %11171 = vst [vmem:[#allocation52_spill] sm:$0xff] %v11170_v61  ;;  %v1731_v30 = vsel %vm8335_vm5, %v7898_v60, 0.0  ;;  %v11178_v29 = vld [vmem:[#allocation28_spill] sm:$0xff]  ;;  %vm11179_vm5 = vcmask 441344  }
 0x221   : > { %v2095_v6 = vpop.permute.xlu0 %2094 }
 0x222   : > { %v2089_v26 = vpop.permute.xlu1 %2088 }
 0x223   : > { %v2209_v48 = vsel %vm11160_vm0, %v2176_v38, %v2089_v26  ;;  %2676 = vrot.lane.b32.xlu0 %v11161_v54, %s7090_s27 }
 0x224   : > { %2670 = vrot.lane.b32.xlu1 %v11163_v51, %s7090_s27  ;;  %6753 = vmatmul.mubr.msk.f32.gmra.mrb[40].mxu0 %vm11164_vm6, %v2209_v48  ;;  %v11173_v48 = vld [vmem:[#allocation21_spill] sm:$0xff]  ;;  %vm11174_vm6 = vcmask 146432  }
 0x225   : > { %v1971_v46 = vpop.permute.xlu0 %1970  ;;  %6755 = vmatprep.mubr.msk.f32.mxu0 %vm11168_vm3, %v2210_v11  ;;  %vm11175_vm3 = vmmov %vm11174_vm6  ;;  %v2797_v51 = vld [vmem:[#allocation2 + $0x8] sm:$0xff] }
 0x226   : > { %v1973_v8 = vpop.permute.xlu1 %1972  ;;  %v2181_v19 = vsel %vm11174_vm6, %v1731_v30, %v1971_v46  ;;  %v2178_v11 = vsel %vm11175_vm3, %v7843_v32, %v1965_v27  ;;  %vm11176_vm4 = vmmov %vm11175_vm3  ;;  %v11181_v32 = vld [vmem:[#allocation23_spill] sm:$0xff]  ;;  %v11184_v30 = vld [vmem:[#allocation30_spill] sm:$0xff] }
 0x227   : > { %2680 = vrot.lane.b32.xlu0 %v11172_v39, %s7090_s27  ;;  %v2179_v55 = vsel %vm11176_vm4, %v1729_v62, %v1967_v14  ;;  %vm11180_vm6 = vmmov %vm11160_vm0  ;;  %v735_v14 = vadd.s32 128, %v7677_v41 }
 0x228   : > { %2674 = vrot.lane.b32.xlu1 %v11173_v48, %s7090_s27  ;;  %v2212_v46 = vsel %vm11180_vm6, %v2179_v55, %v2095_v6  ;;  %vm11182_vm3 = vmmov %vm11179_vm5  ;;  %v11189_v55 = vld [vmem:[#allocation27_spill] sm:$0xff] }
 0x229   : > { %v2099_v38 = vpop.permute.xlu0 %2098  ;;  %vm11183_vm2 = vmmov %vm11182_vm3  ;;  %v867_v62 = vand.u32 15, %v735_v14  ;;  %v11194_v14 = vld [vmem:[#allocation29_spill] sm:$0xff] }
 0x22a   : > { %v2093_v3 = vpop.permute.xlu1 %2092  ;;  %v2214_v26 = vsel %vm11160_vm0, %v2181_v19, %v2099_v38  ;;  %v11185_v19 = vld [vmem:[#allocation25_spill] sm:$0xff] }
 0x22b   : > { %v2211_v60 = vsel %vm11177_vm1, %v2178_v11, %v2093_v3  ;;  %2684 = vrot.lane.b32.xlu0 %v11178_v29, %s7090_s27  ;;  %6761 = vmatprep.mubr.msk.f32.mxu1 %vm11179_vm5, %v2214_v26  ;;  %vm11186_vm1 = vmmov %vm11176_vm4  ;;  %v11188_v26 = vld [vmem:[#allocation32_spill] sm:$0xff] }
 0x22c   : > { %2678 = vrot.lane.b32.xlu1 %v11181_v32, %s7090_s27  ;;  %6756 = vmatmul.mubr.msk.f32.gmra.mrb[42].mxu0 %vm11182_vm3, %v2211_v60  ;;  %v2180_v6 = vsel %vm11186_vm1, %v7875_v34, %v1969_v35  ;;  %vm11187_vm5 = vmmov %vm11160_vm0  ;;  %vm8381_vm0 = vcmp.ge.s32.totalorder %v867_v62, 1  ;;  %v737_v34 = vadd.s32 144, %v7677_v41  ;;  %v11193_v35 = vld [vmem:[#allocation34_spill] sm:$0xff] }
 0x22d   : > { %v1975_v21 = vpop.permute.xlu0 %1974  ;;  %6758 = vmatprep.mubr.msk.f32.mxu0 %vm11183_vm2, %v2212_v46  ;;  %vm11195_vm4 = vmmov %vm11186_vm1 }
 0x22e   : > { %v1977_v27 = vpop.permute.xlu1 %1976  ;;  %vm11196_vm6 = vmmov %vm11186_vm1 }
 0x22f   : > { %2688 = vrot.lane.b32.xlu0 %v11184_v30, %s7090_s27  ;;  %v11190_v30 = vmov 0  ;;  %vm11197_vm3 = vmmov %vm11187_vm5 }
 0x230   : > { %2682 = vrot.lane.b32.xlu1 %v11185_v19, %s7090_s27  ;;  %v11191_v30 = vsel %vm8381_vm0, 4294967295, %v11190_v30  ;;  %vm11198_vm1 = vmmov %vm11197_vm3 }
 0x231   : > { %v2103_v38 = vpop.permute.xlu0 %2102  ;;  %11192 = vst [vmem:[#allocation53_spill] sm:$0xff] %v11191_v30  ;;  %v11201_v30 = vmov 0 }
 0x232   : > { %v2097_v11 = vpop.permute.xlu1 %2096 }
 0x233   : > { %v2213_v3 = vsel %vm11187_vm5, %v2180_v6, %v2097_v11  ;;  %2692 = vrot.lane.b32.xlu0 %v11188_v26, %s7090_s27  ;;  %v2182_v11 = vsel %vm11195_vm4, %v7907_v22, %v1973_v8  ;;  %vm11200_vm5 = vmmov %vm11183_vm2 }
 0x234   : > { %2686 = vrot.lane.b32.xlu1 %v11189_v55, %s7090_s27  ;;  %6759 = vmatmul.mubr.msk.f32.gmra.mrb[44].mxu0 %vm11183_vm2, %v2213_v3  ;;  %v1733_v3 = vsel %vm8381_vm0, %v7930_v43, 0.0  ;;  %v881_v55 = vand.u32 15, %v737_v34  ;;  %v739_v43 = vadd.s32 160, %v7677_v41  ;;  %vm11207_vm0 = vmmov %vm11183_vm2 }
 0x235   : > { %v1979_v60 = vpop.permute.xlu0 %1978  ;;  %v2183_v26 = vsel %vm11196_vm6, %v1733_v3, %v1975_v21  ;;  %v11204_v21 = vld [vmem:[#allocation33_spill] sm:$0xff] }
 0x236   : > { %v1981_v46 = vpop.permute.xlu1 %1980  ;;  %v2216_v29 = vsel %vm11198_vm1, %v2183_v26, %v2103_v38  ;;  %vm8402_vm4 = vcmp.ge.s32.totalorder %v881_v55, 1  ;;  %v2184_v38 = vsel %vm11196_vm6, %v7939_v5, %v1977_v27  ;;  %v895_v55 = vand.u32 15, %v739_v43 }
 0x237   : > { %2696 = vrot.lane.b32.xlu0 %v11193_v35, %s7090_s27  ;;  %v11199_v35 = vld [vmem:[#allocation31_spill] sm:$0xff]  ;;  %v11202_v30 = vsel %vm8402_vm4, 4294967295, %v11201_v30  ;;  %v11208_v5 = vmov 0 }
 0x238   : > { %2690 = vrot.lane.b32.xlu1 %v11194_v14, %s7090_s27  ;;  %11203 = vst [vmem:[#allocation54_spill] sm:$0xff] %v11202_v30  ;;  %vm8419_vm15 = vcmp.ge.s32.totalorder %v895_v55, 1  ;;  %v11211_v30 = vld [vmem:[#allocation44_spill] sm:$0xff] }
 0x239   : > { %v2107_v6 = vpop.permute.xlu0 %2106  ;;  %v11209_v5 = vsel %vm8419_vm15, 4294967295, %v11208_v5 }
 0x23a   : > { %v2101_v62 = vpop.permute.xlu1 %2100  ;;  %11210 = vst [vmem:[#allocation55_spill] sm:$0xff] %v11209_v5 }
 0x23b   : > { %v2215_v19 = vsel %vm11197_vm3, %v2182_v11, %v2101_v62  ;;  %vm11205_vm3 = vmmov %vm11196_vm6 }
 0x23c   : > { %2694 = vrot.lane.b32.xlu1 %v11199_v35, %s7090_s27  ;;  %6762 = vmatmul.mubr.msk.f32.vlgmr.msra.gmra.mrb[0].mxu1 %vm11200_vm5, %v2215_v19  ;;  %v1735_v19 = vsel %vm8402_vm4, %v7962_v33, 0.0  ;;  %vm11206_vm5 = vmmov %vm11198_vm1  ;;  %v741_v33 = vadd.s32 176, %v7677_v41 }
 0x23d   : > { %6764 = vmatprep.mubr.msk.f32.mxu1 %vm11183_vm2, %v2216_v29  ;;  %v1983_v22 = vpop.permute.xlu0 %1982  ;;  %v2185_v26 = vsel %vm11205_vm3, %v1735_v19, %v1979_v60  ;;  %vm11212_vm6 = vmmov %vm11205_vm3 }
 0x23e   : > { %v1985_v8 = vpop.permute.xlu1 %1984  ;;  %v2218_v3 = vsel %vm11206_vm5, %v2185_v26, %v2107_v6  ;;  %v2186_v60 = vsel %vm11212_vm6, %v11211_v30, %v1981_v46  ;;  %v1737_v6 = vsel %vm8419_vm15, %v7992_v9, 0.0  ;;  %v909_v19 = vand.u32 15, %v741_v33  ;;  %vm11215_vm5 = vmmov %vm11183_vm2 }
 0x23f   : > { %v11216_v30 = vmov 0  ;;  %v743_v9 = vadd.s32 192, %v7677_v41  ;;  %vm11219_vm6 = vmmov %vm11205_vm3 }
 0x240   : > { %2698 = vrot.lane.b32.xlu1 %v11204_v21, %s7090_s27  ;;  %vm8434_vm4 = vcmp.ge.s32.totalorder %v909_v19, 1 }
 0x241   : > { %v2111_v34 = vpop.permute.xlu0 %2110  ;;  %v11217_v30 = vsel %vm8434_vm4, 4294967295, %v11216_v30 }
 0x242   : > { %v2105_v29 = vpop.permute.xlu1 %2104  ;;  %11218 = vst [vmem:[#allocation44_spill] sm:$0xff] %v11217_v30 }
 0x243   : > { %v2217_v11 = vsel %vm11198_vm1, %v2184_v38, %v2105_v29  ;;  %v2187_v38 = vsel %vm11205_vm3, %v1737_v6, %v1983_v22  ;;  %v2188_v22 = vsel %vm11219_vm6, %v8001_v20, %v1985_v8  ;;  %v11222_v20 = vmov 0  ;;  %vm11225_vm6 = vmmov %vm11205_vm3 }
 0x244   : > { %6765 = vmatmul.mubr.msk.f32.gmra.mrb[2].mxu1 %vm11183_vm2, %v2217_v11 }
 0x245   : > { %6767 = vmatprep.mubr.msk.f32.mxu1 %vm11207_vm0, %v2218_v3  ;;  %v1987_v62 = vpop.permute.xlu0 %1986  ;;  %vm11213_vm0 = vmmov %vm11198_vm1 }
 0x246   : > { %v1989_v21 = vpop.permute.xlu1 %1988  ;;  %vm11214_vm1 = vmmov %vm11213_vm0 }
 0x247   : > { %v2220_v26 = vsel %vm11214_vm1, %v2187_v38, %v2111_v34  ;;  %v1739_v34 = vsel %vm8434_vm4, %v8026_v24, 0.0  ;;  %vm11220_vm1 = vmmov %vm11213_vm0  ;;  %v745_v24 = vadd.s32 208, %v7677_v41 }
 0x248   : > { %v2189_v33 = vsel %vm11205_vm3, %v1739_v34, %v1987_v62  ;;  %v2190_v62 = vsel %vm11225_vm6, %v8038_v45, %v1989_v21  ;;  %v2830_v45 = vld [vmem:[#allocation2 + $0x110] sm:$0xff]  ;;  %v747_v21 = vadd.s32 224, %v7677_v41  ;;  %vm11243_vm4 = vmmov %vm11183_vm2 }
 0x249   : > { %v2115_v27 = vpop.permute.xlu0 %2114  ;;  %3052 = vrot.lane.b32.xlu0 %v2830_v45, %s7086_s23 }
 0x24a   : > { %v2109_v43 = vpop.permute.xlu1 %2108 }
 0x24b   : > { %v2219_v29 = vsel %vm11213_vm0, %v2186_v60, %v2109_v43  ;;  %v923_v60 = vand.u32 15, %v743_v9  ;;  %v2222_v43 = vsel %vm11220_vm1, %v2189_v33, %v2115_v27  ;;  %v937_v9 = vand.u32 15, %v745_v24  ;;  %vm11226_vm1 = vmmov %vm11213_vm0  ;;  %v2831_v33 = vld [vmem:[#allocation2 + $0x118] sm:$0xff] }
 0x24c   : > { %6768 = vmatmul.mubr.msk.f32.gmra.mrb[4].mxu1 %vm11215_vm5, %v2219_v29  ;;  %vm11221_vm5 = vmmov %vm11183_vm2  ;;  %3054 = vrot.lane.b32.xlu1 %v2831_v33, %s7086_s23  ;;  %v749_v24 = vadd.s32 240, %v7677_v41 }
 0x24d   : > { %6770 = vmatprep.mubr.msk.f32.mxu1 %vm11183_vm2, %v2220_v26  ;;  %v1991_v55 = vpop.permute.xlu0 %1990  ;;  %vm8449_vm15 = vcmp.ge.s32.totalorder %v923_v60, 1  ;;  %vm8465_vm6 = vcmp.ge.s32.totalorder %v937_v9, 1  ;;  %vm11248_vm14 = vmmov %vm11226_vm1 }
 0x24e   : > { %v1993_v11 = vpop.permute.xlu1 %1992  ;;  %v11223_v20 = vsel %vm8449_vm15, 4294967295, %v11222_v20  ;;  %v1741_v27 = vsel %vm8449_vm15, %v8057_v23, 0.0  ;;  %v11228_v23 = vmov 0  ;;  %vm11233_vm15 = vmmov %vm11183_vm2 }
 0x24f   : > { %11224 = vst [vmem:[#allocation56_spill] sm:$0xff] %v11223_v20  ;;  %v2191_v26 = vsel %vm11205_vm3, %v1741_v27, %v1991_v55  ;;  %v11229_v23 = vsel %vm8465_vm6, 4294967295, %v11228_v23  ;;  %v951_v27 = vand.u32 15, %v747_v21 }
 0x250   : > { %11230 = vst [vmem:[#allocation57_spill] sm:$0xff] %v11229_v23 }
 0x251   : > { %v2003_v46 = vpop.permute.xlu0 %2002 }
 0x252   : > { %v2113_v3 = vpop.permute.xlu1 %2112 }
 0x253   : > { %v2221_v6 = vsel %vm11213_vm0, %v2188_v22, %v2113_v3 }
 0x254   : > { %6771 = vmatmul.mubr.msk.f32.gmra.mrb[6].mxu1 %vm11221_vm5, %v2221_v6  ;;  %vm11227_vm5 = vmmov %vm11183_vm2  ;;  %v2192_v6 = vsel %vm11205_vm3, %v8077_v44, %v1993_v11  ;;  %v965_v44 = vand.u32 15, %v749_v24  ;;  %v11234_v11 = vmov 0 }
 0x255   : > { %6773 = vmatprep.mubr.msk.f32.mxu1 %vm11183_vm2, %v2222_v43  ;;  %v2119_v38 = vpop.permute.xlu0 %2118  ;;  %v1743_v43 = vsel %vm8465_vm6, %v8124_v56, 0.0 }
 0x256   : > { %v1997_v19 = vpop.permute.xlu1 %1996  ;;  %v2224_v34 = vsel %vm11226_vm1, %v2191_v26, %v2119_v38 }
 0x259   : > { %v1995_v8 = vpop.permute.xlu0 %1994 }
 0x25a   : > { %v2117_v29 = vpop.permute.xlu1 %2116 }
 0x25b   : > { %v2223_v22 = vsel %vm11213_vm0, %v2190_v62, %v2117_v29  ;;  %vm11231_vm0 = vmmov %vm11205_vm3  ;;  %vm8482_vm3 = vcmp.ge.s32.totalorder %v951_v27, 1 }
 0x25c   : > { %6774 = vmatmul.mubr.msk.f32.gmra.mrb[8].mxu1 %vm11227_vm5, %v2223_v22  ;;  %v2193_v62 = vsel %vm11231_vm0, %v1743_v43, %v1995_v8  ;;  %vm11232_vm5 = vmmov %vm11226_vm1  ;;  %v11235_v11 = vsel %vm8482_vm3, 4294967295, %v11234_v11  ;;  %v1745_v8 = vsel %vm8482_vm3, %v8152_v50, 0.0 }
 0x25d   : > { %6776 = vmatprep.mubr.msk.f32.mxu1 %vm11183_vm2, %v2224_v34  ;;  %v2123_v3 = vpop.permute.xlu0 %2122  ;;  %11236 = vst [vmem:[#allocation58_spill] sm:$0xff] %v11235_v11  ;;  %vm11237_vm6 = vmmov %vm11231_vm0  ;;  %vm8491_vm0 = vcmp.ge.s32.totalorder %v965_v44, 1 }
 0x25e   : > { %v2001_v60 = vpop.permute.xlu1 %2000  ;;  %v2226_v26 = vsel %vm11232_vm5, %v2193_v62, %v2123_v3  ;;  %v2194_v22 = vsel %vm11237_vm6, %v8120_v17, %v1997_v19  ;;  %v11238_v3 = vmov 0  ;;  %vm11242_vm5 = vmmov %vm11226_vm1  ;;  %v1747_v17 = vsel %vm8491_vm0, %v8134_v18, 0.0 }
 0x25f   : > { %v11239_v3 = vsel %vm8491_vm0, 4294967295, %v11238_v3  ;;  %v2196_v50 = vsel %vm11237_vm6, %v8148_v31, %v2001_v60  ;;  %vm11244_vm3 = vmmov %vm11237_vm6 }
 0x260   : > { %11240 = vst [vmem:[#allocation59_spill] sm:$0xff] %v11239_v3  ;;  %v2197_v43 = vsel %vm11244_vm3, %v1747_v17, %v2003_v46  ;;  %vm11249_vm0 = vmmov %vm11183_vm2 }
 0x261   : > { %v1999_v55 = vpop.permute.xlu0 %1998 }
 0x262   : > { %v2121_v38 = vpop.permute.xlu1 %2120 }
 0x263   : > { %v2225_v29 = vsel %vm11226_vm1, %v2192_v6, %v2121_v38 }
 0x264   : > { %6777 = vmatmul.mubr.msk.f32.gmra.mrb[10].mxu1 %vm11183_vm2, %v2225_v29  ;;  %v8517_v29 = vld [vmem:[%s10797_s4] ss:$0 sm:$0xff] }
 0x265   : > { %6779 = vmatprep.mubr.msk.f32.mxu1 %vm11233_vm15, %v2226_v26  ;;  %v2127_v56 = vpop.permute.xlu0 %2126  ;;  %vm11241_vm15 = vmmov %vm11237_vm6 }
 0x266   : > { %v2129_v9 = vpop.permute.xlu1 %2128  ;;  %v2195_v33 = vsel %vm11241_vm15, %v1745_v8, %v1999_v55  ;;  %vm11245_vm15 = vmmov %vm11226_vm1 }
 0x267   : > { %v2228_v21 = vsel %vm11242_vm5, %v2195_v33, %v2127_v56  ;;  %v2229_v55 = vsel %vm11245_vm15, %v2196_v50, %v2129_v9  ;;  %vm11246_vm5 = vmmov %vm11183_vm2 }
 0x269   : > { %v2131_v6 = vpop.permute.xlu0 %2130 }
 0x26a   : > { %v2125_v34 = vpop.permute.xlu1 %2124  ;;  %v2230_v38 = vsel %vm11226_vm1, %v2197_v43, %v2131_v6 }
 0x26b   : > { %v2227_v45 = vsel %vm11226_vm1, %v2194_v22, %v2125_v34 }
 0x26c   : > { %6780 = vmatmul.mubr.msk.f32.gmra.mrb[12].mxu1 %vm11183_vm2, %v2227_v45 }
 0x26d   : > { %6782 = vmatprep.mubr.msk.f32.mxu1 %vm11243_vm4, %v2228_v21  ;;  %vm11247_vm4 = vmmov %vm11244_vm3  ;;  %v2641_v31 = vpop.permute.xlu0 %2640 }
 0x26e   : > { %v2005_v19 = vpop.permute.xlu1 %2004 }
 0x26f   : > { %v2198_v24 = vsel %vm11247_vm4, %v8138_v53, %v2005_v19 }
 0x270   : > { %6783 = vmatmul.mubr.msk.f32.gmra.mrb[14].mxu1 %vm11246_vm5, %v2229_v55 }
 0x271   : > { %6785 = vmatprep.mubr.msk.f32.mxu1 %vm11183_vm2, %v2230_v38  ;;  %v2645_v60 = vpop.permute.xlu0 %2644 }
 0x272   : > { %v2133_v62 = vpop.permute.xlu1 %2132 }
 0x273   : > { %v2231_v18 = vsel %vm11248_vm14, %v2198_v24, %v2133_v62  ;;  %vm11250_vm14 = vcmask 48128  }
 0x274   : > { %6786 = vmatmul.mubr.msk.f32.gmra.mrb[16].mxu1 %vm11249_vm0, %v2231_v18  ;;  %vm11251_vm3 = vmmov %vm11250_vm14 }
 0x275   : > { %v2649_v46 = vpop.permute.xlu0 %2648  ;;  %vm11252_vm0 = vmmov %vm11251_vm3 }
 0x276   : > { %v2643_v27 = vpop.permute.xlu1 %2642  ;;  %vm11253_vm6 = vmmov %vm11252_vm0 }
 0x277   : > { %vm11254_vm15 = vmmov %vm11252_vm0 }
 0x278   : > { %vm11255_vm1 = vmmov %vm11252_vm0 }
 0x279   : > { %v2639_v8 = vpop.permute.xlu0 %2638  ;;  %vm11256_vm5 = vmmov %vm11252_vm0 }
 0x27a   : > { %v2647_v26 = vpop.permute.xlu1 %2646  ;;  %vm11257_vm2 = vmmov %vm11252_vm0 }
 0x27b   : > { %vm11258_vm4 = vmmov %vm11252_vm0 }
 0x27e   : > { %v2637_v33 = vpop.permute.xlu1 %2636 }
 0x2d7   : > { %v6742_v9 = vpop.f32.mrb[32].mxu0 }
 0x2d8   : > { %v2419_v44 = vadd.f32 %v6742_v9, %v8517_v29  ;;  %v2413_v56 = vpop.f32.mrb[33].mxu0 }
 0x2d9   : > { %v2414_v53 = vadd.f32 %v8517_v29, %v2413_v56 }
 0x2da   : > { %v2573_v22 = vmax.f32 %v2419_v44, 0.0 }
 0x2db   : > { %v2572_v34 = vmax.f32 %v2414_v53, 0.0 }
 0x2dc   : > { %v2733_v45 = vadd.f32 %v2639_v8, %v2573_v22  ;;  %2605 = vst.msk [vmem:[#allocation3 + $0x8] sm:$0xff] %vm11250_vm14, %v2573_v22  ;;  %vm11259_vm14 = vmmov %vm11252_vm0 }
 0x2dd   : > { %v2732_v21 = vadd.f32 %v2637_v33, %v2572_v34  ;;  %2604 = vst.msk [vmem:[#allocation3] sm:$0xff] %vm11251_vm3, %v2572_v34  ;;  %vm11260_vm3 = vmmov %vm11252_vm0 }
 0x2de   : > { %2765 = vst.msk [vmem:[#allocation2 + $0x18] sm:$0xff] %vm11252_vm0, %v2733_v45  ;;  %2866 = vrot.lane.b32.xlu1 %v2733_v45, %s7087_s28 }
 0x2df   : > { %2764 = vst.msk [vmem:[#allocation2 + $0x10] sm:$0xff] %vm11253_vm6, %v2732_v21  ;;  %2864 = vrot.lane.b32.xlu0 %v2732_v21, %s7087_s28  ;;  %v6745_v6 = vpop.f32.mrb[34].mxu0  ;;  %v2651_v21 = vpop.permute.xlu1 %2650  ;;  %vm11261_vm6 = vmmov %vm11252_vm0 }
 0x2e0   : > { %v2429_v17 = vadd.f32 %v6745_v6, %v8517_v29  ;;  %v2423_v50 = vpop.f32.mrb[35].mxu0 }
 0x2e1   : > { %v2424_v19 = vadd.f32 %v8517_v29, %v2423_v50 }
 0x2e2   : > { %v2575_v43 = vmax.f32 %v2429_v17, 0.0 }
 0x2e3   : > { %v2574_v55 = vmax.f32 %v2424_v19, 0.0 }
 0x2e4   : > { %v2735_v38 = vadd.f32 %v2643_v27, %v2575_v43  ;;  %2607 = vst.msk [vmem:[#allocation3 + $0x18] sm:$0xff] %vm11254_vm15, %v2575_v43  ;;  %vm11262_vm15 = vmmov %vm11252_vm0 }
 0x2e5   : > { %v2734_v24 = vadd.f32 %v2641_v31, %v2574_v55  ;;  %2606 = vst.msk [vmem:[#allocation3 + $0x10] sm:$0xff] %vm11255_vm1, %v2574_v55  ;;  %vm11263_vm1 = vmmov %vm11252_vm0 }
 0x2e6   : > { %2767 = vst.msk [vmem:[#allocation2 + $0x28] sm:$0xff] %vm11256_vm5, %v2735_v38  ;;  %2870 = vrot.lane.b32.xlu0 %v2735_v38, %s7087_s28  ;;  %vm11264_vm5 = vmmov %vm11252_vm0 }
 0x2e7   : > { %2766 = vst.msk [vmem:[#allocation2 + $0x20] sm:$0xff] %vm11257_vm2, %v2734_v24  ;;  %v6748_v62 = vpop.f32.mrb[36].mxu0  ;;  %vm11265_vm2 = vmmov %vm11252_vm0 }
 0x2e8   : > { %v2439_v18 = vadd.f32 %v6748_v62, %v8517_v29  ;;  %v2433_v9 = vpop.f32.mrb[37].mxu0 }
 0x2e9   : > { %v2434_v44 = vadd.f32 %v8517_v29, %v2433_v9 }
 0x2ea   : > { %v2577_v56 = vmax.f32 %v2439_v18, 0.0  ;;  %2868 = vrot.lane.b32.xlu0 %v2734_v24, %s7087_s28  ;;  %v2655_v18 = vpop.permute.xlu1 %2654 }
 0x2eb   : > { %v2576_v27 = vmax.f32 %v2434_v44, 0.0  ;;  %v2653_v44 = vpop.permute.xlu0 %2652 }
 0x2ec   : > { %v2737_v53 = vadd.f32 %v2647_v26, %v2577_v56  ;;  %2609 = vst.msk [vmem:[#allocation3 + $0x28] sm:$0xff] %vm11258_vm4, %v2577_v56  ;;  %vm11266_vm4 = vmmov %vm11252_vm0 }
 0x2ed   : > { %v2736_v31 = vadd.f32 %v2645_v60, %v2576_v27  ;;  %2608 = vst.msk [vmem:[#allocation3 + $0x20] sm:$0xff] %vm11259_vm14, %v2576_v27  ;;  %v8545_v26 = vld [vmem:[#allocation2 + $0x28] sm:$0xff]  ;;  %vm11267_vm14 = vmmov %vm11252_vm0 }
 0x2ee   : > { %2769 = vst.msk [vmem:[#allocation2 + $0x38] sm:$0xff] %vm11260_vm3, %v2737_v53  ;;  %2874 = vrot.lane.b32.xlu0 %v2737_v53, %s7087_s28  ;;  %v8549_v60 = vld [vmem:[#allocation2 + $0x20] sm:$0xff]  ;;  %vm11268_vm3 = vmmov %vm11252_vm0 }
 0x2ef   : > { %2768 = vst.msk [vmem:[#allocation2 + $0x30] sm:$0xff] %vm11252_vm0, %v2736_v31  ;;  %v6751_v22 = vpop.f32.mrb[38].mxu0  ;;  %2872 = vrot.lane.b32.xlu1 %v2736_v31, %s7087_s28 }
 0x2f0   : > { %v2449_v8 = vadd.f32 %v6751_v22, %v8517_v29  ;;  %v2443_v34 = vpop.f32.mrb[39].mxu0 }
 0x2f1   : > { %v2444_v33 = vadd.f32 %v8517_v29, %v2443_v34 }
 0x2f2   : > { %v2579_v45 = vmax.f32 %v2449_v8, 0.0  ;;  %2994 = vrot.lane.b32.xlu0 %v8545_v26, %s7086_s23 }
 0x2f3   : > { %v2578_v6 = vmax.f32 %v2444_v33, 0.0  ;;  %2992 = vrot.lane.b32.xlu1 %v8549_v60, %s7086_s23 }
 0x2f4   : > { %v2739_v17 = vadd.f32 %v2651_v21, %v2579_v45  ;;  %2611 = vst.msk [vmem:[#allocation3 + $0x38] sm:$0xff] %vm11261_vm6, %v2579_v45  ;;  %v2659_v21 = vpop.permute.xlu1 %2658  ;;  %vm11269_vm6 = vmmov %vm11252_vm0 }
 0x2f5   : > { %v2738_v50 = vadd.f32 %v2649_v46, %v2578_v6  ;;  %2610 = vst.msk [vmem:[#allocation3 + $0x30] sm:$0xff] %vm11262_vm15, %v2578_v6  ;;  %v8561_v24 = vld [vmem:[#allocation2 + $0x38] sm:$0xff]  ;;  %vm11270_vm15 = vmmov %vm11252_vm0 }
 0x2f6   : > { %2771 = vst.msk [vmem:[#allocation2 + $0x48] sm:$0xff] %vm11263_vm1, %v2739_v17  ;;  %2878 = vrot.lane.b32.xlu0 %v2739_v17, %s7087_s28  ;;  %v8565_v46 = vld [vmem:[#allocation2 + $0x30] sm:$0xff]  ;;  %v2657_v17 = vpop.permute.xlu0 %2656  ;;  %vm11271_vm1 = vmmov %vm11252_vm0 }
 0x2f7   : > { %2770 = vst.msk [vmem:[#allocation2 + $0x40] sm:$0xff] %vm11264_vm5, %v2738_v50  ;;  %v6754_v19 = vpop.f32.mrb[40].mxu0  ;;  %2876 = vrot.lane.b32.xlu1 %v2738_v50, %s7087_s28  ;;  %vm11272_vm5 = vmmov %vm11252_vm0 }
 0x2f8   : > { %v2459_v43 = vadd.f32 %v6754_v19, %v8517_v29  ;;  %v2453_v55 = vpop.f32.mrb[41].mxu0 }
 0x2f9   : > { %v2454_v38 = vadd.f32 %v8517_v29, %v2453_v55 }
 0x2fa   : > { %v2581_v62 = vmax.f32 %v2459_v43, 0.0  ;;  %2998 = vrot.lane.b32.xlu0 %v8561_v24, %s7086_s23 }
 0x2fb   : > { %v2580_v9 = vmax.f32 %v2454_v38, 0.0  ;;  %2996 = vrot.lane.b32.xlu1 %v8565_v46, %s7086_s23 }
 0x2fc   : > { %v2741_v56 = vadd.f32 %v2655_v18, %v2581_v62  ;;  %2613 = vst.msk [vmem:[#allocation3 + $0x48] sm:$0xff] %vm11265_vm2, %v2581_v62  ;;  %vm11273_vm2 = vmmov %vm11252_vm0 }
 0x2fd   : > { %v2740_v27 = vadd.f32 %v2653_v44, %v2580_v9  ;;  %2612 = vst.msk [vmem:[#allocation3 + $0x40] sm:$0xff] %vm11266_vm4, %v2580_v9  ;;  %v8577_v34 = vld [vmem:[#allocation2 + $0x48] sm:$0xff]  ;;  %vm11274_vm4 = vmmov %vm11252_vm0 }
 0x2fe   : > { %2773 = vst.msk [vmem:[#allocation2 + $0x58] sm:$0xff] %vm11267_vm14, %v2741_v56  ;;  %2882 = vrot.lane.b32.xlu0 %v2741_v56, %s7087_s28  ;;  %v8581_v45 = vld [vmem:[#allocation2 + $0x40] sm:$0xff]  ;;  %v2663_v56 = vpop.permute.xlu1 %2662  ;;  %vm11275_vm14 = vmmov %vm11252_vm0 }
 0x2ff   : > { %2772 = vst.msk [vmem:[#allocation2 + $0x50] sm:$0xff] %vm11268_vm3, %v2740_v27  ;;  %v6757_v53 = vpop.f32.mrb[42].mxu0  ;;  %2880 = vrot.lane.b32.xlu1 %v2740_v27, %s7087_s28  ;;  %vm11276_vm3 = vmmov %vm11252_vm0 }
 0x300   : > { %v2469_v31 = vadd.f32 %v6757_v53, %v8517_v29  ;;  %v2463_v22 = vpop.f32.mrb[43].mxu0  ;;  %v2661_v53 = vpop.permute.xlu0 %2660 }
 0x301   : > { %v2464_v8 = vadd.f32 %v8517_v29, %v2463_v22 }
 0x302   : > { %v2583_v33 = vmax.f32 %v2469_v31, 0.0  ;;  %3002 = vrot.lane.b32.xlu0 %v8577_v34, %s7086_s23 }
 0x303   : > { %v2582_v6 = vmax.f32 %v2464_v8, 0.0  ;;  %3000 = vrot.lane.b32.xlu1 %v8581_v45, %s7086_s23 }
 0x304   : > { %v2743_v50 = vadd.f32 %v2659_v21, %v2583_v33  ;;  %2615 = vst.msk [vmem:[#allocation3 + $0x58] sm:$0xff] %vm11252_vm0, %v2583_v33 }
 0x305   : > { %v2742_v19 = vadd.f32 %v2657_v17, %v2582_v6  ;;  %2614 = vst.msk [vmem:[#allocation3 + $0x50] sm:$0xff] %vm11269_vm6, %v2582_v6  ;;  %v8593_v18 = vld [vmem:[#allocation2 + $0x58] sm:$0xff]  ;;  %vm11277_vm6 = vmmov %vm11252_vm0 }
 0x306   : > { %2775 = vst.msk [vmem:[#allocation2 + $0x68] sm:$0xff] %vm11270_vm15, %v2743_v50  ;;  %2886 = vrot.lane.b32.xlu0 %v2743_v50, %s7087_s28  ;;  %v8597_v44 = vld [vmem:[#allocation2 + $0x50] sm:$0xff]  ;;  %vm11278_vm15 = vmmov %vm11252_vm0 }
 0x307   : > { %2774 = vst.msk [vmem:[#allocation2 + $0x60] sm:$0xff] %vm11271_vm1, %v2742_v19  ;;  %v6760_v43 = vpop.f32.mrb[44].mxu0  ;;  %2884 = vrot.lane.b32.xlu1 %v2742_v19, %s7087_s28  ;;  %vm11279_vm1 = vmmov %vm11252_vm0 }
 0x308   : > { %v2479_v55 = vadd.f32 %v6760_v43, %v8517_v29  ;;  %v2473_v38 = vpop.f32.mrb[45].mxu0  ;;  %v2667_v43 = vpop.permute.xlu1 %2666 }
 0x309   : > { %v2474_v62 = vadd.f32 %v8517_v29, %v2473_v38  ;;  %v2665_v38 = vpop.permute.xlu0 %2664 }
 0x30a   : > { %v2585_v9 = vmax.f32 %v2479_v55, 0.0  ;;  %3006 = vrot.lane.b32.xlu0 %v8593_v18, %s7086_s23 }
 0x30b   : > { %v2584_v27 = vmax.f32 %v2474_v62, 0.0  ;;  %3004 = vrot.lane.b32.xlu1 %v8597_v44, %s7086_s23 }
 0x30c   : > { %v2745_v31 = vadd.f32 %v2663_v56, %v2585_v9  ;;  %2617 = vst.msk [vmem:[#allocation3 + $0x68] sm:$0xff] %vm11272_vm5, %v2585_v9  ;;  %vm11280_vm5 = vmmov %vm11252_vm0 }
 0x30d   : > { %v2744_v22 = vadd.f32 %v2661_v53, %v2584_v27  ;;  %2616 = vst.msk [vmem:[#allocation3 + $0x60] sm:$0xff] %vm11273_vm2, %v2584_v27  ;;  %v8609_v17 = vld [vmem:[#allocation2 + $0x68] sm:$0xff]  ;;  %vm11281_vm2 = vmmov %vm11252_vm0 }
 0x30e   : > { %2777 = vst.msk [vmem:[#allocation2 + $0x78] sm:$0xff] %vm11274_vm4, %v2745_v31  ;;  %2890 = vrot.lane.b32.xlu0 %v2745_v31, %s7087_s28  ;;  %v8613_v19 = vld [vmem:[#allocation2 + $0x60] sm:$0xff]  ;;  %vm11282_vm4 = vmmov %vm11252_vm0 }
 0x30f   : > { %2776 = vst.msk [vmem:[#allocation2 + $0x70] sm:$0xff] %vm11275_vm14, %v2744_v22  ;;  %v6763_v8 = vpop.f32.mrb[0].mxu1  ;;  %2888 = vrot.lane.b32.xlu1 %v2744_v22, %s7087_s28  ;;  %vm11283_vm14 = vmmov %vm11252_vm0 }
 0x310   : > { %v2489_v33 = vadd.f32 %v6763_v8, %v8517_v29  ;;  %v2483_v21 = vpop.f32.mrb[1].mxu1 }
 0x311   : > { %v2484_v6 = vadd.f32 %v8517_v29, %v2483_v21  ;;  %v2671_v21 = vpop.permute.xlu1 %2670 }
 0x312   : > { %v2587_v50 = vmax.f32 %v2489_v33, 0.0  ;;  %3010 = vrot.lane.b32.xlu0 %v8609_v17, %s7086_s23 }
 0x313   : > { %v2586_v55 = vmax.f32 %v2484_v6, 0.0  ;;  %3008 = vrot.lane.b32.xlu1 %v8613_v19, %s7086_s23 }
 0x314   : > { %v2747_v62 = vadd.f32 %v2667_v43, %v2587_v50  ;;  %2619 = vst.msk [vmem:[#allocation3 + $0x78] sm:$0xff] %vm11276_vm3, %v2587_v50  ;;  %v2669_v50 = vpop.permute.xlu0 %2668  ;;  %vm11284_vm3 = vmmov %vm11252_vm0 }
 0x315   : > { %v2746_v9 = vadd.f32 %v2665_v38, %v2586_v55  ;;  %2618 = vst.msk [vmem:[#allocation3 + $0x70] sm:$0xff] %vm11252_vm0, %v2586_v55  ;;  %v8625_v22 = vld [vmem:[#allocation2 + $0x78] sm:$0xff] }
 0x316   : > { %2779 = vst.msk [vmem:[#allocation2 + $0x88] sm:$0xff] %vm11277_vm6, %v2747_v62  ;;  %2894 = vrot.lane.b32.xlu0 %v2747_v62, %s7087_s28  ;;  %v8629_v33 = vld [vmem:[#allocation2 + $0x70] sm:$0xff]  ;;  %vm11285_vm6 = vmmov %vm11252_vm0 }
 0x317   : > { %2778 = vst.msk [vmem:[#allocation2 + $0x80] sm:$0xff] %vm11278_vm15, %v2746_v9  ;;  %v6766_v56 = vpop.f32.mrb[2].mxu1  ;;  %2892 = vrot.lane.b32.xlu1 %v2746_v9, %s7087_s28  ;;  %vm11286_vm15 = vmmov %vm11252_vm0 }
 0x318   : > { %v2499_v27 = vadd.f32 %v6766_v56, %v8517_v29  ;;  %v2493_v53 = vpop.f32.mrb[3].mxu1 }
 0x319   : > { %v2494_v31 = vadd.f32 %v8517_v29, %v2493_v53 }
 0x31a   : > { %v2589_v8 = vmax.f32 %v2499_v27, 0.0  ;;  %3014 = vrot.lane.b32.xlu0 %v8625_v22, %s7086_s23 }
 0x31b   : > { %v2588_v6 = vmax.f32 %v2494_v31, 0.0  ;;  %3012 = vrot.lane.b32.xlu1 %v8629_v33, %s7086_s23 }
 0x31c   : > { %v2749_v43 = vadd.f32 %v2671_v21, %v2589_v8  ;;  %2621 = vst.msk [vmem:[#allocation3 + $0x88] sm:$0xff] %vm11279_vm1, %v2589_v8  ;;  %v2675_v8 = vpop.permute.xlu1 %2674  ;;  %vm11287_vm1 = vmmov %vm11252_vm0 }
 0x31d   : > { %v2748_v55 = vadd.f32 %v2669_v50, %v2588_v6  ;;  %2620 = vst.msk [vmem:[#allocation3 + $0x80] sm:$0xff] %vm11280_vm5, %v2588_v6  ;;  %v8641_v27 = vld [vmem:[#allocation2 + $0x88] sm:$0xff]  ;;  %v2673_v6 = vpop.permute.xlu0 %2672  ;;  %vm11288_vm5 = vmmov %vm11252_vm0 }
 0x31e   : > { %2781 = vst.msk [vmem:[#allocation2 + $0x98] sm:$0xff] %vm11281_vm2, %v2749_v43  ;;  %2898 = vrot.lane.b32.xlu0 %v2749_v43, %s7087_s28  ;;  %v8645_v31 = vld [vmem:[#allocation2 + $0x80] sm:$0xff]  ;;  %vm11289_vm2 = vmmov %vm11252_vm0 }
 0x31f   : > { %2780 = vst.msk [vmem:[#allocation2 + $0x90] sm:$0xff] %vm11282_vm4, %v2748_v55  ;;  %v6769_v38 = vpop.f32.mrb[4].mxu1  ;;  %2896 = vrot.lane.b32.xlu1 %v2748_v55, %s7087_s28  ;;  %vm11290_vm4 = vmmov %vm11252_vm0 }
 0x320   : > { %v2509_v62 = vadd.f32 %v6769_v38, %v8517_v29  ;;  %v2503_v9 = vpop.f32.mrb[5].mxu1 }
 0x321   : > { %v2504_v56 = vadd.f32 %v8517_v29, %v2503_v9 }
 0x322   : > { %v2591_v53 = vmax.f32 %v2509_v62, 0.0  ;;  %3018 = vrot.lane.b32.xlu0 %v8641_v27, %s7086_s23 }
 0x323   : > { %v2590_v21 = vmax.f32 %v2504_v56, 0.0  ;;  %3016 = vrot.lane.b32.xlu1 %v8645_v31, %s7086_s23 }
 0x324   : > { %v2751_v50 = vadd.f32 %v2675_v8, %v2591_v53  ;;  %2623 = vst.msk [vmem:[#allocation3 + $0x98] sm:$0xff] %vm11283_vm14, %v2591_v53  ;;  %vm11291_vm14 = vmmov %vm11252_vm0 }
 0x325   : > { %v2750_v43 = vadd.f32 %v2673_v6, %v2590_v21  ;;  %2622 = vst.msk [vmem:[#allocation3 + $0x90] sm:$0xff] %vm11284_vm3, %v2590_v21  ;;  %v8657_v56 = vld [vmem:[#allocation2 + $0x98] sm:$0xff]  ;;  %v2679_v21 = vpop.permute.xlu1 %2678  ;;  %vm11292_vm3 = vmmov %vm11252_vm0 }
 0x326   : > { %2783 = vst.msk [vmem:[#allocation2 + $0xa8] sm:$0xff] %vm11252_vm0, %v2751_v50  ;;  %2902 = vrot.lane.b32.xlu0 %v2751_v50, %s7087_s28  ;;  %v8661_v8 = vld [vmem:[#allocation2 + $0x90] sm:$0xff]  ;;  %v2677_v50 = vpop.permute.xlu0 %2676 }
 0x327   : > { %2782 = vst.msk [vmem:[#allocation2 + $0xa0] sm:$0xff] %vm11285_vm6, %v2750_v43  ;;  %v6772_v55 = vpop.f32.mrb[6].mxu1  ;;  %2900 = vrot.lane.b32.xlu1 %v2750_v43, %s7087_s28  ;;  %vm11293_vm6 = vmmov %vm11252_vm0 }
 0x328   : > { %v2519_v38 = vadd.f32 %v6772_v55, %v8517_v29  ;;  %v2513_v62 = vpop.f32.mrb[7].mxu1 }
 0x329   : > { %v2514_v9 = vadd.f32 %v8517_v29, %v2513_v62 }
 0x32a   : > { %v2593_v53 = vmax.f32 %v2519_v38, 0.0  ;;  %3022 = vrot.lane.b32.xlu0 %v8657_v56, %s7086_s23 }
 0x32b   : > { %v2592_v6 = vmax.f32 %v2514_v9, 0.0  ;;  %3020 = vrot.lane.b32.xlu1 %v8661_v8, %s7086_s23 }
 0x32c   : > { %v2753_v43 = vadd.f32 %v2679_v21, %v2593_v53  ;;  %2625 = vst.msk [vmem:[#allocation3 + $0xa8] sm:$0xff] %vm11286_vm15, %v2593_v53  ;;  %v2681_v53 = vpop.permute.xlu0 %2680  ;;  %vm11294_vm15 = vmmov %vm11252_vm0 }
 0x32d   : > { %v2752_v55 = vadd.f32 %v2677_v50, %v2592_v6  ;;  %2624 = vst.msk [vmem:[#allocation3 + $0xa0] sm:$0xff] %vm11287_vm1, %v2592_v6  ;;  %v8673_v21 = vld [vmem:[#allocation2 + $0xa8] sm:$0xff]  ;;  %vm11295_vm1 = vmmov %vm11252_vm0 }
 0x32e   : > { %2785 = vst.msk [vmem:[#allocation2 + $0xb8] sm:$0xff] %vm11288_vm5, %v2753_v43  ;;  %2906 = vrot.lane.b32.xlu0 %v2753_v43, %s7087_s28  ;;  %v8677_v6 = vld [vmem:[#allocation2 + $0xa0] sm:$0xff]  ;;  %v2683_v43 = vpop.permute.xlu1 %2682  ;;  %vm11296_vm5 = vmmov %vm11252_vm0 }
 0x32f   : > { %2784 = vst.msk [vmem:[#allocation2 + $0xb0] sm:$0xff] %vm11289_vm2, %v2752_v55  ;;  %v6775_v38 = vpop.f32.mrb[8].mxu1  ;;  %2904 = vrot.lane.b32.xlu1 %v2752_v55, %s7087_s28  ;;  %vm11297_vm2 = vmmov %vm11252_vm0 }
 0x330   : > { %v2529_v62 = vadd.f32 %v6775_v38, %v8517_v29  ;;  %v2523_v9 = vpop.f32.mrb[9].mxu1 }
 0x331   : > { %v2524_v3 = vadd.f32 %v8517_v29, %v2523_v9  ;;  %v2685_v9 = vpop.permute.xlu0 %2684 }
 0x332   : > { %v2595_v50 = vmax.f32 %v2529_v62, 0.0  ;;  %3026 = vrot.lane.b32.xlu0 %v8673_v21, %s7086_s23  ;;  %v2687_v20 = vpop.permute.xlu1 %2686 }
 0x333   : > { %v2594_v11 = vmax.f32 %v2524_v3, 0.0  ;;  %3024 = vrot.lane.b32.xlu1 %v8677_v6, %s7086_s23 }
 0x334   : > { %v2755_v55 = vadd.f32 %v2683_v43, %v2595_v50  ;;  %2627 = vst.msk [vmem:[#allocation3 + $0xb8] sm:$0xff] %vm11290_vm4, %v2595_v50  ;;  %vm11298_vm4 = vmmov %vm11252_vm0 }
 0x335   : > { %v2754_v38 = vadd.f32 %v2681_v53, %v2594_v11  ;;  %2626 = vst.msk [vmem:[#allocation3 + $0xb0] sm:$0xff] %vm11291_vm14, %v2594_v11  ;;  %v8689_v50 = vld [vmem:[#allocation2 + $0xb8] sm:$0xff]  ;;  %v2689_v30 = vpop.permute.xlu0 %2688  ;;  %vm11299_vm14 = vmmov %vm11252_vm0 }
 0x336   : > { %2787 = vst.msk [vmem:[#allocation2 + $0xc8] sm:$0xff] %vm11292_vm3, %v2755_v55  ;;  %2910 = vrot.lane.b32.xlu0 %v2755_v55, %s7087_s28  ;;  %v8693_v11 = vld [vmem:[#allocation2 + $0xb0] sm:$0xff]  ;;  %vm11300_vm3 = vmmov %vm11252_vm0 }
 0x337   : > { %2786 = vst.msk [vmem:[#allocation2 + $0xc0] sm:$0xff] %vm11252_vm0, %v2754_v38  ;;  %v6778_v62 = vpop.f32.mrb[10].mxu1  ;;  %2908 = vrot.lane.b32.xlu1 %v2754_v38, %s7087_s28 }
 0x338   : > { %v2539_v3 = vadd.f32 %v6778_v62, %v8517_v29  ;;  %v2533_v23 = vpop.f32.mrb[11].mxu1 }
 0x339   : > { %v2534_v43 = vadd.f32 %v8517_v29, %v2533_v23  ;;  %v2691_v23 = vpop.permute.xlu1 %2690  ;;  %v2693_v14 = vpop.permute.xlu0 %2692 }
 0x33a   : > { %v2597_v53 = vmax.f32 %v2539_v3, 0.0  ;;  %3030 = vrot.lane.b32.xlu0 %v8689_v50, %s7086_s23 }
 0x33b   : > { %v2596_v55 = vmax.f32 %v2534_v43, 0.0  ;;  %3028 = vrot.lane.b32.xlu1 %v8693_v11, %s7086_s23 }
 0x33c   : > { %v2757_v38 = vadd.f32 %v2687_v20, %v2597_v53  ;;  %2629 = vst.msk [vmem:[#allocation3 + $0xc8] sm:$0xff] %vm11293_vm6, %v2597_v53  ;;  %vm11301_vm6 = vmmov %vm11252_vm0 }
 0x33d   : > { %v2756_v62 = vadd.f32 %v2685_v9, %v2596_v55  ;;  %2628 = vst.msk [vmem:[#allocation3 + $0xc0] sm:$0xff] %vm11294_vm15, %v2596_v55  ;;  %v8705_v53 = vld [vmem:[#allocation2 + $0xc8] sm:$0xff]  ;;  %vm11302_vm15 = vmmov %vm11252_vm0 }
 0x33e   : > { %2789 = vst.msk [vmem:[#allocation2 + $0xd8] sm:$0xff] %vm11295_vm1, %v2757_v38  ;;  %2914 = vrot.lane.b32.xlu0 %v2757_v38, %s7087_s28  ;;  %v8709_v55 = vld [vmem:[#allocation2 + $0xc0] sm:$0xff]  ;;  %vm11303_vm1 = vmmov %vm11252_vm0 }
 0x33f   : > { %2788 = vst.msk [vmem:[#allocation2 + $0xd0] sm:$0xff] %vm11296_vm5, %v2756_v62  ;;  %v6781_v3 = vpop.f32.mrb[12].mxu1  ;;  %2912 = vrot.lane.b32.xlu1 %v2756_v62, %s7087_s28  ;;  %vm11304_vm5 = vmmov %vm11252_vm0 }
 0x340   : > { %v2549_v43 = vadd.f32 %v6781_v3, %v8517_v29  ;;  %v2543_v5 = vpop.f32.mrb[13].mxu1 }
 0x341   : > { %v2544_v20 = vadd.f32 %v8517_v29, %v2543_v5  ;;  %v2695_v5 = vpop.permute.xlu1 %2694 }
 0x342   : > { %v2599_v9 = vmax.f32 %v2549_v43, 0.0  ;;  %3034 = vrot.lane.b32.xlu0 %v8705_v53, %s7086_s23 }
 0x343   : > { %v2598_v38 = vmax.f32 %v2544_v20, 0.0  ;;  %v6784_v35 = vpop.f32.mrb[14].mxu1  ;;  %3032 = vrot.lane.b32.xlu1 %v8709_v55, %s7086_s23 }
 0x344   : > { %v2759_v62 = vadd.f32 %v2691_v23, %v2599_v9  ;;  %v2559_v3 = vadd.f32 %v6784_v35, %v8517_v29  ;;  %v2553_v32 = vpop.f32.mrb[15].mxu1  ;;  %2631 = vst.msk [vmem:[#allocation3 + $0xd8] sm:$0xff] %vm11297_vm2, %v2599_v9  ;;  %vm11305_vm2 = vmmov %vm11252_vm0 }
 0x345   : > { %v2758_v39 = vadd.f32 %v2689_v30, %v2598_v38  ;;  %v2554_v43 = vadd.f32 %v8517_v29, %v2553_v32  ;;  %2630 = vst.msk [vmem:[#allocation3 + $0xd0] sm:$0xff] %vm11298_vm4, %v2598_v38  ;;  %v8724_v38 = vld [vmem:[#allocation2 + $0xd8] sm:$0xff]  ;;  %vm11306_vm4 = vmmov %vm11252_vm0 }
 0x346   : > { %2791 = vst.msk [vmem:[#allocation2 + $0xe8] sm:$0xff] %vm11299_vm14, %v2759_v62  ;;  %v2601_v20 = vmax.f32 %v2559_v3, 0.0  ;;  %2918 = vrot.lane.b32.xlu0 %v2759_v62, %s7087_s28  ;;  %v2697_v62 = vpop.permute.xlu0 %2696  ;;  %vm11307_vm14 = vmmov %vm11252_vm0 }
 0x347   : > { %2790 = vst.msk [vmem:[#allocation2 + $0xe0] sm:$0xff] %vm11300_vm3, %v2758_v39  ;;  %v2600_v61 = vmax.f32 %v2554_v43, 0.0  ;;  %v6787_v23 = vpop.f32.mrb[16].mxu1  ;;  %2916 = vrot.lane.b32.xlu1 %v2758_v39, %s7087_s28  ;;  %v8730_v39 = vld [vmem:[#allocation2 + $0xd0] sm:$0xff]  ;;  %vm11308_vm3 = vmmov %vm11252_vm0 }
 0x348   : > { %v2761_v35 = vadd.f32 %v2695_v5, %v2601_v20  ;;  %v2569_v9 = vadd.f32 %v6787_v23, %v8517_v29  ;;  %v2563_v48 = vpop.f32.mrb[17].mxu1  ;;  %2633 = vst.msk [vmem:[#allocation3 + $0xe8] sm:$0xff] %vm11252_vm0, %v2601_v20  ;;  %v2699_v5 = vpop.permute.xlu1 %2698 }
 0x349   : > { %v2760_v32 = vadd.f32 %v2693_v14, %v2600_v61  ;;  %v2564_v30 = vadd.f32 %v8517_v29, %v2563_v48  ;;  %2632 = vst.msk [vmem:[#allocation3 + $0xe0] sm:$0xff] %vm11301_vm6, %v2600_v61  ;;  %v6349_v61 = vld [vmem:[%s10796_s3 + $0x38] sm:$0xff]  ;;  %v6350_v48 = vld [vmem:[%s10796_s3 + $0x40] sm:$0xff]  ;;  %vm11309_vm6 = vcmask 97280  }
 0x34a   : > { %2793 = vst.msk [vmem:[#allocation2 + $0xf8] sm:$0xff] %vm11302_vm15, %v2761_v35  ;;  %v2603_v3 = vmax.f32 %v2569_v9, 0.0  ;;  %3038 = vrot.lane.b32.xlu0 %v8724_v38, %s7086_s23  ;;  %v6994_v29 = vpack.c.bf16 %v6350_v48, %v6349_v61  ;;  %v8744_v23 = vpop.permute.xlu0 %3052  ;;  %vm11310_vm15 = vmmov %vm11309_vm6 }
 0x34b   : > { %2792 = vst.msk [vmem:[#allocation2 + $0xf0] sm:$0xff] %vm11303_vm1, %v2760_v32  ;;  %v2602_v43 = vmax.f32 %v2564_v30, 0.0  ;;  %3036 = vrot.lane.b32.xlu1 %v8730_v39, %s7086_s23  ;;  %vm11311_vm1 = vcmask 1045504  }
 0x34c   : > { %v2763_v14 = vadd.f32 %v2699_v5, %v2603_v3  ;;  %2635 = vst.msk [vmem:[#allocation3 + $0xf8] sm:$0xff] %vm11304_vm5, %v2603_v3  ;;  %6995 = vmatprep.subr.bf16.mxu1 %v6994_v29  ;;  %v8764_v5 = vpop.permute.xlu1 %3054  ;;  %vm11312_vm5 = vcmp.lt.s32.totalorder %v7677_v41, 7 }
 0x34d   : > { %v2762_v20 = vadd.f32 %v2697_v62, %v2602_v43  ;;  %2634 = vst.msk [vmem:[#allocation3 + $0xf0] sm:$0xff] %vm11305_vm2, %v2602_v43  ;;  %6997 = vmatpush3.bf16.msra.mxu1 %v6994_v29  ;;  %v8749_v9 = vld [vmem:[#allocation2 + $0xe8] sm:$0xff]  ;;  %vm11313_vm2 = vcmp.lt.s32.totalorder %v7677_v41, 1 }
 0x34e   : > { %2795 = vst.msk [vmem:[#allocation2 + $0x108] sm:$0xff] %vm11306_vm4, %v2763_v14  ;;  %2922 = vrot.lane.b32.xlu0 %v2761_v35, %s7087_s28  ;;  %v8753_v30 = vld [vmem:[#allocation2 + $0xe0] sm:$0xff]  ;;  %v6351_v35 = vld [vmem:[%s10796_s3 + $0x48] sm:$0xff]  ;;  %vm11315_vm4 = vmmov %vm11311_vm1 }
 0x34f   : > { %2794 = vst.msk [vmem:[#allocation2 + $0x100] sm:$0xff] %vm11307_vm14, %v2762_v20  ;;  %2920 = vrot.lane.b32.xlu1 %v2760_v32, %s7087_s28  ;;  %v6352_v32 = vld [vmem:[%s10796_s3 + $0x50] sm:$0xff]  ;;  %vm11316_vm14 = vmmov %vm11252_vm0 }
 0x350   : > { %v6998_v3 = vpack.c.bf16 %v6352_v32, %v6351_v35  ;;  %v2867_v35 = vpop.permute.xlu1 %2866  ;;  %v6354_v32 = vld [vmem:[%s10796_s3 + $0x60] sm:$0xff] }
 0x351   : > { %v2865_v62 = vpop.permute.xlu0 %2864  ;;  %v8767_v61 = vld [vmem:[#allocation2 + $0xf8] sm:$0xff]  ;;  %v3089_v25 = vsel %vm11308_vm3, %v2797_v51, %v2867_v35  ;;  %v2798_v51 = vld [vmem:[#allocation2 + $0x10] sm:$0xff]  ;;  %vm11317_vm3 = vmmov %vm11252_vm0 }
 0x352   : > { %3042 = vrot.lane.b32.xlu0 %v8749_v9, %s7086_s23  ;;  %6999 = vmatprep.subr.bf16.mxu1 %v6998_v3  ;;  %v8771_v48 = vld [vmem:[#allocation2 + $0xf0] sm:$0xff]  ;;  %v3088_v4 = vsel %vm11252_vm0, %v2796_v12, %v2865_v62  ;;  %vm11318_vm0 = vmmov %vm11309_vm6 }
 0x353   : > { %3040 = vrot.lane.b32.xlu1 %v8753_v30, %s7086_s23  ;;  %7001 = vmatpush3.bf16.msra.mxu1 %v6998_v3 }
 0x356   : > { %2926 = vrot.lane.b32.xlu0 %v2763_v14, %s7087_s28  ;;  %v2829_v14 = vld [vmem:[#allocation2 + $0x108] sm:$0xff]  ;;  %v2828_v16 = vld [vmem:[#allocation2 + $0x100] sm:$0xff] }
 0x357   : > { %2924 = vrot.lane.b32.xlu1 %v2762_v20, %s7087_s28  ;;  %v6353_v20 = vld [vmem:[%s10796_s3 + $0x58] sm:$0xff] }
 0x358   : > { %v2871_v43 = vpop.permute.xlu0 %2870  ;;  %v7002_v3 = vpack.c.bf16 %v6354_v32, %v6353_v20  ;;  %v6355_v32 = vld [vmem:[%s10796_s3 + $0x68] sm:$0x3f] }
 0x35a   : > { %3046 = vrot.lane.b32.xlu0 %v8767_v61, %s7086_s23  ;;  %7003 = vmatprep.subr.bf16.mxu1 %v7002_v3 }
 0x35b   : > { %3044 = vrot.lane.b32.xlu1 %v8771_v48, %s7086_s23  ;;  %7005 = vmatpush3.bf16.msra.mxu1 %v7002_v3 }
 0x35c   : > { %v2869_v29 = vpop.permute.xlu0 %2868  ;;  %6800 = vmatprep.subr.msk.mxu1 %vm11311_vm1, %v6355_v32  ;;  %vm11321_vm1 = vmmov %vm11313_vm2 }
 0x35d   : > { %v3090_v35 = vsel %vm11317_vm3, %v2798_v51, %v2869_v29 }
 0x35f   : > { %3050 = vrot.lane.b32.xlu1 %v2829_v14, %s7086_s23  ;;  %6801 = vmatpush3.msk.msra.mxu1 %vm11315_vm4, %v6355_v32 }
 0x360   : > { %v2875_v54 = vpop.permute.xlu0 %2874 }
 0x361   : > { %v2873_v2 = vpop.permute.xlu1 %2872 }
 0x363   : > { %3048 = vrot.lane.b32.xlu1 %v2828_v16, %s7086_s23 }
 0x364   : > { %v2995_v15 = vpop.permute.xlu0 %2994 }
 0x365   : > { %v3121_v52 = vsel %vm11309_vm6, %v3089_v25, %v2995_v15  ;;  %v2993_v37 = vpop.permute.xlu1 %2992  ;;  %vm11319_vm6 = vmmov %vm11318_vm0 }
 0x366   : > { %v3153_v0 = vrot.slane %v3121_v52, 7  ;;  %v3249_v14 = vrot.slane %v3121_v52, 1  ;;  %v8787_v20 = vsel %vm11310_vm15, %v3088_v4, %v2993_v37  ;;  %vm11320_vm15 = vmmov %vm11312_vm5 }
 0x367   : > { %v10965_v3 = vrot.slane %v8787_v20, 7  ;;  %v10960_v16 = vrot.slane %v8787_v20, 1  ;;  %3378 = vrot.lane.b32.xlu1 %v3121_v52, %s7088_s22  ;;  %3376 = vrot.lane.b32.xlu0 %v8787_v20, %s7088_s22  ;;  %v2799_v52 = vld [vmem:[#allocation2 + $0x18] sm:$0xff] }
 0x368   : > { %v2879_v15 = vpop.permute.xlu0 %2878  ;;  %v3091_v12 = vsel %vm11316_vm14, %v2799_v52, %v2871_v43  ;;  %vm11327_vm14 = vmmov %vm11318_vm0 }
 0x369   : > { %v2877_v25 = vpop.permute.xlu1 %2876  ;;  %v3310_v37 = vsel %vm11312_vm5, %v10960_v16, %v3249_v14  ;;  %v8806_v4 = vsel %vm11313_vm2, %v10965_v3, %v3153_v0  ;;  %vm11323_vm5 = vmmov %vm11321_vm1 }
 0x36a   : > { %11314 = vst [vmem:[#allocation60_spill] sm:$0xff] %v8806_v4  ;;  %vm11325_vm2 = vmmov %vm11317_vm3 }
 0x36b   : > { %3504 = vrot.lane.b32.xlu0 %v3310_v37, %s7089_s26  ;;  %vm11326_vm4 = vmmov %vm11325_vm2 }
 0x36c   : > { %v2999_v62 = vpop.permute.xlu0 %2998  ;;  %vm11328_vm3 = vmmov %vm11318_vm0 }
 0x36d   : > { %v3123_v7 = vsel %vm11318_vm0, %v3091_v12, %v2999_v62  ;;  %v2997_v16 = vpop.permute.xlu1 %2996  ;;  %vm11329_vm0 = vmmov %vm11320_vm15 }
 0x36e   : > { %v3155_v58 = vrot.slane %v3123_v7, 7  ;;  %v3251_v1 = vrot.slane %v3123_v7, 1  ;;  %v3122_v47 = vsel %vm11319_vm6, %v3090_v35, %v2997_v16  ;;  %3382 = vrot.lane.b32.xlu1 %v3123_v7, %s7088_s22  ;;  %v3093_v7 = vsel %vm11325_vm2, %v8545_v26, %v2875_v54  ;;  %vm11331_vm6 = vmmov %vm11329_vm0 }
 0x36f   : > { %v3154_v3 = vrot.slane %v3122_v47, 7  ;;  %v3250_v32 = vrot.slane %v3122_v47, 1  ;;  %3380 = vrot.lane.b32.xlu0 %v3122_v47, %s7088_s22  ;;  %v3092_v47 = vsel %vm11326_vm4, %v8549_v60, %v2873_v2  ;;  %vm11334_vm4 = vmmov %vm11328_vm3 }
 0x370   : > { %v2883_v37 = vpop.permute.xlu0 %2882 }
 0x371   : > { %v2881_v4 = vpop.permute.xlu1 %2880  ;;  %v3308_v43 = vsel %vm11320_vm15, %v3250_v32, %v3251_v1  ;;  %v8820_v29 = vsel %vm11321_vm1, %v3154_v3, %v3155_v58  ;;  %v8824_v52 = vsel %vm11323_vm5, %v3153_v0, %v3154_v3  ;;  %v3309_v0 = vsel %vm11329_vm0, %v3249_v14, %v3250_v32  ;;  %vm11332_vm15 = vmmov %vm11321_vm1 }
 0x372   : > { %11322 = vst [vmem:[#allocation61_spill] sm:$0xff] %v8820_v29  ;;  %11324 = vst [vmem:[#allocation62_spill] sm:$0xff] %v8824_v52  ;;  %v3313_v2 = vsel %vm7733_vm7, %v3309_v0, 0.0 }
 0x373   : > { %3508 = vrot.lane.b32.xlu0 %v3308_v43, %s7089_s26  ;;  %vm11333_vm5 = vmmov %vm11325_vm2 }
 0x374   : > { %v3003_v16 = vpop.permute.xlu0 %3002  ;;  %v3095_v32 = vsel %vm11333_vm5, %v8561_v24, %v2879_v15 }
 0x375   : > { %v3125_v12 = vsel %vm11327_vm14, %v3093_v7, %v3003_v16  ;;  %v3001_v51 = vpop.permute.xlu1 %3000  ;;  %v3094_v16 = vsel %vm11325_vm2, %v8565_v46, %v2877_v25  ;;  %vm11335_vm14 = vmmov %vm11328_vm3 }
 0x376   : > { %v3157_v62 = vrot.slane %v3125_v12, 7  ;;  %v3253_v35 = vrot.slane %v3125_v12, 1  ;;  %v3124_v29 = vsel %vm11328_vm3, %v3092_v47, %v3001_v51  ;;  %3386 = vrot.lane.b32.xlu1 %v3125_v12, %s7088_s22  ;;  %vm11336_vm3 = vmmov %vm11329_vm0 }
 0x377   : > { %v3156_v3 = vrot.slane %v3124_v29, 7  ;;  %v3252_v43 = vrot.slane %v3124_v29, 1  ;;  %3384 = vrot.lane.b32.xlu0 %v3124_v29, %s7088_s22 }
 0x378   : > { %v2887_v54 = vpop.permute.xlu0 %2886 }
 0x379   : > { %v2885_v26 = vpop.permute.xlu1 %2884  ;;  %v3306_v60 = vsel %vm11331_vm6, %v3252_v43, %v3253_v35  ;;  %v8843_v7 = vsel %vm11332_vm15, %v3156_v3, %v3157_v62  ;;  %v8848_v14 = vsel %vm11321_vm1, %v3155_v58, %v3156_v3  ;;  %v3307_v58 = vsel %vm11336_vm3, %v3251_v1, %v3252_v43  ;;  %vm11338_vm6 = vmmov %vm11321_vm1 }
 0x37a   : > { %3506 = vrot.lane.b32.xlu1 %v3313_v2, %s7089_s26  ;;  %v3315_v46 = vsel %vm7764_vm8, %v3307_v58, 0.0  ;;  %vm11339_vm15 = vmmov %vm11321_vm1 }
 0x37b   : > { %3512 = vrot.lane.b32.xlu0 %v3306_v60, %s7089_s26  ;;  %vm11340_vm1 = vmmov %vm11325_vm2 }
 0x37c   : > { %v3007_v29 = vpop.permute.xlu0 %3006  ;;  %v3097_v43 = vsel %vm11340_vm1, %v8577_v34, %v2883_v37  ;;  %vm11341_vm5 = vmmov %vm11340_vm1 }
 0x37d   : > { %v3127_v47 = vsel %vm11334_vm4, %v3095_v32, %v3007_v29  ;;  %v3005_v12 = vpop.permute.xlu1 %3004  ;;  %vm11342_vm2 = vmmov %vm11334_vm4 }
 0x37e   : > { %v3159_v51 = vrot.slane %v3127_v47, 7  ;;  %v3255_v0 = vrot.slane %v3127_v47, 1  ;;  %v3126_v2 = vsel %vm11335_vm14, %v3094_v16, %v3005_v12  ;;  %3390 = vrot.lane.b32.xlu1 %v3127_v47, %s7088_s22  ;;  %v3096_v16 = vsel %vm11341_vm5, %v8581_v45, %v2881_v4  ;;  %vm11343_vm4 = vmmov %vm11342_vm2 }
 0x37f   : > { %v3158_v3 = vrot.slane %v3126_v2, 7  ;;  %v3254_v60 = vrot.slane %v3126_v2, 1  ;;  %3388 = vrot.lane.b32.xlu0 %v3126_v2, %s7088_s22  ;;  %vm11344_vm14 = vmmov %vm11329_vm0 }
 0x380   : > { %v2891_v24 = vpop.permute.xlu0 %2890  ;;  %vm11346_vm3 = vmmov %vm11329_vm0 }
 0x381   : > { %v2889_v15 = vpop.permute.xlu1 %2888  ;;  %v3304_v25 = vsel %vm11329_vm0, %v3254_v60, %v3255_v0  ;;  %v8867_v32 = vsel %vm11338_vm6, %v3158_v3, %v3159_v51  ;;  %v8872_v1 = vsel %vm11339_vm15, %v3157_v62, %v3158_v3  ;;  %v3305_v62 = vsel %vm11344_vm14, %v3253_v35, %v3254_v60  ;;  %vm11347_vm0 = vmmov %vm11338_vm6 }
 0x382   : > { %3510 = vrot.lane.b32.xlu1 %v3315_v46, %s7089_s26  ;;  %v3317_v45 = vsel %vm7795_vm9, %v3305_v62, 0.0  ;;  %vm11348_vm6 = vmmov %vm11347_vm0 }
 0x383   : > { %3516 = vrot.lane.b32.xlu0 %v3304_v25, %s7089_s26  ;;  %vm11349_vm15 = vmmov %vm11340_vm1 }
 0x384   : > { %v3011_v29 = vpop.permute.xlu0 %3010  ;;  %v3099_v60 = vsel %vm11349_vm15, %v8593_v18, %v2887_v54  ;;  %vm11350_vm5 = vmmov %vm11342_vm2 }
 0x385   : > { %v3129_v47 = vsel %vm11342_vm2, %v3097_v43, %v3011_v29  ;;  %v3009_v12 = vpop.permute.xlu1 %3008  ;;  %vm11353_vm14 = vmmov %vm11346_vm3 }
 0x386   : > { %v3161_v2 = vrot.slane %v3129_v47, 7  ;;  %v3257_v58 = vrot.slane %v3129_v47, 1  ;;  %v3128_v46 = vsel %vm11343_vm4, %v3096_v16, %v3009_v12  ;;  %3394 = vrot.lane.b32.xlu1 %v3129_v47, %s7088_s22  ;;  %v3098_v16 = vsel %vm11340_vm1, %v8597_v44, %v2885_v26  ;;  %vm11351_vm4 = vmmov %vm11346_vm3 }
 0x387   : > { %v3160_v3 = vrot.slane %v3128_v46, 7  ;;  %v3256_v25 = vrot.slane %v3128_v46, 1  ;;  %3392 = vrot.lane.b32.xlu0 %v3128_v46, %s7088_s22  ;;  %vm11356_vm15 = vmmov %vm11340_vm1 }
 0x388   : > { %v2895_v34 = vpop.permute.xlu0 %2894 }
 0x389   : > { %v2893_v37 = vpop.permute.xlu1 %2892  ;;  %v3302_v4 = vsel %vm11346_vm3, %v3256_v25, %v3257_v58  ;;  %v8891_v43 = vsel %vm11347_vm0, %v3160_v3, %v3161_v2  ;;  %v8896_v35 = vsel %vm11348_vm6, %v3159_v51, %v3160_v3  ;;  %v3303_v51 = vsel %vm11351_vm4, %v3255_v0, %v3256_v25  ;;  %vm11354_vm3 = vmmov %vm11347_vm0 }
 0x38a   : > { %3514 = vrot.lane.b32.xlu1 %v3317_v45, %s7089_s26  ;;  %v3319_v44 = vsel %vm7827_vm10, %v3303_v51, 0.0  ;;  %vm11355_vm6 = vmmov %vm11340_vm1 }
 0x38b   : > { %3520 = vrot.lane.b32.xlu0 %v3302_v4, %s7089_s26  ;;  %v3101_v25 = vsel %vm11355_vm6, %v8609_v17, %v2891_v24  ;;  %vm11357_vm1 = vmmov %vm11342_vm2 }
 0x38c   : > { %v3015_v29 = vpop.permute.xlu0 %3014 }
 0x38d   : > { %v3131_v47 = vsel %vm11350_vm5, %v3099_v60, %v3015_v29  ;;  %v3013_v12 = vpop.permute.xlu1 %3012  ;;  %vm11358_vm5 = vmmov %vm11357_vm1 }
 0x38e   : > { %v3163_v46 = vrot.slane %v3131_v47, 7  ;;  %v3259_v62 = vrot.slane %v3131_v47, 1  ;;  %v3130_v45 = vsel %vm11342_vm2, %v3098_v16, %v3013_v12  ;;  %3398 = vrot.lane.b32.xlu1 %v3131_v47, %s7088_s22  ;;  %v3100_v16 = vsel %vm11356_vm15, %v8613_v19, %v2889_v15  ;;  %vm11359_vm2 = vmmov %vm11351_vm4 }
 0x38f   : > { %v3162_v3 = vrot.slane %v3130_v45, 7  ;;  %v3258_v4 = vrot.slane %v3130_v45, 1  ;;  %3396 = vrot.lane.b32.xlu0 %v3130_v45, %s7088_s22  ;;  %vm11361_vm4 = vmmov %vm11359_vm2 }
 0x390   : > { %v2899_v18 = vpop.permute.xlu0 %2898  ;;  %vm11366_vm15 = vmmov %vm11357_vm1 }
 0x391   : > { %v2897_v54 = vpop.permute.xlu1 %2896  ;;  %v3300_v26 = vsel %vm11353_vm14, %v3258_v4, %v3259_v62  ;;  %v8915_v60 = vsel %vm11354_vm3, %v3162_v3, %v3163_v46  ;;  %v8920_v0 = vsel %vm11347_vm0, %v3161_v2, %v3162_v3  ;;  %v3301_v2 = vsel %vm11359_vm2, %v3257_v58, %v3258_v4  ;;  %vm11362_vm14 = vmmov %vm11347_vm0 }
 0x392   : > { %3518 = vrot.lane.b32.xlu1 %v3319_v44, %s7089_s26  ;;  %v3321_v19 = vsel %vm7859_vm11, %v3301_v2, 0.0  ;;  %vm11363_vm3 = vmmov %vm11347_vm0 }
 0x393   : > { %3524 = vrot.lane.b32.xlu0 %v3300_v26, %s7089_s26  ;;  %vm11364_vm0 = vmmov %vm11355_vm6 }
 0x394   : > { %v3019_v29 = vpop.permute.xlu0 %3018  ;;  %v3103_v4 = vsel %vm11364_vm0, %v8625_v22, %v2895_v34  ;;  %vm11365_vm6 = vmmov %vm11364_vm0 }
 0x395   : > { %v3133_v47 = vsel %vm11357_vm1, %v3101_v25, %v3019_v29  ;;  %v3017_v12 = vpop.permute.xlu1 %3016 }
 0x396   : > { %v3165_v45 = vrot.slane %v3133_v47, 7  ;;  %v3261_v51 = vrot.slane %v3133_v47, 1  ;;  %v3132_v44 = vsel %vm11358_vm5, %v3100_v16, %v3017_v12  ;;  %3402 = vrot.lane.b32.xlu1 %v3133_v47, %s7088_s22  ;;  %v3102_v16 = vsel %vm11365_vm6, %v8629_v33, %v2893_v37  ;;  %vm11367_vm5 = vmmov %vm11359_vm2 }
 0x397   : > { %v3164_v3 = vrot.slane %v3132_v44, 7  ;;  %v3260_v26 = vrot.slane %v3132_v44, 1  ;;  %3400 = vrot.lane.b32.xlu0 %v3132_v44, %s7088_s22  ;;  %vm11372_vm6 = vmmov %vm11357_vm1 }
 0x398   : > { %v2903_v17 = vpop.permute.xlu0 %2902 }
 0x399   : > { %v2901_v24 = vpop.permute.xlu1 %2900  ;;  %v3298_v15 = vsel %vm11361_vm4, %v3260_v26, %v3261_v51  ;;  %v8939_v25 = vsel %vm11362_vm14, %v3164_v3, %v3165_v45  ;;  %v8944_v58 = vsel %vm11363_vm3, %v3163_v46, %v3164_v3  ;;  %v3299_v46 = vsel %vm11367_vm5, %v3259_v62, %v3260_v26  ;;  %vm11369_vm4 = vmmov %vm11363_vm3 }
 0x39a   : > { %3522 = vrot.lane.b32.xlu1 %v3321_v19, %s7089_s26  ;;  %v3323_v33 = vsel %vm7891_vm12, %v3299_v46, 0.0  ;;  %vm11370_vm14 = vmmov %vm11363_vm3 }
 0x39b   : > { %3528 = vrot.lane.b32.xlu0 %v3298_v15, %s7089_s26  ;;  %vm11371_vm3 = vmmov %vm11364_vm0 }
 0x39c   : > { %v3023_v29 = vpop.permute.xlu0 %3022  ;;  %v3105_v26 = vsel %vm11371_vm3, %v8641_v27, %v2899_v18  ;;  %vm11380_vm3 = vmmov %vm11364_vm0 }
 0x39d   : > { %v3135_v47 = vsel %vm11366_vm15, %v3103_v4, %v3023_v29  ;;  %v3021_v12 = vpop.permute.xlu1 %3020  ;;  %vm11373_vm15 = vmmov %vm11357_vm1 }
 0x39e   : > { %v3167_v44 = vrot.slane %v3135_v47, 7  ;;  %v3263_v2 = vrot.slane %v3135_v47, 1  ;;  %v3134_v19 = vsel %vm11357_vm1, %v3102_v16, %v3021_v12  ;;  %3406 = vrot.lane.b32.xlu1 %v3135_v47, %s7088_s22  ;;  %v3104_v16 = vsel %vm11364_vm0, %v8645_v31, %v2897_v54  ;;  %vm11374_vm1 = vmmov %vm11359_vm2 }
 0x39f   : > { %v3166_v3 = vrot.slane %v3134_v19, 7  ;;  %v3262_v15 = vrot.slane %v3134_v19, 1  ;;  %3404 = vrot.lane.b32.xlu0 %v3134_v19, %s7088_s22  ;;  %vm11376_vm5 = vmmov %vm11374_vm1 }
 0x3a0   : > { %v2907_v22 = vpop.permute.xlu0 %2906 }
 0x3a1   : > { %v2905_v34 = vpop.permute.xlu1 %2904  ;;  %v3296_v37 = vsel %vm11359_vm2, %v3262_v15, %v3263_v2  ;;  %v8963_v4 = vsel %vm11369_vm4, %v3166_v3, %v3167_v44  ;;  %v8968_v62 = vsel %vm11370_vm14, %v3165_v45, %v3166_v3  ;;  %v3297_v45 = vsel %vm11374_vm1, %v3261_v51, %v3262_v15  ;;  %vm11377_vm2 = vmmov %vm11369_vm4 }
 0x3a2   : > { %3526 = vrot.lane.b32.xlu1 %v3323_v33, %s7089_s26  ;;  %v3325_v31 = vsel %vm7923_vm13, %v3297_v45, 0.0  ;;  %vm11378_vm4 = vmmov %vm11377_vm2 }
 0x3a3   : > { %3532 = vrot.lane.b32.xlu0 %v3296_v37, %s7089_s26  ;;  %vm11379_vm14 = vmmov %vm11364_vm0 }
 0x3a4   : > { %v3027_v29 = vpop.permute.xlu0 %3026  ;;  %v3107_v15 = vsel %vm11379_vm14, %v8657_v56, %v2903_v17  ;;  %vm11381_vm0 = vmmov %vm11372_vm6 }
 0x3a5   : > { %v3137_v47 = vsel %vm11372_vm6, %v3105_v26, %v3027_v29  ;;  %v3025_v12 = vpop.permute.xlu1 %3024  ;;  %vm11382_vm6 = vmmov %vm11381_vm0 }
 0x3a6   : > { %v3169_v19 = vrot.slane %v3137_v47, 7  ;;  %v3265_v46 = vrot.slane %v3137_v47, 1  ;;  %v3136_v33 = vsel %vm11373_vm15, %v3104_v16, %v3025_v12  ;;  %3410 = vrot.lane.b32.xlu1 %v3137_v47, %s7088_s22  ;;  %v3106_v16 = vsel %vm11380_vm3, %v8661_v8, %v2901_v24  ;;  %vm11383_vm15 = vmmov %vm11374_vm1 }
 0x3a7   : > { %v3168_v3 = vrot.slane %v3136_v33, 7  ;;  %v3264_v37 = vrot.slane %v3136_v33, 1  ;;  %3408 = vrot.lane.b32.xlu0 %v3136_v33, %s7088_s22  ;;  %vm11384_vm1 = vnez %v11087_v10  ;;  %vm11386_vm14 = vmmov %vm11380_vm3  ;;  %v11389_v10 = vld [vmem:[#allocation45_spill] sm:$0xff] }
 0x3a8   : > { %v2911_v27 = vpop.permute.xlu0 %2910 }
 0x3a9   : > { %v2909_v18 = vpop.permute.xlu1 %2908  ;;  %v3294_v54 = vsel %vm11376_vm5, %v3264_v37, %v3265_v46  ;;  %v8987_v26 = vsel %vm11377_vm2, %v3168_v3, %v3169_v19  ;;  %v8992_v51 = vsel %vm11378_vm4, %v3167_v44, %v3168_v3  ;;  %v3295_v44 = vsel %vm11383_vm15, %v3263_v2, %v3264_v37  ;;  %vm11385_vm4 = vmmov %vm11377_vm2 }
 0x3aa   : > { %3530 = vrot.lane.b32.xlu1 %v3325_v31, %s7089_s26  ;;  %v3327_v8 = vsel %vm11384_vm1, %v3295_v44, 0.0  ;;  %v3109_v37 = vsel %vm11386_vm14, %v8673_v21, %v2907_v22  ;;  %vm11388_vm15 = vmmov %vm11376_vm5 }
 0x3ab   : > { %3536 = vrot.lane.b32.xlu0 %v3294_v54, %s7089_s26  ;;  %vm11392_vm14 = vmmov %vm11385_vm4 }
 0x3ac   : > { %v3031_v29 = vpop.permute.xlu0 %3030 }
 0x3ad   : > { %v3139_v47 = vsel %vm11381_vm0, %v3107_v15, %v3031_v29  ;;  %v3029_v12 = vpop.permute.xlu1 %3028 }
 0x3ae   : > { %v3171_v33 = vrot.slane %v3139_v47, 7  ;;  %v3267_v45 = vrot.slane %v3139_v47, 1  ;;  %v3138_v31 = vsel %vm11382_vm6, %v3106_v16, %v3029_v12  ;;  %3414 = vrot.lane.b32.xlu1 %v3139_v47, %s7088_s22  ;;  %v3108_v16 = vsel %vm11380_vm3, %v8677_v6, %v2905_v34  ;;  %vm11387_vm6 = vmmov %vm11381_vm0 }
 0x3af   : > { %v3170_v3 = vrot.slane %v3138_v31, 7  ;;  %v3266_v54 = vrot.slane %v3138_v31, 1  ;;  %3412 = vrot.lane.b32.xlu0 %v3138_v31, %s7088_s22 }
 0x3b0   : > { %v2915_v56 = vpop.permute.xlu0 %2914 }
 0x3b1   : > { %v2913_v17 = vpop.permute.xlu1 %2912  ;;  %v3292_v24 = vsel %vm11376_vm5, %v3266_v54, %v3267_v45  ;;  %v9011_v15 = vsel %vm11377_vm2, %v3170_v3, %v3171_v33  ;;  %v9016_v2 = vsel %vm11385_vm4, %v3169_v19, %v3170_v3  ;;  %v3293_v19 = vsel %vm11388_vm15, %v3265_v46, %v3266_v54  ;;  %vm11391_vm2 = vmmov %vm11388_vm15 }
 0x3b2   : > { %3534 = vrot.lane.b32.xlu1 %v3327_v8, %s7089_s26  ;;  %vm11390_vm5 = vnez %v11389_v10  ;;  %v3111_v54 = vsel %vm11380_vm3, %v8689_v50, %v2911_v27  ;;  %vm11394_vm15 = vmmov %vm11387_vm6 }
 0x3b3   : > { %3540 = vrot.lane.b32.xlu0 %v3292_v24, %s7089_s26  ;;  %v3329_v6 = vsel %vm11390_vm5, %v3293_v19, 0.0 }
 0x3b4   : > { %v3035_v29 = vpop.permute.xlu0 %3034 }
 0x3b5   : > { %v3141_v47 = vsel %vm11381_vm0, %v3109_v37, %v3035_v29  ;;  %v3033_v12 = vpop.permute.xlu1 %3032  ;;  %vm11393_vm0 = vmmov %vm11380_vm3  ;;  %vm11397_vm3 = vcmp.lt.s32.totalorder %v7677_v41, 1 }
 0x3b6   : > { %v3173_v31 = vrot.slane %v3141_v47, 7  ;;  %v3269_v44 = vrot.slane %v3141_v47, 1  ;;  %v3140_v8 = vsel %vm11387_vm6, %v3108_v16, %v3033_v12  ;;  %3418 = vrot.lane.b32.xlu1 %v3141_v47, %s7088_s22  ;;  %v3110_v16 = vsel %vm11393_vm0, %v8693_v11, %v2909_v18  ;;  %vm11398_vm0 = vmmov %vm11397_vm3 }
 0x3b7   : > { %v3172_v3 = vrot.slane %v3140_v8, 7  ;;  %v3268_v24 = vrot.slane %v3140_v8, 1  ;;  %3416 = vrot.lane.b32.xlu0 %v3140_v8, %s7088_s22 }
 0x3b8   : > { %v2919_v21 = vpop.permute.xlu0 %2918 }
 0x3b9   : > { %v2917_v22 = vpop.permute.xlu1 %2916  ;;  %v3290_v34 = vsel %vm11391_vm2, %v3268_v24, %v3269_v44  ;;  %v9035_v37 = vsel %vm11385_vm4, %v3172_v3, %v3173_v31  ;;  %v9040_v46 = vsel %vm11392_vm14, %v3171_v33, %v3172_v3  ;;  %v3291_v33 = vsel %vm11391_vm2, %v3267_v45, %v3268_v24  ;;  %vm11396_vm14 = vmmov %vm11391_vm2 }
 0x3ba   : > { %3538 = vrot.lane.b32.xlu1 %v3329_v6, %s7089_s26  ;;  %vm11395_vm4 = vnez %v11094_v36  ;;  %vm11401_vm2 = vcmask 97280  }
 0x3bb   : > { %3544 = vrot.lane.b32.xlu0 %v3290_v34, %s7089_s26  ;;  %v3331_v11 = vsel %vm11395_vm4, %v3291_v33, 0.0 }
 0x3bc   : > { %v3039_v29 = vpop.permute.xlu0 %3038 }
 0x3bd   : > { %v3143_v47 = vsel %vm11387_vm6, %v3111_v54, %v3039_v29  ;;  %v3037_v12 = vpop.permute.xlu1 %3036  ;;  %vm11399_vm6 = vcmask 48128  }
 0x3be   : > { %v3175_v8 = vrot.slane %v3143_v47, 7  ;;  %v3271_v19 = vrot.slane %v3143_v47, 1  ;;  %v3142_v6 = vsel %vm11394_vm15, %v3110_v16, %v3037_v12  ;;  %3422 = vrot.lane.b32.xlu1 %v3143_v47, %s7088_s22  ;;  %v3113_v24 = vsel %vm11399_vm6, %v8705_v53, %v2915_v56  ;;  %vm11400_vm15 = vmmov %vm11399_vm6 }
 0x3bf   : > { %v3174_v3 = vrot.slane %v3142_v6, 7  ;;  %v3270_v34 = vrot.slane %v3142_v6, 1  ;;  %3420 = vrot.lane.b32.xlu0 %v3142_v6, %s7088_s22  ;;  %v3112_v16 = vsel %vm11400_vm15, %v8709_v55, %v2913_v17  ;;  %vm11406_vm15 = vcmp.lt.s32.totalorder %v7677_v41, 1 }
 0x3c0   : > { %v2923_v50 = vpop.permute.xlu0 %2922 }
 0x3c1   : > { %v2921_v27 = vpop.permute.xlu1 %2920  ;;  %v3288_v18 = vsel %vm11396_vm14, %v3270_v34, %v3271_v19  ;;  %v9059_v54 = vsel %vm11397_vm3, %v3174_v3, %v3175_v8  ;;  %v9064_v45 = vsel %vm11398_vm0, %v3173_v31, %v3174_v3  ;;  %vm11402_vm14 = vmmov %vm11401_vm2  ;;  %vm11403_vm3 = vcmp.lt.s32.totalorder %v7677_v41, 7 }
 0x3c2   : > { %3542 = vrot.lane.b32.xlu1 %v3331_v11, %s7089_s26  ;;  %v3289_v31 = vsel %vm11403_vm3, %v3269_v44, %v3270_v34  ;;  %vm11404_vm0 = vmmov %vm11399_vm6  ;;  %vm11405_vm6 = vnez %v11096_v40 }
 0x3c3   : > { %3548 = vrot.lane.b32.xlu0 %v3288_v18, %s7089_s26  ;;  %v3333_v55 = vsel %vm11405_vm6, %v3289_v31, 0.0  ;;  %vm11408_vm3 = vmmov %vm11406_vm15  ;;  %vm11416_vm6 = vcmp.lt.s32.totalorder %v7677_v41, 1 }
 0x3c4   : > { %v3043_v29 = vpop.permute.xlu0 %3042 }
 0x3c5   : > { %v3145_v47 = vsel %vm11401_vm2, %v3113_v24, %v3043_v29  ;;  %v3041_v12 = vpop.permute.xlu1 %3040 }
 0x3c6   : > { %v3177_v6 = vrot.slane %v3145_v47, 7  ;;  %v3144_v33 = vsel %vm11402_vm14, %v3112_v16, %v3041_v12  ;;  %3426 = vrot.lane.b32.xlu1 %v3145_v47, %s7088_s22  ;;  %vm11407_vm14 = vmmov %vm11404_vm0  ;;  %v3273_v34 = vrot.slane %v3145_v47, 1 }
 0x3c7   : > { %v3176_v3 = vrot.slane %v3144_v33, 7  ;;  %3424 = vrot.lane.b32.xlu0 %v3144_v33, %s7088_s22  ;;  %v3272_v18 = vrot.slane %v3144_v33, 1 }
 0x3c8   : > { %v2927_v11 = vpop.permute.xlu0 %2926 }
 0x3c9   : > { %v3119_v53 = vsel %vm11404_vm0, %v8767_v61, %v2927_v11  ;;  %v2925_v56 = vpop.permute.xlu1 %2924  ;;  %v9083_v17 = vsel %vm11406_vm15, %v3176_v3, %v3177_v6  ;;  %v9094_v61 = vsel %vm11408_vm3, %v3175_v8, %v3176_v3  ;;  %vm11409_vm0 = vmmov %vm11401_vm2 }
 0x3ca   : > { %v9087_v24 = vsel %vm11401_vm2, %v3119_v53, %v8764_v5  ;;  %v3118_v44 = vsel %vm11407_vm14, %v8771_v48, %v2925_v56  ;;  %3546 = vrot.lane.b32.xlu1 %v3333_v55, %s7089_s26  ;;  %vm11410_vm15 = vmmov %vm11407_vm14 }
 0x3cb   : > { %v9098_v29 = vsel %vm11409_vm0, %v3118_v44, %v8744_v23  ;;  %v3115_v16 = vsel %vm11410_vm15, %v8724_v38, %v2919_v21  ;;  %v3183_v5 = vrot.slane %v9087_v24, 7  ;;  %vm11411_vm2 = vmmov %vm11407_vm14 }
 0x3cc   : > { %v3047_v12 = vpop.permute.xlu0 %3046  ;;  %v3182_v33 = vrot.slane %v9098_v29, 7  ;;  %3436 = vrot.lane.b32.xlu0 %v9098_v29, %s7088_s22  ;;  %v3114_v48 = vsel %vm11411_vm2, %v8730_v39, %v2917_v22  ;;  %vm11412_vm14 = vmmov %vm11409_vm0  ;;  %v3117_v22 = vsel %vm11411_vm2, %v8749_v9, %v2923_v50 }
 0x3cd   : > { %v3147_v8 = vsel %vm11412_vm14, %v3115_v16, %v3047_v12  ;;  %v3045_v47 = vpop.permute.xlu1 %3044  ;;  %vm11413_vm3 = vmmov %vm11409_vm0  ;;  %vm11414_vm0 = vcmp.lt.s32.totalorder %v7677_v41, 7  ;;  %vm11417_vm14 = vnez %v11098_v49 }
 0x3ce   : > { %v3179_v31 = vrot.slane %v3147_v8, 7  ;;  %v3146_v23 = vsel %vm11413_vm3, %v3114_v48, %v3045_v47  ;;  %3430 = vrot.lane.b32.xlu1 %v3147_v8, %s7088_s22  ;;  %v3287_v38 = vsel %vm11414_vm0, %v3271_v19, %v3272_v18  ;;  %vm11415_vm15 = vmmov %vm11414_vm0  ;;  %v9118_v39 = vsel %vm11416_vm6, %v3182_v33, %v3183_v5 }
 0x3cf   : > { %v3178_v21 = vrot.slane %v3146_v23, 7  ;;  %v3286_v3 = vsel %vm11415_vm15, %v3272_v18, %v3273_v34  ;;  %v3335_v53 = vsel %vm11417_vm14, %v3287_v38, 0.0  ;;  %vm11418_vm3 = vmmov %vm11416_vm6  ;;  %v3274_v55 = vrot.slane %v3146_v23, 1 }
 0x3d0   : > { %3552 = vrot.lane.b32.xlu0 %v3286_v3, %s7089_s26  ;;  %vm11419_vm0 = vmmov %vm11418_vm3  ;;  %vm11420_vm15 = vcmask 97280   ;;  %v3275_v44 = vrot.slane %v3147_v8, 1  ;;  %v3278_v38 = vrot.slane %v9098_v29, 1  ;;  %vm11431_vm14 = vnez %v11102_v42 }
 0x3d1   : > { %v3051_v11 = vpop.permute.xlu1 %3050  ;;  %v9126_v19 = vsel %vm11418_vm3, %v3178_v21, %v3179_v31  ;;  %v9130_v56 = vsel %vm11419_vm0, %v3177_v6, %v3178_v21  ;;  %vm11421_vm6 = vmmov %vm11411_vm2 }
 0x3d2   : > { %v3149_v18 = vsel %vm11420_vm15, %v3117_v22, %v3051_v11  ;;  %3550 = vrot.lane.b32.xlu1 %v3335_v53, %s7089_s26  ;;  %v3116_v9 = vsel %vm11421_vm6, %v8753_v30, %v2921_v27  ;;  %vm11422_vm2 = vmmov %vm11419_vm0  ;;  %vm11424_vm0 = vcmp.lt.s32.totalorder %v7677_v41, 7  ;;  %v11426_v27 = vrot.slane %v8787_v20, 7 }
 0x3d3   : > { %v3181_v16 = vrot.slane %v3149_v18, 7  ;;  %v3277_v48 = vrot.slane %v3149_v18, 1  ;;  %vm11423_vm3 = vmmov %vm11420_vm15  ;;  %v3285_v47 = vsel %vm11424_vm0, %v3273_v34, %v3274_v55 }
 0x3d4   : > { %3428 = vrot.lane.b32.xlu0 %v3146_v23, %s7088_s22  ;;  %vm11425_vm15 = vmmov %vm11424_vm0 }
 0x3d5   : > { %v3049_v50 = vpop.permute.xlu1 %3048  ;;  %v9139_v12 = vsel %vm11422_vm2, %v3181_v16, %v3182_v33  ;;  %v3284_v23 = vsel %vm11425_vm15, %v3274_v55, %v3275_v44  ;;  %vm11427_vm6 = vmmov %vm11422_vm2  ;;  %vm11428_vm2 = vnez %v11100_v57  ;;  %v3281_v22 = vsel %vm11425_vm15, %v3277_v48, %v3278_v38 }
 0x3d6   : > { %v3148_v6 = vsel %vm11423_vm3, %v3116_v9, %v3049_v50  ;;  %3434 = vrot.lane.b32.xlu1 %v3149_v18, %s7088_s22  ;;  %v3215_v33 = vsel %vm11427_vm6, %v3183_v5, %v11426_v27  ;;  %v3337_v21 = vsel %vm11428_vm2, %v3285_v47, 0.0  ;;  %vm11429_vm3 = vmmov %vm11427_vm6  ;;  %vm11432_vm6 = vcmask 146432  }
 0x3d7   : > { %v3180_v8 = vrot.slane %v3148_v6, 7  ;;  %vm11430_vm0 = vmmov %vm11429_vm3  ;;  %v3276_v29 = vrot.slane %v3148_v6, 1  ;;  %v3216_v5 = vsel %vm11431_vm14, %v3215_v33, 0.0  ;;  %vm11434_vm2 = vcmask 293888  }
 0x3d8   : > { %3556 = vrot.lane.b32.xlu0 %v3284_v23, %s7089_s26 }
 0x3d9   : > { %v3377_v30 = vpop.permute.xlu0 %3376  ;;  %v9157_v34 = vsel %vm11429_vm3, %v3180_v8, %v3181_v16  ;;  %v9161_v3 = vsel %vm11430_vm0, %v3179_v31, %v3180_v8  ;;  %vm11433_vm3 = vnez %v11105_v13  ;;  %vm11435_vm0 = vmmov %vm11425_vm15  ;;  %v3279_v16 = vrot.slane %v9087_v24, 1  ;;  %v3379_v50 = vpop.permute.xlu1 %3378 }
 0x3da   : > { %3554 = vrot.lane.b32.xlu1 %v3337_v21, %s7089_s26  ;;  %v3600_v11 = vsel %vm11432_vm6, %v3216_v5, %v3377_v30  ;;  %v3341_v55 = vsel %vm11433_vm3, %v3281_v22, 0.0  ;;  %v3283_v18 = vsel %vm11435_vm0, %v3275_v44, %v3276_v29  ;;  %vm11436_vm15 = vcmask 441344   ;;  %vm11437_vm14 = vmmov %vm11435_vm0  ;;  %v11443_v21 = vld [vmem:[#allocation60_spill] sm:$0xff]  ;;  %v11446_v22 = vld [vmem:[#allocation47_spill] sm:$0xff] }
 0x3db   : > { %v3282_v9 = vsel %vm11437_vm14, %v3276_v29, %v3277_v48  ;;  %vm11438_vm6 = vnez %v11109_v63  ;;  %v11440_v48 = vrot.slane %v8787_v20, 1  ;;  %vm11441_vm14 = vmmov %vm11435_vm0 }
 0x3dc   : > { %3432 = vrot.lane.b32.xlu0 %v3148_v6, %s7088_s22  ;;  %v3339_v47 = vsel %vm11438_vm6, %v3283_v18, 0.0  ;;  %vm11450_vm6 = vcmask 293888   ;;  %v11453_v18 = vld [vmem:[#allocation6_spill] sm:$0xff] }
 0x3dd   : > { %v3505_v53 = vpop.permute.xlu0 %3504  ;;  %v3311_v30 = vsel %vm11441_vm14, %v3279_v16, %v11440_v48  ;;  %vm11451_vm3 = vmmov %vm11450_vm6 }
 0x3de   : > { %v3632_v31 = vsel %vm11434_vm2, %v3600_v11, %v3505_v53  ;;  %3562 = vrot.lane.b32.xlu1 %v3341_v55, %s7089_s26  ;;  %vm11439_vm2 = vmmov %vm11435_vm0  ;;  %vm11442_vm0 = vnez %v11112_v28  ;;  %v11448_v11 = vld [vmem:[#allocation8_spill] sm:$0xff] }
 0x3df   : > { %6802 = vmatprep.mubr.msk.f32.mxu1 %vm11436_vm15, %v3632_v31  ;;  %v3280_v8 = vsel %vm11439_vm2, %v3278_v38, %v3279_v16  ;;  %v3343_v38 = vsel %vm11442_vm0, %v3311_v30, 0.0  ;;  %vm11444_vm15 = vcmask 146432   ;;  %vm11447_vm2 = vnez %v11446_v22 }
 0x3e0   : > { %3560 = vrot.lane.b32.xlu0 %v3282_v9, %s7089_s26  ;;  %v3383_v44 = vpop.permute.xlu1 %3382  ;;  %v3601_v29 = vsel %vm11444_vm15, %v11443_v21, %v3379_v50  ;;  %vm11449_vm14 = vmmov %vm11444_vm15  ;;  %vm11452_vm0 = vcmask 441344   ;;  %v11455_v9 = vld [vmem:[#allocation10_spill] sm:$0xff] }
 0x3e1   : > { %v3381_v6 = vpop.permute.xlu0 %3380  ;;  %vm11454_vm15 = vmmov %vm11452_vm0 }
 0x3e2   : > { %3558 = vrot.lane.b32.xlu1 %v3339_v47, %s7089_s26  ;;  %v11456_v47 = vld [vmem:[#allocation7_spill] sm:$0xff] }
 0x3e4   : > { %3564 = vrot.lane.b32.xlu0 %v3280_v8, %s7089_s26 }
 0x3e5   : > { %v3509_v23 = vpop.permute.xlu0 %3508 }
 0x3e6   : > { %3438 = vrot.lane.b32.xlu1 %v9087_v24, %s7088_s22  ;;  %v11445_v24 = vld [vmem:[#allocation62_spill] sm:$0xff] }
 0x3e7   : > { %v3218_v20 = vsel %vm11447_vm2, %v11445_v24, 0.0  ;;  %vm11466_vm2 = vcmask 441344  }
 0x3e8   : > { %v3387_v27 = vpop.permute.xlu1 %3386  ;;  %4201 = vrot.lane.b32.xlu0 %v7269_v59, %s7091_s30  ;;  %v3602_v53 = vsel %vm11449_vm14, %v3218_v20, %v3381_v6  ;;  %v11457_v6 = vld [vmem:[#allocation61_spill] sm:$0xff] }
 0x3e9   : > { %v3385_v33 = vpop.permute.xlu0 %3384  ;;  %v3634_v31 = vsel %vm11451_vm3, %v3602_v53, %v3509_v23  ;;  %v11459_v23 = vld [vmem:[#allocation48_spill] sm:$0xff]  ;;  %v11469_v53 = vld [vmem:[#allocation9_spill] sm:$0xff] }
 0x3ea   : > { %3566 = vrot.lane.b32.xlu1 %v3343_v38, %s7089_s26  ;;  %vm11460_vm3 = vnez %v11459_v23  ;;  %v11461_v38 = vld [vmem:[#allocation4_spill] sm:$0xff] }
 0x3eb   : > { %v3220_v48 = vsel %vm11460_vm3, %v8848_v14, 0.0  ;;  %v11468_v14 = vld [vmem:[#allocation12_spill] sm:$0xff]  ;;  %vm11476_vm3 = vcmask 441344  }
 0x3ec   : > { %v3507_v5 = vpop.permute.xlu1 %3506  ;;  %4205 = vrot.lane.b32.xlu0 %v11448_v11, %s7091_s30 }
 0x3ed   : > { %v3633_v59 = vsel %vm11450_vm6, %v3601_v29, %v3507_v5  ;;  %v3513_v55 = vpop.permute.xlu0 %3512  ;;  %vm11458_vm6 = vmmov %vm11449_vm14  ;;  %vm11463_vm14 = vcmask 293888   ;;  %v11465_v5 = vld [vmem:[#allocation5_spill] sm:$0xff] }
 0x3ee   : > { %6803 = vmatmul.mubr.msk.f32.vlgmr.msra.gmra.mrb[18].mxu1 %vm11452_vm0, %v3633_v59  ;;  %4203 = vrot.lane.b32.xlu1 %v11453_v18, %s7091_s30  ;;  %v3603_v8 = vsel %vm11458_vm6, %v11457_v6, %v3383_v44  ;;  %vm11462_vm0 = vmmov %vm11458_vm6  ;;  %v11470_v59 = vld [vmem:[#allocation49_spill] sm:$0xff]  ;;  %v11472_v18 = vld [vmem:[#allocation14_spill] sm:$0xff] }
 0x3ef   : > { %6805 = vmatprep.mubr.msk.f32.mxu1 %vm11454_vm15, %v3634_v31  ;;  %v3604_v21 = vsel %vm11462_vm0, %v3220_v48, %v3385_v33  ;;  %vm11464_vm15 = vmmov %vm11463_vm14  ;;  %v3605_v33 = vsel %vm11462_vm0, %v8843_v7, %v3387_v27  ;;  %v11475_v48 = vld [vmem:[#allocation11_spill] sm:$0xff] }
 0x3f0   : > { %v3391_v16 = vpop.permute.xlu1 %3390  ;;  %4209 = vrot.lane.b32.xlu0 %v11455_v9, %s7091_s30  ;;  %v3636_v20 = vsel %vm11464_vm15, %v3604_v21, %v3513_v55  ;;  %vm11467_vm6 = vmmov %vm11466_vm2 }
 0x3f1   : > { %v3389_v50 = vpop.permute.xlu0 %3388 }
 0x3f2   : > { %4207 = vrot.lane.b32.xlu1 %v11456_v47, %s7091_s30 }
 0x3f4   : > { %v3511_v30 = vpop.permute.xlu1 %3510  ;;  %4199 = vrot.lane.b32.xlu0 %v11461_v38, %s7091_s30  ;;  %v11480_v38 = vld [vmem:[#allocation36_spill] sm:$0xff] }
 0x3f5   : > { %v3635_v29 = vsel %vm11463_vm14, %v3603_v8, %v3511_v30  ;;  %v3517_v24 = vpop.permute.xlu0 %3516  ;;  %vm11471_vm14 = vnez %v11470_v59  ;;  %v11479_v30 = vld [vmem:[#allocation13_spill] sm:$0xff] }
 0x3f6   : > { %4197 = vrot.lane.b32.xlu1 %v11465_v5, %s7091_s30  ;;  %6806 = vmatmul.mubr.msk.f32.gmra.mrb[20].mxu1 %vm11466_vm2, %v3635_v29  ;;  %v3222_v55 = vsel %vm11471_vm14, %v8872_v1, 0.0  ;;  %vm11473_vm2 = vmmov %vm11462_vm0  ;;  %v11478_v1 = vld [vmem:[#allocation16_spill] sm:$0xff]  ;;  %vm11486_vm14 = vcmask 441344  }
 0x3f7   : > { %6808 = vmatprep.mubr.msk.f32.mxu1 %vm11467_vm6, %v3636_v20  ;;  %v3606_v9 = vsel %vm11473_vm2, %v3222_v55, %v3389_v50  ;;  %vm11474_vm6 = vmmov %vm11464_vm15  ;;  %v3607_v50 = vsel %vm11473_vm2, %v8867_v32, %v3391_v16  ;;  %v11489_v55 = vld [vmem:[#allocation17_spill] sm:$0xff] }
 0x3f8   : > { %v3395_v44 = vpop.permute.xlu1 %3394  ;;  %4213 = vrot.lane.b32.xlu0 %v11468_v14, %s7091_s30  ;;  %v3638_v8 = vsel %vm11474_vm6, %v3606_v9, %v3517_v24  ;;  %vm11477_vm0 = vmmov %vm11476_vm3  ;;  %v11482_v24 = vld [vmem:[#allocation18_spill] sm:$0xff] }
 0x3f9   : > { %v3393_v11 = vpop.permute.xlu0 %3392 }
 0x3fa   : > { %4211 = vrot.lane.b32.xlu1 %v11469_v53, %s7091_s30 }
 0x3fc   : > { %v3515_v31 = vpop.permute.xlu1 %3514  ;;  %4217 = vrot.lane.b32.xlu0 %v11472_v18, %s7091_s30 }
 0x3fd   : > { %v3637_v47 = vsel %vm11464_vm15, %v3605_v33, %v3515_v31  ;;  %v3521_v6 = vpop.permute.xlu0 %3520  ;;  %vm11481_vm15 = vnez %v11480_v38  ;;  %v11485_v33 = vld [vmem:[#allocation15_spill] sm:$0xff]  ;;  %v11490_v31 = vld [vmem:[#allocation50_spill] sm:$0xff] }
 0x3fe   : > { %4215 = vrot.lane.b32.xlu1 %v11475_v48, %s7091_s30  ;;  %6809 = vmatmul.mubr.msk.f32.gmra.mrb[22].mxu1 %vm11476_vm3, %v3637_v47  ;;  %v3224_v21 = vsel %vm11481_vm15, %v8896_v35, 0.0  ;;  %vm11483_vm3 = vmmov %vm11473_vm2  ;;  %v11488_v35 = vld [vmem:[#allocation20_spill] sm:$0xff]  ;;  %v11492_v47 = vld [vmem:[#allocation22_spill] sm:$0xff]  ;;  %vm11496_vm15 = vcmask 441344  }
 0x3ff   : > { %6811 = vmatprep.mubr.msk.f32.mxu1 %vm11477_vm0, %v3638_v8  ;;  %v3608_v20 = vsel %vm11483_vm3, %v3224_v21, %v3393_v11  ;;  %vm11484_vm0 = vmmov %vm11474_vm6  ;;  %v3609_v11 = vsel %vm11483_vm3, %v8891_v43, %v3395_v44  ;;  %v11500_v21 = vld [vmem:[#allocation52_spill] sm:$0xff] }
 0x400   : > { %v3399_v7 = vpop.permute.xlu1 %3398  ;;  %4221 = vrot.lane.b32.xlu0 %v11478_v1, %s7091_s30  ;;  %v3640_v53 = vsel %vm11484_vm0, %v3608_v20, %v3521_v6  ;;  %vm11487_vm2 = vmmov %vm11486_vm14  ;;  %v11502_v20 = vld [vmem:[#allocation26_spill] sm:$0xff] }
 0x401   : > { %v3397_v27 = vpop.permute.xlu0 %3396 }
 0x402   : > { %4219 = vrot.lane.b32.xlu1 %v11479_v30, %s7091_s30  ;;  %v11495_v30 = vld [vmem:[#allocation19_spill] sm:$0xff] }
 0x404   : > { %v3519_v29 = vpop.permute.xlu1 %3518  ;;  %4225 = vrot.lane.b32.xlu0 %v11482_v24, %s7091_s30 }
 0x405   : > { %v3639_v5 = vsel %vm11474_vm6, %v3607_v50, %v3519_v29  ;;  %v3525_v14 = vpop.permute.xlu0 %3524  ;;  %vm11491_vm6 = vnez %v11490_v31  ;;  %v11499_v50 = vld [vmem:[#allocation21_spill] sm:$0xff] }
 0x406   : > { %4223 = vrot.lane.b32.xlu1 %v11485_v33, %s7091_s30  ;;  %6812 = vmatmul.mubr.msk.f32.gmra.mrb[24].mxu1 %vm11486_vm14, %v3639_v5  ;;  %v3226_v18 = vsel %vm11491_vm6, %v8920_v0, 0.0  ;;  %vm11493_vm14 = vmmov %vm11483_vm3  ;;  %v11498_v0 = vld [vmem:[#allocation24_spill] sm:$0xff]  ;;  %vm11506_vm6 = vcmask 441344  }
 0x407   : > { %6814 = vmatprep.mubr.msk.f32.mxu1 %vm11487_vm2, %v3640_v53  ;;  %v3610_v6 = vsel %vm11493_vm14, %v3226_v18, %v3397_v27  ;;  %vm11494_vm2 = vmmov %vm11484_vm0  ;;  %v3611_v27 = vsel %vm11493_vm14, %v8915_v60, %v3399_v7 }
 0x408   : > { %v3403_v32 = vpop.permute.xlu1 %3402  ;;  %4229 = vrot.lane.b32.xlu0 %v11488_v35, %s7091_s30  ;;  %v3642_v1 = vsel %vm11494_vm2, %v3610_v6, %v3525_v14  ;;  %vm11497_vm3 = vmmov %vm11496_vm15  ;;  %v11505_v35 = vld [vmem:[#allocation23_spill] sm:$0xff] }
 0x409   : > { %v3401_v16 = vpop.permute.xlu0 %3400 }
 0x40a   : > { %4227 = vrot.lane.b32.xlu1 %v11489_v55, %s7091_s30  ;;  %v11509_v55 = vld [vmem:[#allocation25_spill] sm:$0xff] }
 0x40c   : > { %v3523_v9 = vpop.permute.xlu1 %3522  ;;  %4233 = vrot.lane.b32.xlu0 %v11492_v47, %s7091_s30  ;;  %v11512_v47 = vld [vmem:[#allocation30_spill] sm:$0xff] }
 0x40d   : > { %v3641_v8 = vsel %vm11484_vm0, %v3609_v11, %v3523_v9  ;;  %v3529_v48 = vpop.permute.xlu0 %3528  ;;  %vm11501_vm0 = vnez %v11500_v21  ;;  %v11510_v11 = vld [vmem:[#allocation51_spill] sm:$0xff] }
 0x40e   : > { %4231 = vrot.lane.b32.xlu1 %v11495_v30, %s7091_s30  ;;  %6815 = vmatmul.mubr.msk.f32.gmra.mrb[26].mxu1 %vm11496_vm15, %v3641_v8  ;;  %v3228_v29 = vsel %vm11501_vm0, %v8944_v58, 0.0  ;;  %vm11503_vm15 = vmmov %vm11493_vm14  ;;  %v11508_v58 = vld [vmem:[#allocation28_spill] sm:$0xff]  ;;  %v11515_v30 = vld [vmem:[#allocation27_spill] sm:$0xff]  ;;  %vm11516_vm0 = vcmask 441344  }
 0x40f   : > { %6817 = vmatprep.mubr.msk.f32.mxu1 %vm11497_vm3, %v3642_v1  ;;  %v3612_v5 = vsel %vm11503_vm15, %v3228_v29, %v3401_v16  ;;  %vm11504_vm3 = vmmov %vm11494_vm2  ;;  %v3613_v16 = vsel %vm11503_vm15, %v8939_v25, %v3403_v32 }
 0x410   : > { %v3407_v43 = vpop.permute.xlu1 %3406  ;;  %4237 = vrot.lane.b32.xlu0 %v11498_v0, %s7091_s30  ;;  %v3644_v33 = vsel %vm11504_vm3, %v3612_v5, %v3529_v48  ;;  %vm11507_vm14 = vmmov %vm11506_vm6  ;;  %v11519_v0 = vld [vmem:[#allocation29_spill] sm:$0xff] }
 0x411   : > { %v3405_v44 = vpop.permute.xlu0 %3404 }
 0x412   : > { %4235 = vrot.lane.b32.xlu1 %v11499_v50, %s7091_s30  ;;  %v11520_v50 = vld [vmem:[#allocation53_spill] sm:$0xff] }
 0x414   : > { %v3527_v24 = vpop.permute.xlu1 %3526  ;;  %4241 = vrot.lane.b32.xlu0 %v11502_v20, %s7091_s30 }
 0x415   : > { %v3643_v14 = vsel %vm11494_vm2, %v3611_v27, %v3527_v24  ;;  %v3533_v53 = vpop.permute.xlu0 %3532  ;;  %vm11511_vm2 = vnez %v11510_v11  ;;  %v11522_v24 = vld [vmem:[#allocation34_spill] sm:$0xff] }
 0x416   : > { %4239 = vrot.lane.b32.xlu1 %v11505_v35, %s7091_s30  ;;  %6818 = vmatmul.mubr.msk.f32.gmra.mrb[28].mxu1 %vm11506_vm6, %v3643_v14  ;;  %v3230_v18 = vsel %vm11511_vm2, %v8968_v62, 0.0  ;;  %vm11513_vm6 = vmmov %vm11503_vm15  ;;  %v11518_v62 = vld [vmem:[#allocation32_spill] sm:$0xff]  ;;  %vm11526_vm2 = vcmask 441344  }
 0x417   : > { %6820 = vmatprep.mubr.msk.f32.mxu1 %vm11507_vm14, %v3644_v33  ;;  %v3614_v6 = vsel %vm11513_vm6, %v3230_v18, %v3405_v44  ;;  %vm11514_vm14 = vmmov %vm11504_vm3  ;;  %v3615_v44 = vsel %vm11513_vm6, %v8963_v4, %v3407_v43  ;;  %v11525_v33 = vld [vmem:[#allocation31_spill] sm:$0xff]  ;;  %v11528_v43 = vld [vmem:[#allocation33_spill] sm:$0xff] }
 0x418   : > { %v3411_v60 = vpop.permute.xlu1 %3410  ;;  %4245 = vrot.lane.b32.xlu0 %v11508_v58, %s7091_s30  ;;  %v3646_v1 = vsel %vm11514_vm14, %v3614_v6, %v3533_v53  ;;  %vm11517_vm15 = vmmov %vm11516_vm0  ;;  %v11530_v58 = vld [vmem:[#allocation54_spill] sm:$0xff] }
 0x419   : > { %v3409_v7 = vpop.permute.xlu0 %3408 }
 0x41a   : > { %4243 = vrot.lane.b32.xlu1 %v11509_v55, %s7091_s30 }
 0x41c   : > { %v3531_v9 = vpop.permute.xlu1 %3530  ;;  %4249 = vrot.lane.b32.xlu0 %v11512_v47, %s7091_s30 }
 0x41d   : > { %v3645_v8 = vsel %vm11504_vm3, %v3613_v16, %v3531_v9  ;;  %v3537_v48 = vpop.permute.xlu0 %3536  ;;  %vm11521_vm3 = vnez %v11520_v50 }
 0x41e   : > { %4247 = vrot.lane.b32.xlu1 %v11515_v30, %s7091_s30  ;;  %6821 = vmatmul.mubr.msk.f32.gmra.mrb[30].mxu1 %vm11516_vm0, %v3645_v8  ;;  %v3232_v27 = vsel %vm11521_vm3, %v8992_v51, 0.0  ;;  %vm11523_vm0 = vmmov %vm11513_vm6 }
 0x41f   : > { %6823 = vmatprep.mubr.msk.f32.mxu1 %vm11517_vm15, %v3646_v1  ;;  %v3616_v20 = vsel %vm11523_vm0, %v3232_v27, %v3409_v7  ;;  %vm11524_vm15 = vmmov %vm11514_vm14 }
 0x420   : > { %v3415_v25 = vpop.permute.xlu1 %3414  ;;  %4253 = vrot.lane.b32.xlu0 %v11518_v62, %s7091_s30  ;;  %v3648_v53 = vsel %vm11524_vm15, %v3616_v20, %v3537_v48  ;;  %vm11527_vm6 = vmmov %vm11526_vm2 }
 0x421   : > { %v3413_v32 = vpop.permute.xlu0 %3412  ;;  %vm11529_vm3 = vmmov %vm11523_vm0  ;;  %vm11531_vm0 = vnez %v11530_v58 }
 0x422   : > { %4251 = vrot.lane.b32.xlu1 %v11519_v0, %s7091_s30  ;;  %v3617_v35 = vsel %vm11529_vm3, %v8987_v26, %v3411_v60  ;;  %v3234_v7 = vsel %vm11531_vm0, %v9016_v2, 0.0  ;;  %vm11534_vm4 = vmmov %vm11527_vm6  ;;  %v3619_v26 = vsel %vm11529_vm3, %v9011_v15, %v3415_v25  ;;  %v11535_v60 = vld [vmem:[#allocation55_spill] sm:$0xff]  ;;  %v11540_v25 = vld [vmem:[#allocation44_spill] sm:$0xff] }
 0x423   : > { %vm11536_vm0 = vnez %v11535_v60 }
 0x424   : > { %v3535_v29 = vpop.permute.xlu1 %3534  ;;  %4257 = vrot.lane.b32.xlu0 %v11522_v24, %s7091_s30  ;;  %v3236_v2 = vsel %vm11536_vm0, %v9040_v46, 0.0  ;;  %vm11541_vm0 = vnez %v11540_v25 }
 0x425   : > { %v3647_v5 = vsel %vm11514_vm14, %v3615_v44, %v3535_v29  ;;  %v3541_v14 = vpop.permute.xlu0 %3540  ;;  %vm11532_vm14 = vmmov %vm11529_vm3  ;;  %v3238_v46 = vsel %vm11541_vm0, %v9064_v45, 0.0 }
 0x426   : > { %4255 = vrot.lane.b32.xlu1 %v11525_v33, %s7091_s30  ;;  %6824 = vmatmul.mubr.msk.f32.gmra.mrb[32].mxu1 %vm11526_vm2, %v3647_v5  ;;  %v3618_v16 = vsel %vm11532_vm14, %v3234_v7, %v3413_v32  ;;  %vm11533_vm2 = vmmov %vm11524_vm15  ;;  %v11548_v33 = vld [vmem:[#allocation56_spill] sm:$0xff] }
 0x427   : > { %6826 = vmatprep.mubr.msk.f32.mxu1 %vm11527_vm6, %v3648_v53  ;;  %v3650_v47 = vsel %vm11533_vm2, %v3618_v16, %v3541_v14  ;;  %vm11537_vm14 = vmmov %vm11529_vm3 }
 0x428   : > { %v3419_v4 = vpop.permute.xlu1 %3418  ;;  %vm11544_vm5 = vmmov %vm11533_vm2 }
 0x429   : > { %v3417_v51 = vpop.permute.xlu0 %3416  ;;  %v3621_v15 = vsel %vm11529_vm3, %v9035_v37, %v3419_v4 }
 0x42a   : > { %4259 = vrot.lane.b32.xlu1 %v11528_v43, %s7091_s30  ;;  %v3620_v1 = vsel %vm11537_vm14, %v3236_v2, %v3417_v51  ;;  %vm11542_vm14 = vmmov %vm11529_vm3 }
 0x42c   : > { %v3539_v55 = vpop.permute.xlu1 %3538 }
 0x42d   : > { %v3649_v18 = vsel %vm11524_vm15, %v3617_v35, %v3539_v55  ;;  %v3545_v9 = vpop.permute.xlu0 %3544  ;;  %vm11538_vm15 = vmmov %vm11533_vm2  ;;  %v4392_v55 = vld [vmem:[#allocation2 + $0x118] sm:$0xff] }
 0x42e   : > { %6827 = vmatmul.mubr.msk.f32.gmra.mrb[34].mxu1 %vm11527_vm6, %v3649_v18  ;;  %v3652_v32 = vsel %vm11533_vm2, %v3620_v1, %v3545_v9  ;;  %vm11539_vm6 = vmmov %vm11534_vm4  ;;  %4615 = vrot.lane.b32.xlu1 %v4392_v55, %s7086_s23  ;;  %v11553_v9 = vld [vmem:[#allocation57_spill] sm:$0xff] }
 0x42f   : > { %6829 = vmatprep.mubr.msk.f32.mxu1 %vm11534_vm4, %v3650_v47 }
 0x430   : > { %v3423_v6 = vpop.permute.xlu1 %3422 }
 0x431   : > { %v3421_v8 = vpop.permute.xlu0 %3420 }
 0x432   : > { %v3622_v29 = vsel %vm11542_vm14, %v3238_v46, %v3421_v8 }
 0x434   : > { %v3543_v48 = vpop.permute.xlu1 %3542 }
 0x435   : > { %v3651_v30 = vsel %vm11538_vm15, %v3619_v26, %v3543_v48  ;;  %v3549_v62 = vpop.permute.xlu0 %3548  ;;  %vm11543_vm15 = vmmov %vm11533_vm2 }
 0x436   : > { %6830 = vmatmul.mubr.msk.f32.gmra.mrb[36].mxu1 %vm11539_vm6, %v3651_v30  ;;  %v3654_v20 = vsel %vm11544_vm5, %v3622_v29, %v3549_v62  ;;  %vm11545_vm2 = vmmov %vm11534_vm4  ;;  %v11558_v62 = vld [vmem:[#allocation58_spill] sm:$0xff] }
 0x437   : > { %6832 = vmatprep.mubr.msk.f32.mxu1 %vm11534_vm4, %v3652_v32  ;;  %vm11546_vm6 = vmmov %vm11545_vm2 }
 0x438   : > { %v3427_v0 = vpop.permute.xlu1 %3426  ;;  %vm11547_vm4 = vmmov %vm11529_vm3  ;;  %vm11549_vm3 = vnez %v11548_v33 }
 0x439   : > { %v3425_v44 = vpop.permute.xlu0 %3424  ;;  %v3623_v37 = vsel %vm11547_vm4, %v9059_v54, %v3423_v6  ;;  %v3240_v45 = vsel %vm11549_vm3, %v9094_v61, 0.0  ;;  %vm11550_vm14 = vmmov %vm11547_vm4  ;;  %v4391_v54 = vld [vmem:[#allocation2 + $0x110] sm:$0xff]  ;;  %v3625_v18 = vsel %vm11547_vm4, %v9083_v17, %v3427_v0 }
 0x43a   : > { %v3624_v51 = vsel %vm11550_vm14, %v3240_v45, %v3425_v44  ;;  %4613 = vrot.lane.b32.xlu0 %v4391_v54, %s7086_s23  ;;  %vm11554_vm14 = vnez %v11553_v9 }
 0x43b   : > { %v3242_v47 = vsel %vm11554_vm14, %v9130_v56, 0.0  ;;  %vm11559_vm14 = vnez %v11558_v62 }
 0x43c   : > { %v3547_v27 = vpop.permute.xlu1 %3546  ;;  %v3244_v56 = vsel %vm11559_vm14, %v9161_v3, 0.0  ;;  %vm11566_vm14 = vmmov %vm11547_vm4 }
 0x43d   : > { %v3653_v24 = vsel %vm11543_vm15, %v3621_v15, %v3547_v27  ;;  %vm11551_vm15 = vmmov %vm11544_vm5  ;;  %v11564_v27 = vld [vmem:[#allocation59_spill] sm:$0xff] }
 0x43e   : > { %v3437_v5 = vpop.permute.xlu0 %3436  ;;  %6833 = vmatmul.mubr.msk.f32.gmra.mrb[38].mxu1 %vm11545_vm2, %v3653_v24 }
 0x43f   : > { %6835 = vmatprep.mubr.msk.f32.mxu1 %vm11546_vm6, %v3654_v20  ;;  %vm11552_vm6 = vmmov %vm11545_vm2 }
 0x440   : > { %v3431_v14 = vpop.permute.xlu1 %3430  ;;  %vm11557_vm3 = vmmov %vm11552_vm6 }
 0x441   : > { %v3627_v17 = vsel %vm11547_vm4, %v9126_v19, %v3431_v14  ;;  %vm11562_vm0 = vmmov %vm11557_vm3 }
 0x442   : > { %v3553_v53 = vpop.permute.xlu0 %3552 }
 0x443   : > { %v3656_v35 = vsel %vm11544_vm5, %v3624_v51, %v3553_v53  ;;  %v9419_v51 = vld [vmem:[%s10797_s4 + $0x1] ss:$0 sm:$0xff] }
 0x444   : > { %v3551_v4 = vpop.permute.xlu1 %3550 }
 0x445   : > { %v3655_v43 = vsel %vm11551_vm15, %v3623_v37, %v3551_v4  ;;  %vm11555_vm15 = vmmov %vm11547_vm4 }
 0x446   : > { %v3429_v7 = vpop.permute.xlu0 %3428  ;;  %6836 = vmatmul.mubr.msk.f32.gmra.mrb[40].mxu1 %vm11545_vm2, %v3655_v43  ;;  %vm11556_vm2 = vmmov %vm11544_vm5 }
 0x447   : > { %6838 = vmatprep.mubr.msk.f32.mxu1 %vm11552_vm6, %v3656_v35  ;;  %v3626_v8 = vsel %vm11555_vm15, %v3242_v47, %v3429_v7  ;;  %vm11560_vm15 = vmmov %vm11547_vm4 }
 0x448   : > { %v3435_v16 = vpop.permute.xlu1 %3434 }
 0x449   : > { %v3629_v29 = vsel %vm11547_vm4, %v9157_v34, %v3435_v16 }
 0x44a   : > { %v3557_v61 = vpop.permute.xlu0 %3556 }
 0x44b   : > { %v3658_v2 = vsel %vm11556_vm2, %v3626_v8, %v3557_v61 }
 0x44c   : > { %v3555_v6 = vpop.permute.xlu1 %3554 }
 0x44d   : > { %v3657_v26 = vsel %vm11544_vm5, %v3625_v18, %v3555_v6  ;;  %vm11561_vm5 = vmmov %vm11556_vm2 }
 0x44e   : > { %v3433_v48 = vpop.permute.xlu0 %3432  ;;  %6839 = vmatmul.mubr.msk.f32.gmra.mrb[42].mxu1 %vm11552_vm6, %v3657_v26  ;;  %vm11565_vm6 = vnez %v11564_v27 }
 0x44f   : > { %6841 = vmatprep.mubr.msk.f32.mxu1 %vm11557_vm3, %v3658_v2  ;;  %v3628_v0 = vsel %vm11560_vm15, %v3244_v56, %v3433_v48  ;;  %vm11563_vm3 = vmmov %vm11562_vm0  ;;  %v3246_v19 = vsel %vm11565_vm6, %v9139_v12, 0.0 }
 0x450   : > { %v3563_v1 = vpop.permute.xlu1 %3562  ;;  %v3630_v24 = vsel %vm11566_vm14, %v3246_v19, %v3437_v5  ;;  %vm11567_vm15 = vmmov %vm11556_vm2 }
 0x451   : > { %v3661_v20 = vsel %vm11567_vm15, %v3629_v29, %v3563_v1  ;;  %vm11572_vm6 = vmmov %vm11562_vm0 }
 0x452   : > { %v3561_v30 = vpop.permute.xlu0 %3560 }
 0x453   : > { %v3660_v15 = vsel %vm11556_vm2, %v3628_v0, %v3561_v30 }
 0x454   : > { %v3559_v32 = vpop.permute.xlu1 %3558 }
 0x455   : > { %v3659_v44 = vsel %vm11561_vm5, %v3627_v17, %v3559_v32  ;;  %vm11568_vm5 = vmmov %vm11556_vm2 }
 0x456   : > { %6842 = vmatmul.mubr.msk.f32.gmra.mrb[44].mxu1 %vm11562_vm0, %v3659_v44  ;;  %v3565_v46 = vpop.permute.xlu0 %3564  ;;  %vm11569_vm2 = vmmov %vm11562_vm0 }
 0x457   : > { %6844 = vmatprep.mubr.msk.f32.mxu1 %vm11563_vm3, %v3660_v15  ;;  %v3662_v14 = vsel %vm11568_vm5, %v3630_v24, %v3565_v46  ;;  %vm11570_vm3 = vmmov %vm11547_vm4 }
 0x458   : > { %v3439_v3 = vpop.permute.xlu1 %3438  ;;  %vm11571_vm1 = vmmov %vm11568_vm5 }
 0x459   : > { %v3631_v53 = vsel %vm11570_vm3, %v9118_v39, %v3439_v3 }
 0x45a   : > { %6845 = vmatmul.mubr.msk.f32.gmra.mrb[46].mxu1 %vm11569_vm2, %v3661_v20  ;;  %v4202_v34 = vpop.permute.xlu0 %4201 }
 0x45b   : > { %6847 = vmatprep.mubr.msk.f32.mxu1 %vm11562_vm0, %v3662_v14 }
 0x45c   : > { %v3567_v37 = vpop.permute.xlu1 %3566 }
 0x45d   : > { %v3663_v12 = vsel %vm11571_vm1, %v3631_v53, %v3567_v37  ;;  %vm11574_vm1 = vcmask 48128  }
 0x45e   : > { %6848 = vmatmul.mubr.msk.f32.gmra.mrb[48].mxu1 %vm11572_vm6, %v3663_v12  ;;  %v4206_v45 = vpop.permute.xlu0 %4205  ;;  %vm11575_vm14 = vmmov %vm11574_vm1 }
 0x45f   : > { %vm11578_vm6 = vmmov %vm11574_vm1 }
 0x460   : > { %v4204_v4 = vpop.permute.xlu1 %4203  ;;  %vm11579_vm4 = vmmov %vm11574_vm1 }
 0x461   : > { %vm11582_vm15 = vmmov %vm11574_vm1 }
 0x462   : > { %v4210_v5 = vpop.permute.xlu0 %4209  ;;  %vm11583_vm5 = vmmov %vm11574_vm1 }
 0x463   : > { %vm11586_vm2 = vmmov %vm11574_vm1 }
 0x464   : > { %v4208_v43 = vpop.permute.xlu1 %4207  ;;  %vm11587_vm0 = vmmov %vm11574_vm1 }
 0x465   : > { %vm11590_vm3 = vmmov %vm11587_vm0 }
 0x466   : > { %v4200_v54 = vpop.permute.xlu0 %4199 }
 0x468   : > { %v4198_v18 = vpop.permute.xlu1 %4197 }
 0x4c1   : > { %v6804_v35 = vpop.f32.mrb[18].mxu1 }
 0x4c2   : > { %v9422_v7 = vadd.f32 %v6804_v35, %v9419_v51  ;;  %v3845_v39 = vpop.f32.mrb[19].mxu1 }
 0x4c3   : > { %v9425_v55 = vadd.f32 %v9419_v51, %v3845_v39 }
 0x4c4   : > { %11573 = vst [vmem:[#allocation42_spill] sm:$0xff] %v9422_v7  ;;  %v10978_v16 = vmax.f32 %v9422_v7, 0.0 }
 0x4c5   : > { %v10982_v61 = vmax.f32 %v9425_v55, 0.0 }
 0x4c6   : > { %v4294_v47 = vadd.f32 %v4200_v54, %v10978_v16 }
 0x4c7   : > { %v4293_v6 = vadd.f32 %v4198_v18, %v10982_v61 }
 0x4c8   : > { %4326 = vst.msk [vmem:[#allocation2 + $0x18] sm:$0xff] %vm11574_vm1, %v4294_v47  ;;  %4427 = vrot.lane.b32.xlu1 %v4294_v47, %s7087_s28  ;;  %vm11591_vm1 = vmmov %vm11587_vm0 }
 0x4c9   : > { %4325 = vst.msk [vmem:[#allocation2 + $0x10] sm:$0xff] %vm11575_vm14, %v4293_v6  ;;  %v6807_v8 = vpop.f32.mrb[20].mxu1  ;;  %4425 = vrot.lane.b32.xlu0 %v4293_v6, %s7087_s28  ;;  %vm11594_vm14 = vmmov %vm11587_vm0 }
 0x4ca   : > { %v9438_v26 = vadd.f32 %v6807_v8, %v9419_v51  ;;  %v3855_v2 = vpop.f32.mrb[21].mxu1 }
 0x4cb   : > { %v9441_v48 = vadd.f32 %v9419_v51, %v3855_v2 }
 0x4cc   : > { %11576 = vst [vmem:[#allocation45_spill] sm:$0xff] %v9438_v26  ;;  %v10976_v1 = vmax.f32 %v9438_v26, 0.0 }
 0x4cd   : > { %11577 = vst [vmem:[#allocation60_spill] sm:$0xff] %v9441_v48  ;;  %v10979_v30 = vmax.f32 %v9441_v48, 0.0 }
 0x4ce   : > { %v4296_v17 = vadd.f32 %v4204_v4, %v10976_v1 }
 0x4cf   : > { %v4295_v56 = vadd.f32 %v4202_v34, %v10979_v30 }
 0x4d0   : > { %4328 = vst.msk [vmem:[#allocation2 + $0x28] sm:$0xff] %vm11578_vm6, %v4296_v17  ;;  %4431 = vrot.lane.b32.xlu0 %v4296_v17, %s7087_s28  ;;  %vm11595_vm6 = vmmov %vm11587_vm0 }
 0x4d1   : > { %4327 = vst.msk [vmem:[#allocation2 + $0x20] sm:$0xff] %vm11579_vm4, %v4295_v56  ;;  %v6810_v32 = vpop.f32.mrb[22].mxu1  ;;  %vm11598_vm4 = vmmov %vm11587_vm0 }
 0x4d2   : > { %v9453_v0 = vadd.f32 %v6810_v32, %v9419_v51  ;;  %v3865_v44 = vpop.f32.mrb[23].mxu1 }
 0x4d3   : > { %v9456_v15 = vadd.f32 %v9419_v51, %v3865_v44 }
 0x4d4   : > { %11580 = vst [vmem:[#allocation62_spill] sm:$0xff] %v9453_v0  ;;  %v10972_v46 = vmax.f32 %v9453_v0, 0.0  ;;  %4429 = vrot.lane.b32.xlu0 %v4295_v56, %s7087_s28  ;;  %v4214_v56 = vpop.permute.xlu0 %4213 }
 0x4d5   : > { %11581 = vst [vmem:[#allocation8_spill] sm:$0xff] %v9456_v15  ;;  %v10977_v19 = vmax.f32 %v9456_v15, 0.0 }
 0x4d6   : > { %v4298_v29 = vadd.f32 %v4208_v43, %v10972_v46 }
 0x4d7   : > { %v4297_v3 = vadd.f32 %v4206_v45, %v10977_v19  ;;  %v9475_v37 = vld [vmem:[#allocation2 + $0x28] sm:$0xff]  ;;  %v4212_v45 = vpop.permute.xlu1 %4211 }
 0x4d8   : > { %4330 = vst.msk [vmem:[#allocation2 + $0x38] sm:$0xff] %vm11582_vm15, %v4298_v29  ;;  %4435 = vrot.lane.b32.xlu0 %v4298_v29, %s7087_s28  ;;  %v9480_v34 = vld [vmem:[#allocation2 + $0x20] sm:$0xff]  ;;  %vm11599_vm15 = vmmov %vm11587_vm0 }
 0x4d9   : > { %4329 = vst.msk [vmem:[#allocation2 + $0x30] sm:$0xff] %vm11583_vm5, %v4297_v3  ;;  %v6813_v24 = vpop.f32.mrb[24].mxu1  ;;  %4433 = vrot.lane.b32.xlu1 %v4297_v3, %s7087_s28  ;;  %vm11602_vm5 = vmmov %vm11587_vm0 }
 0x4da   : > { %v9470_v20 = vadd.f32 %v6813_v24, %v9419_v51  ;;  %v3875_v14 = vpop.f32.mrb[25].mxu1 }
 0x4db   : > { %v9473_v53 = vadd.f32 %v9419_v51, %v3875_v14  ;;  %v4216_v2 = vpop.permute.xlu1 %4215 }
 0x4dc   : > { %11584 = vst [vmem:[#allocation6_spill] sm:$0xff] %v9470_v20  ;;  %v10970_v12 = vmax.f32 %v9470_v20, 0.0  ;;  %4555 = vrot.lane.b32.xlu0 %v9475_v37, %s7086_s23 }
 0x4dd   : > { %11585 = vst [vmem:[#allocation10_spill] sm:$0xff] %v9473_v53  ;;  %v10973_v4 = vmax.f32 %v9473_v53, 0.0  ;;  %4553 = vrot.lane.b32.xlu1 %v9480_v34, %s7086_s23 }
 0x4de   : > { %v4300_v43 = vadd.f32 %v4212_v45, %v10970_v12 }
 0x4df   : > { %v4299_v35 = vadd.f32 %v4210_v5, %v10973_v4  ;;  %v9499_v6 = vld [vmem:[#allocation2 + $0x38] sm:$0xff] }
 0x4e0   : > { %4332 = vst.msk [vmem:[#allocation2 + $0x48] sm:$0xff] %vm11586_vm2, %v4300_v43  ;;  %4439 = vrot.lane.b32.xlu0 %v4300_v43, %s7087_s28  ;;  %v9504_v8 = vld [vmem:[#allocation2 + $0x30] sm:$0xff]  ;;  %vm11603_vm2 = vmmov %vm11587_vm0 }
 0x4e1   : > { %4331 = vst.msk [vmem:[#allocation2 + $0x40] sm:$0xff] %vm11587_vm0, %v4299_v35  ;;  %v6816_v39 = vpop.f32.mrb[26].mxu1  ;;  %4437 = vrot.lane.b32.xlu1 %v4299_v35, %s7087_s28 }
 0x4e2   : > { %v9494_v54 = vadd.f32 %v6816_v39, %v9419_v51  ;;  %v3885_v18 = vpop.f32.mrb[27].mxu1  ;;  %v4220_v39 = vpop.permute.xlu1 %4219 }
 0x4e3   : > { %v9497_v47 = vadd.f32 %v9419_v51, %v3885_v18 }
 0x4e4   : > { %11588 = vst [vmem:[#allocation7_spill] sm:$0xff] %v9494_v54  ;;  %v10967_v5 = vmax.f32 %v9494_v54, 0.0  ;;  %4559 = vrot.lane.b32.xlu0 %v9499_v6, %s7086_s23  ;;  %v4358_v54 = vld [vmem:[#allocation2 + $0x8] sm:$0xff] }
 0x4e5   : > { %11589 = vst [vmem:[#allocation61_spill] sm:$0xff] %v9497_v47  ;;  %v10971_v17 = vmax.f32 %v9497_v47, 0.0  ;;  %4557 = vrot.lane.b32.xlu1 %v9504_v8, %s7086_s23  ;;  %v6393_v47 = vld [vmem:[%s10796_s3 + $0x80] sm:$0xff] }
 0x4e6   : > { %v4302_v32 = vadd.f32 %v4216_v2, %v10967_v5  ;;  %v4218_v2 = vpop.permute.xlu0 %4217 }
 0x4e7   : > { %v4301_v44 = vadd.f32 %v4214_v56, %v10971_v17  ;;  %v9523_v45 = vld [vmem:[#allocation2 + $0x48] sm:$0xff] }
 0x4e8   : > { %4334 = vst.msk [vmem:[#allocation2 + $0x58] sm:$0xff] %vm11590_vm3, %v4302_v32  ;;  %4443 = vrot.lane.b32.xlu0 %v4302_v32, %s7087_s28  ;;  %v9528_v35 = vld [vmem:[#allocation2 + $0x40] sm:$0xff]  ;;  %vm11606_vm3 = vmmov %vm11587_vm0 }
 0x4e9   : > { %4333 = vst.msk [vmem:[#allocation2 + $0x50] sm:$0xff] %vm11591_vm1, %v4301_v44  ;;  %v6819_v29 = vpop.f32.mrb[28].mxu1  ;;  %4441 = vrot.lane.b32.xlu1 %v4301_v44, %s7087_s28  ;;  %vm11609_vm1 = vmmov %vm11587_vm0 }
 0x4ea   : > { %v9518_v3 = vadd.f32 %v6819_v29, %v9419_v51  ;;  %v3895_v24 = vpop.f32.mrb[29].mxu1 }
 0x4eb   : > { %v9521_v14 = vadd.f32 %v9419_v51, %v3895_v24 }
 0x4ec   : > { %11592 = vst [vmem:[#allocation4_spill] sm:$0xff] %v9518_v3  ;;  %v10968_v43 = vmax.f32 %v9518_v3, 0.0  ;;  %4563 = vrot.lane.b32.xlu0 %v9523_v45, %s7086_s23 }
 0x4ed   : > { %11593 = vst [vmem:[#allocation5_spill] sm:$0xff] %v9521_v14  ;;  %v10969_v18 = vmax.f32 %v9521_v14, 0.0  ;;  %4561 = vrot.lane.b32.xlu1 %v9528_v35, %s7086_s23  ;;  %v4357_v14 = vld [vmem:[#allocation2] sm:$0xff] }
 0x4ee   : > { %v4304_v56 = vadd.f32 %v4220_v39, %v10968_v43  ;;  %v4224_v43 = vpop.permute.xlu1 %4223 }
 0x4ef   : > { %v4303_v32 = vadd.f32 %v4218_v2, %v10969_v18  ;;  %v9547_v39 = vld [vmem:[#allocation2 + $0x58] sm:$0xff] }
 0x4f0   : > { %4336 = vst.msk [vmem:[#allocation2 + $0x68] sm:$0xff] %vm11594_vm14, %v4304_v56  ;;  %4447 = vrot.lane.b32.xlu0 %v4304_v56, %s7087_s28  ;;  %v9552_v56 = vld [vmem:[#allocation2 + $0x50] sm:$0xff]  ;;  %vm11610_vm14 = vmmov %vm11587_vm0 }
 0x4f1   : > { %4335 = vst.msk [vmem:[#allocation2 + $0x60] sm:$0xff] %vm11595_vm6, %v4303_v32  ;;  %v6822_v44 = vpop.f32.mrb[30].mxu1  ;;  %4445 = vrot.lane.b32.xlu1 %v4303_v32, %s7087_s28  ;;  %v4222_v32 = vpop.permute.xlu0 %4221  ;;  %vm11613_vm6 = vmmov %vm11587_vm0 }
 0x4f2   : > { %v9542_v29 = vadd.f32 %v6822_v44, %v9419_v51  ;;  %v3905_v24 = vpop.f32.mrb[31].mxu1 }
 0x4f3   : > { %v9545_v5 = vadd.f32 %v9419_v51, %v3905_v24 }
 0x4f4   : > { %11596 = vst [vmem:[#allocation12_spill] sm:$0xff] %v9542_v29  ;;  %v10974_v2 = vmax.f32 %v9542_v29, 0.0  ;;  %4567 = vrot.lane.b32.xlu0 %v9547_v39, %s7086_s23 }
 0x4f5   : > { %11597 = vst [vmem:[#allocation9_spill] sm:$0xff] %v9545_v5  ;;  %v10975_v18 = vmax.f32 %v9545_v5, 0.0  ;;  %4565 = vrot.lane.b32.xlu1 %v9552_v56, %s7086_s23 }
 0x4f6   : > { %v4306_v44 = vadd.f32 %v4224_v43, %v10974_v2  ;;  %v4228_v2 = vpop.permute.xlu1 %4227 }
 0x4f7   : > { %v4305_v24 = vadd.f32 %v4222_v32, %v10975_v18  ;;  %v9571_v43 = vld [vmem:[#allocation2 + $0x68] sm:$0xff] }
 0x4f8   : > { %4338 = vst.msk [vmem:[#allocation2 + $0x78] sm:$0xff] %vm11598_vm4, %v4306_v44  ;;  %4451 = vrot.lane.b32.xlu0 %v4306_v44, %s7087_s28  ;;  %v9576_v44 = vld [vmem:[#allocation2 + $0x60] sm:$0xff]  ;;  %vm11614_vm4 = vmmov %vm11587_vm0 }
 0x4f9   : > { %4337 = vst.msk [vmem:[#allocation2 + $0x70] sm:$0xff] %vm11599_vm15, %v4305_v24  ;;  %v6825_v12 = vpop.f32.mrb[32].mxu1  ;;  %4449 = vrot.lane.b32.xlu1 %v4305_v24, %s7087_s28  ;;  %vm11617_vm15 = vmmov %vm11587_vm0 }
 0x4fa   : > { %v9566_v17 = vadd.f32 %v6825_v12, %v9419_v51  ;;  %v3915_v46 = vpop.f32.mrb[33].mxu1  ;;  %v4226_v12 = vpop.permute.xlu0 %4225 }
 0x4fb   : > { %v9569_v4 = vadd.f32 %v9419_v51, %v3915_v46 }
 0x4fc   : > { %11600 = vst [vmem:[#allocation14_spill] sm:$0xff] %v9566_v17  ;;  %v10980_v32 = vmax.f32 %v9566_v17, 0.0  ;;  %4571 = vrot.lane.b32.xlu0 %v9571_v43, %s7086_s23 }
 0x4fd   : > { %11601 = vst [vmem:[#allocation11_spill] sm:$0xff] %v9569_v4  ;;  %v10981_v18 = vmax.f32 %v9569_v4, 0.0  ;;  %4569 = vrot.lane.b32.xlu1 %v9576_v44, %s7086_s23 }
 0x4fe   : > { %v4308_v46 = vadd.f32 %v4228_v2, %v10980_v32  ;;  %v4232_v32 = vpop.permute.xlu1 %4231 }
 0x4ff   : > { %v4307_v24 = vadd.f32 %v4226_v12, %v10981_v18  ;;  %v9595_v2 = vld [vmem:[#allocation2 + $0x78] sm:$0xff] }
 0x500   : > { %4340 = vst.msk [vmem:[#allocation2 + $0x88] sm:$0xff] %vm11602_vm5, %v4308_v46  ;;  %4455 = vrot.lane.b32.xlu0 %v4308_v46, %s7087_s28  ;;  %v9600_v46 = vld [vmem:[#allocation2 + $0x70] sm:$0xff]  ;;  %vm11618_vm5 = vmmov %vm11587_vm0 }
 0x501   : > { %4339 = vst.msk [vmem:[#allocation2 + $0x80] sm:$0xff] %vm11603_vm2, %v4307_v24  ;;  %v6828_v1 = vpop.f32.mrb[34].mxu1  ;;  %4453 = vrot.lane.b32.xlu1 %v4307_v24, %s7087_s28  ;;  %vm11621_vm2 = vmmov %vm11587_vm0 }
 0x502   : > { %v9590_v19 = vadd.f32 %v6828_v1, %v9419_v51  ;;  %v3925_v16 = vpop.f32.mrb[35].mxu1  ;;  %v4230_v1 = vpop.permute.xlu0 %4229 }
 0x503   : > { %v9593_v30 = vadd.f32 %v9419_v51, %v3925_v16 }
 0x504   : > { %11604 = vst [vmem:[#allocation16_spill] sm:$0xff] %v9590_v19  ;;  %v10983_v12 = vmax.f32 %v9590_v19, 0.0  ;;  %4575 = vrot.lane.b32.xlu0 %v9595_v2, %s7086_s23 }
 0x505   : > { %11605 = vst [vmem:[#allocation13_spill] sm:$0xff] %v9593_v30  ;;  %v10984_v18 = vmax.f32 %v9593_v30, 0.0  ;;  %4573 = vrot.lane.b32.xlu1 %v9600_v46, %s7086_s23 }
 0x506   : > { %v4310_v16 = vadd.f32 %v4232_v32, %v10983_v12  ;;  %v4236_v12 = vpop.permute.xlu1 %4235 }
 0x507   : > { %v4309_v24 = vadd.f32 %v4230_v1, %v10984_v18  ;;  %v9619_v32 = vld [vmem:[#allocation2 + $0x88] sm:$0xff] }
 0x508   : > { %4342 = vst.msk [vmem:[#allocation2 + $0x98] sm:$0xff] %vm11587_vm0, %v4310_v16  ;;  %4459 = vrot.lane.b32.xlu0 %v4310_v16, %s7087_s28  ;;  %v9624_v16 = vld [vmem:[#allocation2 + $0x80] sm:$0xff] }
 0x509   : > { %4341 = vst.msk [vmem:[#allocation2 + $0x90] sm:$0xff] %vm11606_vm3, %v4309_v24  ;;  %v6831_v61 = vpop.f32.mrb[36].mxu1  ;;  %4457 = vrot.lane.b32.xlu1 %v4309_v24, %s7087_s28  ;;  %vm11626_vm3 = vmmov %vm11587_vm0 }
 0x50a   : > { %v9614_v27 = vadd.f32 %v6831_v61, %v9419_v51  ;;  %v3935_v62 = vpop.f32.mrb[37].mxu1  ;;  %v4234_v61 = vpop.permute.xlu0 %4233 }
 0x50b   : > { %v9617_v9 = vadd.f32 %v9419_v51, %v3935_v62 }
 0x50c   : > { %11607 = vst [vmem:[#allocation18_spill] sm:$0xff] %v9614_v27  ;;  %v10985_v1 = vmax.f32 %v9614_v27, 0.0  ;;  %4579 = vrot.lane.b32.xlu0 %v9619_v32, %s7086_s23 }
 0x50d   : > { %11608 = vst [vmem:[#allocation15_spill] sm:$0xff] %v9617_v9  ;;  %v10986_v18 = vmax.f32 %v9617_v9, 0.0  ;;  %4577 = vrot.lane.b32.xlu1 %v9624_v16, %s7086_s23 }
 0x50e   : > { %v4312_v62 = vadd.f32 %v4236_v12, %v10985_v1  ;;  %v4240_v1 = vpop.permute.xlu1 %4239 }
 0x50f   : > { %v4311_v24 = vadd.f32 %v4234_v61, %v10986_v18  ;;  %v9643_v12 = vld [vmem:[#allocation2 + $0x98] sm:$0xff] }
 0x510   : > { %4344 = vst.msk [vmem:[#allocation2 + $0xa8] sm:$0xff] %vm11609_vm1, %v4312_v62  ;;  %4463 = vrot.lane.b32.xlu0 %v4312_v62, %s7087_s28  ;;  %v9648_v62 = vld [vmem:[#allocation2 + $0x90] sm:$0xff]  ;;  %vm11627_vm1 = vmmov %vm11587_vm0 }
 0x511   : > { %4343 = vst.msk [vmem:[#allocation2 + $0xa0] sm:$0xff] %vm11610_vm14, %v4311_v24  ;;  %v6834_v33 = vpop.f32.mrb[38].mxu1  ;;  %4461 = vrot.lane.b32.xlu1 %v4311_v24, %s7087_s28  ;;  %vm11630_vm14 = vmmov %vm11587_vm0 }
 0x512   : > { %v9638_v25 = vadd.f32 %v6834_v33, %v9419_v51  ;;  %v3945_v60 = vpop.f32.mrb[39].mxu1  ;;  %v4238_v33 = vpop.permute.xlu0 %4237 }
 0x513   : > { %v9641_v58 = vadd.f32 %v9419_v51, %v3945_v60 }
 0x514   : > { %11611 = vst [vmem:[#allocation20_spill] sm:$0xff] %v9638_v25  ;;  %v10988_v61 = vmax.f32 %v9638_v25, 0.0  ;;  %4583 = vrot.lane.b32.xlu0 %v9643_v12, %s7086_s23 }
 0x515   : > { %11612 = vst [vmem:[#allocation17_spill] sm:$0xff] %v9641_v58  ;;  %v10989_v18 = vmax.f32 %v9641_v58, 0.0  ;;  %4581 = vrot.lane.b32.xlu1 %v9648_v62, %s7086_s23 }
 0x516   : > { %v4314_v60 = vadd.f32 %v4240_v1, %v10988_v61  ;;  %v4242_v61 = vpop.permute.xlu0 %4241 }
 0x517   : > { %v4313_v24 = vadd.f32 %v4238_v33, %v10989_v18  ;;  %v9667_v1 = vld [vmem:[#allocation2 + $0xa8] sm:$0xff]  ;;  %v4244_v18 = vpop.permute.xlu1 %4243 }
 0x518   : > { %4346 = vst.msk [vmem:[#allocation2 + $0xb8] sm:$0xff] %vm11613_vm6, %v4314_v60  ;;  %4467 = vrot.lane.b32.xlu0 %v4314_v60, %s7087_s28  ;;  %v9672_v60 = vld [vmem:[#allocation2 + $0xa0] sm:$0xff]  ;;  %vm11631_vm6 = vmmov %vm11587_vm0 }
 0x519   : > { %4345 = vst.msk [vmem:[#allocation2 + $0xb0] sm:$0xff] %vm11614_vm4, %v4313_v24  ;;  %v6837_v50 = vpop.f32.mrb[40].mxu1  ;;  %4465 = vrot.lane.b32.xlu1 %v4313_v24, %s7087_s28  ;;  %vm11632_vm4 = vmmov %vm11587_vm0 }
 0x51a   : > { %v9662_v11 = vadd.f32 %v6837_v50, %v9419_v51  ;;  %v3955_v21 = vpop.f32.mrb[41].mxu1  ;;  %v4246_v58 = vpop.permute.xlu0 %4245 }
 0x51b   : > { %v9665_v27 = vadd.f32 %v9419_v51, %v3955_v21  ;;  %v4248_v31 = vpop.permute.xlu1 %4247 }
 0x51c   : > { %11615 = vst [vmem:[#allocation22_spill] sm:$0xff] %v9662_v11  ;;  %v10994_v33 = vmax.f32 %v9662_v11, 0.0  ;;  %4587 = vrot.lane.b32.xlu0 %v9667_v1, %s7086_s23 }
 0x51d   : > { %11616 = vst [vmem:[#allocation19_spill] sm:$0xff] %v9665_v27  ;;  %v10995_v24 = vmax.f32 %v9665_v27, 0.0  ;;  %4585 = vrot.lane.b32.xlu1 %v9672_v60, %s7086_s23 }
 0x51e   : > { %v4316_v21 = vadd.f32 %v4244_v18, %v10994_v33 }
 0x51f   : > { %v4315_v50 = vadd.f32 %v4242_v61, %v10995_v24  ;;  %v9691_v33 = vld [vmem:[#allocation2 + $0xb8] sm:$0xff]  ;;  %v4250_v24 = vpop.permute.xlu0 %4249  ;;  %v4252_v11 = vpop.permute.xlu1 %4251 }
 0x520   : > { %4348 = vst.msk [vmem:[#allocation2 + $0xc8] sm:$0xff] %vm11617_vm15, %v4316_v21  ;;  %4471 = vrot.lane.b32.xlu0 %v4316_v21, %s7087_s28  ;;  %v9696_v21 = vld [vmem:[#allocation2 + $0xb0] sm:$0xff]  ;;  %vm11633_vm15 = vmmov %vm11587_vm0 }
 0x521   : > { %4347 = vst.msk [vmem:[#allocation2 + $0xc0] sm:$0xff] %vm11618_vm5, %v4315_v50  ;;  %v6840_v25 = vpop.f32.mrb[42].mxu1  ;;  %4469 = vrot.lane.b32.xlu1 %v4315_v50, %s7087_s28  ;;  %vm11634_vm5 = vmmov %vm11587_vm0 }
 0x522   : > { %v9686_v19 = vadd.f32 %v6840_v25, %v9419_v51  ;;  %v3965_v9 = vpop.f32.mrb[43].mxu1 }
 0x523   : > { %v9689_v18 = vadd.f32 %v9419_v51, %v3965_v9  ;;  %v4256_v29 = vpop.permute.xlu1 %4255 }
 0x524   : > { %11619 = vst [vmem:[#allocation24_spill] sm:$0xff] %v9686_v19  ;;  %v11000_v61 = vmax.f32 %v9686_v19, 0.0  ;;  %4591 = vrot.lane.b32.xlu0 %v9691_v33, %s7086_s23 }
 0x525   : > { %11620 = vst [vmem:[#allocation21_spill] sm:$0xff] %v9689_v18  ;;  %v11001_v50 = vmax.f32 %v9689_v18, 0.0  ;;  %4589 = vrot.lane.b32.xlu1 %v9696_v21, %s7086_s23 }
 0x526   : > { %v4318_v25 = vadd.f32 %v4248_v31, %v11000_v61 }
 0x527   : > { %v4317_v9 = vadd.f32 %v4246_v58, %v11001_v50  ;;  %v9715_v61 = vld [vmem:[#allocation2 + $0xc8] sm:$0xff] }
 0x528   : > { %4350 = vst.msk [vmem:[#allocation2 + $0xd8] sm:$0xff] %vm11621_vm2, %v4318_v25  ;;  %4475 = vrot.lane.b32.xlu0 %v4318_v25, %s7087_s28  ;;  %v9720_v25 = vld [vmem:[#allocation2 + $0xc0] sm:$0xff]  ;;  %vm11635_vm2 = vmmov %vm11587_vm0 }
 0x529   : > { %4349 = vst.msk [vmem:[#allocation2 + $0xd0] sm:$0xff] %vm11587_vm0, %v4317_v9  ;;  %v6843_v27 = vpop.f32.mrb[44].mxu1  ;;  %4473 = vrot.lane.b32.xlu1 %v4317_v9, %s7087_s28  ;;  %vm11636_vm0 = vcmask 97280  }
 0x52a   : > { %v9710_v17 = vadd.f32 %v6843_v27, %v9419_v51  ;;  %v3975_v30 = vpop.f32.mrb[45].mxu1  ;;  %v4254_v27 = vpop.permute.xlu0 %4253 }
 0x52b   : > { %v9713_v31 = vadd.f32 %v9419_v51, %v3975_v30 }
 0x52c   : > { %11622 = vst [vmem:[#allocation26_spill] sm:$0xff] %v9710_v17  ;;  %v11007_v58 = vmax.f32 %v9710_v17, 0.0  ;;  %4595 = vrot.lane.b32.xlu0 %v9715_v61, %s7086_s23 }
 0x52d   : > { %11623 = vst [vmem:[#allocation23_spill] sm:$0xff] %v9713_v31  ;;  %v11008_v50 = vmax.f32 %v9713_v31, 0.0  ;;  %v6846_v19 = vpop.f32.mrb[46].mxu1  ;;  %4593 = vrot.lane.b32.xlu1 %v9720_v25, %s7086_s23 }
 0x52e   : > { %v4320_v30 = vadd.f32 %v4252_v11, %v11007_v58  ;;  %v9728_v9 = vadd.f32 %v6846_v19, %v9419_v51  ;;  %v3985_v18 = vpop.f32.mrb[47].mxu1  ;;  %v4258_v31 = vpop.permute.xlu0 %4257 }
 0x52f   : > { %v4319_v4 = vadd.f32 %v4250_v24, %v11008_v50  ;;  %v9733_v38 = vadd.f32 %v9419_v51, %v3985_v18 }
 0x530   : > { %11624 = vst [vmem:[#allocation28_spill] sm:$0xff] %v9728_v9  ;;  %4352 = vst.msk [vmem:[#allocation2 + $0xe8] sm:$0xff] %vm11626_vm3, %v4320_v30  ;;  %v11011_v3 = vmax.f32 %v9728_v9, 0.0  ;;  %4479 = vrot.lane.b32.xlu0 %v4320_v30, %s7087_s28  ;;  %v9751_v30 = vld [vmem:[#allocation2 + $0xd8] sm:$0xff] }
 0x531   : > { %11625 = vst [vmem:[#allocation25_spill] sm:$0xff] %v9733_v38  ;;  %4351 = vst.msk [vmem:[#allocation2 + $0xe0] sm:$0xff] %vm11627_vm1, %v4319_v4  ;;  %v11012_v11 = vmax.f32 %v9733_v38, 0.0  ;;  %v6849_v19 = vpop.f32.mrb[48].mxu1  ;;  %4477 = vrot.lane.b32.xlu1 %v4319_v4, %s7087_s28  ;;  %vm11638_vm1 = vcmp.lt.s32.totalorder %v7677_v41, 7 }
 0x532   : > { %v4322_v58 = vadd.f32 %v4256_v29, %v11011_v3  ;;  %v9744_v24 = vadd.f32 %v6849_v19, %v9419_v51  ;;  %v3995_v18 = vpop.f32.mrb[49].mxu1  ;;  %v9757_v29 = vld [vmem:[#allocation2 + $0xd0] sm:$0xff]  ;;  %v4260_v19 = vpop.permute.xlu1 %4259  ;;  %vm11637_vm3 = vmmov %vm11636_vm0 }
 0x533   : > { %v4321_v50 = vadd.f32 %v4254_v27, %v11012_v11  ;;  %v9749_v17 = vadd.f32 %v9419_v51, %v3995_v18  ;;  %v9768_v3 = vpop.permute.xlu0 %4613 }
 0x534   : > { %11628 = vst [vmem:[#allocation30_spill] sm:$0xff] %v9744_v24  ;;  %4354 = vst.msk [vmem:[#allocation2 + $0xf8] sm:$0xff] %vm11630_vm14, %v4322_v58  ;;  %v11014_v4 = vmax.f32 %v9744_v24, 0.0  ;;  %4599 = vrot.lane.b32.xlu0 %v9751_v30, %s7086_s23  ;;  %vm11639_vm14 = vcmp.lt.s32.totalorder %v7677_v41, 1 }
 0x535   : > { %11629 = vst [vmem:[#allocation27_spill] sm:$0xff] %v9749_v17  ;;  %4353 = vst.msk [vmem:[#allocation2 + $0xf0] sm:$0xff] %vm11631_vm6, %v4321_v50  ;;  %v11015_v27 = vmax.f32 %v9749_v17, 0.0  ;;  %4597 = vrot.lane.b32.xlu1 %v9757_v29, %s7086_s23 }
 0x536   : > { %v4324_v51 = vadd.f32 %v4260_v19, %v11014_v4  ;;  %v9782_v19 = vpop.permute.xlu1 %4615  ;;  %vm11641_vm6 = vmmov %vm11635_vm2 }
 0x537   : > { %v4323_v18 = vadd.f32 %v4258_v31, %v11015_v27  ;;  %v9773_v11 = vld [vmem:[#allocation2 + $0xe8] sm:$0xff] }
 0x538   : > { %4356 = vst.msk [vmem:[#allocation2 + $0x108] sm:$0xff] %vm11632_vm4, %v4324_v51  ;;  %4483 = vrot.lane.b32.xlu0 %v4322_v58, %s7087_s28  ;;  %v9777_v24 = vld [vmem:[#allocation2 + $0xe0] sm:$0xff]  ;;  %vm11642_vm4 = vmmov %vm11635_vm2 }
 0x539   : > { %4355 = vst.msk [vmem:[#allocation2 + $0x100] sm:$0xff] %vm11633_vm15, %v4323_v18  ;;  %4481 = vrot.lane.b32.xlu1 %v4321_v50, %s7087_s28  ;;  %vm11643_vm15 = vmmov %vm11636_vm0 }
 0x53a   : > { %v4428_v9 = vpop.permute.xlu1 %4427 }
 0x53b   : > { %v4426_v31 = vpop.permute.xlu0 %4425  ;;  %v9785_v4 = vld [vmem:[#allocation2 + $0xf8] sm:$0xff]  ;;  %v4650_v53 = vsel %vm11634_vm5, %v4358_v54, %v4428_v9  ;;  %vm11644_vm5 = vcmask 1045504  }
 0x53c   : > { %4603 = vrot.lane.b32.xlu0 %v9773_v11, %s7086_s23  ;;  %v9789_v50 = vld [vmem:[#allocation2 + $0xf0] sm:$0xff]  ;;  %v6396_v54 = vld [vmem:[%s10796_s3 + $0x98] sm:$0xff] }
 0x53d   : > { %4601 = vrot.lane.b32.xlu1 %v9777_v24, %s7086_s23 }
 0x53f   : > { %v4390_v17 = vld [vmem:[#allocation2 + $0x108] sm:$0xff] }
 0x540   : > { %4487 = vrot.lane.b32.xlu0 %v4324_v51, %s7087_s28  ;;  %v6391_v51 = vld [vmem:[%s10796_s3 + $0x70] sm:$0xff]  ;;  %v4389_v20 = vld [vmem:[#allocation2 + $0x100] sm:$0xff] }
 0x541   : > { %4485 = vrot.lane.b32.xlu1 %v4323_v18, %s7087_s28  ;;  %v6392_v18 = vld [vmem:[%s10796_s3 + $0x78] sm:$0xff] }
 0x542   : > { %v4432_v58 = vpop.permute.xlu0 %4431  ;;  %v7006_v5 = vpack.c.bf16 %v6392_v18, %v6391_v51  ;;  %v4649_v18 = vsel %vm11635_vm2, %v4357_v14, %v4426_v31  ;;  %vm11645_vm2 = vmmov %vm11636_vm0 }
 0x544   : > { %4607 = vrot.lane.b32.xlu0 %v9785_v4, %s7086_s23  ;;  %7007 = vmatprep.subr.bf16.mxu0 %v7006_v5 }
 0x545   : > { %4605 = vrot.lane.b32.xlu1 %v9789_v50, %s7086_s23  ;;  %7009 = vmatpush3.bf16.msra.mxu0 %v7006_v5 }
 0x546   : > { %v4430_v27 = vpop.permute.xlu0 %4429 }
 0x549   : > { %4611 = vrot.lane.b32.xlu1 %v4390_v17, %s7086_s23  ;;  %v6394_v17 = vld [vmem:[%s10796_s3 + $0x88] sm:$0xff] }
 0x54a   : > { %v4436_v38 = vpop.permute.xlu0 %4435  ;;  %v7010_v0 = vpack.c.bf16 %v6394_v17, %v6393_v47  ;;  %v4360_v17 = vld [vmem:[#allocation2 + $0x18] sm:$0xff] }
 0x54b   : > { %v4434_v59 = vpop.permute.xlu1 %4433 }
 0x54c   : > { %7011 = vmatprep.subr.bf16.mxu0 %v7010_v0 }
 0x54d   : > { %4609 = vrot.lane.b32.xlu1 %v4389_v20, %s7086_s23  ;;  %v6395_v20 = vld [vmem:[%s10796_s3 + $0x90] sm:$0xff]  ;;  %7013 = vmatpush3.bf16.msra.mxu0 %v7010_v0  ;;  %v4652_v0 = vsel %vm11641_vm6, %v4360_v17, %v4432_v58  ;;  %vm11652_vm6 = vmmov %vm11642_vm4 }
 0x54e   : > { %v4556_v51 = vpop.permute.xlu0 %4555 }
 0x54f   : > { %v4682_v23 = vsel %vm11636_vm0, %v4650_v53, %v4556_v51  ;;  %v4554_v26 = vpop.permute.xlu1 %4553  ;;  %v7014_v53 = vpack.c.bf16 %v6396_v54, %v6395_v20  ;;  %v4359_v51 = vld [vmem:[#allocation2 + $0x10] sm:$0xff]  ;;  %vm11646_vm0 = vmmov %vm11644_vm5 }
 0x550   : > { %v4714_v15 = vrot.slane %v4682_v23, 7  ;;  %v4810_v7 = vrot.slane %v4682_v23, 1  ;;  %v9811_v48 = vsel %vm11637_vm3, %v4649_v18, %v4554_v26  ;;  %v4651_v20 = vsel %vm11642_vm4, %v4359_v51, %v4430_v27  ;;  %vm11647_vm3 = vmmov %vm11638_vm1 }
 0x551   : > { %v11031_v47 = vrot.slane %v9811_v48, 7  ;;  %v11030_v5 = vrot.slane %v9811_v48, 1  ;;  %4937 = vrot.lane.b32.xlu0 %v9811_v48, %s7088_s22  ;;  %4939 = vrot.lane.b32.xlu1 %v4682_v23, %s7088_s22  ;;  %v6397_v23 = vld [vmem:[%s10796_s3 + $0xa0] sm:$0x3f] }
 0x552   : > { %v4440_v26 = vpop.permute.xlu0 %4439  ;;  %7015 = vmatprep.subr.bf16.mxu0 %v7014_v53 }
 0x553   : > { %v4438_v14 = vpop.permute.xlu1 %4437  ;;  %v4871_v9 = vsel %vm11638_vm1, %v11030_v5, %v4810_v7  ;;  %v9832_v31 = vsel %vm11639_vm14, %v11031_v47, %v4714_v15  ;;  %7017 = vmatpush3.bf16.msra.mxu0 %v7014_v53  ;;  %vm11648_vm1 = vmmov %vm11639_vm14 }
 0x554   : > { %11640 = vst [vmem:[#allocation32_spill] sm:$0xff] %v9832_v31  ;;  %6862 = vmatprep.subr.msk.mxu0 %vm11644_vm5, %v6397_v23  ;;  %vm11650_vm14 = vmmov %vm11648_vm1 }
 0x555   : > { %5065 = vrot.lane.b32.xlu0 %v4871_v9, %s7089_s26  ;;  %vm11654_vm5 = vmmov %vm11645_vm2 }
 0x556   : > { %v4560_v18 = vpop.permute.xlu0 %4559 }
 0x557   : > { %v4684_v54 = vsel %vm11643_vm15, %v4652_v0, %v4560_v18  ;;  %v4558_v5 = vpop.permute.xlu1 %4557  ;;  %6863 = vmatpush3.msk.msra.mxu0 %vm11646_vm0, %v6397_v23  ;;  %v4653_v23 = vsel %vm11642_vm4, %v9480_v34, %v4434_v59  ;;  %vm11653_vm15 = vmmov %vm11645_vm2 }
 0x558   : > { %v4716_v47 = vrot.slane %v4684_v54, 7  ;;  %v4812_v22 = vrot.slane %v4684_v54, 1  ;;  %v4683_v31 = vsel %vm11645_vm2, %v4651_v20, %v4558_v5  ;;  %4943 = vrot.lane.b32.xlu1 %v4684_v54, %s7088_s22  ;;  %vm11655_vm2 = vmmov %vm11647_vm3 }
 0x559   : > { %v4715_v28 = vrot.slane %v4683_v31, 7  ;;  %v4811_v9 = vrot.slane %v4683_v31, 1  ;;  %4941 = vrot.lane.b32.xlu0 %v4683_v31, %s7088_s22  ;;  %v4654_v31 = vsel %vm11652_vm6, %v9475_v37, %v4436_v38  ;;  %vm11657_vm0 = vmmov %vm11655_vm2 }
 0x55a   : > { %v4444_v58 = vpop.permute.xlu0 %4443  ;;  %vm11661_vm6 = vmmov %vm11654_vm5 }
 0x55b   : > { %v4442_v53 = vpop.permute.xlu1 %4441  ;;  %v4869_v27 = vsel %vm11647_vm3, %v4811_v9, %v4812_v22  ;;  %v9850_v17 = vsel %vm11648_vm1, %v4715_v28, %v4716_v47  ;;  %v9854_v5 = vsel %vm11650_vm14, %v4714_v15, %v4715_v28  ;;  %v4870_v28 = vsel %vm11655_vm2, %v4810_v7, %v4811_v9  ;;  %vm11658_vm3 = vmmov %vm11648_vm1 }
 0x55c   : > { %11649 = vst [vmem:[#allocation29_spill] sm:$0xff] %v9850_v17  ;;  %11651 = vst [vmem:[#allocation34_spill] sm:$0xff] %v9854_v5  ;;  %v4874_v59 = vsel %vm7733_vm7, %v4870_v28, 0.0 }
 0x55d   : > { %5069 = vrot.lane.b32.xlu0 %v4869_v27, %s7089_s26  ;;  %vm11659_vm14 = vmmov %vm11642_vm4 }
 0x55e   : > { %v4564_v0 = vpop.permute.xlu0 %4563  ;;  %v4656_v9 = vsel %vm11659_vm14, %v9499_v6, %v4440_v26  ;;  %vm11660_vm7 = vmmov %vm11642_vm4 }
 0x55f   : > { %v4686_v51 = vsel %vm11653_vm15, %v4654_v31, %v4564_v0  ;;  %v4562_v18 = vpop.permute.xlu1 %4561  ;;  %v4655_v5 = vsel %vm11660_vm7, %v9504_v8, %v4438_v14  ;;  %vm11662_vm4 = vmmov %vm11654_vm5 }
 0x560   : > { %v4718_v20 = vrot.slane %v4686_v51, 7  ;;  %v4814_v54 = vrot.slane %v4686_v51, 1  ;;  %v4685_v17 = vsel %vm11654_vm5, %v4653_v23, %v4562_v18  ;;  %4947 = vrot.lane.b32.xlu1 %v4686_v51, %s7088_s22  ;;  %vm11663_vm15 = vmmov %vm11657_vm0 }
 0x561   : > { %v4717_v15 = vrot.slane %v4685_v17, 7  ;;  %v4813_v27 = vrot.slane %v4685_v17, 1  ;;  %4945 = vrot.lane.b32.xlu0 %v4685_v17, %s7088_s22  ;;  %vm11665_vm5 = vmmov %vm11657_vm0 }
 0x562   : > { %v4448_v38 = vpop.permute.xlu0 %4447  ;;  %vm11666_vm2 = vmmov %vm11648_vm1 }
 0x563   : > { %v4446_v37 = vpop.permute.xlu1 %4445  ;;  %v4867_v34 = vsel %vm11657_vm0, %v4813_v27, %v4814_v54  ;;  %v9873_v31 = vsel %vm11658_vm3, %v4717_v15, %v4718_v20  ;;  %v9878_v7 = vsel %vm11648_vm1, %v4716_v47, %v4717_v15  ;;  %v4868_v47 = vsel %vm11663_vm15, %v4812_v22, %v4813_v27  ;;  %vm11667_vm0 = vmmov %vm11648_vm1 }
 0x564   : > { %5067 = vrot.lane.b32.xlu1 %v4874_v59, %s7089_s26  ;;  %v4876_v8 = vsel %vm7764_vm8, %v4868_v47, 0.0  ;;  %vm11668_vm3 = vmmov %vm11660_vm7 }
 0x565   : > { %5073 = vrot.lane.b32.xlu0 %v4867_v34, %s7089_s26  ;;  %v4658_v27 = vsel %vm11668_vm3, %v9523_v45, %v4444_v58  ;;  %vm11669_vm8 = vmmov %vm11668_vm3 }
 0x566   : > { %v4568_v17 = vpop.permute.xlu0 %4567  ;;  %vm11670_vm1 = vmmov %vm11662_vm4 }
 0x567   : > { %v4688_v0 = vsel %vm11661_vm6, %v4656_v9, %v4568_v17  ;;  %v4566_v23 = vpop.permute.xlu1 %4565  ;;  %vm11671_vm14 = vmmov %vm11670_vm1 }
 0x568   : > { %v4720_v51 = vrot.slane %v4688_v0, 7  ;;  %v4816_v18 = vrot.slane %v4688_v0, 1  ;;  %v4687_v28 = vsel %vm11662_vm4, %v4655_v5, %v4566_v23  ;;  %4951 = vrot.lane.b32.xlu1 %v4688_v0, %s7088_s22  ;;  %v4657_v5 = vsel %vm11669_vm8, %v9528_v35, %v4442_v53  ;;  %vm11672_vm7 = vmmov %vm11665_vm5 }
 0x569   : > { %v4719_v15 = vrot.slane %v4687_v28, 7  ;;  %v4815_v59 = vrot.slane %v4687_v28, 1  ;;  %4949 = vrot.lane.b32.xlu0 %v4687_v28, %s7088_s22  ;;  %vm11674_vm6 = vmmov %vm11665_vm5 }
 0x56a   : > { %v4452_v6 = vpop.permute.xlu0 %4451  ;;  %vm11675_vm4 = vmmov %vm11667_vm0 }
 0x56b   : > { %v4450_v26 = vpop.permute.xlu1 %4449  ;;  %v4865_v14 = vsel %vm11665_vm5, %v4815_v59, %v4816_v18  ;;  %v9897_v9 = vsel %vm11666_vm2, %v4719_v15, %v4720_v51  ;;  %v9902_v22 = vsel %vm11667_vm0, %v4718_v20, %v4719_v15  ;;  %v4866_v20 = vsel %vm11672_vm7, %v4814_v54, %v4815_v59  ;;  %vm11676_vm15 = vmmov %vm11667_vm0 }
 0x56c   : > { %5071 = vrot.lane.b32.xlu1 %v4876_v8, %s7089_s26  ;;  %v4878_v35 = vsel %vm7795_vm9, %v4866_v20, 0.0  ;;  %vm11677_vm5 = vmmov %vm11668_vm3 }
 0x56d   : > { %5077 = vrot.lane.b32.xlu0 %v4865_v14, %s7089_s26  ;;  %v4660_v59 = vsel %vm11677_vm5, %v9547_v39, %v4448_v38  ;;  %vm11678_vm9 = vmmov %vm11668_vm3 }
 0x56e   : > { %v4572_v17 = vpop.permute.xlu0 %4571  ;;  %vm11679_vm2 = vmmov %vm11670_vm1 }
 0x56f   : > { %v4690_v0 = vsel %vm11670_vm1, %v4658_v27, %v4572_v17  ;;  %v4570_v23 = vpop.permute.xlu1 %4569  ;;  %vm11680_vm0 = vmmov %vm11670_vm1 }
 0x570   : > { %v4722_v28 = vrot.slane %v4690_v0, 7  ;;  %v4818_v47 = vrot.slane %v4690_v0, 1  ;;  %v4689_v34 = vsel %vm11671_vm14, %v4657_v5, %v4570_v23  ;;  %4955 = vrot.lane.b32.xlu1 %v4690_v0, %s7088_s22  ;;  %v4659_v5 = vsel %vm11678_vm9, %v9552_v56, %v4446_v37  ;;  %vm11681_vm3 = vmmov %vm11674_vm6 }
 0x571   : > { %v4721_v15 = vrot.slane %v4689_v34, 7  ;;  %v4817_v8 = vrot.slane %v4689_v34, 1  ;;  %4953 = vrot.lane.b32.xlu0 %v4689_v34, %s7088_s22  ;;  %vm11683_vm8 = vmmov %vm11681_vm3 }
 0x572   : > { %v4456_v45 = vpop.permute.xlu0 %4455  ;;  %vm11684_vm1 = vmmov %vm11675_vm4 }
 0x573   : > { %v4454_v58 = vpop.permute.xlu1 %4453  ;;  %v4863_v53 = vsel %vm11674_vm6, %v4817_v8, %v4818_v47  ;;  %v9921_v27 = vsel %vm11675_vm4, %v4721_v15, %v4722_v28  ;;  %v9926_v54 = vsel %vm11676_vm15, %v4720_v51, %v4721_v15  ;;  %v4864_v51 = vsel %vm11681_vm3, %v4816_v18, %v4817_v8  ;;  %vm11685_vm14 = vmmov %vm11684_vm1 }
 0x574   : > { %5075 = vrot.lane.b32.xlu1 %v4878_v35, %s7089_s26  ;;  %v4880_v56 = vsel %vm7827_vm10, %v4864_v51, 0.0  ;;  %vm11686_vm7 = vmmov %vm11677_vm5 }
 0x575   : > { %5081 = vrot.lane.b32.xlu0 %v4863_v53, %s7089_s26  ;;  %v4662_v8 = vsel %vm11686_vm7, %v9571_v43, %v4452_v6  ;;  %vm11687_vm10 = vmmov %vm11677_vm5 }
 0x576   : > { %v4576_v17 = vpop.permute.xlu0 %4575  ;;  %vm11688_vm6 = vmmov %vm11680_vm0 }
 0x577   : > { %v4692_v0 = vsel %vm11679_vm2, %v4660_v59, %v4576_v17  ;;  %v4574_v23 = vpop.permute.xlu1 %4573  ;;  %vm11689_vm4 = vmmov %vm11680_vm0 }
 0x578   : > { %v4724_v34 = vrot.slane %v4692_v0, 7  ;;  %v4820_v20 = vrot.slane %v4692_v0, 1  ;;  %v4691_v14 = vsel %vm11680_vm0, %v4659_v5, %v4574_v23  ;;  %4959 = vrot.lane.b32.xlu1 %v4692_v0, %s7088_s22  ;;  %v4661_v5 = vsel %vm11687_vm10, %v9576_v44, %v4450_v26  ;;  %vm11690_vm15 = vmmov %vm11681_vm3 }
 0x579   : > { %v4723_v15 = vrot.slane %v4691_v14, 7  ;;  %v4819_v35 = vrot.slane %v4691_v14, 1  ;;  %4957 = vrot.lane.b32.xlu0 %v4691_v14, %s7088_s22  ;;  %vm11692_vm5 = vmmov %vm11681_vm3 }
 0x57a   : > { %v4460_v39 = vpop.permute.xlu0 %4459  ;;  %vm11693_vm9 = vmmov %vm11684_vm1 }
 0x57b   : > { %v4458_v38 = vpop.permute.xlu1 %4457  ;;  %v4861_v37 = vsel %vm11683_vm8, %v4819_v35, %v4820_v20  ;;  %v9945_v59 = vsel %vm11684_vm1, %v4723_v15, %v4724_v34  ;;  %v9950_v18 = vsel %vm11685_vm14, %v4722_v28, %v4723_v15  ;;  %v4862_v28 = vsel %vm11690_vm15, %v4818_v47, %v4819_v35  ;;  %vm11694_vm2 = vmmov %vm11684_vm1 }
 0x57c   : > { %5079 = vrot.lane.b32.xlu1 %v4880_v56, %s7089_s26  ;;  %v4882_v44 = vsel %vm7859_vm11, %v4862_v28, 0.0  ;;  %vm11695_vm0 = vmmov %vm11686_vm7 }
 0x57d   : > { %5085 = vrot.lane.b32.xlu0 %v4861_v37, %s7089_s26  ;;  %v4664_v35 = vsel %vm11695_vm0, %v9595_v2, %v4456_v45  ;;  %vm11696_vm11 = vmmov %vm11695_vm0 }
 0x57e   : > { %v4580_v17 = vpop.permute.xlu0 %4579  ;;  %vm11697_vm3 = vmmov %vm11689_vm4 }
 0x57f   : > { %v4694_v0 = vsel %vm11688_vm6, %v4662_v8, %v4580_v17  ;;  %v4578_v23 = vpop.permute.xlu1 %4577  ;;  %vm11698_vm8 = vmmov %vm11697_vm3 }
 0x580   : > { %v4726_v14 = vrot.slane %v4694_v0, 7  ;;  %v4822_v51 = vrot.slane %v4694_v0, 1  ;;  %v4693_v53 = vsel %vm11689_vm4, %v4661_v5, %v4578_v23  ;;  %4963 = vrot.lane.b32.xlu1 %v4694_v0, %s7088_s22  ;;  %v4663_v5 = vsel %vm11696_vm11, %v9600_v46, %v4454_v58  ;;  %vm11699_vm1 = vmmov %vm11692_vm5 }
 0x581   : > { %v4725_v15 = vrot.slane %v4693_v53, 7  ;;  %v4821_v56 = vrot.slane %v4693_v53, 1  ;;  %4961 = vrot.lane.b32.xlu0 %v4693_v53, %s7088_s22  ;;  %vm11701_vm14 = vmmov %vm11699_vm1 }
 0x582   : > { %v4464_v43 = vpop.permute.xlu0 %4463  ;;  %vm11702_vm7 = vmmov %vm11694_vm2 }
 0x583   : > { %v4462_v6 = vpop.permute.xlu1 %4461  ;;  %v4859_v26 = vsel %vm11692_vm5, %v4821_v56, %v4822_v51  ;;  %v9969_v8 = vsel %vm11693_vm9, %v4725_v15, %v4726_v14  ;;  %v9974_v47 = vsel %vm11694_vm2, %v4724_v34, %v4725_v15  ;;  %v4860_v34 = vsel %vm11699_vm1, %v4820_v20, %v4821_v56  ;;  %vm11703_vm10 = vmmov %vm11694_vm2 }
 0x584   : > { %5083 = vrot.lane.b32.xlu1 %v4882_v44, %s7089_s26  ;;  %v4884_v46 = vsel %vm7891_vm12, %v4860_v34, 0.0  ;;  %vm11704_vm6 = vmmov %vm11695_vm0 }
 0x585   : > { %5089 = vrot.lane.b32.xlu0 %v4859_v26, %s7089_s26  ;;  %v4666_v56 = vsel %vm11704_vm6, %v9619_v32, %v4460_v39  ;;  %vm11705_vm12 = vmmov %vm11695_vm0 }
 0x586   : > { %v4584_v17 = vpop.permute.xlu0 %4583  ;;  %vm11706_vm4 = vmmov %vm11697_vm3 }
 0x587   : > { %v4696_v0 = vsel %vm11697_vm3, %v4664_v35, %v4584_v17  ;;  %v4582_v23 = vpop.permute.xlu1 %4581  ;;  %vm11707_vm15 = vmmov %vm11697_vm3 }
 0x588   : > { %v4728_v53 = vrot.slane %v4696_v0, 7  ;;  %v4824_v28 = vrot.slane %v4696_v0, 1  ;;  %v4695_v37 = vsel %vm11698_vm8, %v4663_v5, %v4582_v23  ;;  %4967 = vrot.lane.b32.xlu1 %v4696_v0, %s7088_s22  ;;  %v4665_v5 = vsel %vm11705_vm12, %v9624_v16, %v4458_v38  ;;  %vm11708_vm5 = vmmov %vm11699_vm1 }
 0x589   : > { %v4727_v15 = vrot.slane %v4695_v37, 7  ;;  %v4823_v44 = vrot.slane %v4695_v37, 1  ;;  %4965 = vrot.lane.b32.xlu0 %v4695_v37, %s7088_s22  ;;  %vm11709_vm9 = vmmov %vm11699_vm1 }
 0x58a   : > { %v4468_v2 = vpop.permute.xlu0 %4467  ;;  %vm11710_vm0 = vmmov %vm11694_vm2 }
 0x58b   : > { %v4466_v45 = vpop.permute.xlu1 %4465  ;;  %v4857_v58 = vsel %vm11701_vm14, %v4823_v44, %v4824_v28  ;;  %v9993_v35 = vsel %vm11702_vm7, %v4727_v15, %v4728_v53  ;;  %v9998_v20 = vsel %vm11703_vm10, %v4726_v14, %v4727_v15  ;;  %v4858_v14 = vsel %vm11708_vm5, %v4822_v51, %v4823_v44  ;;  %vm11711_vm11 = vmmov %vm11704_vm6 }
 0x58c   : > { %5087 = vrot.lane.b32.xlu1 %v4884_v46, %s7089_s26  ;;  %v4886_v16 = vsel %vm7923_vm13, %v4858_v14, 0.0  ;;  %v4668_v44 = vsel %vm11711_vm11, %v9643_v12, %v4464_v43  ;;  %vm11712_vm13 = vmmov %vm11704_vm6 }
 0x58d   : > { %5093 = vrot.lane.b32.xlu0 %v4857_v58, %s7089_s26  ;;  %vm11713_vm8 = vmmov %vm11697_vm3 }
 0x58e   : > { %v4588_v17 = vpop.permute.xlu0 %4587  ;;  %vm11716_vm7 = vmmov %vm11699_vm1 }
 0x58f   : > { %v4698_v0 = vsel %vm11706_vm4, %v4666_v56, %v4588_v17  ;;  %v4586_v23 = vpop.permute.xlu1 %4585  ;;  %v4667_v56 = vsel %vm11712_vm13, %v9648_v62, %v4462_v6  ;;  %vm11717_vm10 = vmmov %vm11710_vm0 }
 0x590   : > { %v4730_v37 = vrot.slane %v4698_v0, 7  ;;  %v4826_v34 = vrot.slane %v4698_v0, 1  ;;  %v4697_v26 = vsel %vm11707_vm15, %v4665_v5, %v4586_v23  ;;  %4971 = vrot.lane.b32.xlu1 %v4698_v0, %s7088_s22  ;;  %vm11718_vm6 = vmmov %vm11710_vm0 }
 0x591   : > { %v4729_v15 = vrot.slane %v4697_v26, 7  ;;  %v4825_v46 = vrot.slane %v4697_v26, 1  ;;  %4969 = vrot.lane.b32.xlu0 %v4697_v26, %s7088_s22  ;;  %vm11719_vm12 = vmmov %vm11711_vm11 }
 0x592   : > { %v4472_v32 = vpop.permute.xlu0 %4471  ;;  %vm11720_vm4 = vmmov %vm11711_vm11 }
 0x593   : > { %v4470_v39 = vpop.permute.xlu1 %4469  ;;  %v4855_v38 = vsel %vm11709_vm9, %v4825_v46, %v4826_v34  ;;  %v10017_v58 = vsel %vm11694_vm2, %v4729_v15, %v4730_v37  ;;  %v10022_v51 = vsel %vm11710_vm0, %v4728_v53, %v4729_v15  ;;  %v4856_v53 = vsel %vm11699_vm1, %v4824_v28, %v4825_v46  ;;  %vm11721_vm15 = vmmov %vm11697_vm3 }
 0x594   : > { %5091 = vrot.lane.b32.xlu1 %v4886_v16, %s7089_s26  ;;  %v11714_v16 = vld [vmem:[#allocation43_spill] sm:$0xff]  ;;  %v4670_v46 = vsel %vm11719_vm12, %v9667_v1, %v4468_v2  ;;  %vm11722_vm5 = vmmov %vm11697_vm3  ;;  %vm11724_vm2 = vnez %v11389_v10 }
 0x595   : > { %5097 = vrot.lane.b32.xlu0 %v4855_v38, %s7089_s26  ;;  %vm11715_vm14 = vnez %v11714_v16  ;;  %vm11723_vm9 = vmmov %vm11699_vm1 }
 0x596   : > { %v4592_v52 = vpop.permute.xlu0 %4591  ;;  %v4888_v62 = vsel %vm11715_vm14, %v4856_v53, 0.0  ;;  %vm11725_vm0 = vmmov %vm11699_vm1 }
 0x597   : > { %v4700_v17 = vsel %vm11697_vm3, %v4668_v44, %v4592_v52  ;;  %v4590_v5 = vpop.permute.xlu1 %4589  ;;  %v4669_v52 = vsel %vm11720_vm4, %v9672_v60, %v4466_v45  ;;  %vm11726_vm11 = vmmov %vm11718_vm6 }
 0x598   : > { %v4732_v0 = vrot.slane %v4700_v17, 7  ;;  %v4828_v23 = vrot.slane %v4700_v17, 1  ;;  %v4699_v26 = vsel %vm11713_vm8, %v4667_v56, %v4590_v5  ;;  %4975 = vrot.lane.b32.xlu1 %v4700_v17, %s7088_s22  ;;  %vm11727_vm13 = vmmov %vm11718_vm6 }
 0x599   : > { %v4731_v14 = vrot.slane %v4699_v26, 7  ;;  %v4827_v15 = vrot.slane %v4699_v26, 1  ;;  %4973 = vrot.lane.b32.xlu0 %v4699_v26, %s7088_s22  ;;  %vm11728_vm3 = vmmov %vm11720_vm4 }
 0x59a   : > { %v4476_v12 = vpop.permute.xlu0 %4475  ;;  %vm11729_vm8 = vmmov %vm11728_vm3 }
 0x59b   : > { %v4474_v43 = vpop.permute.xlu1 %4473  ;;  %v4853_v6 = vsel %vm11716_vm7, %v4827_v15, %v4828_v23  ;;  %v10041_v38 = vsel %vm11717_vm10, %v4731_v14, %v4732_v0  ;;  %v10046_v28 = vsel %vm11718_vm6, %v4730_v37, %v4731_v14  ;;  %v4854_v37 = vsel %vm11723_vm9, %v4826_v34, %v4827_v15  ;;  %vm11730_vm1 = vmmov %vm11722_vm5 }
 0x59c   : > { %5095 = vrot.lane.b32.xlu1 %v4888_v62, %s7089_s26  ;;  %v4890_v60 = vsel %vm11724_vm2, %v4854_v37, 0.0  ;;  %v4672_v15 = vsel %vm11728_vm3, %v9691_v33, %v4472_v32  ;;  %vm11731_vm14 = vmmov %vm11730_vm1  ;;  %vm11733_vm10 = vnez %v11094_v36 }
 0x59d   : > { %5101 = vrot.lane.b32.xlu0 %v4853_v6, %s7089_s26  ;;  %v4671_v6 = vsel %vm11729_vm8, %v9696_v21, %v4470_v39  ;;  %vm11732_vm7 = vmmov %vm11725_vm0 }
 0x59e   : > { %v4596_v44 = vpop.permute.xlu0 %4595  ;;  %vm11734_vm6 = vmmov %vm11725_vm0 }
 0x59f   : > { %v4702_v56 = vsel %vm11721_vm15, %v4670_v46, %v4596_v44  ;;  %v4594_v17 = vpop.permute.xlu1 %4593  ;;  %vm11735_vm12 = vmmov %vm11726_vm11 }
 0x5a0   : > { %v4734_v5 = vrot.slane %v4702_v56, 7  ;;  %v4830_v26 = vrot.slane %v4702_v56, 1  ;;  %v4701_v53 = vsel %vm11722_vm5, %v4669_v52, %v4594_v17  ;;  %4979 = vrot.lane.b32.xlu1 %v4702_v56, %s7088_s22  ;;  %vm11736_vm4 = vmmov %vm11726_vm11 }
 0x5a1   : > { %v4733_v14 = vrot.slane %v4701_v53, 7  ;;  %v4829_v16 = vrot.slane %v4701_v53, 1  ;;  %4977 = vrot.lane.b32.xlu0 %v4701_v53, %s7088_s22  ;;  %vm11737_vm15 = vmmov %vm11728_vm3 }
 0x5a2   : > { %v4480_v1 = vpop.permute.xlu0 %4479  ;;  %vm11738_vm5 = vmmov %vm11728_vm3 }
 0x5a3   : > { %v4478_v2 = vpop.permute.xlu1 %4477  ;;  %v4851_v45 = vsel %vm11725_vm0, %v4829_v16, %v4830_v26  ;;  %v10065_v62 = vsel %vm11726_vm11, %v4733_v14, %v4734_v5  ;;  %v10070_v34 = vsel %vm11727_vm13, %v4732_v0, %v4733_v14  ;;  %v4852_v0 = vsel %vm11732_vm7, %v4828_v23, %v4829_v16  ;;  %vm11739_vm9 = vmmov %vm11730_vm1 }
 0x5a4   : > { %5099 = vrot.lane.b32.xlu1 %v4890_v60, %s7089_s26  ;;  %v4892_v21 = vsel %vm11733_vm10, %v4852_v0, 0.0  ;;  %v4674_v16 = vsel %vm11737_vm15, %v9715_v61, %v4476_v12  ;;  %v4673_v60 = vsel %vm11738_vm5, %v9720_v25, %v4474_v43  ;;  %vm11740_vm2 = vmmov %vm11730_vm1  ;;  %vm11742_vm13 = vnez %v11096_v40 }
 0x5a5   : > { %5105 = vrot.lane.b32.xlu0 %v4851_v45, %s7089_s26  ;;  %vm11741_vm11 = vmmov %vm11728_vm3 }
 0x5a6   : > { %v4600_v10 = vpop.permute.xlu0 %4599  ;;  %vm11743_vm3 = vmmov %vm11736_vm4 }
 0x5a7   : > { %v4704_v46 = vsel %vm11730_vm1, %v4672_v15, %v4600_v10  ;;  %v4598_v44 = vpop.permute.xlu1 %4597  ;;  %vm11744_vm8 = vmmov %vm11730_vm1 }
 0x5a8   : > { %v4736_v52 = vrot.slane %v4704_v46, 7  ;;  %v4832_v56 = vrot.slane %v4704_v46, 1  ;;  %v4703_v17 = vsel %vm11731_vm14, %v4671_v6, %v4598_v44  ;;  %4983 = vrot.lane.b32.xlu1 %v4704_v46, %s7088_s22  ;;  %vm11745_vm1 = vmmov %vm11738_vm5 }
 0x5a9   : > { %v4735_v53 = vrot.slane %v4703_v17, 7  ;;  %v4831_v37 = vrot.slane %v4703_v17, 1  ;;  %4981 = vrot.lane.b32.xlu0 %v4703_v17, %s7088_s22  ;;  %vm11746_vm14 = vmmov %vm11743_vm3 }
 0x5aa   : > { %v4484_v33 = vpop.permute.xlu0 %4483  ;;  %vm11747_vm7 = vmmov %vm11740_vm2 }
 0x5ab   : > { %v4482_v32 = vpop.permute.xlu1 %4481  ;;  %v4849_v39 = vsel %vm11734_vm6, %v4831_v37, %v4832_v56  ;;  %v10089_v14 = vsel %vm11735_vm12, %v4735_v53, %v4736_v52  ;;  %v10094_v23 = vsel %vm11736_vm4, %v4734_v5, %v4735_v53  ;;  %v4850_v5 = vsel %vm11725_vm0, %v4830_v26, %v4831_v37  ;;  %vm11748_vm10 = vmmov %vm11745_vm1 }
 0x5ac   : > { %5103 = vrot.lane.b32.xlu1 %v4892_v21, %s7089_s26  ;;  %v4894_v25 = vsel %vm11742_vm13, %v4850_v5, 0.0  ;;  %v4676_v37 = vsel %vm11748_vm10, %v9751_v30, %v4480_v1  ;;  %vm11749_vm6 = vmmov %vm11745_vm1 }
 0x5ad   : > { %5109 = vrot.lane.b32.xlu0 %v4849_v39, %s7089_s26  ;;  %vm11750_vm12 = vmmov %vm11740_vm2 }
 0x5ae   : > { %v4604_v36 = vpop.permute.xlu0 %4603  ;;  %vm11751_vm4 = vmmov %vm11740_vm2 }
 0x5af   : > { %v4706_v45 = vsel %vm11739_vm9, %v4674_v16, %v4604_v36  ;;  %v4602_v15 = vpop.permute.xlu1 %4601  ;;  %vm11752_vm15 = vmmov %vm11725_vm0 }
 0x5b0   : > { %v4738_v10 = vrot.slane %v4706_v45, 7  ;;  %v4705_v6 = vsel %vm11740_vm2, %v4673_v60, %v4602_v15  ;;  %4987 = vrot.lane.b32.xlu1 %v4706_v45, %s7088_s22  ;;  %v4834_v40 = vrot.slane %v4706_v45, 1  ;;  %vm11753_vm5 = vmmov %vm11725_vm0  ;;  %vm11756_vm0 = vnez %v11098_v49 }
 0x5b1   : > { %v4737_v46 = vrot.slane %v4705_v6, 7  ;;  %4985 = vrot.lane.b32.xlu0 %v4705_v6, %s7088_s22  ;;  %v4833_v17 = vrot.slane %v4705_v6, 1  ;;  %vm11754_vm9 = vmmov %vm11743_vm3 }
 0x5b2   : > { %v4488_v44 = vpop.permute.xlu0 %4487  ;;  %vm11755_vm2 = vmmov %vm11745_vm1 }
 0x5b3   : > { %v4680_v61 = vsel %vm11741_vm11, %v9785_v4, %v4488_v44  ;;  %v4486_v12 = vpop.permute.xlu1 %4485  ;;  %v10113_v43 = vsel %vm11743_vm3, %v4737_v46, %v4738_v10  ;;  %v10124_v4 = vsel %vm11746_vm14, %v4736_v52, %v4737_v46  ;;  %v4848_v30 = vsel %vm11752_vm15, %v4832_v56, %v4833_v17  ;;  %vm11757_vm11 = vmmov %vm11743_vm3 }
 0x5b4   : > { %v10117_v0 = vsel %vm11744_vm8, %v4680_v61, %v9782_v19  ;;  %v4679_v26 = vsel %vm11745_vm1, %v9789_v50, %v4486_v12  ;;  %5107 = vrot.lane.b32.xlu1 %v4894_v25, %s7089_s26  ;;  %v4675_v50 = vsel %vm11749_vm6, %v9757_v29, %v4478_v2  ;;  %v4847_v60 = vsel %vm11753_vm5, %v4833_v17, %v4834_v40  ;;  %vm11758_vm13 = vmmov %vm11743_vm3 }
 0x5b5   : > { %v10128_v53 = vsel %vm11747_vm7, %v4679_v26, %v9768_v3  ;;  %v4744_v19 = vrot.slane %v10117_v0, 7  ;;  %v4678_v2 = vsel %vm11755_vm2, %v9773_v11, %v4484_v33  ;;  %v4896_v15 = vsel %vm11756_vm0, %v4848_v30, 0.0  ;;  %vm11759_vm3 = vmmov %vm11751_vm4 }
 0x5b6   : > { %v4608_v21 = vpop.permute.xlu0 %4607  ;;  %v4743_v39 = vrot.slane %v10128_v53, 7  ;;  %4997 = vrot.lane.b32.xlu0 %v10128_v53, %s7088_s22  ;;  %vm11760_vm8 = vmmov %vm11745_vm1  ;;  %vm11771_vm2 = vcmask 146432   ;;  %vm11772_vm0 = vnez %v11105_v13 }
 0x5b7   : > { %v4708_v52 = vsel %vm11750_vm12, %v4676_v37, %v4608_v21  ;;  %v4606_v16 = vpop.permute.xlu1 %4605  ;;  %v4677_v49 = vsel %vm11760_vm8, %v9777_v24, %v4482_v32  ;;  %vm11761_vm1 = vmmov %vm11754_vm9  ;;  %v4839_v37 = vrot.slane %v10128_v53, 1  ;;  %v11765_v32 = vrot.slane %v9811_v48, 7 }
 0x5b8   : > { %v4740_v36 = vrot.slane %v4708_v52, 7  ;;  %v4707_v3 = vsel %vm11751_vm4, %v4675_v50, %v4606_v16  ;;  %4991 = vrot.lane.b32.xlu1 %v4708_v52, %s7088_s22  ;;  %v10148_v29 = vsel %vm11754_vm9, %v4743_v39, %v4744_v19  ;;  %v4836_v44 = vrot.slane %v4708_v52, 1  ;;  %vm11762_vm14 = vmmov %vm11759_vm3 }
 0x5b9   : > { %v4739_v1 = vrot.slane %v4707_v3, 7  ;;  %v4835_v5 = vrot.slane %v4707_v3, 1  ;;  %vm11763_vm7 = vmmov %vm11753_vm5  ;;  %vm11767_vm12 = vnez %v11100_v57  ;;  %vm11770_vm9 = vnez %v11102_v42 }
 0x5ba   : > { %5113 = vrot.lane.b32.xlu0 %v4847_v60, %s7089_s26  ;;  %vm11764_vm10 = vmmov %vm11753_vm5 }
 0x5bb   : > { %v4612_v45 = vpop.permute.xlu1 %4611  ;;  %v10156_v56 = vsel %vm11757_vm11, %v4739_v1, %v4740_v36  ;;  %v10160_v6 = vsel %vm11758_vm13, %v4738_v10, %v4739_v1  ;;  %v4846_v25 = vsel %vm11763_vm7, %v4834_v40, %v4835_v5  ;;  %v4845_v26 = vsel %vm11764_vm10, %v4835_v5, %v4836_v44  ;;  %vm11766_vm6 = vmmov %vm11761_vm1 }
 0x5bc   : > { %v4710_v46 = vsel %vm11759_vm3, %v4678_v2, %v4612_v45  ;;  %5111 = vrot.lane.b32.xlu1 %v4896_v15, %s7089_s26  ;;  %v4776_v21 = vsel %vm11766_vm6, %v4744_v19, %v11765_v32  ;;  %vm11768_vm4 = vmmov %vm11761_vm1  ;;  %vm11773_vm11 = vcmask 293888   ;;  %v4840_v1 = vrot.slane %v10117_v0, 1 }
 0x5bd   : > { %v4742_v61 = vrot.slane %v4710_v46, 7  ;;  %v4838_v12 = vrot.slane %v4710_v46, 1  ;;  %vm11769_vm15 = vmmov %vm11761_vm1  ;;  %v4777_v19 = vsel %vm11770_vm9, %v4776_v21, 0.0  ;;  %vm11775_vm3 = vcmask 441344  }
 0x5be   : > { %4989 = vrot.lane.b32.xlu0 %v4707_v3, %s7088_s22  ;;  %vm11774_vm13 = vmmov %vm11753_vm5 }
 0x5bf   : > { %v4610_v11 = vpop.permute.xlu1 %4609  ;;  %v10169_v33 = vsel %vm11761_vm1, %v4742_v61, %v4743_v39  ;;  %v4898_v39 = vsel %vm11767_vm12, %v4846_v25, 0.0  ;;  %v4842_v52 = vsel %vm11753_vm5, %v4838_v12, %v4839_v37  ;;  %vm11776_vm8 = vmmov %vm11753_vm5  ;;  %vm11777_vm1 = vnez %v11109_v63 }
 0x5c0   : > { %v4709_v10 = vsel %vm11762_vm14, %v4677_v49, %v4610_v11  ;;  %4995 = vrot.lane.b32.xlu1 %v4710_v46, %s7088_s22  ;;  %v4902_v3 = vsel %vm11772_vm0, %v4842_v52, 0.0  ;;  %vm11778_vm14 = vmmov %vm11753_vm5  ;;  %v11779_v46 = vrot.slane %v9811_v48, 1  ;;  %v11781_v63 = vmax.f32 %v9425_v55, 0.0  ;;  %v11782_v11 = vld [vmem:[#allocation46_spill] sm:$0xff] }
 0x5c1   : > { %v4741_v17 = vrot.slane %v4709_v10, 7  ;;  %v4837_v53 = vrot.slane %v4709_v10, 1  ;;  %v4841_v45 = vsel %vm11778_vm14, %v4839_v37, %v4840_v1  ;;  %vm11780_vm7 = vmmov %vm11753_vm5  ;;  %vm11783_vm10 = vnez %v11782_v11 }
 0x5c2   : > { %5117 = vrot.lane.b32.xlu0 %v4845_v26, %s7089_s26  ;;  %vm11785_vm6 = vmmov %vm11771_vm2  ;;  %v11789_v26 = vld [vmem:[#allocation60_spill] sm:$0xff] }
 0x5c3   : > { %v4938_v24 = vpop.permute.xlu0 %4937  ;;  %v10187_v40 = vsel %vm11768_vm4, %v4741_v17, %v4742_v61  ;;  %v10191_v50 = vsel %vm11769_vm15, %v4740_v36, %v4741_v17  ;;  %v4844_v30 = vsel %vm11774_vm13, %v4836_v44, %v4837_v53  ;;  %v4843_v42 = vsel %vm11776_vm8, %v4837_v53, %v4838_v12  ;;  %v4940_v60 = vpop.permute.xlu1 %4939  ;;  %v11787_v17 = vld [vmem:[#allocation47_spill] sm:$0xff]  ;;  %vm11791_vm4 = vmmov %vm11771_vm2 }
 0x5c4   : > { %5115 = vrot.lane.b32.xlu1 %v4898_v39, %s7089_s26  ;;  %v5161_v57 = vsel %vm11771_vm2, %v4777_v19, %v4938_v24  ;;  %v4900_v13 = vsel %vm11777_vm1, %v4844_v30, 0.0  ;;  %v4872_v44 = vsel %vm11780_vm7, %v4840_v1, %v11779_v46  ;;  %vm11788_vm12 = vnez %v11787_v17  ;;  %vm11792_vm15 = vmmov %vm11773_vm11  ;;  %v11795_v39 = vld [vmem:[#allocation42_spill] sm:$0xff]  ;;  %v11798_v19 = vld [vmem:[#allocation8_spill] sm:$0xff] }
 0x5c5   : > { %v4904_v12 = vsel %vm11783_vm10, %v4872_v44, 0.0  ;;  %v11790_v37 = vmax.f32 %v11789_v26, 0.0  ;;  %vm11793_vm5 = vmmov %vm11773_vm11  ;;  %v11796_v53 = vmax.f32 %v11795_v39, 0.0  ;;  %v11802_v30 = vld [vmem:[#allocation29_spill] sm:$0xff] }
 0x5c6   : > { %4993 = vrot.lane.b32.xlu0 %v4709_v10, %s7088_s22  ;;  %v11784_v10 = vld [vmem:[#allocation32_spill] sm:$0xff]  ;;  %vm11794_vm9 = vmmov %vm11775_vm3 }
 0x5c7   : > { %v5066_v16 = vpop.permute.xlu0 %5065  ;;  %v5162_v25 = vsel %vm11785_vm6, %v11784_v10, %v4940_v60  ;;  %vm11797_vm2 = vmmov %vm11775_vm3 }
 0x5c8   : > { %v5193_v36 = vsel %vm11773_vm11, %v5161_v57, %v5066_v16  ;;  %5123 = vrot.lane.b32.xlu1 %v4902_v3, %s7089_s26  ;;  %v11799_v57 = vmax.f32 %v11798_v19, 0.0  ;;  %v11800_v3 = vld [vmem:[#allocation45_spill] sm:$0xff]  ;;  %vm11803_vm0 = vmmov %vm11791_vm4 }
 0x5c9   : > { %6864 = vmatprep.mubr.msk.f32.mxu0 %vm11775_vm3, %v5193_v36  ;;  %v11801_v36 = vmax.f32 %v11800_v3, 0.0  ;;  %vm11808_vm13 = vmmov %vm11803_vm0 }
 0x5ca   : > { %5121 = vrot.lane.b32.xlu0 %v4843_v42, %s7089_s26  ;;  %v4944_v15 = vpop.permute.xlu1 %4943  ;;  %v11804_v42 = vld [vmem:[#allocation48_spill] sm:$0xff]  ;;  %vm11809_vm3 = vmmov %vm11793_vm5 }
 0x5cb   : > { %v4942_v2 = vpop.permute.xlu0 %4941  ;;  %v5164_v1 = vsel %vm11803_vm0, %v11802_v30, %v4944_v15  ;;  %vm11805_vm11 = vnez %v11804_v42  ;;  %vm11810_vm8 = vmmov %vm11809_vm3  ;;  %v11812_v15 = vld [vmem:[#allocation62_spill] sm:$0xff]  ;;  %v11836_v30 = vld [vmem:[#allocation36_spill] sm:$0xff] }
 0x5cc   : > { %5119 = vrot.lane.b32.xlu1 %v4900_v13, %s7089_s26  ;;  %v4781_v60 = vsel %vm11805_vm11, %v9878_v7, 0.0  ;;  %v11806_v13 = vld [vmem:[#allocation10_spill] sm:$0xff]  ;;  %vm11811_vm1 = vmmov %vm11797_vm2  ;;  %v11813_v11 = vmax.f32 %v11812_v15, 0.0 }
 0x5cd   : > { %vm11814_vm14 = vmmov %vm11811_vm1 }
 0x5ce   : > { %5125 = vrot.lane.b32.xlu0 %v4841_v45, %s7089_s26  ;;  %v11807_v45 = vmax.f32 %v11806_v13, 0.0  ;;  %vm11819_vm7 = vmmov %vm11803_vm0 }
 0x5cf   : > { %v5070_v5 = vpop.permute.xlu0 %5069  ;;  %vm11824_vm6 = vmmov %vm11803_vm0 }
 0x5d0   : > { %4999 = vrot.lane.b32.xlu1 %v10117_v0, %s7088_s22  ;;  %v11786_v0 = vld [vmem:[#allocation34_spill] sm:$0xff]  ;;  %vm11840_vm11 = vmmov %vm11809_vm3 }
 0x5d1   : > { %v4779_v48 = vsel %vm11788_vm12, %v11786_v0, 0.0  ;;  %vm11825_vm12 = vmmov %vm11809_vm3 }
 0x5d2   : > { %v4948_v61 = vpop.permute.xlu1 %4947  ;;  %4068 = vrot.lane.b32.xlu0 %v11781_v63, %s7087_s28  ;;  %v5163_v55 = vsel %vm11791_vm4, %v4779_v48, %v4942_v2  ;;  %v11820_v48 = vld [vmem:[#allocation49_spill] sm:$0xff]  ;;  %vm11826_vm4 = vmmov %vm11809_vm3 }
 0x5d3   : > { %v4946_v49 = vpop.permute.xlu0 %4945  ;;  %v5195_v21 = vsel %vm11793_vm5, %v5163_v55, %v5070_v5  ;;  %v5166_v17 = vsel %vm11819_vm7, %v9873_v31, %v4948_v61  ;;  %vm11821_vm10 = vnez %v11820_v48  ;;  %vm11830_vm5 = vmmov %vm11811_vm1 }
 0x5d4   : > { %5127 = vrot.lane.b32.xlu1 %v4904_v12, %s7089_s26  ;;  %v5165_v5 = vsel %vm11808_vm13, %v4781_v60, %v4946_v49  ;;  %v11815_v12 = vld [vmem:[#allocation61_spill] sm:$0xff]  ;;  %v11817_v49 = vld [vmem:[#allocation6_spill] sm:$0xff]  ;;  %v11838_v60 = vld [vmem:[#allocation11_spill] sm:$0xff] }
 0x5d5   : > { %v11816_v10 = vmax.f32 %v11815_v12, 0.0  ;;  %v11818_v0 = vmax.f32 %v11817_v49, 0.0  ;;  %vm11841_vm13 = vmmov %vm11809_vm3 }
 0x5d6   : > { %v5068_v41 = vpop.permute.xlu1 %5067  ;;  %4072 = vrot.lane.b32.xlu0 %v11790_v37, %s7087_s28  ;;  %v11822_v37 = vld [vmem:[#allocation5_spill] sm:$0xff]  ;;  %vm11855_vm7 = vmmov %vm11803_vm0 }
 0x5d7   : > { %v5194_v24 = vsel %vm11792_vm15, %v5162_v25, %v5068_v41  ;;  %v5074_v32 = vpop.permute.xlu0 %5073  ;;  %v4783_v41 = vsel %vm11821_vm10, %v9902_v22, 0.0  ;;  %v11823_v55 = vmax.f32 %v11822_v37, 0.0  ;;  %vm11829_vm15 = vmmov %vm11811_vm1  ;;  %v11831_v22 = vld [vmem:[#allocation9_spill] sm:$0xff] }
 0x5d8   : > { %6865 = vmatmul.mubr.msk.f32.vlgmr.msra.gmra.mrb[46].mxu0 %vm11794_vm9, %v5194_v24  ;;  %4070 = vrot.lane.b32.xlu1 %v11796_v53, %s7087_s28  ;;  %v5197_v63 = vsel %vm11810_vm8, %v5165_v5, %v5074_v32  ;;  %v11827_v53 = vld [vmem:[#allocation7_spill] sm:$0xff]  ;;  %v11832_v61 = vmax.f32 %v11831_v22, 0.0  ;;  %vm11835_vm9 = vmmov %vm11803_vm0  ;;  %v11867_v22 = vld [vmem:[#allocation52_spill] sm:$0xff] }
 0x5d9   : > { %6867 = vmatprep.mubr.msk.f32.mxu0 %vm11797_vm2, %v5195_v21  ;;  %v11828_v19 = vmax.f32 %v11827_v53, 0.0  ;;  %vm11837_vm2 = vnez %v11836_v30  ;;  %vm11845_vm8 = vmmov %vm11811_vm1 }
 0x5da   : > { %v4952_v52 = vpop.permute.xlu1 %4951  ;;  %4076 = vrot.lane.b32.xlu0 %v11799_v57, %s7087_s28  ;;  %vm11856_vm10 = vmmov %vm11826_vm4 }
 0x5db   : > { %v4950_v16 = vpop.permute.xlu0 %4949 }
 0x5dc   : > { %4074 = vrot.lane.b32.xlu1 %v11801_v36, %s7087_s28  ;;  %v5167_v24 = vsel %vm11824_vm6, %v4783_v41, %v4950_v16  ;;  %v11833_v16 = vld [vmem:[#allocation4_spill] sm:$0xff]  ;;  %v5168_v36 = vsel %vm11835_vm9, %v9897_v9, %v4952_v52  ;;  %vm11857_vm6 = vmmov %vm11826_vm4 }
 0x5dd   : > { %v11834_v3 = vmax.f32 %v11833_v16, 0.0  ;;  %v11869_v16 = vld [vmem:[#allocation19_spill] sm:$0xff]  ;;  %vm11871_vm9 = vmmov %vm11803_vm0 }
 0x5de   : > { %v5072_v2 = vpop.permute.xlu1 %5071  ;;  %4080 = vrot.lane.b32.xlu0 %v11807_v45, %s7087_s28 }
 0x5df   : > { %v5196_v46 = vsel %vm11809_vm3, %v5164_v1, %v5072_v2  ;;  %v5078_v44 = vpop.permute.xlu0 %5077  ;;  %v4785_v1 = vsel %vm11837_vm2, %v9926_v54, 0.0  ;;  %v11839_v2 = vmax.f32 %v11838_v60, 0.0  ;;  %vm11844_vm3 = vmmov %vm11811_vm1  ;;  %v11846_v54 = vld [vmem:[#allocation13_spill] sm:$0xff]  ;;  %v11874_v60 = vld [vmem:[#allocation20_spill] sm:$0xff] }
 0x5e0   : > { %6868 = vmatmul.mubr.msk.f32.gmra.mrb[48].mxu0 %vm11811_vm1, %v5196_v46  ;;  %4078 = vrot.lane.b32.xlu1 %v11813_v11, %s7087_s28  ;;  %v5199_v39 = vsel %vm11826_vm4, %v5167_v24, %v5078_v44  ;;  %v11842_v44 = vld [vmem:[#allocation12_spill] sm:$0xff]  ;;  %v11847_v52 = vmax.f32 %v11846_v54, 0.0  ;;  %v11848_v11 = vld [vmem:[#allocation14_spill] sm:$0xff]  ;;  %vm11850_vm1 = vmmov %vm11803_vm0 }
 0x5e1   : > { %6870 = vmatprep.mubr.msk.f32.mxu0 %vm11814_vm14, %v5197_v63  ;;  %v11843_v63 = vmax.f32 %v11842_v44, 0.0  ;;  %v11849_v12 = vmax.f32 %v11848_v11, 0.0  ;;  %v11858_v24 = vld [vmem:[#allocation16_spill] sm:$0xff]  ;;  %vm11861_vm4 = vmmov %vm11844_vm3  ;;  %v11883_v44 = vld [vmem:[#allocation51_spill] sm:$0xff] }
 0x5e2   : > { %v4956_v7 = vpop.permute.xlu1 %4955  ;;  %4084 = vrot.lane.b32.xlu0 %v11816_v10, %s7087_s28  ;;  %vm11872_vm2 = vmmov %vm11857_vm6 }
 0x5e3   : > { %v4954_v25 = vpop.permute.xlu0 %4953  ;;  %v5170_v10 = vsel %vm11850_vm1, %v9921_v27, %v4956_v7 }
 0x5e4   : > { %4082 = vrot.lane.b32.xlu1 %v11818_v0, %s7087_s28  ;;  %v5169_v13 = vsel %vm11803_vm0, %v4785_v1, %v4954_v25  ;;  %v11851_v25 = vld [vmem:[#allocation50_spill] sm:$0xff] }
 0x5e5   : > { %vm11852_vm14 = vnez %v11851_v25 }
 0x5e6   : > { %v5076_v26 = vpop.permute.xlu1 %5075  ;;  %4088 = vrot.lane.b32.xlu0 %v11823_v55, %s7087_s28  ;;  %v4787_v49 = vsel %vm11852_vm14, %v9950_v18, 0.0  ;;  %v11862_v18 = vld [vmem:[#allocation17_spill] sm:$0xff] }
 0x5e7   : > { %v5198_v32 = vsel %vm11825_vm12, %v5166_v17, %v5076_v26  ;;  %v5082_v21 = vpop.permute.xlu0 %5081  ;;  %v11853_v17 = vld [vmem:[#allocation15_spill] sm:$0xff]  ;;  %vm11860_vm12 = vmmov %vm11844_vm3  ;;  %v11863_v7 = vmax.f32 %v11862_v18, 0.0 }
 0x5e8   : > { %4086 = vrot.lane.b32.xlu1 %v11828_v19, %s7087_s28  ;;  %6871 = vmatmul.mubr.msk.f32.gmra.mrb[50].mxu0 %vm11829_vm15, %v5198_v32  ;;  %v5201_v46 = vsel %vm11841_vm13, %v5169_v13, %v5082_v21  ;;  %v11854_v48 = vmax.f32 %v11853_v17, 0.0  ;;  %v11859_v32 = vmax.f32 %v11858_v24, 0.0  ;;  %vm11866_vm15 = vmmov %vm11803_vm0 }
 0x5e9   : > { %6873 = vmatprep.mubr.msk.f32.mxu0 %vm11830_vm5, %v5199_v39  ;;  %v11864_v39 = vld [vmem:[#allocation18_spill] sm:$0xff]  ;;  %vm11868_vm5 = vnez %v11867_v22  ;;  %vm11873_vm0 = vmmov %vm11872_vm2 }
 0x5ea   : > { %v4960_v31 = vpop.permute.xlu1 %4959  ;;  %4092 = vrot.lane.b32.xlu0 %v11832_v61, %s7087_s28  ;;  %v11865_v53 = vmax.f32 %v11864_v39, 0.0  ;;  %v4789_v61 = vsel %vm11868_vm5, %v9974_v47, 0.0  ;;  %vm11877_vm13 = vmmov %vm11844_vm3  ;;  %v11878_v47 = vld [vmem:[#allocation21_spill] sm:$0xff] }
 0x5eb   : > { %v4958_v57 = vpop.permute.xlu0 %4957  ;;  %v5172_v19 = vsel %vm11866_vm15, %v9945_v59, %v4960_v31  ;;  %v11879_v31 = vmax.f32 %v11878_v47, 0.0  ;;  %vm11887_vm14 = vmmov %vm11873_vm0 }
 0x5ec   : > { %4090 = vrot.lane.b32.xlu1 %v11834_v3, %s7087_s28  ;;  %v5171_v41 = vsel %vm11855_vm7, %v4787_v49, %v4958_v57  ;;  %v11870_v3 = vmax.f32 %v11869_v16, 0.0  ;;  %vm11888_vm7 = vmmov %vm11873_vm0  ;;  %v11889_v49 = vld [vmem:[#allocation24_spill] sm:$0xff]  ;;  %v11912_v16 = vld [vmem:[#allocation54_spill] sm:$0xff] }
 0x5ed   : > { %vm11902_vm15 = vmmov %vm11850_vm1 }
 0x5ee   : > { %v5080_v42 = vpop.permute.xlu1 %5079  ;;  %4096 = vrot.lane.b32.xlu0 %v11839_v2, %s7087_s28  ;;  %v11875_v2 = vmax.f32 %v11874_v60, 0.0  ;;  %vm11903_vm5 = vmmov %vm11873_vm0 }
 0x5ef   : > { %v5200_v45 = vsel %vm11840_vm11, %v5168_v36, %v5080_v42  ;;  %v5086_v5 = vpop.permute.xlu0 %5085  ;;  %vm11876_vm11 = vmmov %vm11844_vm3 }
 0x5f0   : > { %4094 = vrot.lane.b32.xlu1 %v11843_v63, %s7087_s28  ;;  %6874 = vmatmul.mubr.msk.f32.gmra.mrb[52].mxu0 %vm11844_vm3, %v5200_v45  ;;  %v5203_v55 = vsel %vm11857_vm6, %v5171_v41, %v5086_v5  ;;  %v11880_v45 = vld [vmem:[#allocation22_spill] sm:$0xff]  ;;  %vm11882_vm3 = vmmov %vm11850_vm1 }
 0x5f1   : > { %6876 = vmatprep.mubr.msk.f32.mxu0 %vm11845_vm8, %v5201_v46  ;;  %v11881_v5 = vmax.f32 %v11880_v45, 0.0  ;;  %vm11884_vm8 = vnez %v11883_v44  ;;  %vm11892_vm6 = vmmov %vm11861_vm4 }
 0x5f2   : > { %v4964_v9 = vpop.permute.xlu1 %4963  ;;  %4100 = vrot.lane.b32.xlu0 %v11847_v52, %s7087_s28  ;;  %v4791_v63 = vsel %vm11884_vm8, %v9998_v20, 0.0  ;;  %v11885_v52 = vld [vmem:[#allocation23_spill] sm:$0xff]  ;;  %v11893_v20 = vld [vmem:[#allocation25_spill] sm:$0xff]  ;;  %vm11915_vm8 = vmmov %vm11903_vm5 }
 0x5f3   : > { %v4962_v15 = vpop.permute.xlu0 %4961  ;;  %v5174_v46 = vsel %vm11882_vm3, %v9969_v8, %v4964_v9  ;;  %v11894_v9 = vmax.f32 %v11893_v20, 0.0  ;;  %vm11914_vm3 = vmmov %vm11850_vm1 }
 0x5f4   : > { %4098 = vrot.lane.b32.xlu1 %v11849_v12, %s7087_s28  ;;  %v5173_v36 = vsel %vm11871_vm9, %v4789_v61, %v4962_v15  ;;  %v11886_v15 = vmax.f32 %v11885_v52, 0.0  ;;  %vm11904_vm9 = vmmov %vm11873_vm0 }
 0x5f6   : > { %v5084_v0 = vpop.permute.xlu1 %5083  ;;  %4104 = vrot.lane.b32.xlu0 %v11854_v48, %s7087_s28  ;;  %v11895_v48 = vld [vmem:[#allocation26_spill] sm:$0xff] }
 0x5f7   : > { %v5202_v26 = vsel %vm11856_vm10, %v5170_v10, %v5084_v0  ;;  %v5090_v37 = vpop.permute.xlu0 %5089  ;;  %v11890_v0 = vmax.f32 %v11889_v49, 0.0  ;;  %vm11891_vm10 = vmmov %vm11861_vm4  ;;  %v11896_v41 = vmax.f32 %v11895_v48, 0.0 }
 0x5f8   : > { %4102 = vrot.lane.b32.xlu1 %v11859_v32, %s7087_s28  ;;  %6877 = vmatmul.mubr.msk.f32.gmra.mrb[54].mxu0 %vm11860_vm12, %v5202_v26  ;;  %v5205_v42 = vsel %vm11873_vm0, %v5173_v36, %v5090_v37  ;;  %vm11897_vm12 = vmmov %vm11850_vm1  ;;  %v11898_v37 = vld [vmem:[#allocation53_spill] sm:$0xff]  ;;  %v11900_v32 = vld [vmem:[#allocation27_spill] sm:$0xff] }
 0x5f9   : > { %6879 = vmatprep.mubr.msk.f32.mxu0 %vm11861_vm4, %v5203_v55  ;;  %vm11899_vm4 = vnez %v11898_v37  ;;  %v11901_v18 = vmax.f32 %v11900_v32, 0.0  ;;  %v11944_v37 = vld [vmem:[#allocation57_spill] sm:$0xff] }
 0x5fa   : > { %v4968_v27 = vpop.permute.xlu1 %4967  ;;  %4108 = vrot.lane.b32.xlu0 %v11863_v7, %s7087_s28  ;;  %v4793_v55 = vsel %vm11899_vm4, %v10022_v51, 0.0 }
 0x5fb   : > { %v4966_v21 = vpop.permute.xlu0 %4965  ;;  %v5176_v26 = vsel %vm11897_vm12, %v9993_v35, %v4968_v27  ;;  %v11909_v27 = vld [vmem:[#allocation30_spill] sm:$0xff]  ;;  %vm11922_vm12 = vmmov %vm11914_vm3 }
 0x5fc   : > { %4106 = vrot.lane.b32.xlu1 %v11865_v53, %s7087_s28  ;;  %v5175_v11 = vsel %vm11850_vm1, %v4791_v63, %v4966_v21  ;;  %v11910_v61 = vmax.f32 %v11909_v27, 0.0 }
 0x5fe   : > { %v5088_v57 = vpop.permute.xlu1 %5087  ;;  %4112 = vrot.lane.b32.xlu0 %v11870_v3, %s7087_s28 }
 0x5ff   : > { %v5204_v30 = vsel %vm11872_vm2, %v5172_v19, %v5088_v57  ;;  %v5094_v1 = vpop.permute.xlu0 %5093  ;;  %v11905_v19 = vld [vmem:[#allocation28_spill] sm:$0xff]  ;;  %vm11907_vm2 = vmmov %vm11892_vm6 }
 0x600   : > { %4110 = vrot.lane.b32.xlu1 %v11875_v2, %s7087_s28  ;;  %6880 = vmatmul.mubr.msk.f32.gmra.mrb[56].mxu0 %vm11876_vm11, %v5204_v30  ;;  %v5207_v25 = vsel %vm11888_vm7, %v5175_v11, %v5094_v1  ;;  %v11906_v22 = vmax.f32 %v11905_v19, 0.0  ;;  %vm11908_vm0 = vmmov %vm11907_vm2 }
 0x601   : > { %6882 = vmatprep.mubr.msk.f32.mxu0 %vm11877_vm13, %v5205_v42  ;;  %vm11911_vm11 = vmmov %vm11850_vm1  ;;  %vm11913_vm13 = vnez %v11912_v16 }
 0x602   : > { %v4972_v59 = vpop.permute.xlu1 %4971  ;;  %4116 = vrot.lane.b32.xlu0 %v11879_v31, %s7087_s28  ;;  %v4795_v3 = vsel %vm11913_vm13, %v10046_v28, 0.0  ;;  %vm11916_vm1 = vmmov %vm11903_vm5 }
 0x603   : > { %v4970_v13 = vpop.permute.xlu0 %4969  ;;  %v5178_v57 = vsel %vm11911_vm11, %v10017_v58, %v4972_v59  ;;  %vm11918_vm7 = vmmov %vm11908_vm0  ;;  %v11920_v59 = vld [vmem:[#allocation55_spill] sm:$0xff] }
 0x604   : > { %4114 = vrot.lane.b32.xlu1 %v11881_v5, %s7087_s28  ;;  %v5177_v7 = vsel %vm11902_vm15, %v4793_v55, %v4970_v13  ;;  %vm11923_vm4 = vmmov %vm11916_vm1 }
 0x605   : > { %vm11924_vm15 = vmmov %vm11916_vm1 }
 0x606   : > { %v5092_v54 = vpop.permute.xlu1 %5091  ;;  %4120 = vrot.lane.b32.xlu0 %v11886_v15, %s7087_s28  ;;  %vm11931_vm13 = vmmov %vm11916_vm1 }
 0x607   : > { %v5206_v12 = vsel %vm11887_vm14, %v5174_v46, %v5092_v54  ;;  %v5098_v10 = vpop.permute.xlu0 %5097  ;;  %vm11917_vm14 = vmmov %vm11908_vm0  ;;  %v11928_v54 = vld [vmem:[#allocation44_spill] sm:$0xff] }
 0x608   : > { %4118 = vrot.lane.b32.xlu1 %v11890_v0, %s7087_s28  ;;  %6883 = vmatmul.mubr.msk.f32.gmra.mrb[58].mxu0 %vm11891_vm10, %v5206_v12  ;;  %v5209_v53 = vsel %vm11904_vm9, %v5177_v7, %v5098_v10  ;;  %vm11919_vm10 = vmmov %vm11914_vm3  ;;  %v11936_v0 = vld [vmem:[#allocation56_spill] sm:$0xff] }
 0x609   : > { %6885 = vmatprep.mubr.msk.f32.mxu0 %vm11892_vm6, %v5207_v25  ;;  %vm11921_vm6 = vnez %v11920_v59  ;;  %vm11926_vm9 = vmmov %vm11908_vm0 }
 0x60a   : > { %v4976_v8 = vpop.permute.xlu1 %4975  ;;  %4124 = vrot.lane.b32.xlu0 %v11894_v9, %s7087_s28  ;;  %v4797_v28 = vsel %vm11921_vm6, %v10070_v34, 0.0 }
 0x60b   : > { %v4974_v17 = vpop.permute.xlu0 %4973  ;;  %v5180_v58 = vsel %vm11919_vm10, %v10041_v38, %v4976_v8 }
 0x60c   : > { %4122 = vrot.lane.b32.xlu1 %v11896_v41, %s7087_s28  ;;  %v5179_v30 = vsel %vm11914_vm3, %v4795_v3, %v4974_v17 }
 0x60e   : > { %v5096_v24 = vpop.permute.xlu1 %5095  ;;  %4128 = vrot.lane.b32.xlu0 %v11901_v18, %s7087_s28 }
 0x60f   : > { %v5208_v21 = vsel %vm11903_vm5, %v5176_v26, %v5096_v24  ;;  %v5102_v39 = vpop.permute.xlu0 %5101  ;;  %vm11925_vm5 = vmmov %vm11908_vm0 }
 0x610   : > { %4126 = vrot.lane.b32.xlu1 %v11906_v22, %s7087_s28  ;;  %6886 = vmatmul.mubr.msk.f32.gmra.mrb[60].mxu0 %vm11907_vm2, %v5208_v21  ;;  %v5211_v60 = vsel %vm11916_vm1, %v5179_v30, %v5102_v39  ;;  %vm11927_vm2 = vmmov %vm11914_vm3 }
 0x611   : > { %6888 = vmatprep.mubr.msk.f32.mxu0 %vm11908_vm0, %v5209_v53  ;;  %vm11929_vm0 = vnez %v11928_v54  ;;  %vm11930_vm11 = vmmov %vm11927_vm2  ;;  %v11951_v53 = vld [vmem:[#allocation58_spill] sm:$0xff] }
 0x612   : > { %v4980_v35 = vpop.permute.xlu1 %4979  ;;  %v4799_v34 = vsel %vm11929_vm0, %v10094_v23, 0.0  ;;  %vm11932_vm3 = vmmov %vm11916_vm1 }
 0x613   : > { %v4978_v51 = vpop.permute.xlu0 %4977  ;;  %v5182_v38 = vsel %vm11927_vm2, %v10065_v62, %v4980_v35  ;;  %vm11934_vm1 = vmmov %vm11925_vm5 }
 0x614   : > { %4130 = vrot.lane.b32.xlu1 %v11910_v61, %s7087_s28  ;;  %v5181_v13 = vsel %vm11922_vm12, %v4797_v28, %v4978_v51  ;;  %vm11938_vm10 = vmmov %vm11927_vm2  ;;  %v11958_v61 = vld [vmem:[#allocation59_spill] sm:$0xff] }
 0x615   : > { %vm11939_vm6 = vmmov %vm11932_vm3 }
 0x616   : > { %v5100_v36 = vpop.permute.xlu1 %5099  ;;  %vm11940_vm12 = vmmov %vm11932_vm3 }
 0x617   : > { %v5210_v1 = vsel %vm11915_vm8, %v5178_v57, %v5100_v36  ;;  %v5106_v42 = vpop.permute.xlu0 %5105  ;;  %vm11933_vm8 = vmmov %vm11925_vm5 }
 0x618   : > { %6889 = vmatmul.mubr.msk.f32.gmra.mrb[62].mxu0 %vm11917_vm14, %v5210_v1  ;;  %v5213_v46 = vsel %vm11924_vm15, %v5181_v13, %v5106_v42  ;;  %vm11935_vm14 = vmmov %vm11927_vm2 }
 0x619   : > { %6891 = vmatprep.mubr.msk.f32.mxu0 %vm11918_vm7, %v5211_v60  ;;  %vm11937_vm7 = vnez %v11936_v0  ;;  %vm11942_vm15 = vmmov %vm11934_vm1 }
 0x61a   : > { %v4984_v2 = vpop.permute.xlu1 %4983  ;;  %v4801_v23 = vsel %vm11937_vm7, %v10124_v4, 0.0  ;;  %vm11946_vm0 = vmmov %vm11932_vm3 }
 0x61b   : > { %v4982_v47 = vpop.permute.xlu0 %4981  ;;  %v5184_v62 = vsel %vm11935_vm14, %v10089_v14, %v4984_v2  ;;  %vm11953_vm14 = vmmov %vm11927_vm2 }
 0x61c   : > { %v5183_v15 = vsel %vm11930_vm11, %v4799_v34, %v4982_v47  ;;  %vm11947_vm11 = vmmov %vm11946_vm0 }
 0x61d   : > { %vm11954_vm7 = vmmov %vm11946_vm0 }
 0x61e   : > { %v5104_v31 = vpop.permute.xlu1 %5103 }
 0x61f   : > { %v5212_v45 = vsel %vm11923_vm4, %v5180_v58, %v5104_v31  ;;  %v5110_v5 = vpop.permute.xlu0 %5109  ;;  %vm11941_vm4 = vmmov %vm11934_vm1 }
 0x620   : > { %6892 = vmatmul.mubr.msk.f32.gmra.mrb[64].mxu0 %vm11925_vm5, %v5212_v45  ;;  %v5215_v12 = vsel %vm11932_vm3, %v5183_v15, %v5110_v5  ;;  %vm11943_vm5 = vmmov %vm11927_vm2 }
 0x621   : > { %6894 = vmatprep.mubr.msk.f32.mxu0 %vm11926_vm9, %v5213_v46  ;;  %vm11945_vm9 = vnez %v11944_v37  ;;  %vm11949_vm3 = vmmov %vm11934_vm1  ;;  %v5792_v37 = vld [vmem:[%s10798_s5 + $0x10] sm:$0xff] }
 0x622   : > { %v4988_v44 = vpop.permute.xlu1 %4987  ;;  %v4803_v4 = vsel %vm11945_vm9, %v10160_v6, 0.0  ;;  %vm11961_vm9 = vmmov %vm11927_vm2 }
 0x623   : > { %v4986_v63 = vpop.permute.xlu0 %4985  ;;  %v5186_v14 = vsel %vm11943_vm5, %v10113_v43, %v4988_v44  ;;  %vm4164_vm5 = vcmask 97328  }
 0x624   : > { %v5185_v20 = vsel %vm11938_vm10, %v4801_v23, %v4986_v63  ;;  %vm11955_vm10 = vmmov %vm11946_vm0 }
 0x626   : > { %v5108_v52 = vpop.permute.xlu1 %5107 }
 0x627   : > { %v5214_v11 = vsel %vm11931_vm13, %v5182_v38, %v5108_v52  ;;  %vm11948_vm13 = vmmov %vm11934_vm1 }
 0x628   : > { %v4998_v10 = vpop.permute.xlu0 %4997  ;;  %6895 = vmatmul.mubr.msk.f32.gmra.mrb[66].mxu0 %vm11933_vm8, %v5214_v11  ;;  %vm11950_vm8 = vmmov %vm11927_vm2 }
 0x629   : > { %6897 = vmatprep.mubr.msk.f32.mxu0 %vm11934_vm1, %v5215_v12  ;;  %vm11952_vm1 = vnez %v11951_v53 }
 0x62a   : > { %v4992_v25 = vpop.permute.xlu1 %4991  ;;  %v4805_v6 = vsel %vm11952_vm1, %v10191_v50, 0.0 }
 0x62b   : > { %v5188_v43 = vsel %vm11950_vm8, %v10156_v56, %v4992_v25 }
 0x62c   : > { %v5114_v49 = vpop.permute.xlu0 %5113 }
 0x62d   : > { %v5217_v17 = vsel %vm11940_vm12, %v5185_v20, %v5114_v49  ;;  %vm11957_vm12 = vmmov %vm11949_vm3 }
 0x62e   : > { %v5112_v8 = vpop.permute.xlu1 %5111 }
 0x62f   : > { %v5216_v9 = vsel %vm11939_vm6, %v5184_v62, %v5112_v8  ;;  %vm11956_vm6 = vmmov %vm11949_vm3 }
 0x630   : > { %v4990_v48 = vpop.permute.xlu0 %4989  ;;  %6898 = vmatmul.mubr.msk.f32.gmra.mrb[68].mxu0 %vm11941_vm4, %v5216_v9  ;;  %vm11959_vm4 = vnez %v11958_v61  ;;  %vm11967_vm1 = vmmov %vm11956_vm6 }
 0x631   : > { %6900 = vmatprep.mubr.msk.f32.mxu0 %vm11942_vm15, %v5217_v17  ;;  %v5187_v24 = vsel %vm11927_vm2, %v4803_v4, %v4990_v48  ;;  %v4807_v56 = vsel %vm11959_vm4, %v10169_v33, 0.0  ;;  %vm11960_vm15 = vmmov %vm11927_vm2  ;;  %v5790_v17 = vld [vmem:[%s10798_s5] sm:$0xff]  ;;  %v5791_v48 = vld [vmem:[%s10798_s5 + $0x8] sm:$0xff] }
 0x632   : > { %v4996_v41 = vpop.permute.xlu1 %4995  ;;  %v5191_v16 = vsel %vm11961_vm9, %v4807_v56, %v4998_v10  ;;  %vm11962_vm2 = vmmov %vm11946_vm0 }
 0x633   : > { %v5190_v57 = vsel %vm11960_vm15, %v10187_v40, %v4996_v41  ;;  %v7018_v41 = vpack.c.bf16 %v5791_v48, %v5790_v17 }
 0x634   : > { %v5118_v26 = vpop.permute.xlu0 %5117 }
 0x635   : > { %v5219_v18 = vsel %vm11947_vm11, %v5187_v24, %v5118_v26  ;;  %vm11963_vm11 = vmmov %vm11949_vm3  ;;  %7019 = vmatprep.subr.bf16.mxu1 %v7018_v41  ;;  %v10517_v26 = vld [vmem:[%s10797_s4 + $0x2] ss:$0 sm:$0xff] }
 0x636   : > { %v5116_v55 = vpop.permute.xlu1 %5115  ;;  %7021 = vmatpush3.bf16.msra.mxu1 %v7018_v41 }
 0x637   : > { %v5218_v32 = vsel %vm11946_vm0, %v5186_v14, %v5116_v55  ;;  %6916 = vmatprep.subr.mxu1 %v5792_v37 }
 0x638   : > { %v4994_v7 = vpop.permute.xlu0 %4993  ;;  %6901 = vmatmul.mubr.msk.f32.gmra.mrb[70].mxu0 %vm11948_vm13, %v5218_v32  ;;  %vm11964_vm13 = vmmov %vm11949_vm3 }
 0x639   : > { %6903 = vmatprep.mubr.msk.f32.mxu0 %vm11949_vm3, %v5219_v18  ;;  %v5189_v22 = vsel %vm11953_vm14, %v4805_v6, %v4994_v7  ;;  %vm11965_vm3 = vmmov %vm11950_vm8  ;;  %vm5725_vm14 = vcmask 146528  }
 0x63a   : > { %v5124_v21 = vpop.permute.xlu1 %5123  ;;  %vm11966_vm8 = vmmov %vm11946_vm0  ;;  %6917 = vmatpush3.msra.mxu1 %v5792_v37 }
 0x63b   : > { %v5222_v3 = vsel %vm11962_vm2, %v5190_v57, %v5124_v21 }
 0x63c   : > { %v5122_v39 = vpop.permute.xlu0 %5121 }
 0x63d   : > { %v5221_v51 = vsel %vm11955_vm10, %v5189_v22, %v5122_v39  ;;  %vm11968_vm10 = vcmask 523264  }
 0x63e   : > { %v5120_v19 = vpop.permute.xlu1 %5119 }
 0x63f   : > { %v5220_v35 = vsel %vm11954_vm7, %v5188_v43, %v5120_v19  ;;  %vm5800_vm7 = vcmask 195584  }
 0x640   : > { %v5126_v27 = vpop.permute.xlu0 %5125  ;;  %6904 = vmatmul.mubr.msk.f32.gmra.mrb[72].mxu0 %vm11956_vm6, %v5220_v35  ;;  %vm11969_vm6 = vmmov %vm11968_vm10 }
 0x641   : > { %6906 = vmatprep.mubr.msk.f32.mxu0 %vm11957_vm12, %v5221_v51  ;;  %v5223_v36 = vsel %vm11946_vm0, %v5191_v16, %v5126_v27  ;;  %vm11970_vm12 = vmmov %vm11969_vm6 }
 0x642   : > { %v5000_v50 = vpop.permute.xlu1 %4999  ;;  %vm11971_vm4 = vmmov %vm11969_vm6 }
 0x643   : > { %v5192_v33 = vsel %vm11965_vm3, %v10148_v29, %v5000_v50  ;;  %vm11972_vm15 = vmmov %vm11971_vm4 }
 0x644   : > { %v4069_v30 = vpop.permute.xlu0 %4068  ;;  %6907 = vmatmul.mubr.msk.f32.gmra.mrb[74].mxu0 %vm11963_vm11, %v5222_v3  ;;  %vm11974_vm9 = vmmov %vm11971_vm4 }
 0x645   : > { %4165 = vst.msk [vmem:[#allocation3] sm:$0xff] %vm4164_vm5, %v4069_v30  ;;  %6909 = vmatprep.mubr.msk.f32.mxu0 %vm11964_vm13, %v5223_v36  ;;  %vm11975_vm2 = vmmov %vm11971_vm4 }
 0x646   : > { %v5128_v1 = vpop.permute.xlu1 %5127  ;;  %vm11976_vm0 = vmmov %vm11975_vm2 }
 0x647   : > { %v5224_v40 = vsel %vm11966_vm8, %v5192_v33, %v5128_v1  ;;  %vm11977_vm11 = vmmov %vm11976_vm0 }
 0x648   : > { %v4073_v42 = vpop.permute.xlu0 %4072  ;;  %6910 = vmatmul.mubr.msk.f32.gmra.mrb[76].mxu0 %vm11967_vm1, %v5224_v40  ;;  %vm11978_vm13 = vmmov %vm11976_vm0 }
 0x649   : > { %4167 = vst.msk [vmem:[#allocation3 + $0x10] sm:$0xff] %vm4164_vm5, %v4073_v42  ;;  %vm11979_vm3 = vmmov %vm11976_vm0 }
 0x64a   : > { %v4071_v60 = vpop.permute.xlu1 %4070  ;;  %vm11980_vm8 = vmmov %vm11976_vm0 }
 0x64b   : > { %4166 = vst.msk [vmem:[#allocation3 + $0x8] sm:$0xff] %vm4164_vm5, %v4071_v60  ;;  %vm11981_vm1 = vmmov %vm11976_vm0 }
 0x64c   : > { %v4077_v2 = vpop.permute.xlu0 %4076 }
 0x64d   : > { %4169 = vst.msk [vmem:[#allocation3 + $0x20] sm:$0xff] %vm4164_vm5, %v4077_v2 }
 0x64e   : > { %v4075_v47 = vpop.permute.xlu1 %4074 }
 0x64f   : > { %4168 = vst.msk [vmem:[#allocation3 + $0x18] sm:$0xff] %vm4164_vm5, %v4075_v47 }
 0x650   : > { %v4081_v58 = vpop.permute.xlu0 %4080 }
 0x651   : > { %4171 = vst.msk [vmem:[#allocation3 + $0x30] sm:$0xff] %vm4164_vm5, %v4081_v58 }
 0x652   : > { %v4079_v29 = vpop.permute.xlu1 %4078 }
 0x653   : > { %4170 = vst.msk [vmem:[#allocation3 + $0x28] sm:$0xff] %vm4164_vm5, %v4079_v29 }
 0x654   : > { %v4085_v59 = vpop.permute.xlu0 %4084 }
 0x655   : > { %4173 = vst.msk [vmem:[#allocation3 + $0x40] sm:$0xff] %vm4164_vm5, %v4085_v59 }
 0x656   : > { %v4083_v28 = vpop.permute.xlu1 %4082 }
 0x657   : > { %4172 = vst.msk [vmem:[#allocation3 + $0x38] sm:$0xff] %vm4164_vm5, %v4083_v28 }
 0x658   : > { %v4089_v31 = vpop.permute.xlu0 %4088 }
 0x659   : > { %4175 = vst.msk [vmem:[#allocation3 + $0x50] sm:$0xff] %vm4164_vm5, %v4089_v31 }
 0x65a   : > { %v4087_v13 = vpop.permute.xlu1 %4086 }
 0x65b   : > { %4174 = vst.msk [vmem:[#allocation3 + $0x48] sm:$0xff] %vm4164_vm5, %v4087_v13 }
 0x65c   : > { %v4093_v45 = vpop.permute.xlu0 %4092 }
 0x65d   : > { %4177 = vst.msk [vmem:[#allocation3 + $0x60] sm:$0xff] %vm4164_vm5, %v4093_v45 }
 0x65e   : > { %v4091_v5 = vpop.permute.xlu1 %4090 }
 0x65f   : > { %4176 = vst.msk [vmem:[#allocation3 + $0x58] sm:$0xff] %vm4164_vm5, %v4091_v5 }
 0x660   : > { %v4097_v46 = vpop.permute.xlu0 %4096 }
 0x661   : > { %4179 = vst.msk [vmem:[#allocation3 + $0x70] sm:$0xff] %vm4164_vm5, %v4097_v46 }
 0x662   : > { %v4095_v44 = vpop.permute.xlu1 %4094 }
 0x663   : > { %4178 = vst.msk [vmem:[#allocation3 + $0x68] sm:$0xff] %vm4164_vm5, %v4095_v44 }
 0x664   : > { %v4101_v63 = vpop.permute.xlu0 %4100 }
 0x665   : > { %4181 = vst.msk [vmem:[#allocation3 + $0x80] sm:$0xff] %vm4164_vm5, %v4101_v63 }
 0x666   : > { %v4099_v38 = vpop.permute.xlu1 %4098 }
 0x667   : > { %4180 = vst.msk [vmem:[#allocation3 + $0x78] sm:$0xff] %vm4164_vm5, %v4099_v38 }
 0x668   : > { %v4105_v54 = vpop.permute.xlu0 %4104 }
 0x669   : > { %4183 = vst.msk [vmem:[#allocation3 + $0x90] sm:$0xff] %vm4164_vm5, %v4105_v54 }
 0x66a   : > { %v4103_v34 = vpop.permute.xlu1 %4102 }
 0x66b   : > { %4182 = vst.msk [vmem:[#allocation3 + $0x88] sm:$0xff] %vm4164_vm5, %v4103_v34 }
 0x66c   : > { %v4109_v52 = vpop.permute.xlu0 %4108 }
 0x66d   : > { %4185 = vst.msk [vmem:[#allocation3 + $0xa0] sm:$0xff] %vm4164_vm5, %v4109_v52 }
 0x66e   : > { %v4107_v15 = vpop.permute.xlu1 %4106 }
 0x66f   : > { %4184 = vst.msk [vmem:[#allocation3 + $0x98] sm:$0xff] %vm4164_vm5, %v4107_v15 }
 0x670   : > { %v4113_v11 = vpop.permute.xlu0 %4112 }
 0x671   : > { %4187 = vst.msk [vmem:[#allocation3 + $0xb0] sm:$0xff] %vm4164_vm5, %v4113_v11 }
 0x672   : > { %v4111_v12 = vpop.permute.xlu1 %4110 }
 0x673   : > { %4186 = vst.msk [vmem:[#allocation3 + $0xa8] sm:$0xff] %vm4164_vm5, %v4111_v12 }
 0x674   : > { %v4117_v10 = vpop.permute.xlu0 %4116 }
 0x675   : > { %4189 = vst.msk [vmem:[#allocation3 + $0xc0] sm:$0xff] %vm4164_vm5, %v4117_v10 }
 0x676   : > { %v4115_v25 = vpop.permute.xlu1 %4114 }
 0x677   : > { %4188 = vst.msk [vmem:[#allocation3 + $0xb8] sm:$0xff] %vm4164_vm5, %v4115_v25 }
 0x678   : > { %v4121_v49 = vpop.permute.xlu0 %4120 }
 0x679   : > { %4191 = vst.msk [vmem:[#allocation3 + $0xd0] sm:$0xff] %vm4164_vm5, %v4121_v49 }
 0x67a   : > { %v4119_v62 = vpop.permute.xlu1 %4118 }
 0x67b   : > { %4190 = vst.msk [vmem:[#allocation3 + $0xc8] sm:$0xff] %vm4164_vm5, %v4119_v62 }
 0x67c   : > { %v4125_v0 = vpop.permute.xlu0 %4124 }
 0x67d   : > { %4193 = vst.msk [vmem:[#allocation3 + $0xe0] sm:$0xff] %vm4164_vm5, %v4125_v0 }
 0x67e   : > { %v4123_v23 = vpop.permute.xlu1 %4122 }
 0x67f   : > { %4192 = vst.msk [vmem:[#allocation3 + $0xd8] sm:$0xff] %vm4164_vm5, %v4123_v23 }
 0x680   : > { %v4129_v8 = vpop.permute.xlu0 %4128 }
 0x681   : > { %4195 = vst.msk [vmem:[#allocation3 + $0xf0] sm:$0xff] %vm4164_vm5, %v4129_v8 }
 0x682   : > { %v4127_v20 = vpop.permute.xlu1 %4126 }
 0x683   : > { %4194 = vst.msk [vmem:[#allocation3 + $0xe8] sm:$0xff] %vm4164_vm5, %v4127_v20 }
 0x686   : > { %v4131_v9 = vpop.permute.xlu1 %4130 }
 0x687   : > { %4196 = vst.msk [vmem:[#allocation3 + $0xf8] sm:$0xff] %vm4164_vm5, %v4131_v9  ;;  %vm11973_vm5 = vmmov %vm11971_vm4 }
 0x6ab   : > { %v6866_v14 = vpop.f32.mrb[46].mxu0 }
 0x6ac   : > { %v5412_v4 = vadd.f32 %v6866_v14, %v10517_v26  ;;  %v5406_v55 = vpop.f32.mrb[47].mxu0 }
 0x6ad   : > { %v5407_v24 = vadd.f32 %v10517_v26, %v5406_v55 }
 0x6ae   : > { %v5566_v32 = vmax.f32 %v5412_v4, 0.0 }
 0x6af   : > { %v5565_v18 = vmax.f32 %v5407_v24, 0.0 }
 0x6b0   : > { %5631 = vrot.lane.b32.xlu1 %v5566_v32, %s7086_s23 }
 0x6b1   : > { %5629 = vrot.lane.b32.xlu0 %v5565_v18, %s7086_s23 }
 0x6b3   : > { %v6869_v7 = vpop.f32.mrb[48].mxu0 }
 0x6b4   : > { %v5422_v21 = vadd.f32 %v6869_v7, %v10517_v26  ;;  %v5416_v39 = vpop.f32.mrb[49].mxu0 }
 0x6b5   : > { %v5417_v43 = vadd.f32 %v10517_v26, %v5416_v39 }
 0x6b6   : > { %v5568_v53 = vmax.f32 %v5422_v21, 0.0 }
 0x6b7   : > { %v5567_v6 = vmax.f32 %v5417_v43, 0.0 }
 0x6b8   : > { %5635 = vrot.lane.b32.xlu1 %v5568_v53, %s7086_s23 }
 0x6b9   : > { %5633 = vrot.lane.b32.xlu0 %v5567_v6, %s7086_s23 }
 0x6bb   : > { %v6872_v19 = vpop.f32.mrb[50].mxu0 }
 0x6bc   : > { %v5432_v22 = vadd.f32 %v6872_v19, %v10517_v26  ;;  %v5426_v35 = vpop.f32.mrb[51].mxu0 }
 0x6bd   : > { %v5427_v51 = vadd.f32 %v10517_v26, %v5426_v35 }
 0x6be   : > { %v5570_v27 = vmax.f32 %v5432_v22, 0.0 }
 0x6bf   : > { %v5569_v61 = vmax.f32 %v5427_v51, 0.0 }
 0x6c0   : > { %5639 = vrot.lane.b32.xlu1 %v5570_v27, %s7086_s23 }
 0x6c1   : > { %5637 = vrot.lane.b32.xlu0 %v5569_v61, %s7086_s23 }
 0x6c3   : > { %v6875_v56 = vpop.f32.mrb[52].mxu0 }
 0x6c4   : > { %v5442_v57 = vadd.f32 %v6875_v56, %v10517_v26  ;;  %v5436_v50 = vpop.f32.mrb[53].mxu0 }
 0x6c5   : > { %v5437_v16 = vadd.f32 %v10517_v26, %v5436_v50 }
 0x6c6   : > { %v5572_v3 = vmax.f32 %v5442_v57, 0.0 }
 0x6c7   : > { %v5571_v36 = vmax.f32 %v5437_v16, 0.0 }
 0x6c8   : > { %5643 = vrot.lane.b32.xlu1 %v5572_v3, %s7086_s23 }
 0x6c9   : > { %5641 = vrot.lane.b32.xlu0 %v5571_v36, %s7086_s23 }
 0x6cb   : > { %v6878_v30 = vpop.f32.mrb[54].mxu0 }
 0x6cc   : > { %v5452_v33 = vadd.f32 %v6878_v30, %v10517_v26  ;;  %v5446_v1 = vpop.f32.mrb[55].mxu0 }
 0x6cd   : > { %v5447_v40 = vadd.f32 %v10517_v26, %v5446_v1 }
 0x6ce   : > { %v5574_v42 = vmax.f32 %v5452_v33, 0.0 }
 0x6cf   : > { %v5573_v60 = vmax.f32 %v5447_v40, 0.0 }
 0x6d0   : > { %5647 = vrot.lane.b32.xlu1 %v5574_v42, %s7086_s23 }
 0x6d1   : > { %5645 = vrot.lane.b32.xlu0 %v5573_v60, %s7086_s23 }
 0x6d3   : > { %v6881_v2 = vpop.f32.mrb[56].mxu0 }
 0x6d4   : > { %v5462_v47 = vadd.f32 %v6881_v2, %v10517_v26  ;;  %v5456_v58 = vpop.f32.mrb[57].mxu0 }
 0x6d5   : > { %v5457_v29 = vadd.f32 %v10517_v26, %v5456_v58 }
 0x6d6   : > { %v5576_v59 = vmax.f32 %v5462_v47, 0.0 }
 0x6d7   : > { %v5575_v28 = vmax.f32 %v5457_v29, 0.0 }
 0x6d8   : > { %5651 = vrot.lane.b32.xlu1 %v5576_v59, %s7086_s23 }
 0x6d9   : > { %5649 = vrot.lane.b32.xlu0 %v5575_v28, %s7086_s23 }
 0x6db   : > { %v6884_v31 = vpop.f32.mrb[58].mxu0 }
 0x6dc   : > { %v5472_v13 = vadd.f32 %v6884_v31, %v10517_v26  ;;  %v5466_v45 = vpop.f32.mrb[59].mxu0 }
 0x6dd   : > { %v5467_v5 = vadd.f32 %v10517_v26, %v5466_v45 }
 0x6de   : > { %v5578_v46 = vmax.f32 %v5472_v13, 0.0 }
 0x6df   : > { %v5577_v44 = vmax.f32 %v5467_v5, 0.0 }
 0x6e0   : > { %5655 = vrot.lane.b32.xlu1 %v5578_v46, %s7086_s23 }
 0x6e1   : > { %5653 = vrot.lane.b32.xlu0 %v5577_v44, %s7086_s23 }
 0x6e3   : > { %v6887_v63 = vpop.f32.mrb[60].mxu0 }
 0x6e4   : > { %v5482_v38 = vadd.f32 %v6887_v63, %v10517_v26  ;;  %v5476_v54 = vpop.f32.mrb[61].mxu0 }
 0x6e5   : > { %v5477_v34 = vadd.f32 %v10517_v26, %v5476_v54 }
 0x6e6   : > { %v5580_v52 = vmax.f32 %v5482_v38, 0.0 }
 0x6e7   : > { %v5579_v15 = vmax.f32 %v5477_v34, 0.0 }
 0x6e8   : > { %5659 = vrot.lane.b32.xlu1 %v5580_v52, %s7086_s23 }
 0x6e9   : > { %5657 = vrot.lane.b32.xlu0 %v5579_v15, %s7086_s23 }
 0x6eb   : > { %v6890_v11 = vpop.f32.mrb[62].mxu0 }
 0x6ec   : > { %v5492_v12 = vadd.f32 %v6890_v11, %v10517_v26  ;;  %v5486_v10 = vpop.f32.mrb[63].mxu0 }
 0x6ed   : > { %v5487_v25 = vadd.f32 %v10517_v26, %v5486_v10 }
 0x6ee   : > { %v5582_v49 = vmax.f32 %v5492_v12, 0.0 }
 0x6ef   : > { %v5581_v62 = vmax.f32 %v5487_v25, 0.0 }
 0x6f0   : > { %5663 = vrot.lane.b32.xlu1 %v5582_v49, %s7086_s23 }
 0x6f1   : > { %5661 = vrot.lane.b32.xlu0 %v5581_v62, %s7086_s23 }
 0x6f3   : > { %v6893_v0 = vpop.f32.mrb[64].mxu0 }
 0x6f4   : > { %v5502_v23 = vadd.f32 %v6893_v0, %v10517_v26  ;;  %v5496_v8 = vpop.f32.mrb[65].mxu0 }
 0x6f5   : > { %v5497_v20 = vadd.f32 %v10517_v26, %v5496_v8 }
 0x6f6   : > { %v5584_v9 = vmax.f32 %v5502_v23, 0.0 }
 0x6f7   : > { %v5583_v17 = vmax.f32 %v5497_v20, 0.0 }
 0x6f8   : > { %5667 = vrot.lane.b32.xlu1 %v5584_v9, %s7086_s23 }
 0x6f9   : > { %5665 = vrot.lane.b32.xlu0 %v5583_v17, %s7086_s23 }
 0x6fb   : > { %v6896_v48 = vpop.f32.mrb[66].mxu0 }
 0x6fc   : > { %v5512_v41 = vadd.f32 %v6896_v48, %v10517_v26  ;;  %v5506_v14 = vpop.f32.mrb[67].mxu0 }
 0x6fd   : > { %v5507_v37 = vadd.f32 %v10517_v26, %v5506_v14 }
 0x6fe   : > { %v5586_v4 = vmax.f32 %v5512_v41, 0.0 }
 0x6ff   : > { %v5585_v55 = vmax.f32 %v5507_v37, 0.0 }
 0x700   : > { %5671 = vrot.lane.b32.xlu1 %v5586_v4, %s7086_s23 }
 0x701   : > { %5669 = vrot.lane.b32.xlu0 %v5585_v55, %s7086_s23 }
 0x703   : > { %v6899_v24 = vpop.f32.mrb[68].mxu0 }
 0x704   : > { %v5522_v32 = vadd.f32 %v6899_v24, %v10517_v26  ;;  %v5516_v18 = vpop.f32.mrb[69].mxu0 }
 0x705   : > { %v5517_v7 = vadd.f32 %v10517_v26, %v5516_v18 }
 0x706   : > { %v5588_v21 = vmax.f32 %v5522_v32, 0.0 }
 0x707   : > { %v5587_v39 = vmax.f32 %v5517_v7, 0.0 }
 0x708   : > { %5675 = vrot.lane.b32.xlu1 %v5588_v21, %s7086_s23 }
 0x709   : > { %5673 = vrot.lane.b32.xlu0 %v5587_v39, %s7086_s23 }
 0x70b   : > { %v6902_v43 = vpop.f32.mrb[70].mxu0 }
 0x70c   : > { %v5532_v53 = vadd.f32 %v6902_v43, %v10517_v26  ;;  %v5526_v6 = vpop.f32.mrb[71].mxu0 }
 0x70d   : > { %v5527_v19 = vadd.f32 %v10517_v26, %v5526_v6 }
 0x70e   : > { %v5590_v22 = vmax.f32 %v5532_v53, 0.0 }
 0x70f   : > { %v5589_v35 = vmax.f32 %v5527_v19, 0.0 }
 0x710   : > { %5679 = vrot.lane.b32.xlu1 %v5590_v22, %s7086_s23 }
 0x711   : > { %5677 = vrot.lane.b32.xlu0 %v5589_v35, %s7086_s23 }
 0x713   : > { %v6905_v51 = vpop.f32.mrb[72].mxu0 }
 0x714   : > { %v5542_v27 = vadd.f32 %v6905_v51, %v10517_v26  ;;  %v5536_v61 = vpop.f32.mrb[73].mxu0 }
 0x715   : > { %v5537_v56 = vadd.f32 %v10517_v26, %v5536_v61 }
 0x716   : > { %v5592_v57 = vmax.f32 %v5542_v27, 0.0 }
 0x717   : > { %v5591_v50 = vmax.f32 %v5537_v56, 0.0  ;;  %v6908_v16 = vpop.f32.mrb[74].mxu0 }
 0x718   : > { %v5552_v3 = vadd.f32 %v6908_v16, %v10517_v26  ;;  %5683 = vrot.lane.b32.xlu1 %v5592_v57, %s7086_s23  ;;  %v5546_v36 = vpop.f32.mrb[75].mxu0 }
 0x719   : > { %v5547_v30 = vadd.f32 %v10517_v26, %v5546_v36  ;;  %5681 = vrot.lane.b32.xlu0 %v5591_v50, %s7086_s23 }
 0x71a   : > { %v5594_v33 = vmax.f32 %v5552_v3, 0.0 }
 0x71b   : > { %v5593_v1 = vmax.f32 %v5547_v30, 0.0  ;;  %v6911_v40 = vpop.f32.mrb[76].mxu0 }
 0x71c   : > { %v5562_v42 = vadd.f32 %v6911_v40, %v10517_v26  ;;  %5687 = vrot.lane.b32.xlu1 %v5594_v33, %s7086_s23  ;;  %v5556_v60 = vpop.f32.mrb[77].mxu0 }
 0x71d   : > { %v5557_v2 = vadd.f32 %v10517_v26, %v5556_v60  ;;  %5685 = vrot.lane.b32.xlu0 %v5593_v1, %s7086_s23 }
 0x71e   : > { %v5596_v47 = vmax.f32 %v5562_v42, 0.0 }
 0x71f   : > { %v5595_v58 = vmax.f32 %v5557_v2, 0.0 }
 0x720   : > { %5691 = vrot.lane.b32.xlu1 %v5596_v47, %s7086_s23 }
 0x721   : > { %5689 = vrot.lane.b32.xlu0 %v5595_v58, %s7086_s23 }
 0x722   : > { %v5632_v29 = vpop.permute.xlu1 %5631 }
 0x723   : > { %5727 = vst.msk [vmem:[#allocation3 + $0x8] sm:$0xff] %vm5725_vm14, %v5632_v29  ;;  %v5630_v59 = vpop.permute.xlu0 %5629  ;;  %v10653_v29 = vld [vmem:[%s10799_s6] ss:$0 sm:$0xff] }
 0x724   : > { %5726 = vst.msk [vmem:[#allocation3] sm:$0xff] %vm5725_vm14, %v5630_v59 }
 0x72a   : > { %v5636_v28 = vpop.permute.xlu1 %5635  ;;  %v5759_v13 = vld [vmem:[#allocation3 + $0x8] sm:$0xff] }
 0x72b   : > { %5729 = vst.msk [vmem:[#allocation3 + $0x18] sm:$0xff] %vm5725_vm14, %v5636_v28  ;;  %v5634_v26 = vpop.permute.xlu0 %5633  ;;  %v5758_v31 = vld [vmem:[#allocation3] sm:$0xff] }
 0x72c   : > { %5728 = vst.msk [vmem:[#allocation3 + $0x10] sm:$0xff] %vm5725_vm14, %v5634_v26  ;;  %6918 = vmatprep.mubr.msk.f32.mxu1 %vm5800_vm7, %v5758_v31 }
 0x72d   : > { %6919 = vmatmul.mubr.msk.f32.vlgmr.msra.gmra.mrb[50].mxu1 %vm5800_vm7, %v5759_v13  ;;  %v7045_v13 = vld [vmem:[%s7166_s18 + $0x8] sm:$0xff] }
 0x732   : > { %v5640_v45 = vpop.permute.xlu1 %5639  ;;  %v5761_v44 = vld [vmem:[#allocation3 + $0x18] sm:$0xff] }
 0x733   : > { %5731 = vst.msk [vmem:[#allocation3 + $0x28] sm:$0xff] %vm5725_vm14, %v5640_v45  ;;  %v5638_v5 = vpop.permute.xlu0 %5637  ;;  %v5760_v46 = vld [vmem:[#allocation3 + $0x10] sm:$0xff] }
 0x734   : > { %5730 = vst.msk [vmem:[#allocation3 + $0x20] sm:$0xff] %vm5725_vm14, %v5638_v5  ;;  %6921 = vmatprep.mubr.msk.f32.mxu1 %vm5800_vm7, %v5760_v46  ;;  %v7046_v5 = vld [vmem:[%s7166_s18] sm:$0xff] }
 0x735   : > { %6922 = vmatmul.mubr.msk.f32.gmra.mrb[52].mxu1 %vm5800_vm7, %v5761_v44 }
 0x73a   : > { %v5644_v63 = vpop.permute.xlu1 %5643  ;;  %v5763_v34 = vld [vmem:[#allocation3 + $0x28] sm:$0xff] }
 0x73b   : > { %5733 = vst.msk [vmem:[#allocation3 + $0x38] sm:$0xff] %vm5725_vm14, %v5644_v63  ;;  %v5642_v38 = vpop.permute.xlu0 %5641  ;;  %v5762_v54 = vld [vmem:[#allocation3 + $0x20] sm:$0xff] }
 0x73c   : > { %5732 = vst.msk [vmem:[#allocation3 + $0x30] sm:$0xff] %vm5725_vm14, %v5642_v38  ;;  %6924 = vmatprep.mubr.msk.f32.mxu1 %vm5800_vm7, %v5762_v54 }
 0x73d   : > { %6925 = vmatmul.mubr.msk.f32.gmra.mrb[54].mxu1 %vm5800_vm7, %v5763_v34 }
 0x742   : > { %v5648_v52 = vpop.permute.xlu1 %5647  ;;  %v5765_v12 = vld [vmem:[#allocation3 + $0x38] sm:$0xff] }
 0x743   : > { %5735 = vst.msk [vmem:[#allocation3 + $0x48] sm:$0xff] %vm5725_vm14, %v5648_v52  ;;  %v5646_v15 = vpop.permute.xlu0 %5645  ;;  %v5764_v11 = vld [vmem:[#allocation3 + $0x30] sm:$0xff] }
 0x744   : > { %5734 = vst.msk [vmem:[#allocation3 + $0x40] sm:$0xff] %vm5725_vm14, %v5646_v15  ;;  %6927 = vmatprep.mubr.msk.f32.mxu1 %vm5800_vm7, %v5764_v11  ;;  %v7047_v15 = vld [vmem:[%s7166_s18 + $0x18] sm:$0xff] }
 0x745   : > { %6928 = vmatmul.mubr.msk.f32.gmra.mrb[56].mxu1 %vm5800_vm7, %v5765_v12  ;;  %v7048_v12 = vld [vmem:[%s7166_s18 + $0x10] sm:$0xff] }
 0x74a   : > { %v5652_v10 = vpop.permute.xlu1 %5651  ;;  %v5767_v62 = vld [vmem:[#allocation3 + $0x48] sm:$0xff] }
 0x74b   : > { %5737 = vst.msk [vmem:[#allocation3 + $0x58] sm:$0xff] %vm5725_vm14, %v5652_v10  ;;  %v5650_v25 = vpop.permute.xlu0 %5649  ;;  %v5766_v49 = vld [vmem:[#allocation3 + $0x40] sm:$0xff] }
 0x74c   : > { %5736 = vst.msk [vmem:[#allocation3 + $0x50] sm:$0xff] %vm5725_vm14, %v5650_v25  ;;  %6930 = vmatprep.mubr.msk.f32.mxu1 %vm5800_vm7, %v5766_v49 }
 0x74d   : > { %6931 = vmatmul.mubr.msk.f32.gmra.mrb[58].mxu1 %vm5800_vm7, %v5767_v62 }
 0x752   : > { %v5656_v0 = vpop.permute.xlu1 %5655  ;;  %v5769_v20 = vld [vmem:[#allocation3 + $0x58] sm:$0xff] }
 0x753   : > { %5739 = vst.msk [vmem:[#allocation3 + $0x68] sm:$0xff] %vm5725_vm14, %v5656_v0  ;;  %v5654_v23 = vpop.permute.xlu0 %5653  ;;  %v5768_v8 = vld [vmem:[#allocation3 + $0x50] sm:$0xff] }
 0x754   : > { %5738 = vst.msk [vmem:[#allocation3 + $0x60] sm:$0xff] %vm5725_vm14, %v5654_v23  ;;  %6933 = vmatprep.mubr.msk.f32.mxu1 %vm5800_vm7, %v5768_v8 }
 0x755   : > { %6934 = vmatmul.mubr.msk.f32.gmra.mrb[60].mxu1 %vm5800_vm7, %v5769_v20  ;;  %v7049_v20 = vld [vmem:[%s7166_s18 + $0x28] sm:$0xff] }
 0x75a   : > { %v5660_v9 = vpop.permute.xlu1 %5659  ;;  %v5771_v41 = vld [vmem:[#allocation3 + $0x68] sm:$0xff] }
 0x75b   : > { %5741 = vst.msk [vmem:[#allocation3 + $0x78] sm:$0xff] %vm5725_vm14, %v5660_v9  ;;  %v5658_v17 = vpop.permute.xlu0 %5657  ;;  %v5770_v48 = vld [vmem:[#allocation3 + $0x60] sm:$0xff] }
 0x75c   : > { %5740 = vst.msk [vmem:[#allocation3 + $0x70] sm:$0xff] %vm5725_vm14, %v5658_v17  ;;  %6936 = vmatprep.mubr.msk.f32.mxu1 %vm5800_vm7, %v5770_v48  ;;  %v7050_v17 = vld [vmem:[%s7166_s18 + $0x20] sm:$0xff] }
 0x75d   : > { %6937 = vmatmul.mubr.msk.f32.gmra.mrb[62].mxu1 %vm5800_vm7, %v5771_v41 }
 0x762   : > { %v5664_v14 = vpop.permute.xlu1 %5663  ;;  %v5773_v55 = vld [vmem:[#allocation3 + $0x78] sm:$0xff] }
 0x763   : > { %5743 = vst.msk [vmem:[#allocation3 + $0x88] sm:$0xff] %vm5725_vm14, %v5664_v14  ;;  %v5662_v37 = vpop.permute.xlu0 %5661  ;;  %v5772_v4 = vld [vmem:[#allocation3 + $0x70] sm:$0xff] }
 0x764   : > { %5742 = vst.msk [vmem:[#allocation3 + $0x80] sm:$0xff] %vm5725_vm14, %v5662_v37  ;;  %6939 = vmatprep.mubr.msk.f32.mxu1 %vm5800_vm7, %v5772_v4 }
 0x765   : > { %6940 = vmatmul.mubr.msk.f32.gmra.mrb[64].mxu1 %vm5800_vm7, %v5773_v55 }
 0x76a   : > { %v5668_v24 = vpop.permute.xlu1 %5667  ;;  %v5775_v7 = vld [vmem:[#allocation3 + $0x88] sm:$0xff] }
 0x76b   : > { %5745 = vst.msk [vmem:[#allocation3 + $0x98] sm:$0xff] %vm5725_vm14, %v5668_v24  ;;  %v5666_v32 = vpop.permute.xlu0 %5665  ;;  %v5774_v18 = vld [vmem:[#allocation3 + $0x80] sm:$0xff] }
 0x76c   : > { %5744 = vst.msk [vmem:[#allocation3 + $0x90] sm:$0xff] %vm5725_vm14, %v5666_v32  ;;  %6942 = vmatprep.mubr.msk.f32.mxu1 %vm5800_vm7, %v5774_v18  ;;  %v7051_v32 = vld [vmem:[%s7166_s18 + $0x38] sm:$0xff] }
 0x76d   : > { %6943 = vmatmul.mubr.msk.f32.gmra.mrb[66].mxu1 %vm5800_vm7, %v5775_v7  ;;  %v7052_v7 = vld [vmem:[%s7166_s18 + $0x30] sm:$0xff] }
 0x772   : > { %v5672_v21 = vpop.permute.xlu1 %5671  ;;  %v5777_v53 = vld [vmem:[#allocation3 + $0x98] sm:$0xff] }
 0x773   : > { %5747 = vst.msk [vmem:[#allocation3 + $0xa8] sm:$0xff] %vm5725_vm14, %v5672_v21  ;;  %v5670_v39 = vpop.permute.xlu0 %5669  ;;  %v5776_v43 = vld [vmem:[#allocation3 + $0x90] sm:$0xff] }
 0x774   : > { %5746 = vst.msk [vmem:[#allocation3 + $0xa0] sm:$0xff] %vm5725_vm14, %v5670_v39  ;;  %6945 = vmatprep.mubr.msk.f32.mxu1 %vm5800_vm7, %v5776_v43 }
 0x775   : > { %6946 = vmatmul.mubr.msk.f32.gmra.mrb[68].mxu1 %vm5800_vm7, %v5777_v53 }
 0x77a   : > { %v5676_v6 = vpop.permute.xlu1 %5675  ;;  %v5779_v35 = vld [vmem:[#allocation3 + $0xa8] sm:$0xff] }
 0x77b   : > { %5749 = vst.msk [vmem:[#allocation3 + $0xb8] sm:$0xff] %vm5725_vm14, %v5676_v6  ;;  %v5674_v19 = vpop.permute.xlu0 %5673  ;;  %v5778_v22 = vld [vmem:[#allocation3 + $0xa0] sm:$0xff] }
 0x77c   : > { %5748 = vst.msk [vmem:[#allocation3 + $0xb0] sm:$0xff] %vm5725_vm14, %v5674_v19  ;;  %6948 = vmatprep.mubr.msk.f32.mxu1 %vm5800_vm7, %v5778_v22 }
 0x77d   : > { %6949 = vmatmul.mubr.msk.f32.gmra.mrb[70].mxu1 %vm5800_vm7, %v5779_v35  ;;  %v7053_v35 = vld [vmem:[%s7166_s18 + $0x48] sm:$0xff] }
 0x782   : > { %v5680_v51 = vpop.permute.xlu1 %5679  ;;  %v5781_v56 = vld [vmem:[#allocation3 + $0xb8] sm:$0xff] }
 0x783   : > { %5751 = vst.msk [vmem:[#allocation3 + $0xc8] sm:$0xff] %vm5725_vm14, %v5680_v51  ;;  %v5678_v27 = vpop.permute.xlu0 %5677  ;;  %v5780_v61 = vld [vmem:[#allocation3 + $0xb0] sm:$0xff] }
 0x784   : > { %5750 = vst.msk [vmem:[#allocation3 + $0xc0] sm:$0xff] %vm5725_vm14, %v5678_v27  ;;  %6951 = vmatprep.mubr.msk.f32.mxu1 %vm5800_vm7, %v5780_v61  ;;  %v7054_v27 = vld [vmem:[%s7166_s18 + $0x40] sm:$0xff] }
 0x785   : > { %6952 = vmatmul.mubr.msk.f32.gmra.mrb[72].mxu1 %vm5800_vm7, %v5781_v56 }
 0x78a   : > { %v5684_v57 = vpop.permute.xlu1 %5683  ;;  %v5783_v3 = vld [vmem:[#allocation3 + $0xc8] sm:$0xff] }
 0x78b   : > { %5753 = vst.msk [vmem:[#allocation3 + $0xd8] sm:$0xff] %vm5725_vm14, %v5684_v57  ;;  %v5682_v50 = vpop.permute.xlu0 %5681  ;;  %v5782_v16 = vld [vmem:[#allocation3 + $0xc0] sm:$0xff] }
 0x78c   : > { %5752 = vst.msk [vmem:[#allocation3 + $0xd0] sm:$0xff] %vm5725_vm14, %v5682_v50  ;;  %6954 = vmatprep.mubr.msk.f32.mxu1 %vm5800_vm7, %v5782_v16 }
 0x78d   : > { %6955 = vmatmul.mubr.msk.f32.gmra.mrb[74].mxu1 %vm5800_vm7, %v5783_v3 }
 0x78e   : > { %v5688_v36 = vpop.permute.xlu1 %5687 }
 0x78f   : > { %5755 = vst.msk [vmem:[#allocation3 + $0xe8] sm:$0xff] %vm5725_vm14, %v5688_v36  ;;  %v5686_v30 = vpop.permute.xlu0 %5685 }
 0x790   : > { %5754 = vst.msk [vmem:[#allocation3 + $0xe0] sm:$0xff] %vm5725_vm14, %v5686_v30  ;;  %v7055_v30 = vld [vmem:[%s7166_s18 + $0x58] sm:$0xff] }
 0x792   : > { %v5692_v33 = vpop.permute.xlu1 %5691  ;;  %v5785_v42 = vld [vmem:[#allocation3 + $0xd8] sm:$0xff] }
 0x793   : > { %5757 = vst.msk [vmem:[#allocation3 + $0xf8] sm:$0xff] %vm5725_vm14, %v5692_v33  ;;  %v5690_v1 = vpop.permute.xlu0 %5689  ;;  %v5784_v40 = vld [vmem:[#allocation3 + $0xd0] sm:$0xff] }
 0x794   : > { %5756 = vst.msk [vmem:[#allocation3 + $0xf0] sm:$0xff] %vm5725_vm14, %v5690_v1  ;;  %6957 = vmatprep.mubr.msk.f32.mxu1 %vm5800_vm7, %v5784_v40  ;;  %v7056_v1 = vld [vmem:[%s7166_s18 + $0x50] sm:$0xff]  ;;  %vm11982_vm14 = vmmov %vm11976_vm0 }
 0x795   : > { %6958 = vmatmul.mubr.msk.f32.gmra.mrb[76].mxu1 %vm5800_vm7, %v5785_v42 }
 0x796   : > { %v5787_v2 = vld [vmem:[#allocation3 + $0xe8] sm:$0xff] }
 0x797   : > { %v5786_v60 = vld [vmem:[#allocation3 + $0xe0] sm:$0xff] }
 0x798   : > { %6960 = vmatprep.mubr.msk.f32.mxu1 %vm5800_vm7, %v5786_v60 }
 0x799   : > { %6961 = vmatmul.mubr.msk.f32.gmra.mrb[78].mxu1 %vm5800_vm7, %v5787_v2 }
 0x79a   : > { %v5789_v58 = vld [vmem:[#allocation3 + $0xf8] sm:$0xff] }
 0x79b   : > { %v5788_v47 = vld [vmem:[#allocation3 + $0xf0] sm:$0xff] }
 0x79c   : > { %6963 = vmatprep.mubr.msk.f32.mxu1 %vm5800_vm7, %v5788_v47 }
 0x79d   : > { %6964 = vmatmul.mubr.msk.f32.gmra.mrb[80].mxu1 %vm5800_vm7, %v5789_v58  ;;  %vm11983_vm7 = vmmov %vm11976_vm0 }
 0x800   : > { %v6920_v59 = vpop.f32.mrb[50].mxu1 }
 0x801   : > { %v5969_v28 = vadd.f32 %v6920_v59, %v10653_v29  ;;  %v5963_v26 = vpop.f32.mrb[51].mxu1 }
 0x802   : > { %v5964_v31 = vadd.f32 %v10653_v29, %v5963_v26 }
 0x803   : > { %v6123_v45 = vadd.f32 %v7045_v13, %v5969_v28  ;;  %v7057_v28 = vld [vmem:[%s7166_s18 + $0x68] sm:$0xff] }
 0x804   : > { %v6122_v46 = vadd.f32 %v7046_v5, %v5964_v31  ;;  %v7058_v31 = vld [vmem:[%s7166_s18 + $0x60] sm:$0xff] }
 0x805   : > { %v6155_v44 = vmax.f32 %v6123_v45, 0.0 }
 0x806   : > { %v6154_v63 = vmax.f32 %v6122_v46, 0.0 }
 0x807   : > { %6187 = vst.msk [vmem:[%s10663_s19 + $0x8] sm:$0xff] %vm11968_vm10, %v6155_v44  ;;  %vm11984_vm10 = vmmov %vm11976_vm0 }
 0x808   : > { %6186 = vst.msk [vmem:[%s10663_s19] sm:$0xff] %vm11969_vm6, %v6154_v63  ;;  %v6923_v38 = vpop.f32.mrb[52].mxu1  ;;  %vm11985_vm6 = vmmov %vm11976_vm0 }
 0x809   : > { %v5979_v54 = vadd.f32 %v6923_v38, %v10653_v29  ;;  %v5973_v34 = vpop.f32.mrb[53].mxu1 }
 0x80a   : > { %v5974_v52 = vadd.f32 %v10653_v29, %v5973_v34 }
 0x80b   : > { %v6125_v11 = vadd.f32 %v7047_v15, %v5979_v54  ;;  %v7059_v54 = vld [vmem:[%s7166_s18 + $0x78] sm:$0xff] }
 0x80c   : > { %v6124_v10 = vadd.f32 %v7048_v12, %v5974_v52  ;;  %v7060_v52 = vld [vmem:[%s7166_s18 + $0x70] sm:$0xff] }
 0x80d   : > { %v6157_v25 = vmax.f32 %v6125_v11, 0.0 }
 0x80e   : > { %v6156_v49 = vmax.f32 %v6124_v10, 0.0 }
 0x80f   : > { %6189 = vst.msk [vmem:[%s10663_s19 + $0x18] sm:$0xff] %vm11970_vm12, %v6157_v25  ;;  %vm11986_vm12 = vmmov %vm11976_vm0 }
 0x810   : > { %6188 = vst.msk [vmem:[%s10663_s19 + $0x10] sm:$0xff] %vm11971_vm4, %v6156_v49  ;;  %v6926_v62 = vpop.f32.mrb[54].mxu1  ;;  %vm11987_vm4 = vmmov %vm11976_vm0 }
 0x811   : > { %v5989_v0 = vadd.f32 %v6926_v62, %v10653_v29  ;;  %v5983_v23 = vpop.f32.mrb[55].mxu1 }
 0x812   : > { %v5984_v8 = vadd.f32 %v10653_v29, %v5983_v23 }
 0x813   : > { %v6127_v9 = vadd.f32 %v7049_v20, %v5989_v0  ;;  %v7061_v0 = vld [vmem:[%s7166_s18 + $0x88] sm:$0xff] }
 0x814   : > { %v6126_v48 = vadd.f32 %v7050_v17, %v5984_v8  ;;  %v7062_v8 = vld [vmem:[%s7166_s18 + $0x80] sm:$0xff] }
 0x815   : > { %v6159_v41 = vmax.f32 %v6127_v9, 0.0 }
 0x816   : > { %v6158_v14 = vmax.f32 %v6126_v48, 0.0 }
 0x817   : > { %6191 = vst.msk [vmem:[%s10663_s19 + $0x28] sm:$0xff] %vm11972_vm15, %v6159_v41  ;;  %vm11988_vm15 = vmmov %vm11976_vm0 }
 0x818   : > { %6190 = vst.msk [vmem:[%s10663_s19 + $0x20] sm:$0xff] %vm11973_vm5, %v6158_v14  ;;  %v6929_v37 = vpop.f32.mrb[56].mxu1  ;;  %vm11989_vm5 = vmmov %vm11976_vm0 }
 0x819   : > { %v5999_v4 = vadd.f32 %v6929_v37, %v10653_v29  ;;  %v5993_v55 = vpop.f32.mrb[57].mxu1 }
 0x81a   : > { %v5994_v24 = vadd.f32 %v10653_v29, %v5993_v55 }
 0x81b   : > { %v6129_v18 = vadd.f32 %v7051_v32, %v5999_v4  ;;  %v7063_v4 = vld [vmem:[%s7166_s18 + $0x98] sm:$0xff] }
 0x81c   : > { %v6128_v21 = vadd.f32 %v7052_v7, %v5994_v24  ;;  %v7064_v24 = vld [vmem:[%s7166_s18 + $0x90] sm:$0xff] }
 0x81d   : > { %v6161_v39 = vmax.f32 %v6129_v18, 0.0 }
 0x81e   : > { %v6160_v43 = vmax.f32 %v6128_v21, 0.0 }
 0x81f   : > { %6193 = vst.msk [vmem:[%s10663_s19 + $0x38] sm:$0xff] %vm11974_vm9, %v6161_v39  ;;  %vm11990_vm9 = vmmov %vm11976_vm0 }
 0x820   : > { %6192 = vst.msk [vmem:[%s10663_s19 + $0x30] sm:$0xff] %vm11975_vm2, %v6160_v43  ;;  %v6932_v53 = vpop.f32.mrb[58].mxu1  ;;  %vm11991_vm2 = vmmov %vm11976_vm0 }
 0x821   : > { %v6009_v6 = vadd.f32 %v6932_v53, %v10653_v29  ;;  %v6003_v19 = vpop.f32.mrb[59].mxu1 }
 0x822   : > { %v6004_v22 = vadd.f32 %v10653_v29, %v6003_v19 }
 0x823   : > { %v6131_v51 = vadd.f32 %v7053_v35, %v6009_v6  ;;  %v7065_v6 = vld [vmem:[%s7166_s18 + $0xa8] sm:$0xff] }
 0x824   : > { %v6130_v61 = vadd.f32 %v7054_v27, %v6004_v22  ;;  %v7066_v22 = vld [vmem:[%s7166_s18 + $0xa0] sm:$0xff] }
 0x825   : > { %v6163_v56 = vmax.f32 %v6131_v51, 0.0 }
 0x826   : > { %v6162_v57 = vmax.f32 %v6130_v61, 0.0 }
 0x827   : > { %6195 = vst.msk [vmem:[%s10663_s19 + $0x48] sm:$0xff] %vm11976_vm0, %v6163_v56 }
 0x828   : > { %6194 = vst.msk [vmem:[%s10663_s19 + $0x40] sm:$0xff] %vm11977_vm11, %v6162_v57  ;;  %v6935_v50 = vpop.f32.mrb[60].mxu1  ;;  %vm11992_vm11 = vmmov %vm11976_vm0 }
 0x829   : > { %v6019_v16 = vadd.f32 %v6935_v50, %v10653_v29  ;;  %v6013_v3 = vpop.f32.mrb[61].mxu1 }
 0x82a   : > { %v6014_v36 = vadd.f32 %v10653_v29, %v6013_v3 }
 0x82b   : > { %v6133_v33 = vadd.f32 %v7055_v30, %v6019_v16  ;;  %v7067_v16 = vld [vmem:[%s7166_s18 + $0xb8] sm:$0xff] }
 0x82c   : > { %v6132_v40 = vadd.f32 %v7056_v1, %v6014_v36  ;;  %v7068_v36 = vld [vmem:[%s7166_s18 + $0xb0] sm:$0xff] }
 0x82d   : > { %v6165_v42 = vmax.f32 %v6133_v33, 0.0 }
 0x82e   : > { %v6164_v60 = vmax.f32 %v6132_v40, 0.0 }
 0x82f   : > { %6197 = vst.msk [vmem:[%s10663_s19 + $0x58] sm:$0xff] %vm11978_vm13, %v6165_v42  ;;  %vm11993_vm13 = vmmov %vm11976_vm0 }
 0x830   : > { %6196 = vst.msk [vmem:[%s10663_s19 + $0x50] sm:$0xff] %vm11979_vm3, %v6164_v60  ;;  %v6938_v2 = vpop.f32.mrb[62].mxu1  ;;  %vm11994_vm3 = vmmov %vm11976_vm0 }
 0x831   : > { %v6029_v47 = vadd.f32 %v6938_v2, %v10653_v29  ;;  %v6023_v58 = vpop.f32.mrb[63].mxu1 }
 0x832   : > { %v6024_v59 = vadd.f32 %v10653_v29, %v6023_v58 }
 0x833   : > { %v6135_v26 = vadd.f32 %v7057_v28, %v6029_v47  ;;  %v7069_v47 = vld [vmem:[%s7166_s18 + $0xc8] sm:$0xff] }
 0x834   : > { %v6134_v13 = vadd.f32 %v7058_v31, %v6024_v59  ;;  %v7070_v59 = vld [vmem:[%s7166_s18 + $0xc0] sm:$0xff] }
 0x835   : > { %v6167_v45 = vmax.f32 %v6135_v26, 0.0 }
 0x836   : > { %v6166_v5 = vmax.f32 %v6134_v13, 0.0 }
 0x837   : > { %6199 = vst.msk [vmem:[%s10663_s19 + $0x68] sm:$0xff] %vm11980_vm8, %v6167_v45  ;;  %vm11995_vm8 = vmmov %vm11976_vm0 }
 0x838   : > { %6198 = vst.msk [vmem:[%s10663_s19 + $0x60] sm:$0xff] %vm11981_vm1, %v6166_v5  ;;  %v6941_v46 = vpop.f32.mrb[64].mxu1  ;;  %vm11996_vm1 = vmmov %vm11976_vm0 }
 0x839   : > { %v6039_v44 = vadd.f32 %v6941_v46, %v10653_v29  ;;  %v6033_v63 = vpop.f32.mrb[65].mxu1 }
 0x83a   : > { %v6034_v38 = vadd.f32 %v10653_v29, %v6033_v63 }
 0x83b   : > { %v6137_v34 = vadd.f32 %v7059_v54, %v6039_v44  ;;  %v7071_v44 = vld [vmem:[%s7166_s18 + $0xd8] sm:$0xff] }
 0x83c   : > { %v6136_v15 = vadd.f32 %v7060_v52, %v6034_v38  ;;  %v7072_v38 = vld [vmem:[%s7166_s18 + $0xd0] sm:$0xff] }
 0x83d   : > { %v6169_v11 = vmax.f32 %v6137_v34, 0.0 }
 0x83e   : > { %v6168_v12 = vmax.f32 %v6136_v15, 0.0 }
 0x83f   : > { %6201 = vst.msk [vmem:[%s10663_s19 + $0x78] sm:$0xff] %vm11982_vm14, %v6169_v11  ;;  %vm11997_vm14 = vmmov %vm11976_vm0 }
 0x840   : > { %6200 = vst.msk [vmem:[%s10663_s19 + $0x70] sm:$0xff] %vm11983_vm7, %v6168_v12  ;;  %v6944_v10 = vpop.f32.mrb[66].mxu1  ;;  %vm11998_vm7 = vmmov %vm11976_vm0 }
 0x841   : > { %v6049_v25 = vadd.f32 %v6944_v10, %v10653_v29  ;;  %v6043_v49 = vpop.f32.mrb[67].mxu1 }
 0x842   : > { %v6044_v62 = vadd.f32 %v10653_v29, %v6043_v49 }
 0x843   : > { %v6139_v23 = vadd.f32 %v7061_v0, %v6049_v25  ;;  %v7073_v25 = vld [vmem:[%s7166_s18 + $0xe8] sm:$0xff] }
 0x844   : > { %v6138_v20 = vadd.f32 %v7062_v8, %v6044_v62  ;;  %v7074_v62 = vld [vmem:[%s7166_s18 + $0xe0] sm:$0xff] }
 0x845   : > { %v6171_v9 = vmax.f32 %v6139_v23, 0.0 }
 0x846   : > { %v6170_v17 = vmax.f32 %v6138_v20, 0.0 }
 0x847   : > { %6203 = vst.msk [vmem:[%s10663_s19 + $0x88] sm:$0xff] %vm11984_vm10, %v6171_v9 }
 0x848   : > { %6202 = vst.msk [vmem:[%s10663_s19 + $0x80] sm:$0xff] %vm11985_vm6, %v6170_v17  ;;  %v6947_v48 = vpop.f32.mrb[68].mxu1 }
 0x849   : > { %v6059_v41 = vadd.f32 %v6947_v48, %v10653_v29  ;;  %v6053_v14 = vpop.f32.mrb[69].mxu1 }
 0x84a   : > { %v6054_v37 = vadd.f32 %v10653_v29, %v6053_v14 }
 0x84b   : > { %v6141_v55 = vadd.f32 %v7063_v4, %v6059_v41  ;;  %v7075_v41 = vld [vmem:[%s7166_s18 + $0xf8] sm:$0xff] }
 0x84c   : > { %v6140_v32 = vadd.f32 %v7064_v24, %v6054_v37  ;;  %v7076_v37 = vld [vmem:[%s7166_s18 + $0xf0] sm:$0xff] }
 0x84d   : > { %v6173_v18 = vmax.f32 %v6141_v55, 0.0 }
 0x84e   : > { %v6172_v7 = vmax.f32 %v6140_v32, 0.0 }
 0x84f   : > { %6205 = vst.msk [vmem:[%s10663_s19 + $0x98] sm:$0xff] %vm11986_vm12, %v6173_v18 }
 0x850   : > { %6204 = vst.msk [vmem:[%s10663_s19 + $0x90] sm:$0xff] %vm11987_vm4, %v6172_v7  ;;  %v6950_v21 = vpop.f32.mrb[70].mxu1 }
 0x851   : > { %v6069_v39 = vadd.f32 %v6950_v21, %v10653_v29  ;;  %v6063_v43 = vpop.f32.mrb[71].mxu1 }
 0x852   : > { %v6064_v53 = vadd.f32 %v10653_v29, %v6063_v43 }
 0x853   : > { %v6143_v19 = vadd.f32 %v7065_v6, %v6069_v39 }
 0x854   : > { %v6142_v35 = vadd.f32 %v7066_v22, %v6064_v53 }
 0x855   : > { %v6175_v51 = vmax.f32 %v6143_v19, 0.0 }
 0x856   : > { %v6174_v27 = vmax.f32 %v6142_v35, 0.0 }
 0x857   : > { %6207 = vst.msk [vmem:[%s10663_s19 + $0xa8] sm:$0xff] %vm11988_vm15, %v6175_v51 }
 0x858   : > { %6206 = vst.msk [vmem:[%s10663_s19 + $0xa0] sm:$0xff] %vm11989_vm5, %v6174_v27  ;;  %v6953_v61 = vpop.f32.mrb[72].mxu1 }
 0x859   : > { %v6079_v56 = vadd.f32 %v6953_v61, %v10653_v29  ;;  %v6073_v57 = vpop.f32.mrb[73].mxu1 }
 0x85a   : > { %v6074_v50 = vadd.f32 %v10653_v29, %v6073_v57 }
 0x85b   : > { %v6145_v3 = vadd.f32 %v7067_v16, %v6079_v56 }
 0x85c   : > { %v6144_v30 = vadd.f32 %v7068_v36, %v6074_v50 }
 0x85d   : > { %v6177_v33 = vmax.f32 %v6145_v3, 0.0 }
 0x85e   : > { %v6176_v1 = vmax.f32 %v6144_v30, 0.0 }
 0x85f   : > { %6209 = vst.msk [vmem:[%s10663_s19 + $0xb8] sm:$0xff] %vm11990_vm9, %v6177_v33 }
 0x860   : > { %6208 = vst.msk [vmem:[%s10663_s19 + $0xb0] sm:$0xff] %vm11991_vm2, %v6176_v1  ;;  %v6956_v40 = vpop.f32.mrb[74].mxu1 }
 0x861   : > { %v6089_v42 = vadd.f32 %v6956_v40, %v10653_v29  ;;  %v6083_v60 = vpop.f32.mrb[75].mxu1 }
 0x862   : > { %v6084_v2 = vadd.f32 %v10653_v29, %v6083_v60 }
 0x863   : > { %v6147_v58 = vadd.f32 %v7069_v47, %v6089_v42 }
 0x864   : > { %v6146_v28 = vadd.f32 %v7070_v59, %v6084_v2 }
 0x865   : > { %v6179_v26 = vmax.f32 %v6147_v58, 0.0 }
 0x866   : > { %v6178_v31 = vmax.f32 %v6146_v28, 0.0 }
 0x867   : > { %6211 = vst.msk [vmem:[%s10663_s19 + $0xc8] sm:$0xff] %vm11976_vm0, %v6179_v26 }
 0x868   : > { %6210 = vst.msk [vmem:[%s10663_s19 + $0xc0] sm:$0xff] %vm11992_vm11, %v6178_v31  ;;  %v6959_v13 = vpop.f32.mrb[76].mxu1 }
 0x869   : > { %v6099_v45 = vadd.f32 %v6959_v13, %v10653_v29  ;;  %v6093_v5 = vpop.f32.mrb[77].mxu1 }
 0x86a   : > { %v6094_v46 = vadd.f32 %v10653_v29, %v6093_v5 }
 0x86b   : > { %v6149_v63 = vadd.f32 %v7071_v44, %v6099_v45 }
 0x86c   : > { %v6148_v54 = vadd.f32 %v7072_v38, %v6094_v46  ;;  %v6962_v34 = vpop.f32.mrb[78].mxu1 }
 0x86d   : > { %v6181_v52 = vmax.f32 %v6149_v63, 0.0  ;;  %v6109_v15 = vadd.f32 %v6962_v34, %v10653_v29  ;;  %v6103_v11 = vpop.f32.mrb[79].mxu1 }
 0x86e   : > { %v6180_v12 = vmax.f32 %v6148_v54, 0.0  ;;  %v6104_v10 = vadd.f32 %v10653_v29, %v6103_v11 }
 0x86f   : > { %6213 = vst.msk [vmem:[%s10663_s19 + $0xd8] sm:$0xff] %vm11993_vm13, %v6181_v52  ;;  %v6151_v49 = vadd.f32 %v7073_v25, %v6109_v15 }
 0x870   : > { %6212 = vst.msk [vmem:[%s10663_s19 + $0xd0] sm:$0xff] %vm11994_vm3, %v6180_v12  ;;  %v6150_v0 = vadd.f32 %v7074_v62, %v6104_v10  ;;  %v6965_v23 = vpop.f32.mrb[80].mxu1 }
 0x871   : > { %v6183_v8 = vmax.f32 %v6151_v49, 0.0  ;;  %v6119_v20 = vadd.f32 %v6965_v23, %v10653_v29  ;;  %v6113_v9 = vpop.f32.mrb[81].mxu1 }
 0x872   : > { %v6182_v17 = vmax.f32 %v6150_v0, 0.0  ;;  %v6114_v48 = vadd.f32 %v10653_v29, %v6113_v9 }
 0x873   : > { %6215 = vst.msk [vmem:[%s10663_s19 + $0xe8] sm:$0xff] %vm11995_vm8, %v6183_v8  ;;  %v6153_v14 = vadd.f32 %v7075_v41, %v6119_v20 }
 0x874   : > { %6214 = vst.msk [vmem:[%s10663_s19 + $0xe0] sm:$0xff] %vm11996_vm1, %v6182_v17  ;;  %v6152_v4 = vadd.f32 %v7076_v37, %v6114_v48 }
 0x875   : > { %v6185_v55 = vmax.f32 %v6153_v14, 0.0 }
 0x876   : > { %v6184_v24 = vmax.f32 %v6152_v4, 0.0 }
 0x877   : > { %6217 = vst.msk [vmem:[%s10663_s19 + $0xf8] sm:$0xff] %vm11997_vm14, %v6185_v55 }
 0x878   : > { %6216 = vst.msk [vmem:[%s10663_s19 + $0xf0] sm:$0xff] %vm11998_vm7, %v6184_v24 }
 0x879 PF: > { %s17_s24 = sadd.s32 1, %s7083_s24  }
 0x87a   : > { %p14_p4 = scmp.ge.s32.totalorder %s17_s24, 4  }
 0x87c   :  { %16 = sbr.rel (!%p14_p4) target bundleno = 1 (0x1), region = 82 }

</bundles_post_ra>
